<compile_context>
chip_gen: v7x
topology: tpu7x:2x2x1
jax: 0.10.0
libtpu: 0.0.40
codegen_flags: <defaults>
</compile_context>

<pallas_src>
from functools import partial

import jax
import jax.numpy as jnp
from jax.experimental import pallas as pl
from jax.experimental.pallas import tpu as pltpu

LN_EPS = 1e-6
_VMEM_LIMIT = 48 * 1024 * 1024   # fits v7x (64 MiB physical), generous for v5e/v6e


def _pick_tile(n, target, align):
    """Largest `align`-multiple tile <= target that divides n (or n itself)."""
    if n <= target:
        return n
    t = (target // align) * align
    while t >= align:
        if n % t == 0:
            return t
        t -= align
    return n


def _gelu_tanh(x):
    # nn.GELU(approximate="tanh")
    return 0.5 * x * (1.0 + jnp.tanh(0.7978845608028654 * (x + 0.044715 * x * x * x)))


# ----------------------------------------------------------------------------
# Kernel bodies
# ----------------------------------------------------------------------------

def _ln_mod_linear_kernel(x_ref, shift_ref, scale_ref, w_ref, b_ref, o_ref,
                          xm_ref, *, activation):
    """Fused LayerNorm(eps=1e-6, no affine) + t2i_modulate + Linear (+ GELU-tanh).

    Grid (B, rows//tm, Nout//tn); j (output columns) is innermost/"arbitrary".
    The LN+modulate prologue is computed once per row tile (at j == 0) and
    cached in a bf16 VMEM scratch that feeds the MXU for every column tile.
    """
    @pl.when(pl.program_id(2) == 0)
    def _():
        xv = x_ref[...].astype(jnp.float32)                            # (tm, K)
        mean = jnp.mean(xv, axis=-1, keepdims=True)
        var = jnp.mean((xv - mean) ** 2, axis=-1, keepdims=True)       # biased, like nn.LayerNorm
        xn = (xv - mean) * jax.lax.rsqrt(var + LN_EPS)
        xm = xn * (1.0 + scale_ref[...].astype(jnp.float32)) + shift_ref[...].astype(jnp.float32)
        xm_ref[...] = xm.astype(xm_ref.dtype)                          # bf16 MXU operand

    acc = jnp.dot(xm_ref[...], w_ref[...], preferred_element_type=jnp.float32)
    acc = acc + b_ref[...].astype(jnp.float32)
    if activation == "gelu_tanh":
        acc = _gelu_tanh(acc)
    o_ref[...] = acc.astype(o_ref.dtype)


def _linear_kernel(x_ref, w_ref, b_ref, o_ref):
    acc = jnp.dot(x_ref[...].astype(jnp.bfloat16), w_ref[...],
                  preferred_element_type=jnp.float32)
    o_ref[...] = (acc + b_ref[...].astype(jnp.float32)).astype(o_ref.dtype)


def _linear_res_kernel(x_ref, w_ref, b_ref, res_ref, o_ref):
    # res + (x @ w + b)
    acc = jnp.dot(x_ref[...].astype(jnp.bfloat16), w_ref[...],
                  preferred_element_type=jnp.float32)
    acc = acc + b_ref[...].astype(jnp.float32)
    o_ref[...] = (res_ref[...].astype(jnp.float32) + acc).astype(o_ref.dtype)


def _linear_gate_res_kernel(x_ref, w_ref, b_ref, gate_ref, res_ref, o_ref):
    # res + gate * (x @ w + b)   (gate broadcast over rows)
    acc = jnp.dot(x_ref[...].astype(jnp.bfloat16), w_ref[...],
                  preferred_element_type=jnp.float32)
    acc = acc + b_ref[...].astype(jnp.float32)
    o_ref[...] = (res_ref[...].astype(jnp.float32)
                  + gate_ref[...].astype(jnp.float32) * acc).astype(o_ref.dtype)


def _flash_attn_kernel(q_ref, k_ref, v_ref, o_ref, m_ref, l_ref, acc_ref, *, scale):
    """Flash attention over the kv grid axis (online softmax).

    q_ref: (tq, H, D); k_ref/v_ref: (tk, H, D); o_ref: (tq, H*D) lane-dense.
    Scratch: m_ref/l_ref (H, tq, 1), acc_ref (H, tq, D), persisting across kv tiles.
    """
    ki = pl.program_id(2)
    n_kv = pl.num_programs(2)
    H = q_ref.shape[1]

    @pl.when(ki == 0)
    def _():
        m_ref[...] = jnp.full(m_ref.shape, -jnp.inf, dtype=m_ref.dtype)
        l_ref[...] = jnp.zeros(l_ref.shape, dtype=l_ref.dtype)
        acc_ref[...] = jnp.zeros(acc_ref.shape, dtype=acc_ref.dtype)

    for h in range(H):                                  # static unroll over heads
        qh = (q_ref[:, h, :].astype(jnp.float32) * scale).astype(jnp.bfloat16)
        kh = k_ref[:, h, :].astype(jnp.bfloat16)
        vh = v_ref[:, h, :].astype(jnp.bfloat16)
        # scores: contract head_dim of q and k (no explicit transpose of k)
        s = jax.lax.dot_general(qh, kh, (((1,), (1,)), ((), ())),
                                preferred_element_type=jnp.float32)   # (tq, tk)
        m_prev = m_ref[h]
        m_new = jnp.maximum(m_prev, jnp.max(s, axis=-1, keepdims=True))
        alpha = jnp.exp(m_prev - m_new)
        p = jnp.exp(s - m_new)
        l_ref[h] = alpha * l_ref[h] + jnp.sum(p, axis=-1, keepdims=True)
        acc_ref[h] = alpha * acc_ref[h] + jnp.dot(p.astype(jnp.bfloat16), vh,
                                                  preferred_element_type=jnp.float32)
        m_ref[h] = m_new

    @pl.when(ki == n_kv - 1)
    def _():
        outs = [acc_ref[h] * pl.reciprocal(l_ref[h], approx=True) for h in range(H)]
        # head-major packing along the lane axis -> (tq, H*D), lane-dense store
        o_ref[...] = jnp.concatenate(outs, axis=-1).astype(o_ref.dtype)


# ----------------------------------------------------------------------------
# Pallas wrappers
# ----------------------------------------------------------------------------

def ln_mod_linear(x, shift, scale, w, b, *, activation=None, tm=256, tn=256):
    """out[b] = (LN(x[b]) * (1 + scale[b]) + shift[b]) @ w + b  (+ optional GELU-tanh)."""
    B, N, K = x.shape
    Nout = w.shape[1]
    tm = _pick_tile(N, tm, 8)
    tn = _pick_tile(Nout, tn, 128)
    grid = (B, N // tm, Nout // tn)
    return pl.pallas_call(
        partial(_ln_mod_linear_kernel, activation=activation),
        out_shape=jax.ShapeDtypeStruct((B, N, Nout), x.dtype),
        grid=grid,
        in_specs=[
            pl.BlockSpec((None, tm, K), lambda bi, i, j: (bi, i, 0)),
            pl.BlockSpec((None, 1, K), lambda bi, i, j: (bi, 0, 0)),
            pl.BlockSpec((None, 1, K), lambda bi, i, j: (bi, 0, 0)),
            pl.BlockSpec((K, tn), lambda bi, i, j: (0, j)),
            pl.BlockSpec((1, tn), lambda bi, i, j: (0, j)),
        ],
        out_specs=pl.BlockSpec((None, tm, tn), lambda bi, i, j: (bi, i, j)),
        scratch_shapes=[pltpu.VMEM((tm, K), jnp.bfloat16)],
        compiler_params=pltpu.CompilerParams(
            dimension_semantics=("parallel", "parallel", "arbitrary"),
            vmem_limit_bytes=_VMEM_LIMIT),
    )(x, shift, scale, w, b.reshape(1, Nout))


def linear(x, w, b, *, tm=256, tn=256):
    """x @ w + b, per batch."""
    B, N, K = x.shape
    Nout = w.shape[1]
    tm = _pick_tile(N, tm, 8)
    tn = _pick_tile(Nout, tn, 128)
    grid = (B, N // tm, Nout // tn)
    return pl.pallas_call(
        _linear_kernel,
        out_shape=jax.ShapeDtypeStruct((B, N, Nout), x.dtype),
        grid=grid,
        in_specs=[
            pl.BlockSpec((None, tm, K), lambda bi, i, j: (bi, i, 0)),
            pl.BlockSpec((K, tn), lambda bi, i, j: (0, j)),
            pl.BlockSpec((1, tn), lambda bi, i, j: (0, j)),
        ],
        out_specs=pl.BlockSpec((None, tm, tn), lambda bi, i, j: (bi, i, j)),
        compiler_params=pltpu.CompilerParams(
            dimension_semantics=("parallel", "parallel", "parallel"),
            vmem_limit_bytes=_VMEM_LIMIT),
    )(x, w, b.reshape(1, Nout))


def linear_residual(x, w, b, res, gate=None, *, tm=256, tn=256):
    """res + [gate *] (x @ w + b); gate has shape (B, 1, Nout) (broadcast over tokens)."""
    B, N, K = x.shape
    Nout = w.shape[1]
    tm = _pick_tile(N, tm, 8)
    tn = _pick_tile(Nout, tn, 128)
    grid = (B, N // tm, Nout // tn)
    x_spec = pl.BlockSpec((None, tm, K), lambda bi, i, j: (bi, i, 0))
    w_spec = pl.BlockSpec((K, tn), lambda bi, i, j: (0, j))
    b_spec = pl.BlockSpec((1, tn), lambda bi, i, j: (0, j))
    res_spec = pl.BlockSpec((None, tm, tn), lambda bi, i, j: (bi, i, j))
    out_spec = pl.BlockSpec((None, tm, tn), lambda bi, i, j: (bi, i, j))
    cparams = pltpu.CompilerParams(
        dimension_semantics=("parallel", "parallel", "parallel"),
        vmem_limit_bytes=_VMEM_LIMIT)
    out_shape = jax.ShapeDtypeStruct((B, N, Nout), x.dtype)
    if gate is None:
        return pl.pallas_call(
            _linear_res_kernel, out_shape=out_shape, grid=grid,
            in_specs=[x_spec, w_spec, b_spec, res_spec],
            out_specs=out_spec, compiler_params=cparams,
        )(x, w, b.reshape(1, Nout), res)
    gate_spec = pl.BlockSpec((None, 1, tn), lambda bi, i, j: (bi, 0, j))
    return pl.pallas_call(
        _linear_gate_res_kernel, out_shape=out_shape, grid=grid,
        in_specs=[x_spec, w_spec, b_spec, gate_spec, res_spec],
        out_specs=out_spec, compiler_params=cparams,
    )(x, w, b.reshape(1, Nout), gate, res)


def flash_attention(q_pack, kv_pack, *, q_sel, k_sel, v_sel, scale, tq=128, tk=128):
    """Multi-head attention with online softmax.

    q_pack: (G, Nq, Pq, H, D); kv_pack: (G, Nk, Pk, H, D).  q/k/v are selected
    out of the packed tensors directly by the BlockSpec index maps (no HBM
    transpose / split).  Output: (G, Nq, H*D), heads packed along the lane axis.
    """
    G, Nq, _, H, D = q_pack.shape
    Nk = kv_pack.shape[1]
    C = H * D
    tq = _pick_tile(Nq, tq, 8)
    tk = _pick_tile(Nk, tk, 8)
    grid = (G, Nq // tq, Nk // tk)
    return pl.pallas_call(
        partial(_flash_attn_kernel, scale=scale),
        out_shape=jax.ShapeDtypeStruct((G, Nq, C), q_pack.dtype),
        grid=grid,
        in_specs=[
            pl.BlockSpec((None, tq, None, H, D), lambda g, qi, ki: (g, qi, q_sel, 0, 0)),
            pl.BlockSpec((None, tk, None, H, D), lambda g, qi, ki: (g, ki, k_sel, 0, 0)),
            pl.BlockSpec((None, tk, None, H, D), lambda g, qi, ki: (g, ki, v_sel, 0, 0)),
        ],
        out_specs=pl.BlockSpec((None, tq, C), lambda g, qi, ki: (g, qi, 0)),
        scratch_shapes=[
            pltpu.VMEM((H, tq, 1), jnp.float32),   # running max
            pltpu.VMEM((H, tq, 1), jnp.float32),   # running sum
            pltpu.VMEM((H, tq, D), jnp.float32),   # un-normalized accumulator
        ],
        compiler_params=pltpu.CompilerParams(
            dimension_semantics=("parallel", "parallel", "arbitrary"),
            vmem_limit_bytes=_VMEM_LIMIT),
    )(q_pack, kv_pack, kv_pack)


# ----------------------------------------------------------------------------
# STDiT3Block forward (spatial branch, mask=None, x_mask=None, PAB disabled)
# ----------------------------------------------------------------------------

def stdit3_block_forward(params, x, y, t, *, T, S, num_heads):
    B, N, C = x.shape
    H = num_heads
    D = C // H
    scale = D ** -0.5

    # modulation: (scale_shift_table[None] + t.reshape(B,6,C)).chunk(6) — tiny, plain JAX
    mod = params["scale_shift_table"][None].astype(jnp.float32) + t.reshape(B, 6, C)
    shift_msa, scale_msa, gate_msa = mod[:, 0:1], mod[:, 1:2], mod[:, 2:3]
    shift_mlp, scale_mlp, gate_mlp = mod[:, 3:4], mod[:, 4:5], mod[:, 5:6]

    # --- spatial self-attention branch ---------------------------------------
    qkv = ln_mod_linear(x, shift_msa, scale_msa,
                        params["attn_qkv_w"], params["attn_qkv_b"])          # (B, N, 3C)
    qkv_sp = qkv.reshape(B * T, S, 3, H, D)                                  # free reshape
    attn_o = flash_attention(qkv_sp, qkv_sp, q_sel=0, k_sel=1, v_sel=2,
                             scale=scale)                                    # (B*T, S, C)
    attn_o = attn_o.reshape(B, N, C)
    x = linear_residual(attn_o, params["attn_proj_w"], params["attn_proj_b"],
                        res=x, gate=gate_msa)                # x + gate_msa * proj(attn)

    # --- cross attention branch (mask=None) ----------------------------------
    L = y.shape[1]
    q_c = linear(x, params["cross_q_w"], params["cross_q_b"]).reshape(B, N, 1, H, D)
    kv_c = linear(y, params["cross_kv_w"], params["cross_kv_b"]).reshape(B, L, 2, H, D)
    cross = flash_attention(q_c, kv_c, q_sel=0, k_sel=0, v_sel=1, scale=scale)  # (B, N, C)
    x = linear_residual(cross, params["cross_proj_w"], params["cross_proj_b"],
                        res=x)                               # x + proj(cross), no gate

    # --- MLP branch -----------------------------------------------------------
    h = ln_mod_linear(x, shift_mlp, scale_mlp, params["fc1_w"], params["fc1_b"],
                      activation="gelu_tanh")                                # (B, N, 4C)
    x = linear_residual(h, params["fc2_w"], params["fc2_b"], res=x, gate=gate_mlp)
    return x

    # TODO(synk): PAB caching, x_mask / t0 branch, temporal attention, and the
    # sequence-parallel dynamic_switch all-to-all are not translated (dynamic
    # host-side control flow / multi-device collectives outside this block).


# ----------------------------------------------------------------------------
# Deterministic parameter construction (weights bf16 for the MXU, rest f32)
# ----------------------------------------------------------------------------

def make_params(key, hidden, mlp_ratio=4.0):
    C = hidden
    Cm = int(C * mlp_ratio)
    keys = jax.random.split(key, 16)

    def w(k, shape, s=0.02):
        return (jax.random.normal(k, shape, jnp.float32) * s).astype(jnp.bfloat16)

    def bias(k, shape, s=0.02):
        return jax.random.normal(k, shape, jnp.float32) * s

    return {
        # nn.Parameter(torch.randn(6, hidden) / hidden ** 0.5)
        "scale_shift_table": jax.random.normal(keys[0], (6, C), jnp.float32) / (C ** 0.5),
        # weights stored as (in, out) = W.T relative to PyTorch Linear
        "attn_qkv_w": w(keys[1], (C, 3 * C)), "attn_qkv_b": bias(keys[2], (3 * C,)),
        "attn_proj_w": w(keys[3], (C, C)),    "attn_proj_b": bias(keys[4], (C,)),
        "cross_q_w": w(keys[5], (C, C)),      "cross_q_b": bias(keys[6], (C,)),
        "cross_kv_w": w(keys[7], (C, 2 * C)), "cross_kv_b": bias(keys[8], (2 * C,)),
        "cross_proj_w": w(keys[9], (C, C)),   "cross_proj_b": bias(keys[10], (C,)),
        "fc1_w": w(keys[11], (C, Cm)), "fc1_b": bias(keys[12], (Cm,)),
        "fc2_w": w(keys[13], (Cm, C)), "fc2_b": bias(keys[14], (C,)),
    }


# ----------------------------------------------------------------------------
# Demo
# ----------------------------------------------------------------------------

if __name__ == "__main__":
    B, T, S, C = 2, 4, 8, 32        # hidden_size=32
    num_heads = 4
    L = 8                           # condition (text) tokens
    N = T * S

    key = jax.random.PRNGKey(0)
    k_p, k_x, k_y, k_t = jax.random.split(key, 4)

    params = make_params(k_p, C)
    x = jax.random.normal(k_x, (B, N, C), jnp.float32)
    y = jax.random.normal(k_y, (B, L, C), jnp.float32)
    t = jax.random.normal(k_t, (B, 6 * C), jnp.float32)

    fwd = jax.jit(partial(stdit3_block_forward, T=T, S=S, num_heads=num_heads))
    out = fwd(params, x, y, t)
    jax.block_until_ready(out)
    assert out.shape == (B, N, C)
    assert bool(jnp.all(jnp.isfinite(out)))
    print("KERNEL_OK")
</pallas_src>

<mosaic_0001>
module attributes {stable_mosaic.version = 11 : i64} {
  func.func @_ln_mod_linear_kernel(%arg0: i32, %arg1: i32, %arg2: i32, %arg3: memref<1x32x32xf32, #tpu.memory_space<vmem>>, %arg4: memref<1x1x32xf32, #tpu.memory_space<vmem>>, %arg5: memref<1x1x32xf32, #tpu.memory_space<vmem>>, %arg6: memref<32x96xbf16, #tpu.memory_space<vmem>>, %arg7: memref<1x96xf32, #tpu.memory_space<vmem>>, %arg8: memref<1x32x96xf32, #tpu.memory_space<vmem>>, %arg9: memref<32x32xbf16, #tpu.memory_space<vmem>>) attributes {dimension_semantics = [#tpu.dimension_semantics<parallel>, #tpu.dimension_semantics<parallel>, #tpu.dimension_semantics<arbitrary>], iteration_bounds = array<i64: 2, 1, 1>, scalar_prefetch = 0 : i64, scratch_operands = 1 : i64, tpu.core_type = #tpu.core_type<tc>, window_params = [{transform_indices = @transform_0, window_bounds = array<i64: 1, 32, 32>}, {transform_indices = @transform_1, window_bounds = array<i64: 1, 1, 32>}, {transform_indices = @transform_2, window_bounds = array<i64: 1, 1, 32>}, {transform_indices = @transform_3, window_bounds = array<i64: 32, 96>}, {transform_indices = @transform_4, window_bounds = array<i64: 1, 96>}, {transform_indices = @transform_5, window_bounds = array<i64: 1, 32, 96>}]} {
    %c0_i32 = arith.constant 0 : i32
    %0 = arith.cmpi eq, %arg2, %c0_i32 : i32
    %1 = arith.extui %0 : i1 to i32
    %c0_i32_0 = arith.constant 0 : i32
    %2 = arith.cmpi ne, %1, %c0_i32_0 : i32
    scf.if %2 {
      %c0_9 = arith.constant 0 : index
      %c0_10 = arith.constant 0 : index
      %c0_11 = arith.constant 0 : index
      %12 = vector.load %arg3[%c0_9, %c0_10, %c0_11] : memref<1x32x32xf32, #tpu.memory_space<vmem>>, vector<1x32x32xf32>
      %13 = vector.shape_cast %12 : vector<1x32x32xf32> to vector<32x32xf32>
      %cst_12 = arith.constant dense<0.000000e+00> : vector<32xf32>
      %14 = vector.multi_reduction <add>, %13, %cst_12 [1] : vector<32x32xf32> to vector<32xf32>
      %15 = vector.shape_cast %14 : vector<32xf32> to vector<32x1xf32>
      %cst_13 = arith.constant 3.200000e+01 : f32
      %16 = vector.broadcast %cst_13 : f32 to vector<32x1xf32>
      %17 = arith.divf %15, %16 : vector<32x1xf32>
      %18 = vector.broadcast %17 : vector<32x1xf32> to vector<32x32xf32>
      %19 = arith.subf %13, %18 : vector<32x32xf32>
      %20 = arith.mulf %19, %19 : vector<32x32xf32>
      %cst_14 = arith.constant dense<0.000000e+00> : vector<32xf32>
      %21 = vector.multi_reduction <add>, %20, %cst_14 [1] : vector<32x32xf32> to vector<32xf32>
      %22 = vector.shape_cast %21 : vector<32xf32> to vector<32x1xf32>
      %cst_15 = arith.constant 3.200000e+01 : f32
      %23 = vector.broadcast %cst_15 : f32 to vector<32x1xf32>
      %24 = arith.divf %22, %23 : vector<32x1xf32>
      %25 = vector.broadcast %17 : vector<32x1xf32> to vector<32x32xf32>
      %26 = arith.subf %13, %25 : vector<32x32xf32>
      %cst_16 = arith.constant 9.99999997E-7 : f32
      %27 = vector.broadcast %cst_16 : f32 to vector<32x1xf32>
      %28 = arith.addf %24, %27 : vector<32x1xf32>
      %29 = math.rsqrt %28 : vector<32x1xf32>
      %30 = vector.broadcast %29 : vector<32x1xf32> to vector<32x32xf32>
      %31 = arith.mulf %26, %30 : vector<32x32xf32>
      %c0_17 = arith.constant 0 : index
      %c0_18 = arith.constant 0 : index
      %c0_19 = arith.constant 0 : index
      %32 = vector.load %arg5[%c0_17, %c0_18, %c0_19] : memref<1x1x32xf32, #tpu.memory_space<vmem>>, vector<1x1x32xf32>
      %33 = vector.shape_cast %32 : vector<1x1x32xf32> to vector<1x32xf32>
      %cst_20 = arith.constant 1.000000e+00 : f32
      %34 = vector.broadcast %cst_20 : f32 to vector<1x32xf32>
      %35 = arith.addf %34, %33 : vector<1x32xf32>
      %36 = vector.broadcast %35 : vector<1x32xf32> to vector<32x32xf32>
      %37 = arith.mulf %31, %36 : vector<32x32xf32>
      %c0_21 = arith.constant 0 : index
      %c0_22 = arith.constant 0 : index
      %c0_23 = arith.constant 0 : index
      %38 = vector.load %arg4[%c0_21, %c0_22, %c0_23] : memref<1x1x32xf32, #tpu.memory_space<vmem>>, vector<1x1x32xf32>
      %39 = vector.shape_cast %38 : vector<1x1x32xf32> to vector<1x32xf32>
      %40 = vector.broadcast %39 : vector<1x32xf32> to vector<32x32xf32>
      %41 = arith.addf %37, %40 : vector<32x32xf32>
      %42 = arith.truncf %41 : vector<32x32xf32> to vector<32x32xbf16>
      %c0_24 = arith.constant 0 : index
      %c0_25 = arith.constant 0 : index
      %43 = vector.load %arg9[%c0_24, %c0_25] : memref<32x32xbf16, #tpu.memory_space<vmem>>, vector<32x32xbf16>
      tpu.vector_store %arg9[%c0_24, %c0_25], %42 {strides = array<i32>} : memref<32x32xbf16, #tpu.memory_space<vmem>>, vector<32x32xbf16>,
    } else {
    }
    %c0 = arith.constant 0 : index
    %c0_1 = arith.constant 0 : index
    %3 = vector.load %arg9[%c0, %c0_1] : memref<32x32xbf16, #tpu.memory_space<vmem>>, vector<32x32xbf16>
    %c0_2 = arith.constant 0 : index
    %c0_3 = arith.constant 0 : index
    %4 = vector.load %arg6[%c0_2, %c0_3] : memref<32x96xbf16, #tpu.memory_space<vmem>>, vector<32x96xbf16>
    %cst = arith.constant dense<0.000000e+00> : vector<32x96xf32>
    %5 = tpu.matmul %3, %4, %cst {dimension_numbers = #tpu.dot_dimension_numbers<[1], [0], [0], [1], [0, 0, 1, 1], [], []>} : vector<32x32xbf16>, vector<32x96xbf16>, vector<32x96xf32> -> vector<32x96xf32>
    %c0_4 = arith.constant 0 : index
    %c0_5 = arith.constant 0 : index
    %6 = vector.load %arg7[%c0_4, %c0_5] : memref<1x96xf32, #tpu.memory_space<vmem>>, vector<1x96xf32>
    %7 = vector.broadcast %6 : vector<1x96xf32> to vector<32x96xf32>
    %8 = arith.addf %5, %7 : vector<32x96xf32>
    %c0_6 = arith.constant 0 : index
    %c0_7 = arith.constant 0 : index
    %c0_8 = arith.constant 0 : index
    %9 = vector.load %arg8[%c0_6, %c0_7, %c0_8] : memref<1x32x96xf32, #tpu.memory_space<vmem>>, vector<1x32x96xf32>
    %10 = vector.shape_cast %9 : vector<1x32x96xf32> to vector<32x96xf32>
    %11 = vector.shape_cast %8 : vector<32x96xf32> to vector<1x32x96xf32>
    tpu.vector_store %arg8[%c0_6, %c0_7, %c0_8], %11 {strides = array<i32>} : memref<1x32x96xf32, #tpu.memory_space<vmem>>, vector<1x32x96xf32>,
    return
  }
  func.func @transform_0(%arg0: i32, %arg1: i32, %arg2: i32) -> (i32, i32, i32) {
    %c0_i32 = arith.constant 0 : i32
    %c0_i32_0 = arith.constant 0 : i32
    return %arg0, %arg1, %c0_i32 : i32, i32, i32
  }
  func.func @transform_1(%arg0: i32, %arg1: i32, %arg2: i32) -> (i32, i32, i32) {
    %c0_i32 = arith.constant 0 : i32
    %c0_i32_0 = arith.constant 0 : i32
    %c0_i32_1 = arith.constant 0 : i32
    return %arg0, %c0_i32, %c0_i32_0 : i32, i32, i32
  }
  func.func @transform_2(%arg0: i32, %arg1: i32, %arg2: i32) -> (i32, i32, i32) {
    %c0_i32 = arith.constant 0 : i32
    %c0_i32_0 = arith.constant 0 : i32
    %c0_i32_1 = arith.constant 0 : i32
    return %arg0, %c0_i32, %c0_i32_0 : i32, i32, i32
  }
  func.func @transform_3(%arg0: i32, %arg1: i32, %arg2: i32) -> (i32, i32) {
    %c0_i32 = arith.constant 0 : i32
    %c0_i32_0 = arith.constant 0 : i32
    return %c0_i32, %arg2 : i32, i32
  }
  func.func @transform_4(%arg0: i32, %arg1: i32, %arg2: i32) -> (i32, i32) {
    %c0_i32 = arith.constant 0 : i32
    %c0_i32_0 = arith.constant 0 : i32
    return %c0_i32, %arg2 : i32, i32
  }
  func.func @transform_5(%arg0: i32, %arg1: i32, %arg2: i32) -> (i32, i32, i32) {
    %c0_i32 = arith.constant 0 : i32
    return %arg0, %arg1, %arg2 : i32, i32, i32
  }
}

module attributes {stable_mosaic.version = 11 : i64} {
  func.func @_flash_attn_kernel(%arg0: i32, %arg1: i32, %arg2: i32, %arg3: memref<1x8x1x4x8xf32, #tpu.memory_space<vmem>>, %arg4: memref<1x8x1x4x8xf32, #tpu.memory_space<vmem>>, %arg5: memref<1x8x1x4x8xf32, #tpu.memory_space<vmem>>, %arg6: memref<1x8x32xf32, #tpu.memory_space<vmem>>, %arg7: memref<4x8x1xf32, #tpu.memory_space<vmem>>, %arg8: memref<4x8x1xf32, #tpu.memory_space<vmem>>, %arg9: memref<4x8x8xf32, #tpu.memory_space<vmem>>) attributes {dimension_semantics = [#tpu.dimension_semantics<parallel>, #tpu.dimension_semantics<parallel>, #tpu.dimension_semantics<arbitrary>], iteration_bounds = array<i64: 8, 1, 1>, scalar_prefetch = 0 : i64, scratch_operands = 3 : i64, tpu.core_type = #tpu.core_type<tc>, window_params = [{transform_indices = @transform_0, window_bounds = array<i64: 1, 8, 1, 4, 8>}, {transform_indices = @transform_1, window_bounds = array<i64: 1, 8, 1, 4, 8>}, {transform_indices = @transform_2, window_bounds = array<i64: 1, 8, 1, 4, 8>}, {transform_indices = @transform_3, window_bounds = array<i64: 1, 8, 32>}]} {
    %c0_i32 = arith.constant 0 : i32
    %0 = arith.cmpi eq, %arg2, %c0_i32 : i32
    %1 = arith.extui %0 : i1 to i32
    %c0_i32_0 = arith.constant 0 : i32
    %2 = arith.cmpi ne, %1, %c0_i32_0 : i32
    scf.if %2 {
      %cst_150 = arith.constant 0xFF800000 : f32
      %182 = vector.broadcast %cst_150 : f32 to vector<4x8x1xf32>
      %c0_151 = arith.constant 0 : index
      %c0_152 = arith.constant 0 : index
      %c0_153 = arith.constant 0 : index
      %183 = vector.load %arg7[%c0_151, %c0_152, %c0_153] : memref<4x8x1xf32, #tpu.memory_space<vmem>>, vector<4x8x1xf32>
      tpu.vector_store %arg7[%c0_151, %c0_152, %c0_153], %182 {strides = array<i32>} : memref<4x8x1xf32, #tpu.memory_space<vmem>>, vector<4x8x1xf32>,
      %cst_154 = arith.constant 0.000000e+00 : f32
      %184 = vector.broadcast %cst_154 : f32 to vector<4x8x1xf32>
      %c0_155 = arith.constant 0 : index
      %c0_156 = arith.constant 0 : index
      %c0_157 = arith.constant 0 : index
      %185 = vector.load %arg8[%c0_155, %c0_156, %c0_157] : memref<4x8x1xf32, #tpu.memory_space<vmem>>, vector<4x8x1xf32>
      tpu.vector_store %arg8[%c0_155, %c0_156, %c0_157], %184 {strides = array<i32>} : memref<4x8x1xf32, #tpu.memory_space<vmem>>, vector<4x8x1xf32>,
      %cst_158 = arith.constant 0.000000e+00 : f32
      %186 = vector.broadcast %cst_158 : f32 to vector<4x8x8xf32>
      %c0_159 = arith.constant 0 : index
      %c0_160 = arith.constant 0 : index
      %c0_161 = arith.constant 0 : index
      %187 = vector.load %arg9[%c0_159, %c0_160, %c0_161] : memref<4x8x8xf32, #tpu.memory_space<vmem>>, vector<4x8x8xf32>
      tpu.vector_store %arg9[%c0_159, %c0_160, %c0_161], %186 {strides = array<i32>} : memref<4x8x8xf32, #tpu.memory_space<vmem>>, vector<4x8x8xf32>,
    } else {
    }
    %c0 = arith.constant 0 : index
    %c0_1 = arith.constant 0 : index
    %c0_2 = arith.constant 0 : index
    %c0_3 = arith.constant 0 : index
    %c0_4 = arith.constant 0 : index
    %3 = vector.load %arg3[%c0, %c0_1, %c0_2, %c0_3, %c0_4] : memref<1x8x1x4x8xf32, #tpu.memory_space<vmem>>, vector<1x8x1x1x8xf32>
    %4 = vector.shape_cast %3 : vector<1x8x1x1x8xf32> to vector<8x8xf32>
    %cst = arith.constant 0.353553385 : f32
    %5 = vector.broadcast %cst : f32 to vector<8x8xf32>
    %6 = arith.mulf %4, %5 : vector<8x8xf32>
    %7 = arith.truncf %6 : vector<8x8xf32> to vector<8x8xbf16>
    %c0_5 = arith.constant 0 : index
    %c0_6 = arith.constant 0 : index
    %c0_7 = arith.constant 0 : index
    %c0_8 = arith.constant 0 : index
    %c0_9 = arith.constant 0 : index
    %8 = vector.load %arg4[%c0_5, %c0_6, %c0_7, %c0_8, %c0_9] : memref<1x8x1x4x8xf32, #tpu.memory_space<vmem>>, vector<1x8x1x1x8xf32>
    %9 = vector.shape_cast %8 : vector<1x8x1x1x8xf32> to vector<8x8xf32>
    %10 = arith.truncf %9 : vector<8x8xf32> to vector<8x8xbf16>
    %c0_10 = arith.constant 0 : index
    %c0_11 = arith.constant 0 : index
    %c0_12 = arith.constant 0 : index
    %c0_13 = arith.constant 0 : index
    %c0_14 = arith.constant 0 : index
    %11 = vector.load %arg5[%c0_10, %c0_11, %c0_12, %c0_13, %c0_14] : memref<1x8x1x4x8xf32, #tpu.memory_space<vmem>>, vector<1x8x1x1x8xf32>
    %12 = vector.shape_cast %11 : vector<1x8x1x1x8xf32> to vector<8x8xf32>
    %13 = arith.truncf %12 : vector<8x8xf32> to vector<8x8xbf16>
    %cst_15 = arith.constant dense<0.000000e+00> : vector<8x8xf32>
    %14 = tpu.matmul %7, %10, %cst_15 {dimension_numbers = #tpu.dot_dimension_numbers<[1], [1], [0], [0], [0, 0, 1, 0], [], []>} : vector<8x8xbf16>, vector<8x8xbf16>, vector<8x8xf32> -> vector<8x8xf32>
    %c0_16 = arith.constant 0 : index
    %c0_17 = arith.constant 0 : index
    %c0_18 = arith.constant 0 : index
    %15 = vector.load %arg7[%c0_16, %c0_17, %c0_18] : memref<4x8x1xf32, #tpu.memory_space<vmem>>, vector<1x8x1xf32>
    %16 = vector.shape_cast %15 : vector<1x8x1xf32> to vector<8x1xf32>
    %cst_19 = arith.constant dense<0xFF800000> : vector<8xf32>
    %17 = vector.multi_reduction <maximumf>, %14, %cst_19 [1] : vector<8x8xf32> to vector<8xf32>
    %18 = vector.shape_cast %17 : vector<8xf32> to vector<8x1xf32>
    %19 = arith.maximumf %16, %18 : vector<8x1xf32>
    %20 = arith.subf %16, %19 : vector<8x1xf32>
    %21 = math.exp %20 : vector<8x1xf32>
    %22 = vector.broadcast %19 : vector<8x1xf32> to vector<8x8xf32>
    %23 = arith.subf %14, %22 : vector<8x8xf32>
    %24 = math.exp %23 : vector<8x8xf32>
    %c0_20 = arith.constant 0 : index
    %c0_21 = arith.constant 0 : index
    %c0_22 = arith.constant 0 : index
    %25 = vector.load %arg8[%c0_20, %c0_21, %c0_22] : memref<4x8x1xf32, #tpu.memory_space<vmem>>, vector<1x8x1xf32>
    %26 = vector.shape_cast %25 : vector<1x8x1xf32> to vector<8x1xf32>
    %27 = arith.mulf %21, %26 : vector<8x1xf32>
    %cst_23 = arith.constant dense<0.000000e+00> : vector<8xf32>
    %28 = vector.multi_reduction <add>, %24, %cst_23 [1] : vector<8x8xf32> to vector<8xf32>
    %29 = vector.shape_cast %28 : vector<8xf32> to vector<8x1xf32>
    %30 = arith.addf %27, %29 : vector<8x1xf32>
    %c0_24 = arith.constant 0 : index
    %c0_25 = arith.constant 0 : index
    %c0_26 = arith.constant 0 : index
    %31 = vector.load %arg8[%c0_24, %c0_25, %c0_26] : memref<4x8x1xf32, #tpu.memory_space<vmem>>, vector<1x8x1xf32>
    %32 = vector.shape_cast %31 : vector<1x8x1xf32> to vector<8x1xf32>
    %33 = vector.shape_cast %30 : vector<8x1xf32> to vector<1x8x1xf32>
    tpu.vector_store %arg8[%c0_24, %c0_25, %c0_26], %33 {strides = array<i32>} : memref<4x8x1xf32, #tpu.memory_space<vmem>>, vector<1x8x1xf32>,
    %c0_27 = arith.constant 0 : index
    %c0_28 = arith.constant 0 : index
    %c0_29 = arith.constant 0 : index
    %34 = vector.load %arg9[%c0_27, %c0_28, %c0_29] : memref<4x8x8xf32, #tpu.memory_space<vmem>>, vector<1x8x8xf32>
    %35 = vector.shape_cast %34 : vector<1x8x8xf32> to vector<8x8xf32>
    %36 = vector.broadcast %21 : vector<8x1xf32> to vector<8x8xf32>
    %37 = arith.mulf %36, %35 : vector<8x8xf32>
    %38 = arith.truncf %24 : vector<8x8xf32> to vector<8x8xbf16>
    %cst_30 = arith.constant dense<0.000000e+00> : vector<8x8xf32>
    %39 = tpu.matmul %38, %13, %cst_30 {dimension_numbers = #tpu.dot_dimension_numbers<[1], [0], [0], [1], [0, 0, 1, 1], [], []>} : vector<8x8xbf16>, vector<8x8xbf16>, vector<8x8xf32> -> vector<8x8xf32>
    %40 = arith.addf %37, %39 : vector<8x8xf32>
    %c0_31 = arith.constant 0 : index
    %c0_32 = arith.constant 0 : index
    %c0_33 = arith.constant 0 : index
    %41 = vector.load %arg9[%c0_31, %c0_32, %c0_33] : memref<4x8x8xf32, #tpu.memory_space<vmem>>, vector<1x8x8xf32>
    %42 = vector.shape_cast %41 : vector<1x8x8xf32> to vector<8x8xf32>
    %43 = vector.shape_cast %40 : vector<8x8xf32> to vector<1x8x8xf32>
    tpu.vector_store %arg9[%c0_31, %c0_32, %c0_33], %43 {strides = array<i32>} : memref<4x8x8xf32, #tpu.memory_space<vmem>>, vector<1x8x8xf32>,
    %c0_34 = arith.constant 0 : index
    %c0_35 = arith.constant 0 : index
    %c0_36 = arith.constant 0 : index
    %44 = vector.load %arg7[%c0_34, %c0_35, %c0_36] : memref<4x8x1xf32, #tpu.memory_space<vmem>>, vector<1x8x1xf32>
    %45 = vector.shape_cast %44 : vector<1x8x1xf32> to vector<8x1xf32>
    %46 = vector.shape_cast %19 : vector<8x1xf32> to vector<1x8x1xf32>
    tpu.vector_store %arg7[%c0_34, %c0_35, %c0_36], %46 {strides = array<i32>} : memref<4x8x1xf32, #tpu.memory_space<vmem>>, vector<1x8x1xf32>,
    %c0_37 = arith.constant 0 : index
    %c0_38 = arith.constant 0 : index
    %c0_39 = arith.constant 0 : index
    %c1 = arith.constant 1 : index
    %c0_40 = arith.constant 0 : index
    %47 = vector.load %arg3[%c0_37, %c0_38, %c0_39, %c1, %c0_40] : memref<1x8x1x4x8xf32, #tpu.memory_space<vmem>>, vector<1x8x1x1x8xf32>
    %48 = vector.shape_cast %47 : vector<1x8x1x1x8xf32> to vector<8x8xf32>
    %cst_41 = arith.constant 0.353553385 : f32
    %49 = vector.broadcast %cst_41 : f32 to vector<8x8xf32>
    %50 = arith.mulf %48, %49 : vector<8x8xf32>
    %51 = arith.truncf %50 : vector<8x8xf32> to vector<8x8xbf16>
    %c0_42 = arith.constant 0 : index
    %c0_43 = arith.constant 0 : index
    %c0_44 = arith.constant 0 : index
    %c1_45 = arith.constant 1 : index
    %c0_46 = arith.constant 0 : index
    %52 = vector.load %arg4[%c0_42, %c0_43, %c0_44, %c1_45, %c0_46] : memref<1x8x1x4x8xf32, #tpu.memory_space<vmem>>, vector<1x8x1x1x8xf32>
    %53 = vector.shape_cast %52 : vector<1x8x1x1x8xf32> to vector<8x8xf32>
    %54 = arith.truncf %53 : vector<8x8xf32> to vector<8x8xbf16>
    %c0_47 = arith.constant 0 : index
    %c0_48 = arith.constant 0 : index
    %c0_49 = arith.constant 0 : index
    %c1_50 = arith.constant 1 : index
    %c0_51 = arith.constant 0 : index
    %55 = vector.load %arg5[%c0_47, %c0_48, %c0_49, %c1_50, %c0_51] : memref<1x8x1x4x8xf32, #tpu.memory_space<vmem>>, vector<1x8x1x1x8xf32>
    %56 = vector.shape_cast %55 : vector<1x8x1x1x8xf32> to vector<8x8xf32>
    %57 = arith.truncf %56 : vector<8x8xf32> to vector<8x8xbf16>
    %cst_52 = arith.constant dense<0.000000e+00> : vector<8x8xf32>
    %58 = tpu.matmul %51, %54, %cst_52 {dimension_numbers = #tpu.dot_dimension_numbers<[1], [1], [0], [0], [0, 0, 1, 0], [], []>} : vector<8x8xbf16>, vector<8x8xbf16>, vector<8x8xf32> -> vector<8x8xf32>
    %c1_53 = arith.constant 1 : index
    %c0_54 = arith.constant 0 : index
    %c0_55 = arith.constant 0 : index
    %59 = vector.load %arg7[%c1_53, %c0_54, %c0_55] : memref<4x8x1xf32, #tpu.memory_space<vmem>>, vector<1x8x1xf32>
    %60 = vector.shape_cast %59 : vector<1x8x1xf32> to vector<8x1xf32>
    %cst_56 = arith.constant dense<0xFF800000> : vector<8xf32>
    %61 = vector.multi_reduction <maximumf>, %58, %cst_56 [1] : vector<8x8xf32> to vector<8xf32>
    %62 = vector.shape_cast %61 : vector<8xf32> to vector<8x1xf32>
    %63 = arith.maximumf %60, %62 : vector<8x1xf32>
    %64 = arith.subf %60, %63 : vector<8x1xf32>
    %65 = math.exp %64 : vector<8x1xf32>
    %66 = vector.broadcast %63 : vector<8x1xf32> to vector<8x8xf32>
    %67 = arith.subf %58, %66 : vector<8x8xf32>
    %68 = math.exp %67 : vector<8x8xf32>
    %c1_57 = arith.constant 1 : index
    %c0_58 = arith.constant 0 : index
    %c0_59 = arith.constant 0 : index
    %69 = vector.load %arg8[%c1_57, %c0_58, %c0_59] : memref<4x8x1xf32, #tpu.memory_space<vmem>>, vector<1x8x1xf32>
    %70 = vector.shape_cast %69 : vector<1x8x1xf32> to vector<8x1xf32>
    %71 = arith.mulf %65, %70 : vector<8x1xf32>
    %cst_60 = arith.constant dense<0.000000e+00> : vector<8xf32>
    %72 = vector.multi_reduction <add>, %68, %cst_60 [1] : vector<8x8xf32> to vector<8xf32>
    %73 = vector.shape_cast %72 : vector<8xf32> to vector<8x1xf32>
    %74 = arith.addf %71, %73 : vector<8x1xf32>
    %c1_61 = arith.constant 1 : index
    %c0_62 = arith.constant 0 : index
    %c0_63 = arith.constant 0 : index
    %75 = vector.load %arg8[%c1_61, %c0_62, %c0_63] : memref<4x8x1xf32, #tpu.memory_space<vmem>>, vector<1x8x1xf32>
    %76 = vector.shape_cast %75 : vector<1x8x1xf32> to vector<8x1xf32>
    %77 = vector.shape_cast %74 : vector<8x1xf32> to vector<1x8x1xf32>
    tpu.vector_store %arg8[%c1_61, %c0_62, %c0_63], %77 {strides = array<i32>} : memref<4x8x1xf32, #tpu.memory_space<vmem>>, vector<1x8x1xf32>,
    %c1_64 = arith.constant 1 : index
    %c0_65 = arith.constant 0 : index
    %c0_66 = arith.constant 0 : index
    %78 = vector.load %arg9[%c1_64, %c0_65, %c0_66] : memref<4x8x8xf32, #tpu.memory_space<vmem>>, vector<1x8x8xf32>
    %79 = vector.shape_cast %78 : vector<1x8x8xf32> to vector<8x8xf32>
    %80 = vector.broadcast %65 : vector<8x1xf32> to vector<8x8xf32>
    %81 = arith.mulf %80, %79 : vector<8x8xf32>
    %82 = arith.truncf %68 : vector<8x8xf32> to vector<8x8xbf16>
    %cst_67 = arith.constant dense<0.000000e+00> : vector<8x8xf32>
    %83 = tpu.matmul %82, %57, %cst_67 {dimension_numbers = #tpu.dot_dimension_numbers<[1], [0], [0], [1], [0, 0, 1, 1], [], []>} : vector<8x8xbf16>, vector<8x8xbf16>, vector<8x8xf32> -> vector<8x8xf32>
    %84 = arith.addf %81, %83 : vector<8x8xf32>
    %c1_68 = arith.constant 1 : index
    %c0_69 = arith.constant 0 : index
    %c0_70 = arith.constant 0 : index
    %85 = vector.load %arg9[%c1_68, %c0_69, %c0_70] : memref<4x8x8xf32, #tpu.memory_space<vmem>>, vector<1x8x8xf32>
    %86 = vector.shape_cast %85 : vector<1x8x8xf32> to vector<8x8xf32>
    %87 = vector.shape_cast %84 : vector<8x8xf32> to vector<1x8x8xf32>
    tpu.vector_store %arg9[%c1_68, %c0_69, %c0_70], %87 {strides = array<i32>} : memref<4x8x8xf32, #tpu.memory_space<vmem>>, vector<1x8x8xf32>,
    %c1_71 = arith.constant 1 : index
    %c0_72 = arith.constant 0 : index
    %c0_73 = arith.constant 0 : index
    %88 = vector.load %arg7[%c1_71, %c0_72, %c0_73] : memref<4x8x1xf32, #tpu.memory_space<vmem>>, vector<1x8x1xf32>
    %89 = vector.shape_cast %88 : vector<1x8x1xf32> to vector<8x1xf32>
    %90 = vector.shape_cast %63 : vector<8x1xf32> to vector<1x8x1xf32>
    tpu.vector_store %arg7[%c1_71, %c0_72, %c0_73], %90 {strides = array<i32>} : memref<4x8x1xf32, #tpu.memory_space<vmem>>, vector<1x8x1xf32>,
    %c0_74 = arith.constant 0 : index
    %c0_75 = arith.constant 0 : index
    %c0_76 = arith.constant 0 : index
    %c2 = arith.constant 2 : index
    %c0_77 = arith.constant 0 : index
    %91 = vector.load %arg3[%c0_74, %c0_75, %c0_76, %c2, %c0_77] : memref<1x8x1x4x8xf32, #tpu.memory_space<vmem>>, vector<1x8x1x1x8xf32>
    %92 = vector.shape_cast %91 : vector<1x8x1x1x8xf32> to vector<8x8xf32>
    %cst_78 = arith.constant 0.353553385 : f32
    %93 = vector.broadcast %cst_78 : f32 to vector<8x8xf32>
    %94 = arith.mulf %92, %93 : vector<8x8xf32>
    %95 = arith.truncf %94 : vector<8x8xf32> to vector<8x8xbf16>
    %c0_79 = arith.constant 0 : index
    %c0_80 = arith.constant 0 : index
    %c0_81 = arith.constant 0 : index
    %c2_82 = arith.constant 2 : index
    %c0_83 = arith.constant 0 : index
    %96 = vector.load %arg4[%c0_79, %c0_80, %c0_81, %c2_82, %c0_83] : memref<1x8x1x4x8xf32, #tpu.memory_space<vmem>>, vector<1x8x1x1x8xf32>
    %97 = vector.shape_cast %96 : vector<1x8x1x1x8xf32> to vector<8x8xf32>
    %98 = arith.truncf %97 : vector<8x8xf32> to vector<8x8xbf16>
    %c0_84 = arith.constant 0 : index
    %c0_85 = arith.constant 0 : index
    %c0_86 = arith.constant 0 : index
    %c2_87 = arith.constant 2 : index
    %c0_88 = arith.constant 0 : index
    %99 = vector.load %arg5[%c0_84, %c0_85, %c0_86, %c2_87, %c0_88] : memref<1x8x1x4x8xf32, #tpu.memory_space<vmem>>, vector<1x8x1x1x8xf32>
    %100 = vector.shape_cast %99 : vector<1x8x1x1x8xf32> to vector<8x8xf32>
    %101 = arith.truncf %100 : vector<8x8xf32> to vector<8x8xbf16>
    %cst_89 = arith.constant dense<0.000000e+00> : vector<8x8xf32>
    %102 = tpu.matmul %95, %98, %cst_89 {dimension_numbers = #tpu.dot_dimension_numbers<[1], [1], [0], [0], [0, 0, 1, 0], [], []>} : vector<8x8xbf16>, vector<8x8xbf16>, vector<8x8xf32> -> vector<8x8xf32>
    %c2_90 = arith.constant 2 : index
    %c0_91 = arith.constant 0 : index
    %c0_92 = arith.constant 0 : index
    %103 = vector.load %arg7[%c2_90, %c0_91, %c0_92] : memref<4x8x1xf32, #tpu.memory_space<vmem>>, vector<1x8x1xf32>
    %104 = vector.shape_cast %103 : vector<1x8x1xf32> to vector<8x1xf32>
    %cst_93 = arith.constant dense<0xFF800000> : vector<8xf32>
    %105 = vector.multi_reduction <maximumf>, %102, %cst_93 [1] : vector<8x8xf32> to vector<8xf32>
    %106 = vector.shape_cast %105 : vector<8xf32> to vector<8x1xf32>
    %107 = arith.maximumf %104, %106 : vector<8x1xf32>
    %108 = arith.subf %104, %107 : vector<8x1xf32>
    %109 = math.exp %108 : vector<8x1xf32>
    %110 = vector.broadcast %107 : vector<8x1xf32> to vector<8x8xf32>
    %111 = arith.subf %102, %110 : vector<8x8xf32>
    %112 = math.exp %111 : vector<8x8xf32>
    %c2_94 = arith.constant 2 : index
    %c0_95 = arith.constant 0 : index
    %c0_96 = arith.constant 0 : index
    %113 = vector.load %arg8[%c2_94, %c0_95, %c0_96] : memref<4x8x1xf32, #tpu.memory_space<vmem>>, vector<1x8x1xf32>
    %114 = vector.shape_cast %113 : vector<1x8x1xf32> to vector<8x1xf32>
    %115 = arith.mulf %109, %114 : vector<8x1xf32>
    %cst_97 = arith.constant dense<0.000000e+00> : vector<8xf32>
    %116 = vector.multi_reduction <add>, %112, %cst_97 [1] : vector<8x8xf32> to vector<8xf32>
    %117 = vector.shape_cast %116 : vector<8xf32> to vector<8x1xf32>
    %118 = arith.addf %115, %117 : vector<8x1xf32>
    %c2_98 = arith.constant 2 : index
    %c0_99 = arith.constant 0 : index
    %c0_100 = arith.constant 0 : index
    %119 = vector.load %arg8[%c2_98, %c0_99, %c0_100] : memref<4x8x1xf32, #tpu.memory_space<vmem>>, vector<1x8x1xf32>
    %120 = vector.shape_cast %119 : vector<1x8x1xf32> to vector<8x1xf32>
    %121 = vector.shape_cast %118 : vector<8x1xf32> to vector<1x8x1xf32>
    tpu.vector_store %arg8[%c2_98, %c0_99, %c0_100], %121 {strides = array<i32>} : memref<4x8x1xf32, #tpu.memory_space<vmem>>, vector<1x8x1xf32>,
    %c2_101 = arith.constant 2 : index
    %c0_102 = arith.constant 0 : index
    %c0_103 = arith.constant 0 : index
    %122 = vector.load %arg9[%c2_101, %c0_102, %c0_103] : memref<4x8x8xf32, #tpu.memory_space<vmem>>, vector<1x8x8xf32>
    %123 = vector.shape_cast %122 : vector<1x8x8xf32> to vector<8x8xf32>
    %124 = vector.broadcast %109 : vector<8x1xf32> to vector<8x8xf32>
    %125 = arith.mulf %124, %123 : vector<8x8xf32>
    %126 = arith.truncf %112 : vector<8x8xf32> to vector<8x8xbf16>
    %cst_104 = arith.constant dense<0.000000e+00> : vector<8x8xf32>
    %127 = tpu.matmul %126, %101, %cst_104 {dimension_numbers = #tpu.dot_dimension_numbers<[1], [0], [0], [1], [0, 0, 1, 1], [], []>} : vector<8x8xbf16>, vector<8x8xbf16>, vector<8x8xf32> -> vector<8x8xf32>
    %128 = arith.addf %125, %127 : vector<8x8xf32>
    %c2_105 = arith.constant 2 : index
    %c0_106 = arith.constant 0 : index
    %c0_107 = arith.constant 0 : index
    %129 = vector.load %arg9[%c2_105, %c0_106, %c0_107] : memref<4x8x8xf32, #tpu.memory_space<vmem>>, vector<1x8x8xf32>
    %130 = vector.shape_cast %129 : vector<1x8x8xf32> to vector<8x8xf32>
    %131 = vector.shape_cast %128 : vector<8x8xf32> to vector<1x8x8xf32>
    tpu.vector_store %arg9[%c2_105, %c0_106, %c0_107], %131 {strides = array<i32>} : memref<4x8x8xf32, #tpu.memory_space<vmem>>, vector<1x8x8xf32>,
    %c2_108 = arith.constant 2 : index
    %c0_109 = arith.constant 0 : index
    %c0_110 = arith.constant 0 : index
    %132 = vector.load %arg7[%c2_108, %c0_109, %c0_110] : memref<4x8x1xf32, #tpu.memory_space<vmem>>, vector<1x8x1xf32>
    %133 = vector.shape_cast %132 : vector<1x8x1xf32> to vector<8x1xf32>
    %134 = vector.shape_cast %107 : vector<8x1xf32> to vector<1x8x1xf32>
    tpu.vector_store %arg7[%c2_108, %c0_109, %c0_110], %134 {strides = array<i32>} : memref<4x8x1xf32, #tpu.memory_space<vmem>>, vector<1x8x1xf32>,
    %c0_111 = arith.constant 0 : index
    %c0_112 = arith.constant 0 : index
    %c0_113 = arith.constant 0 : index
    %c3 = arith.constant 3 : index
    %c0_114 = arith.constant 0 : index
    %135 = vector.load %arg3[%c0_111, %c0_112, %c0_113, %c3, %c0_114] : memref<1x8x1x4x8xf32, #tpu.memory_space<vmem>>, vector<1x8x1x1x8xf32>
    %136 = vector.shape_cast %135 : vector<1x8x1x1x8xf32> to vector<8x8xf32>
    %cst_115 = arith.constant 0.353553385 : f32
    %137 = vector.broadcast %cst_115 : f32 to vector<8x8xf32>
    %138 = arith.mulf %136, %137 : vector<8x8xf32>
    %139 = arith.truncf %138 : vector<8x8xf32> to vector<8x8xbf16>
    %c0_116 = arith.constant 0 : index
    %c0_117 = arith.constant 0 : index
    %c0_118 = arith.constant 0 : index
    %c3_119 = arith.constant 3 : index
    %c0_120 = arith.constant 0 : index
    %140 = vector.load %arg4[%c0_116, %c0_117, %c0_118, %c3_119, %c0_120] : memref<1x8x1x4x8xf32, #tpu.memory_space<vmem>>, vector<1x8x1x1x8xf32>
    %141 = vector.shape_cast %140 : vector<1x8x1x1x8xf32> to vector<8x8xf32>
    %142 = arith.truncf %141 : vector<8x8xf32> to vector<8x8xbf16>
    %c0_121 = arith.constant 0 : index
    %c0_122 = arith.constant 0 : index
    %c0_123 = arith.constant 0 : index
    %c3_124 = arith.constant 3 : index
    %c0_125 = arith.constant 0 : index
    %143 = vector.load %arg5[%c0_121, %c0_122, %c0_123, %c3_124, %c0_125] : memref<1x8x1x4x8xf32, #tpu.memory_space<vmem>>, vector<1x8x1x1x8xf32>
    %144 = vector.shape_cast %143 : vector<1x8x1x1x8xf32> to vector<8x8xf32>
    %145 = arith.truncf %144 : vector<8x8xf32> to vector<8x8xbf16>
    %cst_126 = arith.constant dense<0.000000e+00> : vector<8x8xf32>
    %146 = tpu.matmul %139, %142, %cst_126 {dimension_numbers = #tpu.dot_dimension_numbers<[1], [1], [0], [0], [0, 0, 1, 0], [], []>} : vector<8x8xbf16>, vector<8x8xbf16>, vector<8x8xf32> -> vector<8x8xf32>
    %c3_127 = arith.constant 3 : index
    %c0_128 = arith.constant 0 : index
    %c0_129 = arith.constant 0 : index
    %147 = vector.load %arg7[%c3_127, %c0_128, %c0_129] : memref<4x8x1xf32, #tpu.memory_space<vmem>>, vector<1x8x1xf32>
    %148 = vector.shape_cast %147 : vector<1x8x1xf32> to vector<8x1xf32>
    %cst_130 = arith.constant dense<0xFF800000> : vector<8xf32>
    %149 = vector.multi_reduction <maximumf>, %146, %cst_130 [1] : vector<8x8xf32> to vector<8xf32>
    %150 = vector.shape_cast %149 : vector<8xf32> to vector<8x1xf32>
    %151 = arith.maximumf %148, %150 : vector<8x1xf32>
    %152 = arith.subf %148, %151 : vector<8x1xf32>
    %153 = math.exp %152 : vector<8x1xf32>
    %154 = vector.broadcast %151 : vector<8x1xf32> to vector<8x8xf32>
    %155 = arith.subf %146, %154 : vector<8x8xf32>
    %156 = math.exp %155 : vector<8x8xf32>
    %c3_131 = arith.constant 3 : index
    %c0_132 = arith.constant 0 : index
    %c0_133 = arith.constant 0 : index
    %157 = vector.load %arg8[%c3_131, %c0_132, %c0_133] : memref<4x8x1xf32, #tpu.memory_space<vmem>>, vector<1x8x1xf32>
    %158 = vector.shape_cast %157 : vector<1x8x1xf32> to vector<8x1xf32>
    %159 = arith.mulf %153, %158 : vector<8x1xf32>
    %cst_134 = arith.constant dense<0.000000e+00> : vector<8xf32>
    %160 = vector.multi_reduction <add>, %156, %cst_134 [1] : vector<8x8xf32> to vector<8xf32>
    %161 = vector.shape_cast %160 : vector<8xf32> to vector<8x1xf32>
    %162 = arith.addf %159, %161 : vector<8x1xf32>
    %c3_135 = arith.constant 3 : index
    %c0_136 = arith.constant 0 : index
    %c0_137 = arith.constant 0 : index
    %163 = vector.load %arg8[%c3_135, %c0_136, %c0_137] : memref<4x8x1xf32, #tpu.memory_space<vmem>>, vector<1x8x1xf32>
    %164 = vector.shape_cast %163 : vector<1x8x1xf32> to vector<8x1xf32>
    %165 = vector.shape_cast %162 : vector<8x1xf32> to vector<1x8x1xf32>
    tpu.vector_store %arg8[%c3_135, %c0_136, %c0_137], %165 {strides = array<i32>} : memref<4x8x1xf32, #tpu.memory_space<vmem>>, vector<1x8x1xf32>,
    %c3_138 = arith.constant 3 : index
    %c0_139 = arith.constant 0 : index
    %c0_140 = arith.constant 0 : index
    %166 = vector.load %arg9[%c3_138, %c0_139, %c0_140] : memref<4x8x8xf32, #tpu.memory_space<vmem>>, vector<1x8x8xf32>
    %167 = vector.shape_cast %166 : vector<1x8x8xf32> to vector<8x8xf32>
    %168 = vector.broadcast %153 : vector<8x1xf32> to vector<8x8xf32>
    %169 = arith.mulf %168, %167 : vector<8x8xf32>
    %170 = arith.truncf %156 : vector<8x8xf32> to vector<8x8xbf16>
    %cst_141 = arith.constant dense<0.000000e+00> : vector<8x8xf32>
    %171 = tpu.matmul %170, %145, %cst_141 {dimension_numbers = #tpu.dot_dimension_numbers<[1], [0], [0], [1], [0, 0, 1, 1], [], []>} : vector<8x8xbf16>, vector<8x8xbf16>, vector<8x8xf32> -> vector<8x8xf32>
    %172 = arith.addf %169, %171 : vector<8x8xf32>
    %c3_142 = arith.constant 3 : index
    %c0_143 = arith.constant 0 : index
    %c0_144 = arith.constant 0 : index
    %173 = vector.load %arg9[%c3_142, %c0_143, %c0_144] : memref<4x8x8xf32, #tpu.memory_space<vmem>>, vector<1x8x8xf32>
    %174 = vector.shape_cast %173 : vector<1x8x8xf32> to vector<8x8xf32>
    %175 = vector.shape_cast %172 : vector<8x8xf32> to vector<1x8x8xf32>
    tpu.vector_store %arg9[%c3_142, %c0_143, %c0_144], %175 {strides = array<i32>} : memref<4x8x8xf32, #tpu.memory_space<vmem>>, vector<1x8x8xf32>,
    %c3_145 = arith.constant 3 : index
    %c0_146 = arith.constant 0 : index
    %c0_147 = arith.constant 0 : index
    %176 = vector.load %arg7[%c3_145, %c0_146, %c0_147] : memref<4x8x1xf32, #tpu.memory_space<vmem>>, vector<1x8x1xf32>
    %177 = vector.shape_cast %176 : vector<1x8x1xf32> to vector<8x1xf32>
    %178 = vector.shape_cast %151 : vector<8x1xf32> to vector<1x8x1xf32>
    tpu.vector_store %arg7[%c3_145, %c0_146, %c0_147], %178 {strides = array<i32>} : memref<4x8x1xf32, #tpu.memory_space<vmem>>, vector<1x8x1xf32>,
    %c0_i32_148 = arith.constant 0 : i32
    %179 = arith.cmpi eq, %arg2, %c0_i32_148 : i32
    %180 = arith.extui %179 : i1 to i32
    %c0_i32_149 = arith.constant 0 : i32
    %181 = arith.cmpi ne, %180, %c0_i32_149 : i32
    scf.if %181 {
      %c0_150 = arith.constant 0 : index
      %c0_151 = arith.constant 0 : index
      %c0_152 = arith.constant 0 : index
      %182 = vector.load %arg9[%c0_150, %c0_151, %c0_152] : memref<4x8x8xf32, #tpu.memory_space<vmem>>, vector<1x8x8xf32>
      %183 = vector.shape_cast %182 : vector<1x8x8xf32> to vector<8x8xf32>
      %c0_153 = arith.constant 0 : index
      %c0_154 = arith.constant 0 : index
      %c0_155 = arith.constant 0 : index
      %184 = vector.load %arg8[%c0_153, %c0_154, %c0_155] : memref<4x8x1xf32, #tpu.memory_space<vmem>>, vector<1x8x1xf32>
      %185 = vector.shape_cast %184 : vector<1x8x1xf32> to vector<8x1xf32>
      %186 = tpu.reciprocal %185 {approx = true} : vector<8x1xf32> -> vector<8x1xf32>
      %187 = vector.broadcast %186 : vector<8x1xf32> to vector<8x8xf32>
      %188 = arith.mulf %183, %187 : vector<8x8xf32>
      %c1_156 = arith.constant 1 : index
      %c0_157 = arith.constant 0 : index
      %c0_158 = arith.constant 0 : index
      %189 = vector.load %arg9[%c1_156, %c0_157, %c0_158] : memref<4x8x8xf32, #tpu.memory_space<vmem>>, vector<1x8x8xf32>
      %190 = vector.shape_cast %189 : vector<1x8x8xf32> to vector<8x8xf32>
      %c1_159 = arith.constant 1 : index
      %c0_160 = arith.constant 0 : index
      %c0_161 = arith.constant 0 : index
      %191 = vector.load %arg8[%c1_159, %c0_160, %c0_161] : memref<4x8x1xf32, #tpu.memory_space<vmem>>, vector<1x8x1xf32>
      %192 = vector.shape_cast %191 : vector<1x8x1xf32> to vector<8x1xf32>
      %193 = tpu.reciprocal %192 {approx = true} : vector<8x1xf32> -> vector<8x1xf32>
      %194 = vector.broadcast %193 : vector<8x1xf32> to vector<8x8xf32>
      %195 = arith.mulf %190, %194 : vector<8x8xf32>
      %c2_162 = arith.constant 2 : index
      %c0_163 = arith.constant 0 : index
      %c0_164 = arith.constant 0 : index
      %196 = vector.load %arg9[%c2_162, %c0_163, %c0_164] : memref<4x8x8xf32, #tpu.memory_space<vmem>>, vector<1x8x8xf32>
      %197 = vector.shape_cast %196 : vector<1x8x8xf32> to vector<8x8xf32>
      %c2_165 = arith.constant 2 : index
      %c0_166 = arith.constant 0 : index
      %c0_167 = arith.constant 0 : index
      %198 = vector.load %arg8[%c2_165, %c0_166, %c0_167] : memref<4x8x1xf32, #tpu.memory_space<vmem>>, vector<1x8x1xf32>
      %199 = vector.shape_cast %198 : vector<1x8x1xf32> to vector<8x1xf32>
      %200 = tpu.reciprocal %199 {approx = true} : vector<8x1xf32> -> vector<8x1xf32>
      %201 = vector.broadcast %200 : vector<8x1xf32> to vector<8x8xf32>
      %202 = arith.mulf %197, %201 : vector<8x8xf32>
      %c3_168 = arith.constant 3 : index
      %c0_169 = arith.constant 0 : index
      %c0_170 = arith.constant 0 : index
      %203 = vector.load %arg9[%c3_168, %c0_169, %c0_170] : memref<4x8x8xf32, #tpu.memory_space<vmem>>, vector<1x8x8xf32>
      %204 = vector.shape_cast %203 : vector<1x8x8xf32> to vector<8x8xf32>
      %c3_171 = arith.constant 3 : index
      %c0_172 = arith.constant 0 : index
      %c0_173 = arith.constant 0 : index
      %205 = vector.load %arg8[%c3_171, %c0_172, %c0_173] : memref<4x8x1xf32, #tpu.memory_space<vmem>>, vector<1x8x1xf32>
      %206 = vector.shape_cast %205 : vector<1x8x1xf32> to vector<8x1xf32>
      %207 = tpu.reciprocal %206 {approx = true} : vector<8x1xf32> -> vector<8x1xf32>
      %208 = vector.broadcast %207 : vector<8x1xf32> to vector<8x8xf32>
      %209 = arith.mulf %204, %208 : vector<8x8xf32>
      %210 = tpu.concatenate %188, %195, %202, %209 in 1 : vector<8x8xf32>, vector<8x8xf32>, vector<8x8xf32>, vector<8x8xf32> -> vector<8x32xf32>
      %c0_174 = arith.constant 0 : index
      %c0_175 = arith.constant 0 : index
      %c0_176 = arith.constant 0 : index
      %211 = vector.load %arg6[%c0_174, %c0_175, %c0_176] : memref<1x8x32xf32, #tpu.memory_space<vmem>>, vector<1x8x32xf32>
      %212 = vector.shape_cast %211 : vector<1x8x32xf32> to vector<8x32xf32>
      %213 = vector.shape_cast %210 : vector<8x32xf32> to vector<1x8x32xf32>
      tpu.vector_store %arg6[%c0_174, %c0_175, %c0_176], %213 {strides = array<i32>} : memref<1x8x32xf32, #tpu.memory_space<vmem>>, vector<1x8x32xf32>,
    } else {
    }
    return
  }
  func.func @transform_0(%arg0: i32, %arg1: i32, %arg2: i32) -> (i32, i32, i32, i32, i32) {
    %c0_i32 = arith.constant 0 : i32
    %c0_i32_0 = arith.constant 0 : i32
    %c0_i32_1 = arith.constant 0 : i32
    %c0_i32_2 = arith.constant 0 : i32
    return %arg0, %arg1, %c0_i32, %c0_i32_0, %c0_i32_1 : i32, i32, i32, i32, i32
  }
  func.func @transform_1(%arg0: i32, %arg1: i32, %arg2: i32) -> (i32, i32, i32, i32, i32) {
    %c1_i32 = arith.constant 1 : i32
    %c0_i32 = arith.constant 0 : i32
    %c0_i32_0 = arith.constant 0 : i32
    %c0_i32_1 = arith.constant 0 : i32
    return %arg0, %arg2, %c1_i32, %c0_i32, %c0_i32_0 : i32, i32, i32, i32, i32
  }
  func.func @transform_2(%arg0: i32, %arg1: i32, %arg2: i32) -> (i32, i32, i32, i32, i32) {
    %c2_i32 = arith.constant 2 : i32
    %c0_i32 = arith.constant 0 : i32
    %c0_i32_0 = arith.constant 0 : i32
    %c0_i32_1 = arith.constant 0 : i32
    return %arg0, %arg2, %c2_i32, %c0_i32, %c0_i32_0 : i32, i32, i32, i32, i32
  }
  func.func @transform_3(%arg0: i32, %arg1: i32, %arg2: i32) -> (i32, i32, i32) {
    %c0_i32 = arith.constant 0 : i32
    %c0_i32_0 = arith.constant 0 : i32
    return %arg0, %arg1, %c0_i32 : i32, i32, i32
  }
}

module attributes {stable_mosaic.version = 11 : i64} {
  func.func @_linear_gate_res_kernel(%arg0: i32, %arg1: i32, %arg2: i32, %arg3: memref<1x32x32xf32, #tpu.memory_space<vmem>>, %arg4: memref<32x32xbf16, #tpu.memory_space<vmem>>, %arg5: memref<1x32xf32, #tpu.memory_space<vmem>>, %arg6: memref<1x1x32xf32, #tpu.memory_space<vmem>>, %arg7: memref<1x32x32xf32, #tpu.memory_space<vmem>>, %arg8: memref<1x32x32xf32, #tpu.memory_space<vmem>>) attributes {dimension_semantics = [#tpu.dimension_semantics<parallel>, #tpu.dimension_semantics<parallel>, #tpu.dimension_semantics<parallel>], iteration_bounds = array<i64: 2, 1, 1>, scalar_prefetch = 0 : i64, scratch_operands = 0 : i64, tpu.core_type = #tpu.core_type<tc>, window_params = [{transform_indices = @transform_0, window_bounds = array<i64: 1, 32, 32>}, {transform_indices = @transform_1, window_bounds = array<i64: 32, 32>}, {transform_indices = @transform_2, window_bounds = array<i64: 1, 32>}, {transform_indices = @transform_3, window_bounds = array<i64: 1, 1, 32>}, {transform_indices = @transform_4, window_bounds = array<i64: 1, 32, 32>}, {transform_indices = @transform_5, window_bounds = array<i64: 1, 32, 32>}]} {
    %c0 = arith.constant 0 : index
    %c0_0 = arith.constant 0 : index
    %c0_1 = arith.constant 0 : index
    %0 = vector.load %arg3[%c0, %c0_0, %c0_1] : memref<1x32x32xf32, #tpu.memory_space<vmem>>, vector<1x32x32xf32>
    %1 = vector.shape_cast %0 : vector<1x32x32xf32> to vector<32x32xf32>
    %2 = arith.truncf %1 : vector<32x32xf32> to vector<32x32xbf16>
    %c0_2 = arith.constant 0 : index
    %c0_3 = arith.constant 0 : index
    %3 = vector.load %arg4[%c0_2, %c0_3] : memref<32x32xbf16, #tpu.memory_space<vmem>>, vector<32x32xbf16>
    %cst = arith.constant dense<0.000000e+00> : vector<32x32xf32>
    %4 = tpu.matmul %2, %3, %cst {dimension_numbers = #tpu.dot_dimension_numbers<[1], [0], [0], [1], [0, 0, 1, 1], [], []>} : vector<32x32xbf16>, vector<32x32xbf16>, vector<32x32xf32> -> vector<32x32xf32>
    %c0_4 = arith.constant 0 : index
    %c0_5 = arith.constant 0 : index
    %5 = vector.load %arg5[%c0_4, %c0_5] : memref<1x32xf32, #tpu.memory_space<vmem>>, vector<1x32xf32>
    %6 = vector.broadcast %5 : vector<1x32xf32> to vector<32x32xf32>
    %7 = arith.addf %4, %6 : vector<32x32xf32>
    %c0_6 = arith.constant 0 : index
    %c0_7 = arith.constant 0 : index
    %c0_8 = arith.constant 0 : index
    %8 = vector.load %arg7[%c0_6, %c0_7, %c0_8] : memref<1x32x32xf32, #tpu.memory_space<vmem>>, vector<1x32x32xf32>
    %9 = vector.shape_cast %8 : vector<1x32x32xf32> to vector<32x32xf32>
    %c0_9 = arith.constant 0 : index
    %c0_10 = arith.constant 0 : index
    %c0_11 = arith.constant 0 : index
    %10 = vector.load %arg6[%c0_9, %c0_10, %c0_11] : memref<1x1x32xf32, #tpu.memory_space<vmem>>, vector<1x1x32xf32>
    %11 = vector.shape_cast %10 : vector<1x1x32xf32> to vector<1x32xf32>
    %12 = vector.broadcast %11 : vector<1x32xf32> to vector<32x32xf32>
    %13 = arith.mulf %12, %7 : vector<32x32xf32>
    %14 = arith.addf %9, %13 : vector<32x32xf32>
    %c0_12 = arith.constant 0 : index
    %c0_13 = arith.constant 0 : index
    %c0_14 = arith.constant 0 : index
    %15 = vector.load %arg8[%c0_12, %c0_13, %c0_14] : memref<1x32x32xf32, #tpu.memory_space<vmem>>, vector<1x32x32xf32>
    %16 = vector.shape_cast %15 : vector<1x32x32xf32> to vector<32x32xf32>
    %17 = vector.shape_cast %14 : vector<32x32xf32> to vector<1x32x32xf32>
    tpu.vector_store %arg8[%c0_12, %c0_13, %c0_14], %17 {strides = array<i32>} : memref<1x32x32xf32, #tpu.memory_space<vmem>>, vector<1x32x32xf32>,
    return
  }
  func.func @transform_0(%arg0: i32, %arg1: i32, %arg2: i32) -> (i32, i32, i32) {
    %c0_i32 = arith.constant 0 : i32
    %c0_i32_0 = arith.constant 0 : i32
    return %arg0, %arg1, %c0_i32 : i32, i32, i32
  }
  func.func @transform_1(%arg0: i32, %arg1: i32, %arg2: i32) -> (i32, i32) {
    %c0_i32 = arith.constant 0 : i32
    %c0_i32_0 = arith.constant 0 : i32
    return %c0_i32, %arg2 : i32, i32
  }
  func.func @transform_2(%arg0: i32, %arg1: i32, %arg2: i32) -> (i32, i32) {
    %c0_i32 = arith.constant 0 : i32
    %c0_i32_0 = arith.constant 0 : i32
    return %c0_i32, %arg2 : i32, i32
  }
  func.func @transform_3(%arg0: i32, %arg1: i32, %arg2: i32) -> (i32, i32, i32) {
    %c0_i32 = arith.constant 0 : i32
    %c0_i32_0 = arith.constant 0 : i32
    return %arg0, %c0_i32, %arg2 : i32, i32, i32
  }
  func.func @transform_4(%arg0: i32, %arg1: i32, %arg2: i32) -> (i32, i32, i32) {
    %c0_i32 = arith.constant 0 : i32
    return %arg0, %arg1, %arg2 : i32, i32, i32
  }
  func.func @transform_5(%arg0: i32, %arg1: i32, %arg2: i32) -> (i32, i32, i32) {
    %c0_i32 = arith.constant 0 : i32
    return %arg0, %arg1, %arg2 : i32, i32, i32
  }
}

module attributes {stable_mosaic.version = 11 : i64} {
  func.func @_linear_kernel(%arg0: i32, %arg1: i32, %arg2: i32, %arg3: memref<1x32x32xf32, #tpu.memory_space<vmem>>, %arg4: memref<32x32xbf16, #tpu.memory_space<vmem>>, %arg5: memref<1x32xf32, #tpu.memory_space<vmem>>, %arg6: memref<1x32x32xf32, #tpu.memory_space<vmem>>) attributes {dimension_semantics = [#tpu.dimension_semantics<parallel>, #tpu.dimension_semantics<parallel>, #tpu.dimension_semantics<parallel>], iteration_bounds = array<i64: 2, 1, 1>, scalar_prefetch = 0 : i64, scratch_operands = 0 : i64, tpu.core_type = #tpu.core_type<tc>, window_params = [{transform_indices = @transform_0, window_bounds = array<i64: 1, 32, 32>}, {transform_indices = @transform_1, window_bounds = array<i64: 32, 32>}, {transform_indices = @transform_2, window_bounds = array<i64: 1, 32>}, {transform_indices = @transform_3, window_bounds = array<i64: 1, 32, 32>}]} {
    %c0 = arith.constant 0 : index
    %c0_0 = arith.constant 0 : index
    %c0_1 = arith.constant 0 : index
    %0 = vector.load %arg3[%c0, %c0_0, %c0_1] : memref<1x32x32xf32, #tpu.memory_space<vmem>>, vector<1x32x32xf32>
    %1 = vector.shape_cast %0 : vector<1x32x32xf32> to vector<32x32xf32>
    %2 = arith.truncf %1 : vector<32x32xf32> to vector<32x32xbf16>
    %c0_2 = arith.constant 0 : index
    %c0_3 = arith.constant 0 : index
    %3 = vector.load %arg4[%c0_2, %c0_3] : memref<32x32xbf16, #tpu.memory_space<vmem>>, vector<32x32xbf16>
    %cst = arith.constant dense<0.000000e+00> : vector<32x32xf32>
    %4 = tpu.matmul %2, %3, %cst {dimension_numbers = #tpu.dot_dimension_numbers<[1], [0], [0], [1], [0, 0, 1, 1], [], []>} : vector<32x32xbf16>, vector<32x32xbf16>, vector<32x32xf32> -> vector<32x32xf32>
    %c0_4 = arith.constant 0 : index
    %c0_5 = arith.constant 0 : index
    %5 = vector.load %arg5[%c0_4, %c0_5] : memref<1x32xf32, #tpu.memory_space<vmem>>, vector<1x32xf32>
    %6 = vector.broadcast %5 : vector<1x32xf32> to vector<32x32xf32>
    %7 = arith.addf %4, %6 : vector<32x32xf32>
    %c0_6 = arith.constant 0 : index
    %c0_7 = arith.constant 0 : index
    %c0_8 = arith.constant 0 : index
    %8 = vector.load %arg6[%c0_6, %c0_7, %c0_8] : memref<1x32x32xf32, #tpu.memory_space<vmem>>, vector<1x32x32xf32>
    %9 = vector.shape_cast %8 : vector<1x32x32xf32> to vector<32x32xf32>
    %10 = vector.shape_cast %7 : vector<32x32xf32> to vector<1x32x32xf32>
    tpu.vector_store %arg6[%c0_6, %c0_7, %c0_8], %10 {strides = array<i32>} : memref<1x32x32xf32, #tpu.memory_space<vmem>>, vector<1x32x32xf32>,
    return
  }
  func.func @transform_0(%arg0: i32, %arg1: i32, %arg2: i32) -> (i32, i32, i32) {
    %c0_i32 = arith.constant 0 : i32
    %c0_i32_0 = arith.constant 0 : i32
    return %arg0, %arg1, %c0_i32 : i32, i32, i32
  }
  func.func @transform_1(%arg0: i32, %arg1: i32, %arg2: i32) -> (i32, i32) {
    %c0_i32 = arith.constant 0 : i32
    %c0_i32_0 = arith.constant 0 : i32
    return %c0_i32, %arg2 : i32, i32
  }
  func.func @transform_2(%arg0: i32, %arg1: i32, %arg2: i32) -> (i32, i32) {
    %c0_i32 = arith.constant 0 : i32
    %c0_i32_0 = arith.constant 0 : i32
    return %c0_i32, %arg2 : i32, i32
  }
  func.func @transform_3(%arg0: i32, %arg1: i32, %arg2: i32) -> (i32, i32, i32) {
    %c0_i32 = arith.constant 0 : i32
    return %arg0, %arg1, %arg2 : i32, i32, i32
  }
}

module attributes {stable_mosaic.version = 11 : i64} {
  func.func @_linear_kernel(%arg0: i32, %arg1: i32, %arg2: i32, %arg3: memref<1x8x32xf32, #tpu.memory_space<vmem>>, %arg4: memref<32x64xbf16, #tpu.memory_space<vmem>>, %arg5: memref<1x64xf32, #tpu.memory_space<vmem>>, %arg6: memref<1x8x64xf32, #tpu.memory_space<vmem>>) attributes {dimension_semantics = [#tpu.dimension_semantics<parallel>, #tpu.dimension_semantics<parallel>, #tpu.dimension_semantics<parallel>], iteration_bounds = array<i64: 2, 1, 1>, scalar_prefetch = 0 : i64, scratch_operands = 0 : i64, tpu.core_type = #tpu.core_type<tc>, window_params = [{transform_indices = @transform_0, window_bounds = array<i64: 1, 8, 32>}, {transform_indices = @transform_1, window_bounds = array<i64: 32, 64>}, {transform_indices = @transform_2, window_bounds = array<i64: 1, 64>}, {transform_indices = @transform_3, window_bounds = array<i64: 1, 8, 64>}]} {
    %c0 = arith.constant 0 : index
    %c0_0 = arith.constant 0 : index
    %c0_1 = arith.constant 0 : index
    %0 = vector.load %arg3[%c0, %c0_0, %c0_1] : memref<1x8x32xf32, #tpu.memory_space<vmem>>, vector<1x8x32xf32>
    %1 = vector.shape_cast %0 : vector<1x8x32xf32> to vector<8x32xf32>
    %2 = arith.truncf %1 : vector<8x32xf32> to vector<8x32xbf16>
    %c0_2 = arith.constant 0 : index
    %c0_3 = arith.constant 0 : index
    %3 = vector.load %arg4[%c0_2, %c0_3] : memref<32x64xbf16, #tpu.memory_space<vmem>>, vector<32x64xbf16>
    %cst = arith.constant dense<0.000000e+00> : vector<8x64xf32>
    %4 = tpu.matmul %2, %3, %cst {dimension_numbers = #tpu.dot_dimension_numbers<[1], [0], [0], [1], [0, 0, 1, 1], [], []>} : vector<8x32xbf16>, vector<32x64xbf16>, vector<8x64xf32> -> vector<8x64xf32>
    %c0_4 = arith.constant 0 : index
    %c0_5 = arith.constant 0 : index
    %5 = vector.load %arg5[%c0_4, %c0_5] : memref<1x64xf32, #tpu.memory_space<vmem>>, vector<1x64xf32>
    %6 = vector.broadcast %5 : vector<1x64xf32> to vector<8x64xf32>
    %7 = arith.addf %4, %6 : vector<8x64xf32>
    %c0_6 = arith.constant 0 : index
    %c0_7 = arith.constant 0 : index
    %c0_8 = arith.constant 0 : index
    %8 = vector.load %arg6[%c0_6, %c0_7, %c0_8] : memref<1x8x64xf32, #tpu.memory_space<vmem>>, vector<1x8x64xf32>
    %9 = vector.shape_cast %8 : vector<1x8x64xf32> to vector<8x64xf32>
    %10 = vector.shape_cast %7 : vector<8x64xf32> to vector<1x8x64xf32>
    tpu.vector_store %arg6[%c0_6, %c0_7, %c0_8], %10 {strides = array<i32>} : memref<1x8x64xf32, #tpu.memory_space<vmem>>, vector<1x8x64xf32>,
    return
  }
  func.func @transform_0(%arg0: i32, %arg1: i32, %arg2: i32) -> (i32, i32, i32) {
    %c0_i32 = arith.constant 0 : i32
    %c0_i32_0 = arith.constant 0 : i32
    return %arg0, %arg1, %c0_i32 : i32, i32, i32
  }
  func.func @transform_1(%arg0: i32, %arg1: i32, %arg2: i32) -> (i32, i32) {
    %c0_i32 = arith.constant 0 : i32
    %c0_i32_0 = arith.constant 0 : i32
    return %c0_i32, %arg2 : i32, i32
  }
  func.func @transform_2(%arg0: i32, %arg1: i32, %arg2: i32) -> (i32, i32) {
    %c0_i32 = arith.constant 0 : i32
    %c0_i32_0 = arith.constant 0 : i32
    return %c0_i32, %arg2 : i32, i32
  }
  func.func @transform_3(%arg0: i32, %arg1: i32, %arg2: i32) -> (i32, i32, i32) {
    %c0_i32 = arith.constant 0 : i32
    return %arg0, %arg1, %arg2 : i32, i32, i32
  }
}

module attributes {stable_mosaic.version = 11 : i64} {
  func.func @_flash_attn_kernel(%arg0: i32, %arg1: i32, %arg2: i32, %arg3: memref<1x32x1x4x8xf32, #tpu.memory_space<vmem>>, %arg4: memref<1x8x1x4x8xf32, #tpu.memory_space<vmem>>, %arg5: memref<1x8x1x4x8xf32, #tpu.memory_space<vmem>>, %arg6: memref<1x32x32xf32, #tpu.memory_space<vmem>>, %arg7: memref<4x32x1xf32, #tpu.memory_space<vmem>>, %arg8: memref<4x32x1xf32, #tpu.memory_space<vmem>>, %arg9: memref<4x32x8xf32, #tpu.memory_space<vmem>>) attributes {dimension_semantics = [#tpu.dimension_semantics<parallel>, #tpu.dimension_semantics<parallel>, #tpu.dimension_semantics<arbitrary>], iteration_bounds = array<i64: 2, 1, 1>, scalar_prefetch = 0 : i64, scratch_operands = 3 : i64, tpu.core_type = #tpu.core_type<tc>, window_params = [{transform_indices = @transform_0, window_bounds = array<i64: 1, 32, 1, 4, 8>}, {transform_indices = @transform_1, window_bounds = array<i64: 1, 8, 1, 4, 8>}, {transform_indices = @transform_2, window_bounds = array<i64: 1, 8, 1, 4, 8>}, {transform_indices = @transform_3, window_bounds = array<i64: 1, 32, 32>}]} {
    %c0_i32 = arith.constant 0 : i32
    %0 = arith.cmpi eq, %arg2, %c0_i32 : i32
    %1 = arith.extui %0 : i1 to i32
    %c0_i32_0 = arith.constant 0 : i32
    %2 = arith.cmpi ne, %1, %c0_i32_0 : i32
    scf.if %2 {
      %cst_150 = arith.constant 0xFF800000 : f32
      %182 = vector.broadcast %cst_150 : f32 to vector<4x32x1xf32>
      %c0_151 = arith.constant 0 : index
      %c0_152 = arith.constant 0 : index
      %c0_153 = arith.constant 0 : index
      %183 = vector.load %arg7[%c0_151, %c0_152, %c0_153] : memref<4x32x1xf32, #tpu.memory_space<vmem>>, vector<4x32x1xf32>
      tpu.vector_store %arg7[%c0_151, %c0_152, %c0_153], %182 {strides = array<i32>} : memref<4x32x1xf32, #tpu.memory_space<vmem>>, vector<4x32x1xf32>,
      %cst_154 = arith.constant 0.000000e+00 : f32
      %184 = vector.broadcast %cst_154 : f32 to vector<4x32x1xf32>
      %c0_155 = arith.constant 0 : index
      %c0_156 = arith.constant 0 : index
      %c0_157 = arith.constant 0 : index
      %185 = vector.load %arg8[%c0_155, %c0_156, %c0_157] : memref<4x32x1xf32, #tpu.memory_space<vmem>>, vector<4x32x1xf32>
      tpu.vector_store %arg8[%c0_155, %c0_156, %c0_157], %184 {strides = array<i32>} : memref<4x32x1xf32, #tpu.memory_space<vmem>>, vector<4x32x1xf32>,
      %cst_158 = arith.constant 0.000000e+00 : f32
      %186 = vector.broadcast %cst_158 : f32 to vector<4x32x8xf32>
      %c0_159 = arith.constant 0 : index
      %c0_160 = arith.constant 0 : index
      %c0_161 = arith.constant 0 : index
      %187 = vector.load %arg9[%c0_159, %c0_160, %c0_161] : memref<4x32x8xf32, #tpu.memory_space<vmem>>, vector<4x32x8xf32>
      tpu.vector_store %arg9[%c0_159, %c0_160, %c0_161], %186 {strides = array<i32>} : memref<4x32x8xf32, #tpu.memory_space<vmem>>, vector<4x32x8xf32>,
    } else {
    }
    %c0 = arith.constant 0 : index
    %c0_1 = arith.constant 0 : index
    %c0_2 = arith.constant 0 : index
    %c0_3 = arith.constant 0 : index
    %c0_4 = arith.constant 0 : index
    %3 = vector.load %arg3[%c0, %c0_1, %c0_2, %c0_3, %c0_4] : memref<1x32x1x4x8xf32, #tpu.memory_space<vmem>>, vector<1x32x1x1x8xf32>
    %4 = vector.shape_cast %3 : vector<1x32x1x1x8xf32> to vector<32x8xf32>
    %cst = arith.constant 0.353553385 : f32
    %5 = vector.broadcast %cst : f32 to vector<32x8xf32>
    %6 = arith.mulf %4, %5 : vector<32x8xf32>
    %7 = arith.truncf %6 : vector<32x8xf32> to vector<32x8xbf16>
    %c0_5 = arith.constant 0 : index
    %c0_6 = arith.constant 0 : index
    %c0_7 = arith.constant 0 : index
    %c0_8 = arith.constant 0 : index
    %c0_9 = arith.constant 0 : index
    %8 = vector.load %arg4[%c0_5, %c0_6, %c0_7, %c0_8, %c0_9] : memref<1x8x1x4x8xf32, #tpu.memory_space<vmem>>, vector<1x8x1x1x8xf32>
    %9 = vector.shape_cast %8 : vector<1x8x1x1x8xf32> to vector<8x8xf32>
    %10 = arith.truncf %9 : vector<8x8xf32> to vector<8x8xbf16>
    %c0_10 = arith.constant 0 : index
    %c0_11 = arith.constant 0 : index
    %c0_12 = arith.constant 0 : index
    %c0_13 = arith.constant 0 : index
    %c0_14 = arith.constant 0 : index
    %11 = vector.load %arg5[%c0_10, %c0_11, %c0_12, %c0_13, %c0_14] : memref<1x8x1x4x8xf32, #tpu.memory_space<vmem>>, vector<1x8x1x1x8xf32>
    %12 = vector.shape_cast %11 : vector<1x8x1x1x8xf32> to vector<8x8xf32>
    %13 = arith.truncf %12 : vector<8x8xf32> to vector<8x8xbf16>
    %cst_15 = arith.constant dense<0.000000e+00> : vector<32x8xf32>
    %14 = tpu.matmul %7, %10, %cst_15 {dimension_numbers = #tpu.dot_dimension_numbers<[1], [1], [0], [0], [0, 0, 1, 0], [], []>} : vector<32x8xbf16>, vector<8x8xbf16>, vector<32x8xf32> -> vector<32x8xf32>
    %c0_16 = arith.constant 0 : index
    %c0_17 = arith.constant 0 : index
    %c0_18 = arith.constant 0 : index
    %15 = vector.load %arg7[%c0_16, %c0_17, %c0_18] : memref<4x32x1xf32, #tpu.memory_space<vmem>>, vector<1x32x1xf32>
    %16 = vector.shape_cast %15 : vector<1x32x1xf32> to vector<32x1xf32>
    %cst_19 = arith.constant dense<0xFF800000> : vector<32xf32>
    %17 = vector.multi_reduction <maximumf>, %14, %cst_19 [1] : vector<32x8xf32> to vector<32xf32>
    %18 = vector.shape_cast %17 : vector<32xf32> to vector<32x1xf32>
    %19 = arith.maximumf %16, %18 : vector<32x1xf32>
    %20 = arith.subf %16, %19 : vector<32x1xf32>
    %21 = math.exp %20 : vector<32x1xf32>
    %22 = vector.broadcast %19 : vector<32x1xf32> to vector<32x8xf32>
    %23 = arith.subf %14, %22 : vector<32x8xf32>
    %24 = math.exp %23 : vector<32x8xf32>
    %c0_20 = arith.constant 0 : index
    %c0_21 = arith.constant 0 : index
    %c0_22 = arith.constant 0 : index
    %25 = vector.load %arg8[%c0_20, %c0_21, %c0_22] : memref<4x32x1xf32, #tpu.memory_space<vmem>>, vector<1x32x1xf32>
    %26 = vector.shape_cast %25 : vector<1x32x1xf32> to vector<32x1xf32>
    %27 = arith.mulf %21, %26 : vector<32x1xf32>
    %cst_23 = arith.constant dense<0.000000e+00> : vector<32xf32>
    %28 = vector.multi_reduction <add>, %24, %cst_23 [1] : vector<32x8xf32> to vector<32xf32>
    %29 = vector.shape_cast %28 : vector<32xf32> to vector<32x1xf32>
    %30 = arith.addf %27, %29 : vector<32x1xf32>
    %c0_24 = arith.constant 0 : index
    %c0_25 = arith.constant 0 : index
    %c0_26 = arith.constant 0 : index
    %31 = vector.load %arg8[%c0_24, %c0_25, %c0_26] : memref<4x32x1xf32, #tpu.memory_space<vmem>>, vector<1x32x1xf32>
    %32 = vector.shape_cast %31 : vector<1x32x1xf32> to vector<32x1xf32>
    %33 = vector.shape_cast %30 : vector<32x1xf32> to vector<1x32x1xf32>
    tpu.vector_store %arg8[%c0_24, %c0_25, %c0_26], %33 {strides = array<i32>} : memref<4x32x1xf32, #tpu.memory_space<vmem>>, vector<1x32x1xf32>,
    %c0_27 = arith.constant 0 : index
    %c0_28 = arith.constant 0 : index
    %c0_29 = arith.constant 0 : index
    %34 = vector.load %arg9[%c0_27, %c0_28, %c0_29] : memref<4x32x8xf32, #tpu.memory_space<vmem>>, vector<1x32x8xf32>
    %35 = vector.shape_cast %34 : vector<1x32x8xf32> to vector<32x8xf32>
    %36 = vector.broadcast %21 : vector<32x1xf32> to vector<32x8xf32>
    %37 = arith.mulf %36, %35 : vector<32x8xf32>
    %38 = arith.truncf %24 : vector<32x8xf32> to vector<32x8xbf16>
    %cst_30 = arith.constant dense<0.000000e+00> : vector<32x8xf32>
    %39 = tpu.matmul %38, %13, %cst_30 {dimension_numbers = #tpu.dot_dimension_numbers<[1], [0], [0], [1], [0, 0, 1, 1], [], []>} : vector<32x8xbf16>, vector<8x8xbf16>, vector<32x8xf32> -> vector<32x8xf32>
    %40 = arith.addf %37, %39 : vector<32x8xf32>
    %c0_31 = arith.constant 0 : index
    %c0_32 = arith.constant 0 : index
    %c0_33 = arith.constant 0 : index
    %41 = vector.load %arg9[%c0_31, %c0_32, %c0_33] : memref<4x32x8xf32, #tpu.memory_space<vmem>>, vector<1x32x8xf32>
    %42 = vector.shape_cast %41 : vector<1x32x8xf32> to vector<32x8xf32>
    %43 = vector.shape_cast %40 : vector<32x8xf32> to vector<1x32x8xf32>
    tpu.vector_store %arg9[%c0_31, %c0_32, %c0_33], %43 {strides = array<i32>} : memref<4x32x8xf32, #tpu.memory_space<vmem>>, vector<1x32x8xf32>,
    %c0_34 = arith.constant 0 : index
    %c0_35 = arith.constant 0 : index
    %c0_36 = arith.constant 0 : index
    %44 = vector.load %arg7[%c0_34, %c0_35, %c0_36] : memref<4x32x1xf32, #tpu.memory_space<vmem>>, vector<1x32x1xf32>
    %45 = vector.shape_cast %44 : vector<1x32x1xf32> to vector<32x1xf32>
    %46 = vector.shape_cast %19 : vector<32x1xf32> to vector<1x32x1xf32>
    tpu.vector_store %arg7[%c0_34, %c0_35, %c0_36], %46 {strides = array<i32>} : memref<4x32x1xf32, #tpu.memory_space<vmem>>, vector<1x32x1xf32>,
    %c0_37 = arith.constant 0 : index
    %c0_38 = arith.constant 0 : index
    %c0_39 = arith.constant 0 : index
    %c1 = arith.constant 1 : index
    %c0_40 = arith.constant 0 : index
    %47 = vector.load %arg3[%c0_37, %c0_38, %c0_39, %c1, %c0_40] : memref<1x32x1x4x8xf32, #tpu.memory_space<vmem>>, vector<1x32x1x1x8xf32>
    %48 = vector.shape_cast %47 : vector<1x32x1x1x8xf32> to vector<32x8xf32>
    %cst_41 = arith.constant 0.353553385 : f32
    %49 = vector.broadcast %cst_41 : f32 to vector<32x8xf32>
    %50 = arith.mulf %48, %49 : vector<32x8xf32>
    %51 = arith.truncf %50 : vector<32x8xf32> to vector<32x8xbf16>
    %c0_42 = arith.constant 0 : index
    %c0_43 = arith.constant 0 : index
    %c0_44 = arith.constant 0 : index
    %c1_45 = arith.constant 1 : index
    %c0_46 = arith.constant 0 : index
    %52 = vector.load %arg4[%c0_42, %c0_43, %c0_44, %c1_45, %c0_46] : memref<1x8x1x4x8xf32, #tpu.memory_space<vmem>>, vector<1x8x1x1x8xf32>
    %53 = vector.shape_cast %52 : vector<1x8x1x1x8xf32> to vector<8x8xf32>
    %54 = arith.truncf %53 : vector<8x8xf32> to vector<8x8xbf16>
    %c0_47 = arith.constant 0 : index
    %c0_48 = arith.constant 0 : index
    %c0_49 = arith.constant 0 : index
    %c1_50 = arith.constant 1 : index
    %c0_51 = arith.constant 0 : index
    %55 = vector.load %arg5[%c0_47, %c0_48, %c0_49, %c1_50, %c0_51] : memref<1x8x1x4x8xf32, #tpu.memory_space<vmem>>, vector<1x8x1x1x8xf32>
    %56 = vector.shape_cast %55 : vector<1x8x1x1x8xf32> to vector<8x8xf32>
    %57 = arith.truncf %56 : vector<8x8xf32> to vector<8x8xbf16>
    %cst_52 = arith.constant dense<0.000000e+00> : vector<32x8xf32>
    %58 = tpu.matmul %51, %54, %cst_52 {dimension_numbers = #tpu.dot_dimension_numbers<[1], [1], [0], [0], [0, 0, 1, 0], [], []>} : vector<32x8xbf16>, vector<8x8xbf16>, vector<32x8xf32> -> vector<32x8xf32>
    %c1_53 = arith.constant 1 : index
    %c0_54 = arith.constant 0 : index
    %c0_55 = arith.constant 0 : index
    %59 = vector.load %arg7[%c1_53, %c0_54, %c0_55] : memref<4x32x1xf32, #tpu.memory_space<vmem>>, vector<1x32x1xf32>
    %60 = vector.shape_cast %59 : vector<1x32x1xf32> to vector<32x1xf32>
    %cst_56 = arith.constant dense<0xFF800000> : vector<32xf32>
    %61 = vector.multi_reduction <maximumf>, %58, %cst_56 [1] : vector<32x8xf32> to vector<32xf32>
    %62 = vector.shape_cast %61 : vector<32xf32> to vector<32x1xf32>
    %63 = arith.maximumf %60, %62 : vector<32x1xf32>
    %64 = arith.subf %60, %63 : vector<32x1xf32>
    %65 = math.exp %64 : vector<32x1xf32>
    %66 = vector.broadcast %63 : vector<32x1xf32> to vector<32x8xf32>
    %67 = arith.subf %58, %66 : vector<32x8xf32>
    %68 = math.exp %67 : vector<32x8xf32>
    %c1_57 = arith.constant 1 : index
    %c0_58 = arith.constant 0 : index
    %c0_59 = arith.constant 0 : index
    %69 = vector.load %arg8[%c1_57, %c0_58, %c0_59] : memref<4x32x1xf32, #tpu.memory_space<vmem>>, vector<1x32x1xf32>
    %70 = vector.shape_cast %69 : vector<1x32x1xf32> to vector<32x1xf32>
    %71 = arith.mulf %65, %70 : vector<32x1xf32>
    %cst_60 = arith.constant dense<0.000000e+00> : vector<32xf32>
    %72 = vector.multi_reduction <add>, %68, %cst_60 [1] : vector<32x8xf32> to vector<32xf32>
    %73 = vector.shape_cast %72 : vector<32xf32> to vector<32x1xf32>
    %74 = arith.addf %71, %73 : vector<32x1xf32>
    %c1_61 = arith.constant 1 : index
    %c0_62 = arith.constant 0 : index
    %c0_63 = arith.constant 0 : index
    %75 = vector.load %arg8[%c1_61, %c0_62, %c0_63] : memref<4x32x1xf32, #tpu.memory_space<vmem>>, vector<1x32x1xf32>
    %76 = vector.shape_cast %75 : vector<1x32x1xf32> to vector<32x1xf32>
    %77 = vector.shape_cast %74 : vector<32x1xf32> to vector<1x32x1xf32>
    tpu.vector_store %arg8[%c1_61, %c0_62, %c0_63], %77 {strides = array<i32>} : memref<4x32x1xf32, #tpu.memory_space<vmem>>, vector<1x32x1xf32>,
    %c1_64 = arith.constant 1 : index
    %c0_65 = arith.constant 0 : index
    %c0_66 = arith.constant 0 : index
    %78 = vector.load %arg9[%c1_64, %c0_65, %c0_66] : memref<4x32x8xf32, #tpu.memory_space<vmem>>, vector<1x32x8xf32>
    %79 = vector.shape_cast %78 : vector<1x32x8xf32> to vector<32x8xf32>
    %80 = vector.broadcast %65 : vector<32x1xf32> to vector<32x8xf32>
    %81 = arith.mulf %80, %79 : vector<32x8xf32>
    %82 = arith.truncf %68 : vector<32x8xf32> to vector<32x8xbf16>
    %cst_67 = arith.constant dense<0.000000e+00> : vector<32x8xf32>
    %83 = tpu.matmul %82, %57, %cst_67 {dimension_numbers = #tpu.dot_dimension_numbers<[1], [0], [0], [1], [0, 0, 1, 1], [], []>} : vector<32x8xbf16>, vector<8x8xbf16>, vector<32x8xf32> -> vector<32x8xf32>
    %84 = arith.addf %81, %83 : vector<32x8xf32>
    %c1_68 = arith.constant 1 : index
    %c0_69 = arith.constant 0 : index
    %c0_70 = arith.constant 0 : index
    %85 = vector.load %arg9[%c1_68, %c0_69, %c0_70] : memref<4x32x8xf32, #tpu.memory_space<vmem>>, vector<1x32x8xf32>
    %86 = vector.shape_cast %85 : vector<1x32x8xf32> to vector<32x8xf32>
    %87 = vector.shape_cast %84 : vector<32x8xf32> to vector<1x32x8xf32>
    tpu.vector_store %arg9[%c1_68, %c0_69, %c0_70], %87 {strides = array<i32>} : memref<4x32x8xf32, #tpu.memory_space<vmem>>, vector<1x32x8xf32>,
    %c1_71 = arith.constant 1 : index
    %c0_72 = arith.constant 0 : index
    %c0_73 = arith.constant 0 : index
    %88 = vector.load %arg7[%c1_71, %c0_72, %c0_73] : memref<4x32x1xf32, #tpu.memory_space<vmem>>, vector<1x32x1xf32>
    %89 = vector.shape_cast %88 : vector<1x32x1xf32> to vector<32x1xf32>
    %90 = vector.shape_cast %63 : vector<32x1xf32> to vector<1x32x1xf32>
    tpu.vector_store %arg7[%c1_71, %c0_72, %c0_73], %90 {strides = array<i32>} : memref<4x32x1xf32, #tpu.memory_space<vmem>>, vector<1x32x1xf32>,
    %c0_74 = arith.constant 0 : index
    %c0_75 = arith.constant 0 : index
    %c0_76 = arith.constant 0 : index
    %c2 = arith.constant 2 : index
    %c0_77 = arith.constant 0 : index
    %91 = vector.load %arg3[%c0_74, %c0_75, %c0_76, %c2, %c0_77] : memref<1x32x1x4x8xf32, #tpu.memory_space<vmem>>, vector<1x32x1x1x8xf32>
    %92 = vector.shape_cast %91 : vector<1x32x1x1x8xf32> to vector<32x8xf32>
    %cst_78 = arith.constant 0.353553385 : f32
    %93 = vector.broadcast %cst_78 : f32 to vector<32x8xf32>
    %94 = arith.mulf %92, %93 : vector<32x8xf32>
    %95 = arith.truncf %94 : vector<32x8xf32> to vector<32x8xbf16>
    %c0_79 = arith.constant 0 : index
    %c0_80 = arith.constant 0 : index
    %c0_81 = arith.constant 0 : index
    %c2_82 = arith.constant 2 : index
    %c0_83 = arith.constant 0 : index
    %96 = vector.load %arg4[%c0_79, %c0_80, %c0_81, %c2_82, %c0_83] : memref<1x8x1x4x8xf32, #tpu.memory_space<vmem>>, vector<1x8x1x1x8xf32>
    %97 = vector.shape_cast %96 : vector<1x8x1x1x8xf32> to vector<8x8xf32>
    %98 = arith.truncf %97 : vector<8x8xf32> to vector<8x8xbf16>
    %c0_84 = arith.constant 0 : index
    %c0_85 = arith.constant 0 : index
    %c0_86 = arith.constant 0 : index
    %c2_87 = arith.constant 2 : index
    %c0_88 = arith.constant 0 : index
    %99 = vector.load %arg5[%c0_84, %c0_85, %c0_86, %c2_87, %c0_88] : memref<1x8x1x4x8xf32, #tpu.memory_space<vmem>>, vector<1x8x1x1x8xf32>
    %100 = vector.shape_cast %99 : vector<1x8x1x1x8xf32> to vector<8x8xf32>
    %101 = arith.truncf %100 : vector<8x8xf32> to vector<8x8xbf16>
    %cst_89 = arith.constant dense<0.000000e+00> : vector<32x8xf32>
    %102 = tpu.matmul %95, %98, %cst_89 {dimension_numbers = #tpu.dot_dimension_numbers<[1], [1], [0], [0], [0, 0, 1, 0], [], []>} : vector<32x8xbf16>, vector<8x8xbf16>, vector<32x8xf32> -> vector<32x8xf32>
    %c2_90 = arith.constant 2 : index
    %c0_91 = arith.constant 0 : index
    %c0_92 = arith.constant 0 : index
    %103 = vector.load %arg7[%c2_90, %c0_91, %c0_92] : memref<4x32x1xf32, #tpu.memory_space<vmem>>, vector<1x32x1xf32>
    %104 = vector.shape_cast %103 : vector<1x32x1xf32> to vector<32x1xf32>
    %cst_93 = arith.constant dense<0xFF800000> : vector<32xf32>
    %105 = vector.multi_reduction <maximumf>, %102, %cst_93 [1] : vector<32x8xf32> to vector<32xf32>
    %106 = vector.shape_cast %105 : vector<32xf32> to vector<32x1xf32>
    %107 = arith.maximumf %104, %106 : vector<32x1xf32>
    %108 = arith.subf %104, %107 : vector<32x1xf32>
    %109 = math.exp %108 : vector<32x1xf32>
    %110 = vector.broadcast %107 : vector<32x1xf32> to vector<32x8xf32>
    %111 = arith.subf %102, %110 : vector<32x8xf32>
    %112 = math.exp %111 : vector<32x8xf32>
    %c2_94 = arith.constant 2 : index
    %c0_95 = arith.constant 0 : index
    %c0_96 = arith.constant 0 : index
    %113 = vector.load %arg8[%c2_94, %c0_95, %c0_96] : memref<4x32x1xf32, #tpu.memory_space<vmem>>, vector<1x32x1xf32>
    %114 = vector.shape_cast %113 : vector<1x32x1xf32> to vector<32x1xf32>
    %115 = arith.mulf %109, %114 : vector<32x1xf32>
    %cst_97 = arith.constant dense<0.000000e+00> : vector<32xf32>
    %116 = vector.multi_reduction <add>, %112, %cst_97 [1] : vector<32x8xf32> to vector<32xf32>
    %117 = vector.shape_cast %116 : vector<32xf32> to vector<32x1xf32>
    %118 = arith.addf %115, %117 : vector<32x1xf32>
    %c2_98 = arith.constant 2 : index
    %c0_99 = arith.constant 0 : index
    %c0_100 = arith.constant 0 : index
    %119 = vector.load %arg8[%c2_98, %c0_99, %c0_100] : memref<4x32x1xf32, #tpu.memory_space<vmem>>, vector<1x32x1xf32>
    %120 = vector.shape_cast %119 : vector<1x32x1xf32> to vector<32x1xf32>
    %121 = vector.shape_cast %118 : vector<32x1xf32> to vector<1x32x1xf32>
    tpu.vector_store %arg8[%c2_98, %c0_99, %c0_100], %121 {strides = array<i32>} : memref<4x32x1xf32, #tpu.memory_space<vmem>>, vector<1x32x1xf32>,
    %c2_101 = arith.constant 2 : index
    %c0_102 = arith.constant 0 : index
    %c0_103 = arith.constant 0 : index
    %122 = vector.load %arg9[%c2_101, %c0_102, %c0_103] : memref<4x32x8xf32, #tpu.memory_space<vmem>>, vector<1x32x8xf32>
    %123 = vector.shape_cast %122 : vector<1x32x8xf32> to vector<32x8xf32>
    %124 = vector.broadcast %109 : vector<32x1xf32> to vector<32x8xf32>
    %125 = arith.mulf %124, %123 : vector<32x8xf32>
    %126 = arith.truncf %112 : vector<32x8xf32> to vector<32x8xbf16>
    %cst_104 = arith.constant dense<0.000000e+00> : vector<32x8xf32>
    %127 = tpu.matmul %126, %101, %cst_104 {dimension_numbers = #tpu.dot_dimension_numbers<[1], [0], [0], [1], [0, 0, 1, 1], [], []>} : vector<32x8xbf16>, vector<8x8xbf16>, vector<32x8xf32> -> vector<32x8xf32>
    %128 = arith.addf %125, %127 : vector<32x8xf32>
    %c2_105 = arith.constant 2 : index
    %c0_106 = arith.constant 0 : index
    %c0_107 = arith.constant 0 : index
    %129 = vector.load %arg9[%c2_105, %c0_106, %c0_107] : memref<4x32x8xf32, #tpu.memory_space<vmem>>, vector<1x32x8xf32>
    %130 = vector.shape_cast %129 : vector<1x32x8xf32> to vector<32x8xf32>
    %131 = vector.shape_cast %128 : vector<32x8xf32> to vector<1x32x8xf32>
    tpu.vector_store %arg9[%c2_105, %c0_106, %c0_107], %131 {strides = array<i32>} : memref<4x32x8xf32, #tpu.memory_space<vmem>>, vector<1x32x8xf32>,
    %c2_108 = arith.constant 2 : index
    %c0_109 = arith.constant 0 : index
    %c0_110 = arith.constant 0 : index
    %132 = vector.load %arg7[%c2_108, %c0_109, %c0_110] : memref<4x32x1xf32, #tpu.memory_space<vmem>>, vector<1x32x1xf32>
    %133 = vector.shape_cast %132 : vector<1x32x1xf32> to vector<32x1xf32>
    %134 = vector.shape_cast %107 : vector<32x1xf32> to vector<1x32x1xf32>
    tpu.vector_store %arg7[%c2_108, %c0_109, %c0_110], %134 {strides = array<i32>} : memref<4x32x1xf32, #tpu.memory_space<vmem>>, vector<1x32x1xf32>,
    %c0_111 = arith.constant 0 : index
    %c0_112 = arith.constant 0 : index
    %c0_113 = arith.constant 0 : index
    %c3 = arith.constant 3 : index
    %c0_114 = arith.constant 0 : index
    %135 = vector.load %arg3[%c0_111, %c0_112, %c0_113, %c3, %c0_114] : memref<1x32x1x4x8xf32, #tpu.memory_space<vmem>>, vector<1x32x1x1x8xf32>
    %136 = vector.shape_cast %135 : vector<1x32x1x1x8xf32> to vector<32x8xf32>
    %cst_115 = arith.constant 0.353553385 : f32
    %137 = vector.broadcast %cst_115 : f32 to vector<32x8xf32>
    %138 = arith.mulf %136, %137 : vector<32x8xf32>
    %139 = arith.truncf %138 : vector<32x8xf32> to vector<32x8xbf16>
    %c0_116 = arith.constant 0 : index
    %c0_117 = arith.constant 0 : index
    %c0_118 = arith.constant 0 : index
    %c3_119 = arith.constant 3 : index
    %c0_120 = arith.constant 0 : index
    %140 = vector.load %arg4[%c0_116, %c0_117, %c0_118, %c3_119, %c0_120] : memref<1x8x1x4x8xf32, #tpu.memory_space<vmem>>, vector<1x8x1x1x8xf32>
    %141 = vector.shape_cast %140 : vector<1x8x1x1x8xf32> to vector<8x8xf32>
    %142 = arith.truncf %141 : vector<8x8xf32> to vector<8x8xbf16>
    %c0_121 = arith.constant 0 : index
    %c0_122 = arith.constant 0 : index
    %c0_123 = arith.constant 0 : index
    %c3_124 = arith.constant 3 : index
    %c0_125 = arith.constant 0 : index
    %143 = vector.load %arg5[%c0_121, %c0_122, %c0_123, %c3_124, %c0_125] : memref<1x8x1x4x8xf32, #tpu.memory_space<vmem>>, vector<1x8x1x1x8xf32>
    %144 = vector.shape_cast %143 : vector<1x8x1x1x8xf32> to vector<8x8xf32>
    %145 = arith.truncf %144 : vector<8x8xf32> to vector<8x8xbf16>
    %cst_126 = arith.constant dense<0.000000e+00> : vector<32x8xf32>
    %146 = tpu.matmul %139, %142, %cst_126 {dimension_numbers = #tpu.dot_dimension_numbers<[1], [1], [0], [0], [0, 0, 1, 0], [], []>} : vector<32x8xbf16>, vector<8x8xbf16>, vector<32x8xf32> -> vector<32x8xf32>
    %c3_127 = arith.constant 3 : index
    %c0_128 = arith.constant 0 : index
    %c0_129 = arith.constant 0 : index
    %147 = vector.load %arg7[%c3_127, %c0_128, %c0_129] : memref<4x32x1xf32, #tpu.memory_space<vmem>>, vector<1x32x1xf32>
    %148 = vector.shape_cast %147 : vector<1x32x1xf32> to vector<32x1xf32>
    %cst_130 = arith.constant dense<0xFF800000> : vector<32xf32>
    %149 = vector.multi_reduction <maximumf>, %146, %cst_130 [1] : vector<32x8xf32> to vector<32xf32>
    %150 = vector.shape_cast %149 : vector<32xf32> to vector<32x1xf32>
    %151 = arith.maximumf %148, %150 : vector<32x1xf32>
    %152 = arith.subf %148, %151 : vector<32x1xf32>
    %153 = math.exp %152 : vector<32x1xf32>
    %154 = vector.broadcast %151 : vector<32x1xf32> to vector<32x8xf32>
    %155 = arith.subf %146, %154 : vector<32x8xf32>
    %156 = math.exp %155 : vector<32x8xf32>
    %c3_131 = arith.constant 3 : index
    %c0_132 = arith.constant 0 : index
    %c0_133 = arith.constant 0 : index
    %157 = vector.load %arg8[%c3_131, %c0_132, %c0_133] : memref<4x32x1xf32, #tpu.memory_space<vmem>>, vector<1x32x1xf32>
    %158 = vector.shape_cast %157 : vector<1x32x1xf32> to vector<32x1xf32>
    %159 = arith.mulf %153, %158 : vector<32x1xf32>
    %cst_134 = arith.constant dense<0.000000e+00> : vector<32xf32>
    %160 = vector.multi_reduction <add>, %156, %cst_134 [1] : vector<32x8xf32> to vector<32xf32>
    %161 = vector.shape_cast %160 : vector<32xf32> to vector<32x1xf32>
    %162 = arith.addf %159, %161 : vector<32x1xf32>
    %c3_135 = arith.constant 3 : index
    %c0_136 = arith.constant 0 : index
    %c0_137 = arith.constant 0 : index
    %163 = vector.load %arg8[%c3_135, %c0_136, %c0_137] : memref<4x32x1xf32, #tpu.memory_space<vmem>>, vector<1x32x1xf32>
    %164 = vector.shape_cast %163 : vector<1x32x1xf32> to vector<32x1xf32>
    %165 = vector.shape_cast %162 : vector<32x1xf32> to vector<1x32x1xf32>
    tpu.vector_store %arg8[%c3_135, %c0_136, %c0_137], %165 {strides = array<i32>} : memref<4x32x1xf32, #tpu.memory_space<vmem>>, vector<1x32x1xf32>,
    %c3_138 = arith.constant 3 : index
    %c0_139 = arith.constant 0 : index
    %c0_140 = arith.constant 0 : index
    %166 = vector.load %arg9[%c3_138, %c0_139, %c0_140] : memref<4x32x8xf32, #tpu.memory_space<vmem>>, vector<1x32x8xf32>
    %167 = vector.shape_cast %166 : vector<1x32x8xf32> to vector<32x8xf32>
    %168 = vector.broadcast %153 : vector<32x1xf32> to vector<32x8xf32>
    %169 = arith.mulf %168, %167 : vector<32x8xf32>
    %170 = arith.truncf %156 : vector<32x8xf32> to vector<32x8xbf16>
    %cst_141 = arith.constant dense<0.000000e+00> : vector<32x8xf32>
    %171 = tpu.matmul %170, %145, %cst_141 {dimension_numbers = #tpu.dot_dimension_numbers<[1], [0], [0], [1], [0, 0, 1, 1], [], []>} : vector<32x8xbf16>, vector<8x8xbf16>, vector<32x8xf32> -> vector<32x8xf32>
    %172 = arith.addf %169, %171 : vector<32x8xf32>
    %c3_142 = arith.constant 3 : index
    %c0_143 = arith.constant 0 : index
    %c0_144 = arith.constant 0 : index
    %173 = vector.load %arg9[%c3_142, %c0_143, %c0_144] : memref<4x32x8xf32, #tpu.memory_space<vmem>>, vector<1x32x8xf32>
    %174 = vector.shape_cast %173 : vector<1x32x8xf32> to vector<32x8xf32>
    %175 = vector.shape_cast %172 : vector<32x8xf32> to vector<1x32x8xf32>
    tpu.vector_store %arg9[%c3_142, %c0_143, %c0_144], %175 {strides = array<i32>} : memref<4x32x8xf32, #tpu.memory_space<vmem>>, vector<1x32x8xf32>,
    %c3_145 = arith.constant 3 : index
    %c0_146 = arith.constant 0 : index
    %c0_147 = arith.constant 0 : index
    %176 = vector.load %arg7[%c3_145, %c0_146, %c0_147] : memref<4x32x1xf32, #tpu.memory_space<vmem>>, vector<1x32x1xf32>
    %177 = vector.shape_cast %176 : vector<1x32x1xf32> to vector<32x1xf32>
    %178 = vector.shape_cast %151 : vector<32x1xf32> to vector<1x32x1xf32>
    tpu.vector_store %arg7[%c3_145, %c0_146, %c0_147], %178 {strides = array<i32>} : memref<4x32x1xf32, #tpu.memory_space<vmem>>, vector<1x32x1xf32>,
    %c0_i32_148 = arith.constant 0 : i32
    %179 = arith.cmpi eq, %arg2, %c0_i32_148 : i32
    %180 = arith.extui %179 : i1 to i32
    %c0_i32_149 = arith.constant 0 : i32
    %181 = arith.cmpi ne, %180, %c0_i32_149 : i32
    scf.if %181 {
      %c0_150 = arith.constant 0 : index
      %c0_151 = arith.constant 0 : index
      %c0_152 = arith.constant 0 : index
      %182 = vector.load %arg9[%c0_150, %c0_151, %c0_152] : memref<4x32x8xf32, #tpu.memory_space<vmem>>, vector<1x32x8xf32>
      %183 = vector.shape_cast %182 : vector<1x32x8xf32> to vector<32x8xf32>
      %c0_153 = arith.constant 0 : index
      %c0_154 = arith.constant 0 : index
      %c0_155 = arith.constant 0 : index
      %184 = vector.load %arg8[%c0_153, %c0_154, %c0_155] : memref<4x32x1xf32, #tpu.memory_space<vmem>>, vector<1x32x1xf32>
      %185 = vector.shape_cast %184 : vector<1x32x1xf32> to vector<32x1xf32>
      %186 = tpu.reciprocal %185 {approx = true} : vector<32x1xf32> -> vector<32x1xf32>
      %187 = vector.broadcast %186 : vector<32x1xf32> to vector<32x8xf32>
      %188 = arith.mulf %183, %187 : vector<32x8xf32>
      %c1_156 = arith.constant 1 : index
      %c0_157 = arith.constant 0 : index
      %c0_158 = arith.constant 0 : index
      %189 = vector.load %arg9[%c1_156, %c0_157, %c0_158] : memref<4x32x8xf32, #tpu.memory_space<vmem>>, vector<1x32x8xf32>
      %190 = vector.shape_cast %189 : vector<1x32x8xf32> to vector<32x8xf32>
      %c1_159 = arith.constant 1 : index
      %c0_160 = arith.constant 0 : index
      %c0_161 = arith.constant 0 : index
      %191 = vector.load %arg8[%c1_159, %c0_160, %c0_161] : memref<4x32x1xf32, #tpu.memory_space<vmem>>, vector<1x32x1xf32>
      %192 = vector.shape_cast %191 : vector<1x32x1xf32> to vector<32x1xf32>
      %193 = tpu.reciprocal %192 {approx = true} : vector<32x1xf32> -> vector<32x1xf32>
      %194 = vector.broadcast %193 : vector<32x1xf32> to vector<32x8xf32>
      %195 = arith.mulf %190, %194 : vector<32x8xf32>
      %c2_162 = arith.constant 2 : index
      %c0_163 = arith.constant 0 : index
      %c0_164 = arith.constant 0 : index
      %196 = vector.load %arg9[%c2_162, %c0_163, %c0_164] : memref<4x32x8xf32, #tpu.memory_space<vmem>>, vector<1x32x8xf32>
      %197 = vector.shape_cast %196 : vector<1x32x8xf32> to vector<32x8xf32>
      %c2_165 = arith.constant 2 : index
      %c0_166 = arith.constant 0 : index
      %c0_167 = arith.constant 0 : index
      %198 = vector.load %arg8[%c2_165, %c0_166, %c0_167] : memref<4x32x1xf32, #tpu.memory_space<vmem>>, vector<1x32x1xf32>
      %199 = vector.shape_cast %198 : vector<1x32x1xf32> to vector<32x1xf32>
      %200 = tpu.reciprocal %199 {approx = true} : vector<32x1xf32> -> vector<32x1xf32>
      %201 = vector.broadcast %200 : vector<32x1xf32> to vector<32x8xf32>
      %202 = arith.mulf %197, %201 : vector<32x8xf32>
      %c3_168 = arith.constant 3 : index
      %c0_169 = arith.constant 0 : index
      %c0_170 = arith.constant 0 : index
      %203 = vector.load %arg9[%c3_168, %c0_169, %c0_170] : memref<4x32x8xf32, #tpu.memory_space<vmem>>, vector<1x32x8xf32>
      %204 = vector.shape_cast %203 : vector<1x32x8xf32> to vector<32x8xf32>
      %c3_171 = arith.constant 3 : index
      %c0_172 = arith.constant 0 : index
      %c0_173 = arith.constant 0 : index
      %205 = vector.load %arg8[%c3_171, %c0_172, %c0_173] : memref<4x32x1xf32, #tpu.memory_space<vmem>>, vector<1x32x1xf32>
      %206 = vector.shape_cast %205 : vector<1x32x1xf32> to vector<32x1xf32>
      %207 = tpu.reciprocal %206 {approx = true} : vector<32x1xf32> -> vector<32x1xf32>
      %208 = vector.broadcast %207 : vector<32x1xf32> to vector<32x8xf32>
      %209 = arith.mulf %204, %208 : vector<32x8xf32>
      %210 = tpu.concatenate %188, %195, %202, %209 in 1 : vector<32x8xf32>, vector<32x8xf32>, vector<32x8xf32>, vector<32x8xf32> -> vector<32x32xf32>
      %c0_174 = arith.constant 0 : index
      %c0_175 = arith.constant 0 : index
      %c0_176 = arith.constant 0 : index
      %211 = vector.load %arg6[%c0_174, %c0_175, %c0_176] : memref<1x32x32xf32, #tpu.memory_space<vmem>>, vector<1x32x32xf32>
      %212 = vector.shape_cast %211 : vector<1x32x32xf32> to vector<32x32xf32>
      %213 = vector.shape_cast %210 : vector<32x32xf32> to vector<1x32x32xf32>
      tpu.vector_store %arg6[%c0_174, %c0_175, %c0_176], %213 {strides = array<i32>} : memref<1x32x32xf32, #tpu.memory_space<vmem>>, vector<1x32x32xf32>,
    } else {
    }
    return
  }
  func.func @transform_0(%arg0: i32, %arg1: i32, %arg2: i32) -> (i32, i32, i32, i32, i32) {
    %c0_i32 = arith.constant 0 : i32
    %c0_i32_0 = arith.constant 0 : i32
    %c0_i32_1 = arith.constant 0 : i32
    %c0_i32_2 = arith.constant 0 : i32
    return %arg0, %arg1, %c0_i32, %c0_i32_0, %c0_i32_1 : i32, i32, i32, i32, i32
  }
  func.func @transform_1(%arg0: i32, %arg1: i32, %arg2: i32) -> (i32, i32, i32, i32, i32) {
    %c0_i32 = arith.constant 0 : i32
    %c0_i32_0 = arith.constant 0 : i32
    %c0_i32_1 = arith.constant 0 : i32
    %c0_i32_2 = arith.constant 0 : i32
    return %arg0, %arg2, %c0_i32, %c0_i32_0, %c0_i32_1 : i32, i32, i32, i32, i32
  }
  func.func @transform_2(%arg0: i32, %arg1: i32, %arg2: i32) -> (i32, i32, i32, i32, i32) {
    %c1_i32 = arith.constant 1 : i32
    %c0_i32 = arith.constant 0 : i32
    %c0_i32_0 = arith.constant 0 : i32
    %c0_i32_1 = arith.constant 0 : i32
    return %arg0, %arg2, %c1_i32, %c0_i32, %c0_i32_0 : i32, i32, i32, i32, i32
  }
  func.func @transform_3(%arg0: i32, %arg1: i32, %arg2: i32) -> (i32, i32, i32) {
    %c0_i32 = arith.constant 0 : i32
    %c0_i32_0 = arith.constant 0 : i32
    return %arg0, %arg1, %c0_i32 : i32, i32, i32
  }
}

module attributes {stable_mosaic.version = 11 : i64} {
  func.func @_linear_res_kernel(%arg0: i32, %arg1: i32, %arg2: i32, %arg3: memref<1x32x32xf32, #tpu.memory_space<vmem>>, %arg4: memref<32x32xbf16, #tpu.memory_space<vmem>>, %arg5: memref<1x32xf32, #tpu.memory_space<vmem>>, %arg6: memref<1x32x32xf32, #tpu.memory_space<vmem>>, %arg7: memref<1x32x32xf32, #tpu.memory_space<vmem>>) attributes {dimension_semantics = [#tpu.dimension_semantics<parallel>, #tpu.dimension_semantics<parallel>, #tpu.dimension_semantics<parallel>], iteration_bounds = array<i64: 2, 1, 1>, scalar_prefetch = 0 : i64, scratch_operands = 0 : i64, tpu.core_type = #tpu.core_type<tc>, window_params = [{transform_indices = @transform_0, window_bounds = array<i64: 1, 32, 32>}, {transform_indices = @transform_1, window_bounds = array<i64: 32, 32>}, {transform_indices = @transform_2, window_bounds = array<i64: 1, 32>}, {transform_indices = @transform_3, window_bounds = array<i64: 1, 32, 32>}, {transform_indices = @transform_4, window_bounds = array<i64: 1, 32, 32>}]} {
    %c0 = arith.constant 0 : index
    %c0_0 = arith.constant 0 : index
    %c0_1 = arith.constant 0 : index
    %0 = vector.load %arg3[%c0, %c0_0, %c0_1] : memref<1x32x32xf32, #tpu.memory_space<vmem>>, vector<1x32x32xf32>
    %1 = vector.shape_cast %0 : vector<1x32x32xf32> to vector<32x32xf32>
    %2 = arith.truncf %1 : vector<32x32xf32> to vector<32x32xbf16>
    %c0_2 = arith.constant 0 : index
    %c0_3 = arith.constant 0 : index
    %3 = vector.load %arg4[%c0_2, %c0_3] : memref<32x32xbf16, #tpu.memory_space<vmem>>, vector<32x32xbf16>
    %cst = arith.constant dense<0.000000e+00> : vector<32x32xf32>
    %4 = tpu.matmul %2, %3, %cst {dimension_numbers = #tpu.dot_dimension_numbers<[1], [0], [0], [1], [0, 0, 1, 1], [], []>} : vector<32x32xbf16>, vector<32x32xbf16>, vector<32x32xf32> -> vector<32x32xf32>
    %c0_4 = arith.constant 0 : index
    %c0_5 = arith.constant 0 : index
    %5 = vector.load %arg5[%c0_4, %c0_5] : memref<1x32xf32, #tpu.memory_space<vmem>>, vector<1x32xf32>
    %6 = vector.broadcast %5 : vector<1x32xf32> to vector<32x32xf32>
    %7 = arith.addf %4, %6 : vector<32x32xf32>
    %c0_6 = arith.constant 0 : index
    %c0_7 = arith.constant 0 : index
    %c0_8 = arith.constant 0 : index
    %8 = vector.load %arg6[%c0_6, %c0_7, %c0_8] : memref<1x32x32xf32, #tpu.memory_space<vmem>>, vector<1x32x32xf32>
    %9 = vector.shape_cast %8 : vector<1x32x32xf32> to vector<32x32xf32>
    %10 = arith.addf %9, %7 : vector<32x32xf32>
    %c0_9 = arith.constant 0 : index
    %c0_10 = arith.constant 0 : index
    %c0_11 = arith.constant 0 : index
    %11 = vector.load %arg7[%c0_9, %c0_10, %c0_11] : memref<1x32x32xf32, #tpu.memory_space<vmem>>, vector<1x32x32xf32>
    %12 = vector.shape_cast %11 : vector<1x32x32xf32> to vector<32x32xf32>
    %13 = vector.shape_cast %10 : vector<32x32xf32> to vector<1x32x32xf32>
    tpu.vector_store %arg7[%c0_9, %c0_10, %c0_11], %13 {strides = array<i32>} : memref<1x32x32xf32, #tpu.memory_space<vmem>>, vector<1x32x32xf32>,
    return
  }
  func.func @transform_0(%arg0: i32, %arg1: i32, %arg2: i32) -> (i32, i32, i32) {
    %c0_i32 = arith.constant 0 : i32
    %c0_i32_0 = arith.constant 0 : i32
    return %arg0, %arg1, %c0_i32 : i32, i32, i32
  }
  func.func @transform_1(%arg0: i32, %arg1: i32, %arg2: i32) -> (i32, i32) {
    %c0_i32 = arith.constant 0 : i32
    %c0_i32_0 = arith.constant 0 : i32
    return %c0_i32, %arg2 : i32, i32
  }
  func.func @transform_2(%arg0: i32, %arg1: i32, %arg2: i32) -> (i32, i32) {
    %c0_i32 = arith.constant 0 : i32
    %c0_i32_0 = arith.constant 0 : i32
    return %c0_i32, %arg2 : i32, i32
  }
  func.func @transform_3(%arg0: i32, %arg1: i32, %arg2: i32) -> (i32, i32, i32) {
    %c0_i32 = arith.constant 0 : i32
    return %arg0, %arg1, %arg2 : i32, i32, i32
  }
  func.func @transform_4(%arg0: i32, %arg1: i32, %arg2: i32) -> (i32, i32, i32) {
    %c0_i32 = arith.constant 0 : i32
    return %arg0, %arg1, %arg2 : i32, i32, i32
  }
}

module attributes {stable_mosaic.version = 11 : i64} {
  func.func @_ln_mod_linear_kernel(%arg0: i32, %arg1: i32, %arg2: i32, %arg3: memref<1x32x32xf32, #tpu.memory_space<vmem>>, %arg4: memref<1x1x32xf32, #tpu.memory_space<vmem>>, %arg5: memref<1x1x32xf32, #tpu.memory_space<vmem>>, %arg6: memref<32x128xbf16, #tpu.memory_space<vmem>>, %arg7: memref<1x128xf32, #tpu.memory_space<vmem>>, %arg8: memref<1x32x128xf32, #tpu.memory_space<vmem>>, %arg9: memref<32x32xbf16, #tpu.memory_space<vmem>>) attributes {dimension_semantics = [#tpu.dimension_semantics<parallel>, #tpu.dimension_semantics<parallel>, #tpu.dimension_semantics<arbitrary>], iteration_bounds = array<i64: 2, 1, 1>, scalar_prefetch = 0 : i64, scratch_operands = 1 : i64, tpu.core_type = #tpu.core_type<tc>, window_params = [{transform_indices = @transform_0, window_bounds = array<i64: 1, 32, 32>}, {transform_indices = @transform_1, window_bounds = array<i64: 1, 1, 32>}, {transform_indices = @transform_2, window_bounds = array<i64: 1, 1, 32>}, {transform_indices = @transform_3, window_bounds = array<i64: 32, 128>}, {transform_indices = @transform_4, window_bounds = array<i64: 1, 128>}, {transform_indices = @transform_5, window_bounds = array<i64: 1, 32, 128>}]} {
    %c0_i32 = arith.constant 0 : i32
    %0 = arith.cmpi eq, %arg2, %c0_i32 : i32
    %1 = arith.extui %0 : i1 to i32
    %c0_i32_0 = arith.constant 0 : i32
    %2 = arith.cmpi ne, %1, %c0_i32_0 : i32
    scf.if %2 {
      %c0_13 = arith.constant 0 : index
      %c0_14 = arith.constant 0 : index
      %c0_15 = arith.constant 0 : index
      %25 = vector.load %arg3[%c0_13, %c0_14, %c0_15] : memref<1x32x32xf32, #tpu.memory_space<vmem>>, vector<1x32x32xf32>
      %26 = vector.shape_cast %25 : vector<1x32x32xf32> to vector<32x32xf32>
      %cst_16 = arith.constant dense<0.000000e+00> : vector<32xf32>
      %27 = vector.multi_reduction <add>, %26, %cst_16 [1] : vector<32x32xf32> to vector<32xf32>
      %28 = vector.shape_cast %27 : vector<32xf32> to vector<32x1xf32>
      %cst_17 = arith.constant 3.200000e+01 : f32
      %29 = vector.broadcast %cst_17 : f32 to vector<32x1xf32>
      %30 = arith.divf %28, %29 : vector<32x1xf32>
      %31 = vector.broadcast %30 : vector<32x1xf32> to vector<32x32xf32>
      %32 = arith.subf %26, %31 : vector<32x32xf32>
      %33 = arith.mulf %32, %32 : vector<32x32xf32>
      %cst_18 = arith.constant dense<0.000000e+00> : vector<32xf32>
      %34 = vector.multi_reduction <add>, %33, %cst_18 [1] : vector<32x32xf32> to vector<32xf32>
      %35 = vector.shape_cast %34 : vector<32xf32> to vector<32x1xf32>
      %cst_19 = arith.constant 3.200000e+01 : f32
      %36 = vector.broadcast %cst_19 : f32 to vector<32x1xf32>
      %37 = arith.divf %35, %36 : vector<32x1xf32>
      %38 = vector.broadcast %30 : vector<32x1xf32> to vector<32x32xf32>
      %39 = arith.subf %26, %38 : vector<32x32xf32>
      %cst_20 = arith.constant 9.99999997E-7 : f32
      %40 = vector.broadcast %cst_20 : f32 to vector<32x1xf32>
      %41 = arith.addf %37, %40 : vector<32x1xf32>
      %42 = math.rsqrt %41 : vector<32x1xf32>
      %43 = vector.broadcast %42 : vector<32x1xf32> to vector<32x32xf32>
      %44 = arith.mulf %39, %43 : vector<32x32xf32>
      %c0_21 = arith.constant 0 : index
      %c0_22 = arith.constant 0 : index
      %c0_23 = arith.constant 0 : index
      %45 = vector.load %arg5[%c0_21, %c0_22, %c0_23] : memref<1x1x32xf32, #tpu.memory_space<vmem>>, vector<1x1x32xf32>
      %46 = vector.shape_cast %45 : vector<1x1x32xf32> to vector<1x32xf32>
      %cst_24 = arith.constant 1.000000e+00 : f32
      %47 = vector.broadcast %cst_24 : f32 to vector<1x32xf32>
      %48 = arith.addf %47, %46 : vector<1x32xf32>
      %49 = vector.broadcast %48 : vector<1x32xf32> to vector<32x32xf32>
      %50 = arith.mulf %44, %49 : vector<32x32xf32>
      %c0_25 = arith.constant 0 : index
      %c0_26 = arith.constant 0 : index
      %c0_27 = arith.constant 0 : index
      %51 = vector.load %arg4[%c0_25, %c0_26, %c0_27] : memref<1x1x32xf32, #tpu.memory_space<vmem>>, vector<1x1x32xf32>
      %52 = vector.shape_cast %51 : vector<1x1x32xf32> to vector<1x32xf32>
      %53 = vector.broadcast %52 : vector<1x32xf32> to vector<32x32xf32>
      %54 = arith.addf %50, %53 : vector<32x32xf32>
      %55 = arith.truncf %54 : vector<32x32xf32> to vector<32x32xbf16>
      %c0_28 = arith.constant 0 : index
      %c0_29 = arith.constant 0 : index
      %56 = vector.load %arg9[%c0_28, %c0_29] : memref<32x32xbf16, #tpu.memory_space<vmem>>, vector<32x32xbf16>
      tpu.vector_store %arg9[%c0_28, %c0_29], %55 {strides = array<i32>} : memref<32x32xbf16, #tpu.memory_space<vmem>>, vector<32x32xbf16>,
    } else {
    }
    %c0 = arith.constant 0 : index
    %c0_1 = arith.constant 0 : index
    %3 = vector.load %arg9[%c0, %c0_1] : memref<32x32xbf16, #tpu.memory_space<vmem>>, vector<32x32xbf16>
    %c0_2 = arith.constant 0 : index
    %c0_3 = arith.constant 0 : index
    %4 = vector.load %arg6[%c0_2, %c0_3] : memref<32x128xbf16, #tpu.memory_space<vmem>>, vector<32x128xbf16>
    %cst = arith.constant dense<0.000000e+00> : vector<32x128xf32>
    %5 = tpu.matmul %3, %4, %cst {dimension_numbers = #tpu.dot_dimension_numbers<[1], [0], [0], [1], [0, 0, 1, 1], [], []>} : vector<32x32xbf16>, vector<32x128xbf16>, vector<32x128xf32> -> vector<32x128xf32>
    %c0_4 = arith.constant 0 : index
    %c0_5 = arith.constant 0 : index
    %6 = vector.load %arg7[%c0_4, %c0_5] : memref<1x128xf32, #tpu.memory_space<vmem>>, vector<1x128xf32>
    %7 = vector.broadcast %6 : vector<1x128xf32> to vector<32x128xf32>
    %8 = arith.addf %5, %7 : vector<32x128xf32>
    %cst_6 = arith.constant 5.000000e-01 : f32
    %9 = vector.broadcast %cst_6 : f32 to vector<32x128xf32>
    %10 = arith.mulf %9, %8 : vector<32x128xf32>
    %cst_7 = arith.constant 4.471500e-02 : f32
    %11 = vector.broadcast %cst_7 : f32 to vector<32x128xf32>
    %12 = arith.mulf %11, %8 : vector<32x128xf32>
    %13 = arith.mulf %12, %8 : vector<32x128xf32>
    %14 = arith.mulf %13, %8 : vector<32x128xf32>
    %15 = arith.addf %8, %14 : vector<32x128xf32>
    %cst_8 = arith.constant 0.797884583 : f32
    %16 = vector.broadcast %cst_8 : f32 to vector<32x128xf32>
    %17 = arith.mulf %16, %15 : vector<32x128xf32>
    %18 = math.tanh %17 : vector<32x128xf32>
    %cst_9 = arith.constant 1.000000e+00 : f32
    %19 = vector.broadcast %cst_9 : f32 to vector<32x128xf32>
    %20 = arith.addf %19, %18 : vector<32x128xf32>
    %21 = arith.mulf %10, %20 : vector<32x128xf32>
    %c0_10 = arith.constant 0 : index
    %c0_11 = arith.constant 0 : index
    %c0_12 = arith.constant 0 : index
    %22 = vector.load %arg8[%c0_10, %c0_11, %c0_12] : memref<1x32x128xf32, #tpu.memory_space<vmem>>, vector<1x32x128xf32>
    %23 = vector.shape_cast %22 : vector<1x32x128xf32> to vector<32x128xf32>
    %24 = vector.shape_cast %21 : vector<32x128xf32> to vector<1x32x128xf32>
    tpu.vector_store %arg8[%c0_10, %c0_11, %c0_12], %24 {strides = array<i32>} : memref<1x32x128xf32, #tpu.memory_space<vmem>>, vector<1x32x128xf32>,
    return
  }
  func.func @transform_0(%arg0: i32, %arg1: i32, %arg2: i32) -> (i32, i32, i32) {
    %c0_i32 = arith.constant 0 : i32
    %c0_i32_0 = arith.constant 0 : i32
    return %arg0, %arg1, %c0_i32 : i32, i32, i32
  }
  func.func @transform_1(%arg0: i32, %arg1: i32, %arg2: i32) -> (i32, i32, i32) {
    %c0_i32 = arith.constant 0 : i32
    %c0_i32_0 = arith.constant 0 : i32
    %c0_i32_1 = arith.constant 0 : i32
    return %arg0, %c0_i32, %c0_i32_0 : i32, i32, i32
  }
  func.func @transform_2(%arg0: i32, %arg1: i32, %arg2: i32) -> (i32, i32, i32) {
    %c0_i32 = arith.constant 0 : i32
    %c0_i32_0 = arith.constant 0 : i32
    %c0_i32_1 = arith.constant 0 : i32
    return %arg0, %c0_i32, %c0_i32_0 : i32, i32, i32
  }
  func.func @transform_3(%arg0: i32, %arg1: i32, %arg2: i32) -> (i32, i32) {
    %c0_i32 = arith.constant 0 : i32
    %c0_i32_0 = arith.constant 0 : i32
    return %c0_i32, %arg2 : i32, i32
  }
  func.func @transform_4(%arg0: i32, %arg1: i32, %arg2: i32) -> (i32, i32) {
    %c0_i32 = arith.constant 0 : i32
    %c0_i32_0 = arith.constant 0 : i32
    return %c0_i32, %arg2 : i32, i32
  }
  func.func @transform_5(%arg0: i32, %arg1: i32, %arg2: i32) -> (i32, i32, i32) {
    %c0_i32 = arith.constant 0 : i32
    return %arg0, %arg1, %arg2 : i32, i32, i32
  }
}

module attributes {stable_mosaic.version = 11 : i64} {
  func.func @_linear_gate_res_kernel(%arg0: i32, %arg1: i32, %arg2: i32, %arg3: memref<1x32x128xf32, #tpu.memory_space<vmem>>, %arg4: memref<128x32xbf16, #tpu.memory_space<vmem>>, %arg5: memref<1x32xf32, #tpu.memory_space<vmem>>, %arg6: memref<1x1x32xf32, #tpu.memory_space<vmem>>, %arg7: memref<1x32x32xf32, #tpu.memory_space<vmem>>, %arg8: memref<1x32x32xf32, #tpu.memory_space<vmem>>) attributes {dimension_semantics = [#tpu.dimension_semantics<parallel>, #tpu.dimension_semantics<parallel>, #tpu.dimension_semantics<parallel>], iteration_bounds = array<i64: 2, 1, 1>, scalar_prefetch = 0 : i64, scratch_operands = 0 : i64, tpu.core_type = #tpu.core_type<tc>, window_params = [{transform_indices = @transform_0, window_bounds = array<i64: 1, 32, 128>}, {transform_indices = @transform_1, window_bounds = array<i64: 128, 32>}, {transform_indices = @transform_2, window_bounds = array<i64: 1, 32>}, {transform_indices = @transform_3, window_bounds = array<i64: 1, 1, 32>}, {transform_indices = @transform_4, window_bounds = array<i64: 1, 32, 32>}, {transform_indices = @transform_5, window_bounds = array<i64: 1, 32, 32>}]} {
    %c0 = arith.constant 0 : index
    %c0_0 = arith.constant 0 : index
    %c0_1 = arith.constant 0 : index
    %0 = vector.load %arg3[%c0, %c0_0, %c0_1] : memref<1x32x128xf32, #tpu.memory_space<vmem>>, vector<1x32x128xf32>
    %1 = vector.shape_cast %0 : vector<1x32x128xf32> to vector<32x128xf32>
    %2 = arith.truncf %1 : vector<32x128xf32> to vector<32x128xbf16>
    %c0_2 = arith.constant 0 : index
    %c0_3 = arith.constant 0 : index
    %3 = vector.load %arg4[%c0_2, %c0_3] : memref<128x32xbf16, #tpu.memory_space<vmem>>, vector<128x32xbf16>
    %cst = arith.constant dense<0.000000e+00> : vector<32x32xf32>
    %4 = tpu.matmul %2, %3, %cst {dimension_numbers = #tpu.dot_dimension_numbers<[1], [0], [0], [1], [0, 0, 1, 1], [], []>} : vector<32x128xbf16>, vector<128x32xbf16>, vector<32x32xf32> -> vector<32x32xf32>
    %c0_4 = arith.constant 0 : index
    %c0_5 = arith.constant 0 : index
    %5 = vector.load %arg5[%c0_4, %c0_5] : memref<1x32xf32, #tpu.memory_space<vmem>>, vector<1x32xf32>
    %6 = vector.broadcast %5 : vector<1x32xf32> to vector<32x32xf32>
    %7 = arith.addf %4, %6 : vector<32x32xf32>
    %c0_6 = arith.constant 0 : index
    %c0_7 = arith.constant 0 : index
    %c0_8 = arith.constant 0 : index
    %8 = vector.load %arg7[%c0_6, %c0_7, %c0_8] : memref<1x32x32xf32, #tpu.memory_space<vmem>>, vector<1x32x32xf32>
    %9 = vector.shape_cast %8 : vector<1x32x32xf32> to vector<32x32xf32>
    %c0_9 = arith.constant 0 : index
    %c0_10 = arith.constant 0 : index
    %c0_11 = arith.constant 0 : index
    %10 = vector.load %arg6[%c0_9, %c0_10, %c0_11] : memref<1x1x32xf32, #tpu.memory_space<vmem>>, vector<1x1x32xf32>
    %11 = vector.shape_cast %10 : vector<1x1x32xf32> to vector<1x32xf32>
    %12 = vector.broadcast %11 : vector<1x32xf32> to vector<32x32xf32>
    %13 = arith.mulf %12, %7 : vector<32x32xf32>
    %14 = arith.addf %9, %13 : vector<32x32xf32>
    %c0_12 = arith.constant 0 : index
    %c0_13 = arith.constant 0 : index
    %c0_14 = arith.constant 0 : index
    %15 = vector.load %arg8[%c0_12, %c0_13, %c0_14] : memref<1x32x32xf32, #tpu.memory_space<vmem>>, vector<1x32x32xf32>
    %16 = vector.shape_cast %15 : vector<1x32x32xf32> to vector<32x32xf32>
    %17 = vector.shape_cast %14 : vector<32x32xf32> to vector<1x32x32xf32>
    tpu.vector_store %arg8[%c0_12, %c0_13, %c0_14], %17 {strides = array<i32>} : memref<1x32x32xf32, #tpu.memory_space<vmem>>, vector<1x32x32xf32>,
    return
  }
  func.func @transform_0(%arg0: i32, %arg1: i32, %arg2: i32) -> (i32, i32, i32) {
    %c0_i32 = arith.constant 0 : i32
    %c0_i32_0 = arith.constant 0 : i32
    return %arg0, %arg1, %c0_i32 : i32, i32, i32
  }
  func.func @transform_1(%arg0: i32, %arg1: i32, %arg2: i32) -> (i32, i32) {
    %c0_i32 = arith.constant 0 : i32
    %c0_i32_0 = arith.constant 0 : i32
    return %c0_i32, %arg2 : i32, i32
  }
  func.func @transform_2(%arg0: i32, %arg1: i32, %arg2: i32) -> (i32, i32) {
    %c0_i32 = arith.constant 0 : i32
    %c0_i32_0 = arith.constant 0 : i32
    return %c0_i32, %arg2 : i32, i32
  }
  func.func @transform_3(%arg0: i32, %arg1: i32, %arg2: i32) -> (i32, i32, i32) {
    %c0_i32 = arith.constant 0 : i32
    %c0_i32_0 = arith.constant 0 : i32
    return %arg0, %c0_i32, %arg2 : i32, i32, i32
  }
  func.func @transform_4(%arg0: i32, %arg1: i32, %arg2: i32) -> (i32, i32, i32) {
    %c0_i32 = arith.constant 0 : i32
    return %arg0, %arg1, %arg2 : i32, i32, i32
  }
  func.func @transform_5(%arg0: i32, %arg1: i32, %arg2: i32) -> (i32, i32, i32) {
    %c0_i32 = arith.constant 0 : i32
    return %arg0, %arg1, %arg2 : i32, i32, i32
  }
}

</mosaic_0001>

<bundles_post_ra>
// kernel: stdit3_block_forward.9
= control target key start
LH: loop header
LB: loop body
LE: loop exit
PB: predicated region body
PF: predicated region fallthrough
CT: control target
= control target key end

     0   :  { %s780_s18 = smov 0   ;;  %s782_s19 = smov 0   ;;  %s849_s0 = inlined_call_operand.vmem [shape: f32[2,32,32], index: 0, kind: input, shape index: {}]   ;;  %s850_s1 = inlined_call_operand.vmem [shape: f32[2,1,32], index: 1, kind: input, shape index: {}]   ;;  %s851_s2 = inlined_call_operand.vmem [shape: f32[2,1,32], index: 2, kind: input, shape index: {}]   ;;  %s852_s3 = inlined_call_operand.vmem [shape: bf16[32,96], index: 3, kind: input, shape index: {}]   ;;  %s853_s4 = inlined_call_operand.vmem [shape: f32[1,96], index: 4, kind: input, shape index: {}]   ;;  %s854_s5 = inlined_call_operand.vmem [shape: f32[2,32,96], index: 5, kind: output, shape index: {}]  }
   0x1   :  { %s784_s20 = smov 0  }
   0x2 LB: > { %s34_s21 = sadd.s32 1, %s744_s19  ;;  %p665_p0 = scmp.ge.s32.totalorder %s748_s20, 1  ;;  %s748_s20 = sphi %s784_s20, %s15_s20   ;;  %s744_s19 = sphi %s782_s19, %s856_s19   ;;  %s740_s18 = sphi %s780_s18, %s855_s18  }
   0x3   : > { %p36_p1 = scmp.ge.s32.totalorder %s34_s21, 2  ;;  %p250_p2 = scmp.lt.s32.totalorder %s748_s20, 3 }
   0x5   : > { %s858_s21 = smov (%p36_p1, %s34_s21), 0  ;;  %p251_p3 = pnand %p665_p0, %p250_p2 }
   0x6   : > { %p303_p4 = scmp.lt.s32.totalorder (!%p251_p3), %s740_s18, 1  ;;  %vm347_vm0 = vcmask (!%p251_p3), 261120   ;;  %v716_v28 = vld [vmem:[%s852_s3] sm:$0xff] (!%p251_p3)   ;;  %v717_v29 = vld [vmem:[%s852_s3 + $0x8] sm:$0xff] (!%p251_p3)   ;;  %v404_v33 = vlaneseq (!%p251_p3)  ;;  %vm509_vm1 = vcmask (!%p251_p3), 785408  }
   0x7   : > { %254 = sbr.rel (%p251_p3) target bundleno = 567 (0x237), region = 40  ;;  %684 = vmatprep.subr.bf16.mxu0 (!%p251_p3), %v716_v28 }
   0x8   : > { %685 = vmatpush3.bf16.msra.mxu0 (!%p251_p3), %v716_v28  ;;  %v405_v40 = vshrl.u32 (!%p251_p3), %v404_v33, 7 }
   0x9   : > { %686 = vmatprep.subr.bf16.mxu0 (!%p251_p3), %v717_v29 }
   0xa   : > { %v406_v46 = vsub.s32 (!%p251_p3), 0, %v405_v40 }
   0xc   : > { %687 = vmatpush3.bf16.msra.mxu0 (!%p251_p3), %v717_v29 }
   0xe   : > { %s860_s18 = smov (!%p303_p4, %s740_s18), 1 }
   0xf   : > { %s678_s22 = sshll.u32 %s860_s18, 5  ;;  %s317_s7 = scalar_lea.vmem %s851_s2, %s860_s18 }
  0x10   : > { %s310_s25 = scalar_lea.vmem %s849_s0, %s678_s22  ;;  %v401_v42 = vld [vmem:[%s317_s7] sm:$0x1]  ;;  %s314_s10 = scalar_lea.vmem %s850_s1, %s860_s18 }
  0x11   : > { %v343_v0 = vld [vmem:[%s310_s25] sm:$0xff]  ;;  %v345_v1 = vld [vmem:[%s310_s25 + $0x10] sm:$0xff]  ;;  %v344_v4 = vld [vmem:[%s310_s25 + $0x8] sm:$0xff]  ;;  %v402_v45 = vadd.f32 1.0, %v401_v42  ;;  %s336_s15 = scalar_lea.vmem %s854_s5, %s678_s22 }
  0x12   : > { %v348_v2 = vsel %vm347_vm0, %v343_v0, 0.0  ;;  %v354_v3 = vsel %vm347_vm0, %v345_v1, 0.0  ;;  %v346_v5 = vld [vmem:[%s310_s25 + $0x18] sm:$0xff]  ;;  %v351_v6 = vsel %vm347_vm0, %v344_v4, 0.0  ;;  %v670_v54 = vld [vmem:[%s314_s10] ss:$0 sm:$0xff] }
  0x13   : > { %349 = vadd.xlane.f32.xlu0 %v348_v2  ;;  %355 = vadd.xlane.f32.xlu1 %v354_v3  ;;  %v357_v7 = vsel %vm347_vm0, %v346_v5, 0.0  ;;  %v407_v48 = vrot.slane %v402_v45, %v406_v46 }
  0x17   : > { %352 = vadd.xlane.f32.xlu0 %v351_v6  ;;  %358 = vadd.xlane.f32.xlu1 %v357_v7 }
  0xa0   : > { %v350_v8 = vpop.xlane.xlu0 %349  ;;  %v356_v9 = vpop.xlane.xlu1 %355 }
  0xa1   : > { %v361_v10 = vmul.f32 0.03125, %v350_v8  ;;  %v363_v11 = vmul.f32 0.03125, %v356_v9 }
  0xa3   : > { %v365_v12 = vsub.f32 %v343_v0, %v361_v10  ;;  %v367_v13 = vsub.f32 %v345_v1, %v363_v11 }
  0xa4   : > { %v353_v14 = vpop.xlane.xlu0 %352  ;;  %v359_v15 = vpop.xlane.xlu1 %358 }
  0xa5   : > { %v362_v16 = vmul.f32 0.03125, %v353_v14  ;;  %v364_v17 = vmul.f32 0.03125, %v359_v15  ;;  %v369_v18 = vmul.f32 %v365_v12, %v365_v12  ;;  %v371_v19 = vmul.f32 %v367_v13, %v367_v13 }
  0xa7   : > { %v366_v20 = vsub.f32 %v344_v4, %v362_v16  ;;  %v368_v21 = vsub.f32 %v346_v5, %v364_v17  ;;  %v373_v22 = vsel %vm347_vm0, %v369_v18, 0.0  ;;  %v379_v23 = vsel %vm347_vm0, %v371_v19, 0.0  ;;  %v671_v5 = vld [vmem:[%s853_s4] ss:$0 sm:$0xff] }
  0xa8   : > { %374 = vadd.xlane.f32.xlu0 %v373_v22 }
  0xa9   : > { %v370_v24 = vmul.f32 %v366_v20, %v366_v20  ;;  %v372_v25 = vmul.f32 %v368_v21, %v368_v21 }
  0xab   : > { %v376_v26 = vsel %vm347_vm0, %v370_v24, 0.0  ;;  %v382_v27 = vsel %vm347_vm0, %v372_v25, 0.0 }
  0xac   : > { %380 = vadd.xlane.f32.xlu0 %v379_v23  ;;  %377 = vadd.xlane.f32.xlu1 %v376_v26 }
  0xb0   : > { %383 = vadd.xlane.f32.xlu1 %v382_v27 }
 0x135   : > { %v375_v30 = vpop.xlane.xlu0 %374 }
 0x136   : > { %v385_v31 = vmul.f32 0.03125, %v375_v30 }
 0x138   : > { %v389_v32 = vadd.f32 1e-06, %v385_v31 }
 0x139   : > { %v378_v34 = vpop.xlane.xlu1 %377  ;;  %v381_v35 = vpop.xlane.xlu0 %380 }
 0x13a   : > { %718 = vrsqrt.f32 %v389_v32  ;;  %v386_v36 = vmul.f32 0.03125, %v378_v34  ;;  %v387_v37 = vmul.f32 0.03125, %v381_v35 }
 0x13c   : > { %v390_v38 = vadd.f32 1e-06, %v386_v36  ;;  %v391_v39 = vadd.f32 1e-06, %v387_v37 }
 0x13d   : > { %v384_v41 = vpop.xlane.xlu1 %383 }
 0x13e   : > { %720 = vrsqrt.f32 %v390_v38  ;;  %v388_v43 = vmul.f32 0.03125, %v384_v41 }
 0x13f   : > { %722 = vrsqrt.f32 %v391_v39 }
 0x140   : > { %v392_v44 = vadd.f32 1e-06, %v388_v43 }
 0x142   : > { %724 = vrsqrt.f32 %v392_v44 }
 0x144   : > { %v719_v47 = vpop.eup %718 }
 0x145   : > { %v397_v49 = vmul.f32 %v719_v47, %v365_v12 }
 0x147   : > { %v409_v52 = vmul.f32 %v407_v48, %v397_v49 }
 0x148   : > { %v721_v50 = vpop.eup %720 }
 0x149   : > { %v723_v51 = vpop.eup %722  ;;  %v398_v53 = vmul.f32 %v721_v50, %v366_v20  ;;  %v420_v58 = vadd.f32 %v670_v54, %v409_v52 }
 0x14a   : > { %v399_v55 = vmul.f32 %v723_v51, %v367_v13 }
 0x14b   : > { %v410_v56 = vmul.f32 %v407_v48, %v398_v53 }
 0x14c   : > { %v725_v57 = vpop.eup %724  ;;  %v411_v60 = vmul.f32 %v407_v48, %v399_v55 }
 0x14d   : > { %v421_v59 = vadd.f32 %v670_v54, %v410_v56  ;;  %v400_v61 = vmul.f32 %v725_v57, %v368_v21 }
 0x14e   : > { %v422_v0 = vadd.f32 %v670_v54, %v411_v60 }
 0x14f   : > { %v424_v62 = vpack.c.bf16 %v421_v59, %v420_v58  ;;  %v412_v63 = vmul.f32 %v407_v48, %v400_v61 }
 0x151   : > { %426 = vst.msk [vmem:[#allocation2] sm:$0xff] %vm347_vm0, %v424_v62  ;;  %v423_v1 = vadd.f32 %v670_v54, %v412_v63 }
 0x153   : > { %v425_v2 = vpack.c.bf16 %v423_v1, %v422_v0 }
 0x155   : > { %427 = vst.msk [vmem:[#allocation2 + $0x8] sm:$0xff] %vm347_vm0, %v425_v2 }
 0x158   : > { %v428_v3 = vld [vmem:[#allocation2] sm:$0xff] }
 0x159   : > { %688 = vmatprep.mubr.msk.bf16.mxu0 %vm347_vm0, %v428_v3 }
 0x15c   : > { %v429_v4 = vld [vmem:[#allocation2 + $0x8] sm:$0xff] }
 0x15d   : > { %689 = vmatmul.mubr.msk.bf16.vlgmr.msra.gmra.mrb[0].mxu0 %vm347_vm0, %v429_v4 }
 0x230   : > { %v690_v6 = vpop.f32.mrb[0].mxu0 }
 0x231   : > { %v503_v7 = vadd.f32 %v690_v6, %v671_v5  ;;  %v494_v8 = vpop.f32.mrb[1].mxu0 }
 0x232   : > { %v495_v9 = vadd.f32 %v671_v5, %v494_v8  ;;  %v691_v10 = vpop.f32.mrb[2].mxu0 }
 0x233   : > { %512 = vst.msk [vmem:[%s336_s15 + $0x10] sm:$0xff] %vm509_vm1, %v503_v7  ;;  %v506_v11 = vadd.f32 %v691_v10, %v671_v5  ;;  %v497_v12 = vpop.f32.mrb[3].mxu0 }
 0x234   : > { %510 = vst.msk [vmem:[%s336_s15] sm:$0xff] %vm509_vm1, %v495_v9  ;;  %v498_v13 = vadd.f32 %v671_v5, %v497_v12 }
 0x235   : > { %513 = vst.msk [vmem:[%s336_s15 + $0x18] sm:$0xff] %vm509_vm1, %v506_v11 }
 0x236   : > { %511 = vst.msk [vmem:[%s336_s15 + $0x8] sm:$0xff] %vm509_vm1, %v498_v13 }
 0x237 PF: > { %s15_s20 = sadd.s32 1, %s748_s20   ;;  %s855_s18 = smov %s744_s19 }
 0x238   : > { %p12_p5 = scmp.ge.s32.totalorder %s15_s20, 4   ;;  %s856_s19 = smov %s858_s21 }
 0x23a   :  { %14 = sbr.rel (!%p12_p5) target bundleno = 2 (0x2), region = 86 }

// kernel: stdit3_block_forward.11
= control target key start
LH: loop header
LB: loop body
LE: loop exit
PB: predicated region body
PF: predicated region fallthrough
CT: control target
= control target key end

     0   :  { %s767_s18 = smov 0   ;;  %s769_s19 = smov 0   ;;  %s821_s0 = inlined_call_operand.vmem [shape: f32[2,32,32], index: 0, kind: input, shape index: {}]   ;;  %s822_s1 = inlined_call_operand.vmem [shape: bf16[32,32], index: 1, kind: input, shape index: {}]   ;;  %s823_s2 = inlined_call_operand.vmem [shape: f32[1,32], index: 2, kind: input, shape index: {}]   ;;  %s824_s3 = inlined_call_operand.vmem [shape: f32[2,1,32], index: 3, kind: input, shape index: {}]   ;;  %s825_s4 = inlined_call_operand.vmem [shape: f32[2,32,32], index: 4, kind: input, shape index: {}]   ;;  %s826_s5 = inlined_call_operand.vmem [shape: f32[2,32,32], index: 5, kind: output, shape index: {}]  }
   0x1   :  { %s771_s20 = smov 0  }
   0x2 LB: > { %s34_s21 = sadd.s32 1, %s731_s19  ;;  %p657_p0 = scmp.ge.s32.totalorder %s735_s20, 1  ;;  %s735_s20 = sphi %s771_s20, %s15_s20   ;;  %s731_s19 = sphi %s769_s19, %s828_s19   ;;  %s727_s18 = sphi %s767_s18, %s827_s18  }
   0x3   : > { %p36_p1 = scmp.ge.s32.totalorder %s34_s21, 2  ;;  %p269_p2 = scmp.lt.s32.totalorder %s735_s20, 3 }
   0x5   : > { %s830_s21 = smov (%p36_p1, %s34_s21), 0  ;;  %p270_p3 = pnand %p657_p0, %p269_p2 }
   0x6   : > { %v711_v0 = vld [vmem:[%s822_s1] sm:$0xff] (!%p270_p3)   ;;  %p334_p4 = scmp.lt.s32.totalorder (!%p270_p3), %s727_s18, 1  ;;  %v712_v1 = vld [vmem:[%s822_s1 + $0x8] sm:$0xff] (!%p270_p3)   ;;  %vm412_vm0 = vcmask (!%p270_p3), 261120  }
   0x7   : > { %273 = sbr.rel (%p270_p3) target bundleno = 243 (0xf3), region = 40  ;;  %679 = vmatprep.subr.bf16.mxu0 (!%p270_p3), %v711_v0  ;;  %v664_v8 = vld [vmem:[%s823_s2] ss:$0 sm:$0xff] (!%p270_p3) }
   0x8   : > { %680 = vmatpush3.bf16.msra.mxu0 (!%p270_p3), %v711_v0 }
   0x9   : > { %681 = vmatprep.subr.bf16.mxu0 (!%p270_p3), %v712_v1 }
   0xc   : > { %682 = vmatpush3.bf16.msra.mxu0 (!%p270_p3), %v712_v1 }
   0xe   : > { %s832_s18 = smov (!%p334_p4, %s727_s18), 1 }
   0xf   : > { %s672_s26 = sshll.u32 %s832_s18, 5  ;;  %s355_s7 = scalar_lea.vmem %s824_s3, %s832_s18 }
  0x10   : > { %s341_s29 = scalar_lea.vmem %s821_s0, %s672_s26  ;;  %s367_s12 = scalar_lea.vmem %s825_s4, %s672_s26  ;;  %v669_v10 = vld [vmem:[%s355_s7] ss:$0 sm:$0xff] }
  0x11   : > { %v383_v2 = vld [vmem:[%s341_s29] sm:$0xff]  ;;  %v384_v3 = vld [vmem:[%s341_s29 + $0x8] sm:$0xff]  ;;  %v385_v4 = vld [vmem:[%s341_s29 + $0x10] sm:$0xff]  ;;  %s380_s15 = scalar_lea.vmem %s826_s5, %s672_s26 }
  0x12   : > { %v387_v5 = vpack.c.bf16 %v384_v3, %v383_v2  ;;  %v386_v6 = vld [vmem:[%s341_s29 + $0x18] sm:$0xff]  ;;  %v470_v13 = vld [vmem:[%s367_s12 + $0x10] sm:$0xff]  ;;  %v468_v17 = vld [vmem:[%s367_s12] sm:$0xff] }
  0x13   : > { %v388_v7 = vpack.c.bf16 %v386_v6, %v385_v4  ;;  %v471_v21 = vld [vmem:[%s367_s12 + $0x18] sm:$0xff]  ;;  %v469_v25 = vld [vmem:[%s367_s12 + $0x8] sm:$0xff] }
  0x14   : > { %683 = vmatprep.mubr.msk.bf16.mxu0 %vm412_vm0, %v387_v5 }
  0x15   : > { %684 = vmatmul.mubr.msk.bf16.vlgmr.msra.gmra.mrb[0].mxu0 %vm412_vm0, %v388_v7 }
  0xe8   : > { %v685_v9 = vpop.f32.mrb[0].mxu0 }
  0xe9   : > { %v462_v11 = vadd.f32 %v685_v9, %v664_v8  ;;  %v453_v12 = vpop.f32.mrb[1].mxu0 }
  0xea   : > { %v454_v14 = vadd.f32 %v664_v8, %v453_v12  ;;  %v686_v15 = vpop.f32.mrb[2].mxu0 }
  0xeb   : > { %v481_v16 = vmul.f32 %v669_v10, %v462_v11  ;;  %v465_v18 = vadd.f32 %v686_v15, %v664_v8  ;;  %v456_v19 = vpop.f32.mrb[3].mxu0 }
  0xec   : > { %v479_v20 = vmul.f32 %v669_v10, %v454_v14  ;;  %v457_v22 = vadd.f32 %v664_v8, %v456_v19 }
  0xed   : > { %v485_v23 = vadd.f32 %v481_v16, %v470_v13  ;;  %v482_v24 = vmul.f32 %v669_v10, %v465_v18 }
  0xee   : > { %v483_v26 = vadd.f32 %v479_v20, %v468_v17  ;;  %v480_v27 = vmul.f32 %v669_v10, %v457_v22 }
  0xef   : > { %489 = vst.msk [vmem:[%s380_s15 + $0x10] sm:$0xff] %vm412_vm0, %v485_v23  ;;  %v486_v28 = vadd.f32 %v482_v24, %v471_v21 }
  0xf0   : > { %487 = vst.msk [vmem:[%s380_s15] sm:$0xff] %vm412_vm0, %v483_v26  ;;  %v484_v29 = vadd.f32 %v480_v27, %v469_v25 }
  0xf1   : > { %490 = vst.msk [vmem:[%s380_s15 + $0x18] sm:$0xff] %vm412_vm0, %v486_v28 }
  0xf2   : > { %488 = vst.msk [vmem:[%s380_s15 + $0x8] sm:$0xff] %vm412_vm0, %v484_v29 }
  0xf3 PF: > { %s15_s20 = sadd.s32 1, %s735_s20   ;;  %s827_s18 = smov %s731_s19 }
  0xf4   : > { %p12_p5 = scmp.ge.s32.totalorder %s15_s20, 4   ;;  %s828_s19 = smov %s830_s21 }
  0xf6   :  { %14 = sbr.rel (!%p12_p5) target bundleno = 2 (0x2), region = 82 }

// kernel: stdit3_block_forward.12
= control target key start
LH: loop header
LB: loop body
LE: loop exit
PB: predicated region body
PF: predicated region fallthrough
CT: control target
= control target key end

     0   :  { %s575_s12 = smov 0   ;;  %s577_s13 = smov 0   ;;  %s623_s0 = inlined_call_operand.vmem [shape: f32[2,32,32], index: 0, kind: input, shape index: {}]   ;;  %s624_s1 = inlined_call_operand.vmem [shape: bf16[32,32], index: 1, kind: input, shape index: {}]   ;;  %s625_s2 = inlined_call_operand.vmem [shape: f32[1,32], index: 2, kind: input, shape index: {}]   ;;  %s626_s3 = inlined_call_operand.vmem [shape: f32[2,32,32], index: 3, kind: output, shape index: {}]  }
   0x1   :  { %s579_s14 = smov 0  }
   0x2 LB: > { %s32_s15 = sadd.s32 1, %s549_s13  ;;  %p479_p0 = scmp.ge.s32.totalorder %s553_s14, 1  ;;  %s553_s14 = sphi %s579_s14, %s13_s14   ;;  %s549_s13 = sphi %s577_s13, %s628_s13   ;;  %s545_s12 = sphi %s575_s12, %s627_s12  }
   0x3   : > { %p34_p1 = scmp.ge.s32.totalorder %s32_s15, 2  ;;  %p184_p2 = scmp.lt.s32.totalorder %s553_s14, 3 }
   0x5   : > { %s630_s15 = smov (%p34_p1, %s32_s15), 0  ;;  %p185_p3 = pnand %p479_p0, %p184_p2 }
   0x6   : > { %v529_v0 = vld [vmem:[%s624_s1] sm:$0xff] (!%p185_p3)   ;;  %p227_p4 = scmp.lt.s32.totalorder (!%p185_p3), %s545_s12, 1  ;;  %v530_v1 = vld [vmem:[%s624_s1 + $0x8] sm:$0xff] (!%p185_p3)   ;;  %vm286_vm0 = vcmask (!%p185_p3), 261120  }
   0x7   : > { %188 = sbr.rel (%p185_p3) target bundleno = 239 (0xef), region = 32  ;;  %497 = vmatprep.subr.bf16.mxu0 (!%p185_p3), %v529_v0  ;;  %v484_v8 = vld [vmem:[%s625_s2] ss:$0 sm:$0xff] (!%p185_p3) }
   0x8   : > { %498 = vmatpush3.bf16.msra.mxu0 (!%p185_p3), %v529_v0 }
   0x9   : > { %499 = vmatprep.subr.bf16.mxu0 (!%p185_p3), %v530_v1 }
   0xc   : > { %500 = vmatpush3.bf16.msra.mxu0 (!%p185_p3), %v530_v1 }
   0xe   : > { %s632_s12 = smov (!%p227_p4, %s545_s12), 1 }
   0xf   : > { %s491_s20 = sshll.u32 %s632_s12, 5 }
  0x10   : > { %s234_s23 = scalar_lea.vmem %s623_s0, %s491_s20  ;;  %s254_s28 = scalar_lea.vmem %s626_s3, %s491_s20 }
  0x11   : > { %v257_v2 = vld [vmem:[%s234_s23] sm:$0xff]  ;;  %v258_v3 = vld [vmem:[%s234_s23 + $0x8] sm:$0xff]  ;;  %v259_v4 = vld [vmem:[%s234_s23 + $0x10] sm:$0xff] }
  0x12   : > { %v261_v5 = vpack.c.bf16 %v258_v3, %v257_v2  ;;  %v260_v6 = vld [vmem:[%s234_s23 + $0x18] sm:$0xff] }
  0x13   : > { %v262_v7 = vpack.c.bf16 %v260_v6, %v259_v4 }
  0x14   : > { %501 = vmatprep.mubr.msk.bf16.mxu0 %vm286_vm0, %v261_v5 }
  0x15   : > { %502 = vmatmul.mubr.msk.bf16.vlgmr.msra.gmra.mrb[0].mxu0 %vm286_vm0, %v262_v7 }
  0xe8   : > { %v503_v9 = vpop.f32.mrb[0].mxu0 }
  0xe9   : > { %v336_v10 = vadd.f32 %v503_v9, %v484_v8  ;;  %v327_v11 = vpop.f32.mrb[1].mxu0 }
  0xea   : > { %v328_v12 = vadd.f32 %v484_v8, %v327_v11  ;;  %v504_v13 = vpop.f32.mrb[2].mxu0 }
  0xeb   : > { %344 = vst.msk [vmem:[%s254_s28 + $0x10] sm:$0xff] %vm286_vm0, %v336_v10  ;;  %v339_v14 = vadd.f32 %v504_v13, %v484_v8  ;;  %v330_v15 = vpop.f32.mrb[3].mxu0 }
  0xec   : > { %342 = vst.msk [vmem:[%s254_s28] sm:$0xff] %vm286_vm0, %v328_v12  ;;  %v331_v16 = vadd.f32 %v484_v8, %v330_v15 }
  0xed   : > { %345 = vst.msk [vmem:[%s254_s28 + $0x18] sm:$0xff] %vm286_vm0, %v339_v14 }
  0xee   : > { %343 = vst.msk [vmem:[%s254_s28 + $0x8] sm:$0xff] %vm286_vm0, %v331_v16 }
  0xef PF: > { %s13_s14 = sadd.s32 1, %s553_s14   ;;  %s627_s12 = smov %s549_s13 }
  0xf0   : > { %p10_p5 = scmp.ge.s32.totalorder %s13_s14, 4   ;;  %s628_s13 = smov %s630_s15 }
  0xf2   :  { %12 = sbr.rel (!%p10_p5) target bundleno = 2 (0x2), region = 68 }

// kernel: stdit3_block_forward.13
= control target key start
LH: loop header
LB: loop body
LE: loop exit
PB: predicated region body
PF: predicated region fallthrough
CT: control target
= control target key end

     0   :  { %s530_s12 = smov 0   ;;  %s532_s13 = smov 0   ;;  %s572_s0 = inlined_call_operand.vmem [shape: f32[2,8,32], index: 0, kind: input, shape index: {}]   ;;  %s573_s1 = inlined_call_operand.vmem [shape: bf16[32,64], index: 1, kind: input, shape index: {}]   ;;  %s574_s2 = inlined_call_operand.vmem [shape: f32[1,64], index: 2, kind: input, shape index: {}]   ;;  %s575_s3 = inlined_call_operand.vmem [shape: f32[2,8,64], index: 3, kind: output, shape index: {}]  }
   0x1   :  { %s534_s14 = smov 0  }
   0x2 LB: > { %s32_s15 = sadd.s32 1, %s502_s13  ;;  %p436_p0 = scmp.ge.s32.totalorder %s506_s14, 1  ;;  %s506_s14 = sphi %s534_s14, %s13_s14   ;;  %s502_s13 = sphi %s532_s13, %s577_s13   ;;  %s498_s12 = sphi %s530_s12, %s576_s12  }
   0x3   : > { %p34_p1 = scmp.ge.s32.totalorder %s32_s15, 2  ;;  %p181_p2 = scmp.lt.s32.totalorder %s506_s14, 3 }
   0x5   : > { %s579_s15 = smov (%p34_p1, %s32_s15), 0  ;;  %p182_p3 = pnand %p436_p0, %p181_p2 }
   0x6   : > { %v482_v0 = vld [vmem:[%s573_s1] sm:$0xff] (!%p182_p3)   ;;  %v508_v1 = vmov (!%p182_p3), 0.0   ;;  %v483_v2 = vld [vmem:[%s573_s1 + $0x8] sm:$0xff] (!%p182_p3)   ;;  %vm509_vm0 = vmmov (!%p182_p3), 0   ;;  %p219_p4 = scmp.lt.s32.totalorder (!%p182_p3), %s498_s12, 1  ;;  %vm269_vm1 = vcmask (!%p182_p3), 261120  }
   0x7   : > { %185 = sbr.rel (%p182_p3) target bundleno = 235 (0xeb), region = 32  ;;  %448 = vmatprep.subr.bf16.mxu0 (!%p182_p3), %v508_v1  ;;  %452 = vmatprep.mubr.msk.bf16.mxu0 (!%p182_p3), %vm509_vm0, %v508_v1  ;;  %v439_v5 = vld [vmem:[%s574_s2] ss:$0 sm:$0xff] (!%p182_p3)  ;;  %vm313_vm2 = vcmask (!%p182_p3), 523264  }
   0x8   : > { %449 = vmatpush3.bf16.msra.mxu0 (!%p182_p3), %v482_v0 }
   0x9   : > { %450 = vmatprep.subr.bf16.mxu0 (!%p182_p3), %v508_v1 }
   0xc   : > { %451 = vmatpush3.bf16.msra.mxu0 (!%p182_p3), %v483_v2 }
   0xe   : > { %s581_s12 = smov (!%p219_p4, %s498_s12), 1 }
   0xf   : > { %s437_s20 = sshll.u32 %s581_s12, 3 }
  0x10   : > { %s225_s23 = scalar_lea.vmem %s572_s0, %s437_s20  ;;  %s242_s28 = scalar_lea.vmem %s575_s3, %s437_s20 }
  0x11   : > { %v244_v3 = vld [vmem:[%s225_s23] sm:$0xff] }
  0x12   : > { %v245_v4 = vpack.c.bf16 %v244_v3, %v244_v3 }
  0x14   : > { %453 = vmatmul.mubr.msk.bf16.vlgmr.msra.gmra.mrb[0].mxu0 %vm269_vm1, %v245_v4 }
  0xe7   : > { %v307_v6 = vpop.f32.mrb[0].mxu0 }
  0xe8   : > { %v308_v7 = vadd.f32 %v439_v5, %v307_v6  ;;  %v454_v8 = vpop.f32.mrb[1].mxu0 }
  0xe9   : > { %v310_v9 = vpop.f32.mrb[2].mxu0 }
  0xea   : > { %314 = vst.msk [vmem:[%s242_s28] sm:$0xff] %vm313_vm2, %v308_v7  ;;  %v455_v10 = vpop.f32.mrb[3].mxu0 }
  0xeb PF: > { %s13_s14 = sadd.s32 1, %s506_s14   ;;  %s576_s12 = smov %s502_s13 }
  0xec   : > { %p10_p5 = scmp.ge.s32.totalorder %s13_s14, 4   ;;  %s577_s13 = smov %s579_s15 }
  0xee   :  { %12 = sbr.rel (!%p10_p5) target bundleno = 2 (0x2), region = 68 }

// kernel: stdit3_block_forward.10
= control target key start
LH: loop header
LB: loop body
LE: loop exit
PB: predicated region body
PF: predicated region fallthrough
CT: control target
= control target key end

     0   :  { %s2035_s12 = smov 0   ;;  %s2037_s13 = smov 0   ;;  %s2491_s0 = inlined_call_operand.vmem [shape: f32[8,8,3,4,8], index: 0, kind: input, shape index: {}, may-alias: {0,1,2}]   ;;  %s2492_s1 = inlined_call_operand.vmem [shape: f32[8,8,3,4,8], index: 1, kind: input, shape index: {}, may-alias: {0,1,2}]   ;;  %s2493_s2 = inlined_call_operand.vmem [shape: f32[8,8,3,4,8], index: 2, kind: input, shape index: {}, may-alias: {0,1,2}]   ;;  %s2494_s3 = inlined_call_operand.vmem [shape: f32[8,8,32], index: 3, kind: output, shape index: {}]  }
   0x1   :  { %s2039_s14 = smov 0   ;;  %s2041_s15 = smov 0  }
   0x2   :  { %s2043_s16 = smov 0  }
   0x3 LB: > { %s32_s17 = sadd.s32 1, %s2002_s15  ;;  %p48_p1 = scmp.ne.s32.totalorder %s1994_s13, %s1990_s12  ;;  %s2006_s16 = sphi %s2043_s16, %s13_s16   ;;  %s2002_s15 = sphi %s2041_s15, %s2499_s15   ;;  %s1998_s14 = sphi %s2039_s14, %s2498_s14   ;;  %s1994_s13 = sphi %s2037_s13, %s2497_s13   ;;  %s1990_s12 = sphi %s2035_s12, %s2496_s12  }
   0x4   : > { %p34_p0 = scmp.ge.s32.totalorder %s32_s17, 8  ;;  %p49_p2 = scmp.eq.s32.totalorder %s2006_s16, 0 }
   0x5   : > { %s41_s20 = sadd.s32 1, %s1994_s13  ;;  %p1792_p5 = scmp.ge.s32.totalorder %s2006_s16, 8 }
   0x6   : > { %s2501_s17 = smov (%p34_p0, %s32_s17), 0  ;;  %p2066_p3 = por %p49_p2, %p48_p1 }
   0x7   : > { %s36_s19 = ssub.s32 %s2002_s15, %s2501_s17  ;;  %158 = sbr.rel (%p1792_p5) target bundleno = 44 (0x2c), region = 16 }
   0x8   : > { %p39_p4 = scmp.eq.s32.totalorder %s36_s19, 0 }
   0xa   : > { %s2074_s21 = scalar_select %p39_p4, %s1994_s13, %s41_s20  }
   0xe   : > { %161 = sbr.rel (!%p2066_p3) target bundleno = 24 (0x18), region = 20  ;;  %s163_s22 = sand.u32 (%p2066_p3), 1, %s1994_s13  }
   0xf   : > { %s1894_s23 = smul.u32 (%p2066_p3), 96, %s2002_s15  ;;  %s1793_s24 = sshll.u32 (%p2066_p3), %s163_s22, 5 }
  0x10   : > { %s165_s28 = scalar_lea.vmem (%p2066_p3), [#allocation5], %s1793_s24 }
  0x11   : > { %s171_s27 = scalar_lea.vmem (%p2066_p3), %s2491_s0, %s1894_s23 }
  0x12   : > { %v187_v0 = vld [vmem:[%s171_s27] sm:$0xf] (%p2066_p3)  ;;  %v189_v1 = vld [vmem:[%s171_s27 + $0xc] sm:$0xf] (%p2066_p3)  ;;  %v191_v2 = vld [vmem:[%s171_s27 + $0x18] sm:$0xf] (%p2066_p3) }
  0x13   : > { %188 = vst [vmem:[%s165_s28] sm:$0xf] (%p2066_p3), %v187_v0  ;;  %190 = vst [vmem:[%s165_s28 + $0x4] sm:$0xf] (%p2066_p3), %v189_v1  ;;  %v193_v3 = vld [vmem:[%s171_s27 + $0x24] sm:$0xf] (%p2066_p3) }
  0x14   : > { %192 = vst [vmem:[%s165_s28 + $0x8] sm:$0xf] (%p2066_p3), %v191_v2  ;;  %v195_v4 = vld [vmem:[%s171_s27 + $0x30] sm:$0xf] (%p2066_p3)  ;;  %v197_v5 = vld [vmem:[%s171_s27 + $0x3c] sm:$0xf] (%p2066_p3) }
  0x15   : > { %194 = vst [vmem:[%s165_s28 + $0xc] sm:$0xf] %v193_v3  ;;  %196 = vst [vmem:[%s165_s28 + $0x10] sm:$0xf] %v195_v4  ;;  %v199_v6 = vld [vmem:[%s171_s27 + $0x48] sm:$0xf] }
  0x16   : > { %198 = vst [vmem:[%s165_s28 + $0x14] sm:$0xf] %v197_v5  ;;  %v201_v7 = vld [vmem:[%s171_s27 + $0x54] sm:$0xf]  ;;  %200 = vst [vmem:[%s165_s28 + $0x18] sm:$0xf] %v199_v6 }
  0x17   : > { %202 = vst [vmem:[%s165_s28 + $0x1c] sm:$0xf] %v201_v7 }
  0x18 PF: > { %241 = sbr.rel (!%p2066_p3) target bundleno = 34 (0x22), region = 61  ;;  %s243_s29 = sand.u32 (%p2066_p3), 1, %s1994_s13  }
  0x19   : > { %s1796_s30 = smul.u32 (%p2066_p3), 96, %s2002_s15  ;;  %s1795_s4 = sshll.u32 (%p2066_p3), %s243_s29, 5 }
  0x1a   : > { %s245_s8 = scalar_lea.vmem (%p2066_p3), [#allocation6], %s1795_s4 }
  0x1b   : > { %s1700_s7 = scalar_lea.vmem (%p2066_p3), %s2492_s1, %s1796_s30 }
  0x1c   : > { %v1797_v8 = vld [vmem:[%s1700_s7 + $0x4] sm:$0xf] (%p2066_p3)  ;;  %v1798_v9 = vld [vmem:[%s1700_s7 + $0x10] sm:$0xf] (%p2066_p3)  ;;  %v1799_v10 = vld [vmem:[%s1700_s7 + $0x1c] sm:$0xf] (%p2066_p3) }
  0x1d   : > { %269 = vst [vmem:[%s245_s8] sm:$0xf] (%p2066_p3), %v1797_v8  ;;  %271 = vst [vmem:[%s245_s8 + $0x4] sm:$0xf] (%p2066_p3), %v1798_v9  ;;  %v1800_v11 = vld [vmem:[%s1700_s7 + $0x28] sm:$0xf] (%p2066_p3) }
  0x1e   : > { %273 = vst [vmem:[%s245_s8 + $0x8] sm:$0xf] (%p2066_p3), %v1799_v10  ;;  %v1801_v12 = vld [vmem:[%s1700_s7 + $0x34] sm:$0xf] (%p2066_p3)  ;;  %v1802_v13 = vld [vmem:[%s1700_s7 + $0x40] sm:$0xf] (%p2066_p3) }
  0x1f   : > { %275 = vst [vmem:[%s245_s8 + $0xc] sm:$0xf] %v1800_v11  ;;  %277 = vst [vmem:[%s245_s8 + $0x10] sm:$0xf] %v1801_v12  ;;  %v1803_v14 = vld [vmem:[%s1700_s7 + $0x4c] sm:$0xf] }
  0x20   : > { %279 = vst [vmem:[%s245_s8 + $0x14] sm:$0xf] %v1802_v13  ;;  %v1804_v15 = vld [vmem:[%s1700_s7 + $0x58] sm:$0xf]  ;;  %281 = vst [vmem:[%s245_s8 + $0x18] sm:$0xf] %v1803_v14 }
  0x21   : > { %283 = vst [vmem:[%s245_s8 + $0x1c] sm:$0xf] %v1804_v15 }
  0x22 PF: > { %322 = sbr.rel (!%p2066_p3) target bundleno = 44 (0x2c), region = 102  ;;  %s324_s9 = sand.u32 (%p2066_p3), 1, %s1994_s13  }
  0x23   : > { %s1806_s10 = smul.u32 (%p2066_p3), 96, %s2002_s15  ;;  %s1805_s11 = sshll.u32 (%p2066_p3), %s324_s9, 5 }
  0x24   : > { %s326_s23 = scalar_lea.vmem (%p2066_p3), [#allocation7], %s1805_s11 }
  0x25   : > { %s1708_s22 = scalar_lea.vmem (%p2066_p3), %s2493_s2, %s1806_s10 }
  0x26   : > { %v1807_v16 = vld [vmem:[%s1708_s22 + $0x8] sm:$0xf] (%p2066_p3)  ;;  %v1808_v17 = vld [vmem:[%s1708_s22 + $0x14] sm:$0xf] (%p2066_p3)  ;;  %v1809_v18 = vld [vmem:[%s1708_s22 + $0x20] sm:$0xf] (%p2066_p3) }
  0x27   : > { %350 = vst [vmem:[%s326_s23] sm:$0xf] (%p2066_p3), %v1807_v16  ;;  %352 = vst [vmem:[%s326_s23 + $0x4] sm:$0xf] (%p2066_p3), %v1808_v17  ;;  %v1810_v19 = vld [vmem:[%s1708_s22 + $0x2c] sm:$0xf] (%p2066_p3) }
  0x28   : > { %354 = vst [vmem:[%s326_s23 + $0x8] sm:$0xf] (%p2066_p3), %v1809_v18  ;;  %v1811_v20 = vld [vmem:[%s1708_s22 + $0x38] sm:$0xf] (%p2066_p3)  ;;  %v1812_v21 = vld [vmem:[%s1708_s22 + $0x44] sm:$0xf] (%p2066_p3) }
  0x29   : > { %356 = vst [vmem:[%s326_s23 + $0xc] sm:$0xf] %v1810_v19  ;;  %358 = vst [vmem:[%s326_s23 + $0x10] sm:$0xf] %v1811_v20  ;;  %v1813_v22 = vld [vmem:[%s1708_s22 + $0x50] sm:$0xf] }
  0x2a   : > { %360 = vst [vmem:[%s326_s23 + $0x14] sm:$0xf] %v1812_v21  ;;  %v1814_v23 = vld [vmem:[%s1708_s22 + $0x5c] sm:$0xf]  ;;  %362 = vst [vmem:[%s326_s23 + $0x18] sm:$0xf] %v1813_v22 }
  0x2b   : > { %364 = vst [vmem:[%s326_s23 + $0x1c] sm:$0xf] %v1814_v23 }
  0x2c PF: > { %p1815_p6 = scmp.ge.s32.totalorder %s2006_s16, 1  ;;  %p402_p7 = scmp.lt.s32.totalorder %s2006_s16, 9 }
  0x2e   : > { %p403_p8 = pnand %p1815_p6, %p402_p7 }
  0x2f   : > { %s409_s18 = sand.u32 (!%p403_p8), 1, %s1990_s12   ;;  %vm480_vm0 = vcmask (!%p403_p8), 64512   ;;  %v2008_v24 = vmov (!%p403_p8), 0.0   ;;  %vm558_vm1 = vcmask (!%p403_p8), 1041409   ;;  %vm561_vm2 = vcmask (!%p403_p8), 1042434   ;;  %s2012_s27 = smov (!%p403_p8), 8  }
  0x30   : > { %406 = sbr.rel (%p403_p8) target bundleno = 1513 (0x5e9), region = 143  ;;  %1846 = vmatprep.subr.bf16.mxu0 (!%p403_p8), %v2008_v24  ;;  %s2102_s24 = sshll.u32 (!%p403_p8), %s409_s18, 5  ;;  %481 = vst.msk [vmem:[#allocation4] sm:$0xff] (!%p403_p8), %vm480_vm0, %v2008_v24  ;;  %482 = vst.msk [vmem:[#allocation4 + $0x8] sm:$0xff] (!%p403_p8), %vm480_vm0, %v2008_v24  ;;  %1852 = vmatprep.subr.bf16.mxu1 (!%p403_p8), %v2008_v24  ;;  %vm564_vm3 = vcmask (!%p403_p8), 1043459   ;;  %vm567_vm4 = vcmask (!%p403_p8), 1044484  }
  0x31   : > { %483 = vst.msk [vmem:[#allocation4 + $0x10] sm:$0xff] (!%p403_p8), %vm480_vm0, %v2008_v24  ;;  %484 = vst.msk [vmem:[#allocation4 + $0x18] sm:$0xff] (!%p403_p8), %vm480_vm0, %v2008_v24  ;;  %s2114_s12 = scalar_lea.vmem (!%p403_p8), [#allocation6], %s2102_s24  ;;  %vm570_vm5 = vcmask (!%p403_p8), 1045509   ;;  %vm2009_vm6 = vmmov (!%p403_p8), 0   ;;  %vm573_vm7 = vcmask (!%p403_p8), 1046534  }
  0x32   : > { %v509_v25 = vld [vmem:[%s2114_s12] sm:$0x1] (!%p403_p8)  ;;  %v510_v26 = vld [vmem:[%s2114_s12 + $0x4] sm:$0x1] (!%p403_p8)  ;;  %v511_v27 = vld [vmem:[%s2114_s12 + $0x8] sm:$0x1] (!%p403_p8)  ;;  %1848 = vmatprep.mubr.msk.bf16.mxu0 (!%p403_p8), %vm2009_vm6, %v2008_v24  ;;  %1854 = vmatprep.mubr.msk.bf16.mxu1 (!%p403_p8), %vm2009_vm6, %v2008_v24 }
  0x33   : > { %v512_v28 = vld [vmem:[%s2114_s12 + $0xc] sm:$0x1] (!%p403_p8)  ;;  %v513_v29 = vld [vmem:[%s2114_s12 + $0x10] sm:$0x1] (!%p403_p8)  ;;  %v514_v30 = vld [vmem:[%s2114_s12 + $0x14] sm:$0x1] (!%p403_p8)  ;;  %v517_v31 = vpack.c.bf16 (!%p403_p8), %v509_v25, %v509_v25  ;;  %v518_v32 = vpack.c.bf16 (!%p403_p8), %v510_v26, %v510_v26  ;;  %v519_v33 = vpack.c.bf16 (!%p403_p8), %v511_v27, %v511_v27 }
  0x34   : > { %v515_v34 = vld [vmem:[%s2114_s12 + $0x18] sm:$0x1] (!%p403_p8)  ;;  %v516_v35 = vld [vmem:[%s2114_s12 + $0x1c] sm:$0x1] (!%p403_p8)  ;;  %v520_v36 = vpack.c.bf16 (!%p403_p8), %v512_v28, %v512_v28  ;;  %v521_v37 = vpack.c.bf16 (!%p403_p8), %v513_v29, %v513_v29  ;;  %v522_v38 = vpack.c.bf16 (!%p403_p8), %v514_v30, %v514_v30  ;;  %vm576_vm8 = vcmask (!%p403_p8), 1047559   ;;  %s2129_s25 = scalar_lea.vmem (!%p403_p8), [#allocation5], %s2102_s24 }
  0x35   : > { %v485_v39 = vld [vmem:[%s2129_s25] sm:$0x1] (!%p403_p8)  ;;  %v523_v40 = vpack.c.bf16 (!%p403_p8), %v515_v34, %v515_v34  ;;  %v524_v41 = vpack.c.bf16 (!%p403_p8), %v516_v35, %v516_v35  ;;  %v587_v42 = vunpack.c.l.b16 (!%p403_p8), %v517_v31  ;;  %v588_v43 = vunpack.c.l.b16 (!%p403_p8), %v518_v32  ;;  %v486_v44 = vld [vmem:[%s2129_s25 + $0x4] sm:$0x1] (!%p403_p8)  ;;  %v487_v45 = vld [vmem:[%s2129_s25 + $0x8] sm:$0x1] (!%p403_p8) }
  0x36   : > { %v589_v46 = vunpack.c.l.b16 (!%p403_p8), %v519_v33  ;;  %v590_v47 = vunpack.c.l.b16 (!%p403_p8), %v520_v36  ;;  %v591_v48 = vunpack.c.l.b16 (!%p403_p8), %v521_v37  ;;  %v592_v49 = vunpack.c.l.b16 (!%p403_p8), %v522_v38  ;;  %v488_v50 = vld [vmem:[%s2129_s25 + $0xc] sm:$0x1] (!%p403_p8)  ;;  %v489_v51 = vld [vmem:[%s2129_s25 + $0x10] sm:$0x1] (!%p403_p8)  ;;  %v490_v52 = vld [vmem:[%s2129_s25 + $0x14] sm:$0x1] (!%p403_p8) }
  0x37   : > { %v593_v53 = vunpack.c.l.b16 %v523_v40  ;;  %v594_v54 = vunpack.c.l.b16 %v524_v41  ;;  %v595_v55 = vrot.slane %v588_v43, 7  ;;  %v491_v56 = vld [vmem:[%s2129_s25 + $0x18] sm:$0x1]  ;;  %v493_v57 = vmul.f32 0.35355338, %v485_v39  ;;  %s2175_s26 = scalar_lea.vmem [#allocation7], %s2102_s24 }
  0x38   : > { %v597_v58 = vrot.slane %v589_v46, 6  ;;  %v599_v59 = vrot.slane %v590_v47, 5  ;;  %v601_v60 = vrot.slane %v591_v48, 4  ;;  %v603_v61 = vrot.slane %v592_v49, 3  ;;  %v492_v62 = vld [vmem:[%s2129_s25 + $0x1c] sm:$0x1] }
  0x39   : > { %v596_v63 = vsel %vm558_vm1, %v595_v55, %v587_v42  ;;  %v605_v0 = vrot.slane %v593_v53, 2  ;;  %v607_v1 = vrot.slane %v594_v54, 1  ;;  %v494_v2 = vmul.f32 0.35355338, %v486_v44  ;;  %s2013_s28 = smov 16   ;;  %s2014_s29 = smov 24  }
  0x3a   : > { %v598_v3 = vsel %vm561_vm2, %v597_v58, %v596_v63  ;;  %v495_v4 = vmul.f32 0.35355338, %v487_v45  ;;  %v496_v5 = vmul.f32 0.35355338, %v488_v50  ;;  %v497_v6 = vmul.f32 0.35355338, %v489_v51 }
  0x3b   : > { %v600_v7 = vsel %vm564_vm3, %v599_v59, %v598_v3  ;;  %v498_v8 = vmul.f32 0.35355338, %v490_v52  ;;  %v499_v9 = vmul.f32 0.35355338, %v491_v56  ;;  %v500_v10 = vmul.f32 0.35355338, %v492_v62 }
  0x3c   : > { %v602_v11 = vsel %vm567_vm4, %v601_v60, %v600_v7  ;;  %v501_v12 = vpack.c.bf16 %v493_v57, %v493_v57  ;;  %v502_v13 = vpack.c.bf16 %v494_v2, %v494_v2  ;;  %v503_v14 = vpack.c.bf16 %v495_v4, %v495_v4  ;;  %v526_v56 = vld [vmem:[%s2175_s26 + $0x4] sm:$0x1]  ;;  %v527_v57 = vld [vmem:[%s2175_s26 + $0x8] sm:$0x1]  ;;  %v525_v59 = vld [vmem:[%s2175_s26] sm:$0x1] }
  0x3d   : > { %v604_v15 = vsel %vm570_vm5, %v603_v61, %v602_v11  ;;  %v504_v16 = vpack.c.bf16 %v496_v5, %v496_v5  ;;  %v505_v17 = vpack.c.bf16 %v497_v6, %v497_v6  ;;  %v506_v18 = vpack.c.bf16 %v498_v8, %v498_v8  ;;  %v528_v60 = vld [vmem:[%s2175_s26 + $0xc] sm:$0x1]  ;;  %v529_v63 = vld [vmem:[%s2175_s26 + $0x10] sm:$0x1]  ;;  %v530_v3 = vld [vmem:[%s2175_s26 + $0x14] sm:$0x1] }
  0x3e   : > { %v606_v19 = vsel %vm573_vm7, %v605_v0, %v604_v15  ;;  %v507_v20 = vpack.c.bf16 %v499_v9, %v499_v9  ;;  %v508_v21 = vpack.c.bf16 %v500_v10, %v500_v10  ;;  %v549_v22 = vunpack.c.l.b16 %v501_v12  ;;  %v531_v7 = vld [vmem:[%s2175_s26 + $0x18] sm:$0x1]  ;;  %p459_p9 = scmp.lt.s32.totalorder %s1998_s14, 7 }
  0x3f   : > { %v608_v23 = vsel %vm576_vm8, %v607_v1, %v606_v19  ;;  %v550_v25 = vunpack.c.l.b16 %v502_v13  ;;  %v551_v26 = vunpack.c.l.b16 %v503_v14  ;;  %v552_v27 = vunpack.c.l.b16 %v504_v16  ;;  %v532_v13 = vld [vmem:[%s2175_s26 + $0x1c] sm:$0x1] }
  0x40   : > { %v609_v28 = vpack.c.b16 %v608_v23, %v608_v23  ;;  %v553_v29 = vunpack.c.l.b16 %v505_v17  ;;  %v554_v30 = vunpack.c.l.b16 %v506_v18  ;;  %v555_v31 = vunpack.c.l.b16 %v507_v20  ;;  %s2503_s14 = smov (!%p459_p9, %s1998_s14), 7 }
  0x41   : > { %v556_v32 = vunpack.c.l.b16 %v508_v21  ;;  %v557_v33 = vrot.slane %v550_v25, 7  ;;  %v560_v34 = vrot.slane %v551_v26, 6  ;;  %v563_v35 = vrot.slane %v552_v27, 5  ;;  %s1819_s30 = sshll.u32 %s2503_s14, 3 }
  0x42   : > { %v615_v36 = vsel %vm480_vm0, %v609_v28, 0  ;;  %v566_v37 = vrot.slane %v553_v29, 4  ;;  %v569_v39 = vrot.slane %v554_v30, 3  ;;  %v572_v41 = vrot.slane %v555_v31, 2  ;;  %s465_s6 = scalar_lea.vmem %s2494_s3, %s1819_s30 }
  0x43   : > { %1847 = vmatpush3.bf16.xpose.msra.mxu0 %v615_v36  ;;  %v559_v38 = vsel %vm558_vm1, %v557_v33, %v549_v22  ;;  %v575_v43 = vrot.slane %v556_v32, 1  ;;  %vm471_vm9 = vcmask 7168   ;;  %v2010_v49 = vmov -inf  }
  0x44   : > { %v562_v40 = vsel %vm561_vm2, %v560_v34, %v559_v38  ;;  %1864 = vmatprep.subr.bf16.mxu0 %v2008_v24  ;;  %472 = vst.msk [vmem:[#allocation2] sm:$0xff] %vm471_vm9, %v2010_v49  ;;  %473 = vst.msk [vmem:[#allocation2 + $0x8] sm:$0xff] %vm471_vm9, %v2010_v49  ;;  %v2011_v55 = vmov 0   ;;  %v534_v58 = vpack.c.bf16 %v526_v56, %v526_v56  ;;  %v535_v61 = vpack.c.bf16 %v527_v57, %v527_v57  ;;  %v796_v38 = vld [vmem:[%s2114_s12 + $0x9] sm:$0x1] }
  0x45   : > { %v565_v42 = vsel %vm564_vm3, %v563_v35, %v562_v40  ;;  %474 = vst.msk [vmem:[#allocation2 + $0x10] sm:$0xff] %vm471_vm9, %v2010_v49  ;;  %475 = vst.msk [vmem:[#allocation2 + $0x18] sm:$0xff] %vm471_vm9, %v2010_v49  ;;  %1942 = vset.pattern.permute.xlu0 %v2011_v55  ;;  %1943 = vset.pattern.permute.xlu1 %v2011_v55  ;;  %v533_v0 = vpack.c.bf16 %v525_v59, %v525_v59  ;;  %vm723_vm10 = vcmask 1043456   ;;  %v794_v40 = vld [vmem:[%s2114_s12 + $0x1] sm:$0x1]  ;;  %vm1656_vm11 = vcmask 130048  }
  0x46   : > { %v568_v44 = vsel %vm567_vm4, %v566_v37, %v565_v42  ;;  %476 = vst.msk [vmem:[#allocation3] sm:$0xff] %vm471_vm9, %v2008_v24  ;;  %477 = vst.msk [vmem:[#allocation3 + $0x8] sm:$0xff] %vm471_vm9, %v2008_v24  ;;  %v536_v1 = vpack.c.bf16 %v528_v60, %v528_v60  ;;  %v698_v2 = vunpack.c.l.b16 %v534_v58  ;;  %v537_v4 = vpack.c.bf16 %v529_v63, %v529_v63  ;;  %v795_v37 = vld [vmem:[%s2114_s12 + $0x5] sm:$0x1]  ;;  %v770_v57 = vld [vmem:[%s2129_s25 + $0x1] sm:$0x1] }
  0x47   : > { %v571_v45 = vsel %vm570_vm5, %v569_v39, %v568_v44  ;;  %478 = vst.msk [vmem:[#allocation3 + $0x10] sm:$0xff] %vm471_vm9, %v2008_v24  ;;  %479 = vst.msk [vmem:[#allocation3 + $0x18] sm:$0xff] %vm471_vm9, %v2008_v24  ;;  %v699_v5 = vunpack.c.l.b16 %v535_v61  ;;  %v538_v8 = vpack.c.bf16 %v530_v3, %v530_v3  ;;  %v697_v9 = vunpack.c.l.b16 %v533_v0  ;;  %v773_v60 = vld [vmem:[%s2129_s25 + $0xd] sm:$0x1]  ;;  %v800_v63 = vld [vmem:[%s2114_s12 + $0x19] sm:$0x1] }
  0x48   : > { %v574_v46 = vsel %vm573_vm7, %v572_v41, %v571_v45  ;;  %v700_v10 = vunpack.c.l.b16 %v536_v1  ;;  %v705_v11 = vrot.slane %v698_v2, 7  ;;  %v539_v14 = vpack.c.bf16 %v531_v7, %v531_v7  ;;  %v797_v41 = vld [vmem:[%s2114_s12 + $0xd] sm:$0x1]  ;;  %v798_v45 = vld [vmem:[%s2114_s12 + $0x11] sm:$0x1] }
  0x49   : > { %v577_v47 = vsel %vm576_vm8, %v575_v43, %v574_v46  ;;  %v701_v15 = vunpack.c.l.b16 %v537_v4  ;;  %v707_v16 = vrot.slane %v699_v5, 6  ;;  %v540_v17 = vpack.c.bf16 %v532_v13, %v532_v13  ;;  %v774_v5 = vld [vmem:[%s2129_s25 + $0x11] sm:$0x1]  ;;  %v1073_v7 = vld [vmem:[%s2114_s12 + $0x6] sm:$0x1] }
  0x4a   : > { %v578_v48 = vpack.c.b16 %v577_v47, %v577_v47  ;;  %v702_v18 = vunpack.c.l.b16 %v538_v8  ;;  %v706_v19 = vsel %vm558_vm1, %v705_v11, %v697_v9  ;;  %v709_v20 = vrot.slane %v700_v10, 5  ;;  %v771_v47 = vld [vmem:[%s2129_s25 + $0x5] sm:$0x1]  ;;  %v801_v8 = vld [vmem:[%s2114_s12 + $0x1d] sm:$0x1] }
  0x4b   : > { %v2181_v62 = vld [vmem:[#allocation2] sm:$0xff]  ;;  %v703_v22 = vunpack.c.l.b16 %v539_v14  ;;  %v708_v23 = vsel %vm561_vm2, %v707_v16, %v706_v19  ;;  %v711_v25 = vrot.slane %v701_v15, 4  ;;  %v704_v26 = vunpack.c.l.b16 %v540_v17  ;;  %v775_v17 = vld [vmem:[%s2129_s25 + $0x15] sm:$0x1]  ;;  %v1074_v19 = vld [vmem:[%s2114_s12 + $0xa] sm:$0x1] }
  0x4c   : > { %1849 = vmatmul.mubr.msk.bf16.vlgmr.msra.gmra.mrb[0].mxu0 %vm480_vm0, %v578_v48  ;;  %v710_v27 = vsel %vm564_vm3, %v709_v20, %v708_v23  ;;  %v713_v28 = vrot.slane %v702_v18, 3  ;;  %v803_v39 = vpack.c.bf16 %v795_v37, %v795_v37  ;;  %v804_v42 = vpack.c.bf16 %v796_v38, %v796_v38  ;;  %v799_v48 = vld [vmem:[%s2114_s12 + $0x15] sm:$0x1] }
  0x4d   : > { %1866 = vmatprep.mubr.msk.bf16.mxu0 %vm2009_vm6, %v2008_v24  ;;  %v712_v29 = vsel %vm567_vm4, %v711_v25, %v710_v27  ;;  %v715_v30 = vrot.slane %v703_v22, 2  ;;  %v717_v32 = vrot.slane %v704_v26, 1  ;;  %v802_v43 = vpack.c.bf16 %v794_v40, %v794_v40  ;;  %v1072_v26 = vld [vmem:[%s2114_s12 + $0x2] sm:$0x1] }
  0x4e   : > { %v714_v31 = vsel %vm570_vm5, %v713_v28, %v712_v29  ;;  %v866_v44 = vunpack.c.l.b16 %v803_v39  ;;  %v805_v46 = vpack.c.bf16 %v797_v41, %v797_v41  ;;  %v867_v49 = vunpack.c.l.b16 %v804_v42  ;;  %v776_v29 = vld [vmem:[%s2129_s25 + $0x19] sm:$0x1]  ;;  %v777_v41 = vld [vmem:[%s2129_s25 + $0x1d] sm:$0x1] }
  0x4f   : > { %v716_v33 = vsel %vm573_vm7, %v715_v30, %v714_v31  ;;  %v779_v55 = vmul.f32 0.35355338, %v771_v47  ;;  %v807_v58 = vpack.c.bf16 %v799_v48, %v799_v48  ;;  %v778_v2 = vmul.f32 0.35355338, %v770_v57 }
  0x50   : > { %v718_v34 = vsel %vm576_vm8, %v717_v32, %v716_v33  ;;  %v868_v56 = vunpack.c.l.b16 %v805_v46  ;;  %v875_v59 = vrot.slane %v867_v49, 6  ;;  %v808_v9 = vpack.c.bf16 %v800_v63, %v800_v63  ;;  %v1076_v46 = vld [vmem:[%s2114_s12 + $0x12] sm:$0x1] }
  0x51   : > { %v719_v35 = vpack.c.b16 %v718_v34, %v718_v34  ;;  %v787_v3 = vpack.c.bf16 %v779_v55, %v779_v55  ;;  %v870_v10 = vunpack.c.l.b16 %v807_v58  ;;  %v786_v15 = vpack.c.bf16 %v778_v2, %v778_v2  ;;  %v1075_v34 = vld [vmem:[%s2114_s12 + $0xe] sm:$0x1] }
  0x52   : > { %v877_v4 = vrot.slane %v868_v56, 5  ;;  %v782_v18 = vmul.f32 0.35355338, %v774_v5  ;;  %v1081_v20 = vpack.c.bf16 %v1073_v7, %v1073_v7  ;;  %v809_v22 = vpack.c.bf16 %v801_v8, %v801_v8  ;;  %v1078_v5 = vld [vmem:[%s2114_s12 + $0x1a] sm:$0x1] }
  0x53   : > { %v725_v36 = vsel %vm723_vm10, %v719_v35, 0  ;;  %v835_v16 = vunpack.c.l.b16 %v787_v3  ;;  %v871_v27 = vunpack.c.l.b16 %v808_v9  ;;  %v881_v28 = vrot.slane %v870_v10, 3 }
  0x54   : > { %1853 = vmatpush3.bf16.msra.mxu1 %v725_v36  ;;  %v783_v31 = vmul.f32 0.35355338, %v775_v17  ;;  %v834_v32 = vunpack.c.l.b16 %v786_v15  ;;  %v1082_v35 = vpack.c.bf16 %v1074_v19, %v1074_v19  ;;  %v790_v37 = vpack.c.bf16 %v782_v18, %v782_v18 }
  0x55   : > { %1858 = vmatprep.subr.bf16.mxu1 %v2008_v24  ;;  %v842_v33 = vrot.slane %v835_v16, 7  ;;  %v1080_v38 = vpack.c.bf16 %v1072_v26, %v1072_v26  ;;  %v1144_v39 = vunpack.c.l.b16 %v1081_v20  ;;  %v872_v40 = vunpack.c.l.b16 %v809_v22  ;;  %v1049_v16 = vld [vmem:[%s2129_s25 + $0x6] sm:$0x1]  ;;  %v1048_v26 = vld [vmem:[%s2129_s25 + $0x2] sm:$0x1] }
  0x56   : > { %v1083_v47 = vpack.c.bf16 %v1075_v34, %v1075_v34  ;;  %v791_v49 = vpack.c.bf16 %v783_v31, %v783_v31  ;;  %v785_v57 = vmul.f32 0.35355338, %v777_v41  ;;  %v1086_v18 = vpack.c.bf16 %v1078_v5, %v1078_v5 }
  0x57   : > { %v1151_v55 = vrot.slane %v1144_v39, 7  ;;  %v885_v56 = vrot.slane %v872_v40, 1  ;;  %v1052_v40 = vld [vmem:[%s2129_s25 + $0x12] sm:$0x1]  ;;  %v1056_v41 = vmul.f32 0.35355338, %v1048_v26 }
  0x58   : > { %v839_v2 = vunpack.c.l.b16 %v791_v49  ;;  %v793_v10 = vpack.c.bf16 %v785_v57, %v785_v57  ;;  %vm1658_vm12 = vcmask 195584   ;;  %vm1660_vm13 = vcmask 261120  }
  0x5a   : > { %v850_v17 = vrot.slane %v839_v2, 3  ;;  %v1060_v2 = vmul.f32 0.35355338, %v1052_v40 }
 0x11f   : > { %v2170_v50 = vpop.f32.mrb[0].mxu0 }
 0x120   : > { %v1850_v51 = vpop.f32.mrb[1].mxu0  ;;  %v658_v52 = vsel %vm480_vm0, %v2170_v50, -inf }
 0x121   : > { %659 = vmax.xlane.f32.xlu0 %v658_v52  ;;  %v654_v53 = vpop.f32.mrb[2].mxu0  ;;  %v806_v51 = vpack.c.bf16 %v798_v45, %v798_v45  ;;  %v865_v52 = vunpack.c.l.b16 %v802_v43  ;;  %v883_v43 = vrot.slane %v871_v27, 2  ;;  %v2243_v27 = vunpack.c.l.b16 %v793_v10  ;;  %v1328_v10 = vld [vmem:[%s2129_s25 + $0xb] sm:$0x1] }
 0x122   : > { %v1851_v54 = vpop.f32.mrb[3].mxu0  ;;  %v873_v53 = vrot.slane %v866_v44, 7  ;;  %v784_v44 = vmul.f32 0.35355338, %v776_v29  ;;  %v1057_v29 = vmul.f32 0.35355338, %v1049_v16 }
 0x123   : > { %v772_v54 = vld [vmem:[%s2129_s25 + $0x9] sm:$0x1]  ;;  %v869_v0 = vunpack.c.l.b16 %v806_v51  ;;  %v843_v51 = vsel %vm558_vm1, %v842_v33, %v834_v32  ;;  %v1050_v33 = vld [vmem:[%s2129_s25 + $0xa] sm:$0x1] }
 0x124   : > { %v780_v61 = vmul.f32 0.35355338, %v772_v54  ;;  %v874_v1 = vsel %vm558_vm1, %v873_v53, %v865_v52  ;;  %v1145_v52 = vunpack.c.l.b16 %v1082_v35  ;;  %v838_v53 = vunpack.c.l.b16 %v790_v37  ;;  %v1051_v37 = vld [vmem:[%s2129_s25 + $0xe] sm:$0x1] }
 0x125   : > { %v876_v11 = vsel %vm561_vm2, %v875_v59, %v874_v1  ;;  %v879_v14 = vrot.slane %v869_v0, 4  ;;  %v1143_v54 = vunpack.c.l.b16 %v1080_v38  ;;  %v1077_v59 = vld [vmem:[%s2114_s12 + $0x16] sm:$0x1]  ;;  %v792_v63 = vpack.c.bf16 %v784_v44, %v784_v44 }
 0x126   : > { %v788_v13 = vpack.c.bf16 %v780_v61, %v780_v61  ;;  %v878_v23 = vsel %vm564_vm3, %v877_v4, %v876_v11  ;;  %v1146_v1 = vunpack.c.l.b16 %v1083_v47  ;;  %v1153_v3 = vrot.slane %v1145_v52, 6  ;;  %v1054_v52 = vld [vmem:[%s2129_s25 + $0x1a] sm:$0x1] }
 0x127   : > { %v880_v36 = vsel %vm567_vm4, %v879_v14, %v878_v23  ;;  %v848_v4 = vrot.slane %v838_v53, 4  ;;  %v1085_v7 = vpack.c.bf16 %v1077_v59, %v1077_v59  ;;  %v1152_v8 = vsel %vm558_vm1, %v1151_v55, %v1143_v54  ;;  %v1353_v53 = vld [vmem:[%s2114_s12 + $0xf] sm:$0x1] }
 0x128   : > { %v836_v30 = vunpack.c.l.b16 %v788_v13  ;;  %v882_v48 = vsel %vm570_vm5, %v881_v28, %v880_v36  ;;  %v840_v14 = vunpack.c.l.b16 %v792_v63  ;;  %v1155_v15 = vrot.slane %v1146_v1, 5 }
 0x129   : > { %v884_v61 = vsel %vm573_vm7, %v883_v43, %v882_v48  ;;  %v1154_v20 = vsel %vm561_vm2, %v1153_v3, %v1152_v8  ;;  %v1149_v35 = vunpack.c.l.b16 %v1086_v18  ;;  %v854_v44 = vrot.slane %v2243_v27, 1  ;;  %v1350_v48 = vld [vmem:[%s2114_s12 + $0x3] sm:$0x1] }
 0x12a   : > { %v844_v45 = vrot.slane %v836_v30, 6  ;;  %v886_v9 = vsel %vm576_vm8, %v885_v56, %v884_v61  ;;  %v1351_v30 = vld [vmem:[%s2114_s12 + $0x7] sm:$0x1]  ;;  %v852_v31 = vrot.slane %v840_v14, 2  ;;  %v1156_v32 = vsel %vm564_vm3, %v1155_v15, %v1154_v20  ;;  %v1355_v20 = vld [vmem:[%s2114_s12 + $0x17] sm:$0x1] }
 0x12b   : > { %v887_v22 = vpack.c.b16 %v886_v9, %v886_v9  ;;  %v1359_v43 = vpack.c.bf16 %v1351_v30, %v1351_v30  ;;  %v1065_v47 = vpack.c.bf16 %v1057_v29, %v1057_v29  ;;  %v1161_v54 = vrot.slane %v1149_v35, 2 }
 0x12c   : > { %v845_v0 = vsel %vm561_vm2, %v844_v45, %v843_v51  ;;  %v1053_v51 = vld [vmem:[%s2129_s25 + $0x16] sm:$0x1]  ;;  %v1059_v56 = vmul.f32 0.35355338, %v1051_v37  ;;  %v1064_v61 = vpack.c.bf16 %v1056_v41, %v1056_v41  ;;  %v1358_v63 = vpack.c.bf16 %v1350_v48, %v1350_v48 }
 0x12d   : > { %v2253_v38 = vsel %vm480_vm0, %v887_v22, 0  ;;  %v1061_v3 = vmul.f32 0.35355338, %v1053_v51  ;;  %v1113_v5 = vunpack.c.l.b16 %v1065_v47  ;;  %v2272_v8 = vmul.f32 0.35355338, %v1054_v52 }
 0x12e   : > { %v1361_v9 = vpack.c.bf16 %v1353_v53, %v1353_v53  ;;  %v1067_v15 = vpack.c.bf16 %v1059_v56, %v1059_v56  ;;  %v1421_v22 = vunpack.c.l.b16 %v1358_v63  ;;  %v1336_v29 = vmul.f32 0.35355338, %v1328_v10  ;;  %v1357_v52 = vld [vmem:[%s2114_s12 + $0x1f] sm:$0x1] }
 0x12f   : > { %v1070_v35 = vpack.c.bf16 %v2272_v8, %v2272_v8  ;;  %v1363_v40 = vpack.c.bf16 %v1355_v20, %v1355_v20 }
 0x130   : > { %v1424_v30 = vunpack.c.l.b16 %v1361_v9  ;;  %v1115_v37 = vunpack.c.l.b16 %v1067_v15  ;;  %v1344_v48 = vpack.c.bf16 %v1336_v29, %v1336_v29 }
 0x132   : > { %v1433_v53 = vrot.slane %v1424_v30, 5 }
 0x1ae   : > { %v660_v6 = vpop.xlane.xlu0 %659 }
 0x1af   : > { %v2187_v12 = vmax.f32 %v2181_v62, %v660_v6  ;;  %v781_v6 = vmul.f32 0.35355338, %v773_v60  ;;  %v1084_v60 = vpack.c.bf16 %v1076_v46, %v1076_v46  ;;  %v1058_v46 = vmul.f32 0.35355338, %v1050_v33 }
 0x1b0   : > { %v1068_v33 = vpack.c.bf16 %v1060_v2, %v1060_v2 }
 0x1b1   : > { %v662_v21 = vsub.f32 %v2181_v62, %v2187_v12  ;;  %769 = vst.msk [vmem:[#allocation2] sm:$0xff] %vm471_vm9, %v2187_v12  ;;  %667 = vperm.xlu0 %1942, %v2187_v12   ;;  %v789_v25 = vpack.c.bf16 %v781_v6, %v781_v6  ;;  %v1079_v6 = vld [vmem:[%s2114_s12 + $0x1e] sm:$0x1]  ;;  %v1147_v13 = vunpack.c.l.b16 %v1084_v60 }
 0x1b2   : > { %v1087_v19 = vpack.c.bf16 %v1079_v6, %v1079_v6  ;;  %v1055_v60 = vld [vmem:[%s2129_s25 + $0x1e] sm:$0x1]  ;;  %v1354_v6 = vld [vmem:[%s2114_s12 + $0x13] sm:$0x1] }
 0x1b3   : > { %v837_v42 = vunpack.c.l.b16 %v789_v25  ;;  %v1148_v25 = vunpack.c.l.b16 %v1085_v7  ;;  %v1157_v28 = vrot.slane %v1147_v13, 4  ;;  %v2276_v14 = vmul.f32 0.35355338, %v1055_v60  ;;  %v1331_v60 = vld [vmem:[%s2129_s25 + $0x17] sm:$0x1] }
 0x1b4   : > { %v2249_v36 = vunpack.c.l.b16 %v1087_v19  ;;  %v1112_v19 = vunpack.c.l.b16 %v1064_v61  ;;  %v1362_v26 = vpack.c.bf16 %v1354_v6, %v1354_v6  ;;  %v1339_v8 = vmul.f32 0.35355338, %v1331_v60 }
 0x1b5   : > { %v846_v58 = vrot.slane %v837_v42, 5  ;;  %v1159_v39 = vrot.slane %v1148_v25, 3  ;;  %v1352_v42 = vld [vmem:[%s2114_s12 + $0xb] sm:$0x1]  ;;  %v1158_v45 = vsel %vm567_vm4, %v1157_v28, %v1156_v32  ;;  %v1120_v25 = vrot.slane %v1113_v5, 7 }
 0x1b6   : > { %v1163_v55 = vrot.slane %v2249_v36, 1  ;;  %v1360_v57 = vpack.c.bf16 %v1352_v42, %v1352_v42  ;;  %v1329_v28 = vld [vmem:[%s2129_s25 + $0xf] sm:$0x1]  ;;  %v1330_v42 = vld [vmem:[%s2129_s25 + $0x13] sm:$0x1]  ;;  %v1425_v47 = vunpack.c.l.b16 %v1362_v26  ;;  %v1392_v5 = vunpack.c.l.b16 %v1344_v48 }
 0x1b7   : > { %v847_v11 = vsel %vm564_vm3, %v846_v58, %v845_v0  ;;  %v1327_v58 = vld [vmem:[%s2129_s25 + $0x7] sm:$0x1]  ;;  %v1160_v59 = vsel %vm570_vm5, %v1159_v39, %v1158_v45  ;;  %v1422_v0 = vunpack.c.l.b16 %v1359_v43  ;;  %v1356_v39 = vld [vmem:[%s2114_s12 + $0x1b] sm:$0x1]  ;;  %v1337_v43 = vmul.f32 0.35355338, %v1329_v28 }
 0x1b8   : > { %v849_v23 = vsel %vm567_vm4, %v848_v4, %v847_v11  ;;  %v1066_v4 = vpack.c.bf16 %v1058_v46, %v1058_v46  ;;  %v1335_v11 = vmul.f32 0.35355338, %v1327_v58  ;;  %v1162_v13 = vsel %vm573_vm7, %v1161_v54, %v1160_v59 }
 0x1b9   : > { %v851_v34 = vsel %vm570_vm5, %v850_v17, %v849_v23  ;;  %v1423_v16 = vunpack.c.l.b16 %v1360_v57  ;;  %v1326_v17 = vld [vmem:[%s2129_s25 + $0x3] sm:$0x1]  ;;  %v1429_v23 = vrot.slane %v1422_v0, 7  ;;  %v2287_v45 = vsel %vm576_vm8, %v1163_v55, %v1162_v13 }
 0x1ba   : > { %v2261_v49 = vsel %vm573_vm7, %v852_v31, %v851_v34  ;;  %v1334_v31 = vmul.f32 0.35355338, %v1326_v17  ;;  %v1343_v32 = vpack.c.bf16 %v1335_v11, %v1335_v11  ;;  %v1069_v34 = vpack.c.bf16 %v1061_v3, %v1061_v3 }
 0x1bb   : > { %v1431_v36 = vrot.slane %v1423_v16, 6  ;;  %v1430_v41 = vsel %vm558_vm1, %v1429_v23, %v1421_v22  ;;  %v1121_v51 = vsel %vm558_vm1, %v1120_v25, %v1112_v19  ;;  %v1116_v57 = vunpack.c.l.b16 %v1068_v33  ;;  %v1333_v25 = vld [vmem:[%s2129_s25 + $0x1f] sm:$0x1] }
 0x1bc   : > { %v1342_v54 = vpack.c.bf16 %v1334_v31, %v1334_v31  ;;  %v1391_v56 = vunpack.c.l.b16 %v1343_v32  ;;  %v1364_v58 = vpack.c.bf16 %v1356_v39, %v1356_v39  ;;  %v1338_v61 = vmul.f32 0.35355338, %v1330_v42 }
 0x1bd   : > { %v1432_v59 = vsel %vm561_vm2, %v1431_v36, %v1430_v41  ;;  %v1117_v63 = vunpack.c.l.b16 %v1069_v34  ;;  %v1124_v0 = vrot.slane %v1115_v37, 5  ;;  %v1426_v55 = vunpack.c.l.b16 %v1363_v40 }
 0x1be   : > { %v1365_v3 = vpack.c.bf16 %v1357_v52, %v1357_v52  ;;  %v1434_v6 = vsel %vm564_vm3, %v1433_v53, %v1432_v59  ;;  %v1390_v9 = vunpack.c.l.b16 %v1342_v54  ;;  %v1398_v10 = vrot.slane %v1391_v56, 7 }
 0x1bf   : > { %v1071_v11 = vpack.c.bf16 %v2276_v14, %v2276_v14  ;;  %v1126_v13 = vrot.slane %v1116_v57, 4  ;;  %v1427_v15 = vunpack.c.l.b16 %v1364_v58  ;;  %v1346_v16 = vpack.c.bf16 %v1338_v61, %v1338_v61 }
 0x1c0   : > { %v1437_v20 = vrot.slane %v1426_v55, 3  ;;  %v1400_v28 = vrot.slane %v1392_v5, 6  ;;  %v1128_v29 = vrot.slane %v1117_v63, 3  ;;  %v1428_v14 = vunpack.c.l.b16 %v1365_v3 }
 0x1c1   : > { %v1347_v30 = vpack.c.bf16 %v1339_v8, %v1339_v8  ;;  %v1399_v31 = vsel %vm558_vm1, %v1398_v10, %v1390_v9  ;;  %v855_v32 = vsel %vm576_vm8, %v854_v44, %v2261_v49  ;;  %v1439_v34 = vrot.slane %v1427_v15, 2 }
 0x1c2   : > { %v1119_v36 = vunpack.c.l.b16 %v1071_v11  ;;  %v1341_v39 = vmul.f32 0.35355338, %v1333_v25  ;;  %v1165_v27 = vpack.c.b16 %v2287_v45, %v2287_v45  ;;  %v1401_v41 = vsel %vm561_vm2, %v1400_v28, %v1399_v31 }
 0x1c4   : > { %v1349_v52 = vpack.c.bf16 %v1341_v39, %v1341_v39  ;;  %v1170_v54 = vsel %vm480_vm0, %v1165_v27, 0  ;;  %v814_v27 = vld [vmem:[%s2175_s26 + $0x11] sm:$0x1] }
 0x1c6   : > { %v1397_v61 = vunpack.c.l.b16 %v1349_v52  ;;  %v2371_v52 = vld [vmem:[#allocation2 + $0x10] sm:$0xff] }
 0x230   : > { %v668_v1 = vpop.permute.xlu0 %667 }
 0x231   : > { %v670_v7 = vsub.f32 %v2170_v50, %v668_v1  ;;  %v1114_v50 = vunpack.c.l.b16 %v1066_v4  ;;  %v1345_v1 = vpack.c.bf16 %v1337_v43, %v1337_v43  ;;  %v1435_v4 = vrot.slane %v1425_v47, 4 }
 0x232   : > { %v1395_v43 = vunpack.c.l.b16 %v1347_v30  ;;  %v2354_v30 = vld [vmem:[#allocation2 + $0x8] sm:$0xff] }
 0x233   : > { %v671_v18 = vmul.f32 1.442695, %v670_v7  ;;  %v1122_v46 = vrot.slane %v1114_v50, 6  ;;  %v1332_v7 = vld [vmem:[%s2129_s25 + $0x1b] sm:$0x1]  ;;  %v1393_v22 = vunpack.c.l.b16 %v1345_v1  ;;  %v1436_v50 = vsel %vm567_vm4, %v1435_v4, %v1434_v6 }
 0x234   : > { %v1340_v26 = vmul.f32 0.35355338, %v1332_v7  ;;  %v1438_v37 = vsel %vm570_vm5, %v1437_v20, %v1436_v50  ;;  %v1406_v58 = vrot.slane %v1395_v43, 3 }
 0x235   : > { %1944 = vpow2.f32 %v671_v18  ;;  %v1123_v2 = vsel %vm561_vm2, %v1122_v46, %v1121_v51  ;;  %v1118_v18 = vunpack.c.l.b16 %v1070_v35  ;;  %v1394_v35 = vunpack.c.l.b16 %v1346_v16 }
 0x236   : > { %v1125_v19 = vsel %vm564_vm3, %v1124_v0, %v1123_v2  ;;  %v1402_v40 = vrot.slane %v1393_v22, 5  ;;  %v1348_v49 = vpack.c.bf16 %v1340_v26, %v1340_v26  ;;  %v856_v46 = vpack.c.b16 %v855_v32, %v855_v32  ;;  %v811_v32 = vld [vmem:[%s2175_s26 + $0x5] sm:$0x1] }
 0x237   : > { %v1127_v33 = vsel %vm567_vm4, %v1126_v13, %v1125_v19  ;;  %v1130_v44 = vrot.slane %v1118_v18, 2  ;;  %v1440_v47 = vsel %vm573_vm7, %v1439_v34, %v1438_v37  ;;  %v1404_v48 = vrot.slane %v1394_v35, 4  ;;  %v812_v34 = vld [vmem:[%s2175_s26 + $0x9] sm:$0x1]  ;;  %v813_v37 = vld [vmem:[%s2175_s26 + $0xd] sm:$0x1] }
 0x238   : > { %v1129_v42 = vsel %vm570_vm5, %v1128_v29, %v1127_v33  ;;  %v1132_v51 = vrot.slane %v1119_v36, 1  ;;  %v1403_v53 = vsel %vm564_vm3, %v1402_v40, %v1401_v41  ;;  %v1396_v56 = vunpack.c.l.b16 %v1348_v49  ;;  %v810_v36 = vld [vmem:[%s2175_s26 + $0x1] sm:$0x1] }
 0x239   : > { %v1131_v45 = vsel %vm573_vm7, %v1130_v44, %v1129_v42  ;;  %v1405_v59 = vsel %vm567_vm4, %v1404_v48, %v1403_v53  ;;  %v1410_v2 = vrot.slane %v1397_v61, 1  ;;  %v819_v35 = vpack.c.bf16 %v811_v32, %v811_v32  ;;  %v815_v42 = vld [vmem:[%s2175_s26 + $0x15] sm:$0x1]  ;;  %v817_v53 = vld [vmem:[%s2175_s26 + $0x1d] sm:$0x1] }
 0x23a   : > { %v1133_v60 = vsel %vm576_vm8, %v1132_v51, %v1131_v45  ;;  %v1408_v0 = vrot.slane %v1396_v56, 2  ;;  %v1407_v55 = vsel %vm570_vm5, %v1406_v58, %v1405_v59  ;;  %v820_v39 = vpack.c.bf16 %v812_v34, %v812_v34  ;;  %v1088_v32 = vld [vmem:[%s2175_s26 + $0x2] sm:$0x1]  ;;  %v1091_v34 = vld [vmem:[%s2175_s26 + $0xe] sm:$0x1] }
 0x23b   : > { %v1134_v1 = vpack.c.b16 %v1133_v60, %v1133_v60  ;;  %v818_v44 = vpack.c.bf16 %v810_v36, %v810_v36  ;;  %v821_v49 = vpack.c.bf16 %v813_v37, %v813_v37  ;;  %v977_v41 = vunpack.c.l.b16 %v819_v35 }
 0x23c   : > { %v1409_v4 = vsel %vm573_vm7, %v1408_v0, %v1407_v55  ;;  %v978_v43 = vunpack.c.l.b16 %v820_v39  ;;  %v825_v58 = vpack.c.bf16 %v817_v53, %v817_v53  ;;  %v1096_v36 = vpack.c.bf16 %v1088_v32, %v1088_v32  ;;  %v1367_v39 = vld [vmem:[%s2175_s26 + $0x7] sm:$0x1]  ;;  %v1369_v53 = vld [vmem:[%s2175_s26 + $0xf] sm:$0x1] }
 0x23d   : > { %v1411_v5 = vsel %vm576_vm8, %v1410_v2, %v1409_v4  ;;  %v976_v48 = vunpack.c.l.b16 %v818_v44  ;;  %v979_v51 = vunpack.c.l.b16 %v821_v49  ;;  %v984_v56 = vrot.slane %v977_v41, 7 }
 0x23e   : > { %v1412_v6 = vpack.c.b16 %v1411_v5, %v1411_v5  ;;  %v983_v2 = vunpack.c.l.b16 %v825_v58  ;;  %v1099_v44 = vpack.c.bf16 %v1091_v34, %v1091_v34  ;;  %v1254_v41 = vunpack.c.l.b16 %v1096_v36 }
 0x23f   : > { %v2298_v17 = vpop.eup %1944  ;;  %v988_v60 = vrot.slane %v979_v51, 5  ;;  %v985_v0 = vsel %vm558_vm1, %v984_v56, %v976_v48 }
 0x240   : > { %v688_v23 = vpack.c.bf16 %v2298_v17, %v2298_v17  ;;  %v1257_v48 = vunpack.c.l.b16 %v1099_v44 }
 0x242   : > { %1855 = vmatmul.mubr.msk.bf16.vlgmr.msra.gmra.mrb[0].mxu1 %vm480_vm0, %v688_v23 }
 0x243   : > { %1859 = vmatpush3.bf16.xpose.msra.mxu1 %v2253_v38  ;;  %1860 = vmatprep.mubr.msk.bf16.mxu1 %vm2009_vm6, %v2008_v24  ;;  %v1441_v38 = vrot.slane %v1428_v14, 1 }
 0x244   : > { %1870 = vmatprep.subr.bf16.mxu1 %v2008_v24 }
 0x245   : > { %v1442_v57 = vsel %vm576_vm8, %v1441_v38, %v1440_v47  ;;  %v822_v38 = vpack.c.bf16 %v814_v27, %v814_v27  ;;  %v823_v47 = vpack.c.bf16 %v815_v42, %v815_v42  ;;  %v1092_v27 = vld [vmem:[%s2175_s26 + $0x12] sm:$0x1]  ;;  %v1368_v42 = vld [vmem:[%s2175_s26 + $0xb] sm:$0x1] }
 0x246   : > { %v1443_v63 = vpack.c.b16 %v1442_v57, %v1442_v57  ;;  %v986_v57 = vrot.slane %v978_v43, 6  ;;  %v1093_v43 = vld [vmem:[%s2175_s26 + $0x16] sm:$0x1] }
 0x247   : > { %v980_v45 = vunpack.c.l.b16 %v822_v38  ;;  %v981_v59 = vunpack.c.l.b16 %v823_v47  ;;  %v1375_v38 = vpack.c.bf16 %v1367_v39, %v1367_v39  ;;  %v1366_v47 = vld [vmem:[%s2175_s26 + $0x3] sm:$0x1]  ;;  %v1101_v56 = vpack.c.bf16 %v1093_v43, %v1093_v43 }
 0x248   : > { %v1448_v3 = vsel %vm480_vm0, %v1443_v63, 0  ;;  %v1374_v58 = vpack.c.bf16 %v1366_v47, %v1366_v47 }
 0x249   : > { %v990_v55 = vrot.slane %v980_v45, 4  ;;  %v992_v4 = vrot.slane %v981_v59, 3  ;;  %v1094_v45 = vld [vmem:[%s2175_s26 + $0x1a] sm:$0x1]  ;;  %v1533_v59 = vunpack.c.l.b16 %v1375_v38 }
 0x24a   : > { %1861 = vmatmul.mubr.msk.bf16.vlgmr.msra.gmra.mrb[4].mxu1 %vm480_vm0, %v856_v46  ;;  %v816_v46 = vld [vmem:[%s2175_s26 + $0x19] sm:$0x1] }
 0x24b   : > { %1871 = vmatpush3.bf16.xpose.msra.mxu1 %v1170_v54  ;;  %1872 = vmatprep.mubr.msk.bf16.mxu1 %vm2009_vm6, %v2008_v24  ;;  %v824_v54 = vpack.c.bf16 %v816_v46, %v816_v46  ;;  %v1100_v46 = vpack.c.bf16 %v1092_v27, %v1092_v27 }
 0x24c   : > { %1882 = vmatprep.subr.bf16.mxu1 %v2008_v24 }
 0x24d   : > { %v982_v63 = vunpack.c.l.b16 %v824_v54  ;;  %v1376_v54 = vpack.c.bf16 %v1368_v42, %v1368_v42 }
 0x252   : > { %1873 = vmatmul.mubr.msk.bf16.vlgmr.msra.gmra.mrb[8].mxu1 %vm480_vm0, %v1134_v1 }
 0x253   : > { %1883 = vmatpush3.bf16.xpose.msra.mxu1 %v1448_v3  ;;  %1884 = vmatprep.mubr.msk.bf16.mxu1 %vm2009_vm6, %v2008_v24  ;;  %v987_v3 = vsel %vm561_vm2, %v986_v57, %v985_v0  ;;  %v1377_v0 = vpack.c.bf16 %v1369_v53, %v1369_v53 }
 0x254   : > { %v989_v5 = vsel %vm564_vm3, %v988_v60, %v987_v3  ;;  %v1258_v60 = vunpack.c.l.b16 %v1100_v46 }
 0x25a   : > { %1885 = vmatmul.mubr.msk.bf16.vlgmr.msra.gmra.mrb[12].mxu1 %vm480_vm0, %v1412_v6  ;;  %v994_v6 = vrot.slane %v982_v63, 2  ;;  %v1370_v63 = vld [vmem:[%s2175_s26 + $0x13] sm:$0x1] }
 0x315   : > { %v2340_v7 = vpop.f32.mrb[0].mxu1 }
 0x316   : > { %v1856_v8 = vpop.f32.mrb[1].mxu1 }
 0x317   : > { %v764_v9 = vpop.f32.mrb[2].mxu1 }
 0x318   : > { %v1857_v10 = vpop.f32.mrb[3].mxu1  ;;  %v991_v9 = vsel %vm567_vm4, %v990_v55, %v989_v5  ;;  %v1095_v55 = vld [vmem:[%s2175_s26 + $0x1e] sm:$0x1]  ;;  %v1259_v5 = vunpack.c.l.b16 %v1101_v56 }
 0x319   : > { %v996_v10 = vrot.slane %v983_v2, 1  ;;  %v1102_v2 = vpack.c.bf16 %v1094_v45, %v1094_v45 }
 0x31d   : > { %v2342_v11 = vpop.f32.mrb[4].mxu1 }
 0x31e   : > { %v1862_v13 = vpop.f32.mrb[5].mxu1  ;;  %v936_v15 = vsel %vm480_vm0, %v2342_v11, -inf }
 0x31f   : > { %937 = vmax.xlane.f32.xlu1 %v936_v15  ;;  %v931_v16 = vpop.f32.mrb[6].mxu1  ;;  %v993_v13 = vsel %vm570_vm5, %v992_v4, %v991_v9  ;;  %v1534_v4 = vunpack.c.l.b16 %v1376_v54  ;;  %v1540_v9 = vrot.slane %v1533_v59, 7 }
 0x320   : > { %v1863_v18 = vpop.f32.mrb[7].mxu1  ;;  %v995_v15 = vsel %vm573_vm7, %v994_v6, %v993_v13  ;;  %v2388_v16 = vld [vmem:[#allocation2 + $0x18] sm:$0xff]  ;;  %v1532_v6 = vunpack.c.l.b16 %v1374_v58  ;;  %v1371_v13 = vld [vmem:[%s2175_s26 + $0x17] sm:$0x1] }
 0x321   : > { %v997_v18 = vsel %vm576_vm8, %v996_v10, %v995_v15  ;;  %v1268_v10 = vrot.slane %v1258_v60, 4  ;;  %v1378_v15 = vpack.c.bf16 %v1370_v63, %v1370_v63 }
 0x322   : > { %v1541_v32 = vsel %vm558_vm1, %v1540_v9, %v1532_v6 }
 0x323   : > { %v1536_v36 = vunpack.c.l.b16 %v1378_v15 }
 0x325   : > { %v2346_v19 = vpop.f32.mrb[8].mxu1  ;;  %v1546_v46 = vrot.slane %v1536_v36, 4  ;;  %v1230_v36 = vld [vmem:[#allocation3 + $0x10] sm:$0xff] }
 0x326   : > { %v1874_v20 = vpop.f32.mrb[9].mxu1  ;;  %v1214_v22 = vsel %vm480_vm0, %v2346_v19, -inf }
 0x327   : > { %1215 = vmax.xlane.f32.xlu1 %v1214_v22  ;;  %v1209_v23 = vpop.f32.mrb[10].mxu1  ;;  %v998_v20 = vpack.c.b16 %v997_v18, %v997_v18  ;;  %v1103_v18 = vpack.c.bf16 %v1095_v55, %v1095_v55 }
 0x328   : > { %v1875_v50 = vpop.f32.mrb[11].mxu1 }
 0x329   : > { %v1003_v50 = vsel %vm723_vm10, %v998_v20, 0  ;;  %v1261_v39 = vunpack.c.l.b16 %v1103_v18 }
 0x32a   : > { %1865 = vmatpush3.bf16.msra.mxu0 %v1003_v50  ;;  %v1260_v50 = vunpack.c.l.b16 %v1102_v2 }
 0x32b   : > { %1876 = vmatprep.subr.bf16.mxu0 %v2008_v24  ;;  %v1274_v47 = vrot.slane %v1261_v39, 1 }
 0x32c   : > { %v1272_v44 = vrot.slane %v1260_v50, 2 }
 0x32d   : > { %v2350_v25 = vpop.f32.mrb[12].mxu1 }
 0x32e   : > { %v1886_v26 = vpop.f32.mrb[13].mxu1  ;;  %v1492_v28 = vsel %vm480_vm0, %v2350_v25, -inf }
 0x32f   : > { %1493 = vmax.xlane.f32.xlu1 %v1492_v28  ;;  %v1487_v29 = vpop.f32.mrb[14].mxu1  ;;  %v675_v28 = vsel %vm480_vm0, %v2298_v17, 0.0 }
 0x330   : > { %v1887_v14 = vpop.f32.mrb[15].mxu1  ;;  %v1089_v29 = vld [vmem:[%s2175_s26 + $0x6] sm:$0x1] }
 0x331   : > { %v1090_v14 = vld [vmem:[%s2175_s26 + $0xa] sm:$0x1] }
 0x332   : > { %v1098_v35 = vpack.c.bf16 %v1090_v14, %v1090_v14  ;;  %v1372_v14 = vld [vmem:[%s2175_s26 + $0x1b] sm:$0x1] }
 0x334   : > { %v1256_v49 = vunpack.c.l.b16 %v1098_v35 }
 0x336   : > { %v1264_v51 = vrot.slane %v1256_v49, 6  ;;  %v1373_v49 = vld [vmem:[%s2175_s26 + $0x1f] sm:$0x1] }
 0x3ac   : > { %v938_v31 = vpop.xlane.xlu1 %937 }
 0x3ad   : > { %v2358_v33 = vmax.f32 %v2354_v30, %v938_v31  ;;  %v1097_v31 = vpack.c.bf16 %v1089_v29, %v1089_v29  ;;  %v1270_v29 = vrot.slane %v1259_v5, 3 }
 0x3af   : > { %v940_v40 = vsub.f32 %v2354_v30, %v2358_v33  ;;  %1047 = vst.msk [vmem:[#allocation2 + $0x8] sm:$0xff] %vm471_vm9, %v2358_v33  ;;  %945 = vperm.xlu1 %1943, %v2358_v33   ;;  %v1255_v37 = vunpack.c.l.b16 %v1097_v31  ;;  %v1379_v31 = vpack.c.bf16 %v1371_v13, %v1371_v13 }
 0x3b1   : > { %v1262_v17 = vrot.slane %v1255_v37, 7  ;;  %v1537_v43 = vunpack.c.l.b16 %v1379_v31  ;;  %v673_v31 = vld [vmem:[#allocation3] sm:$0xff] }
 0x3b3   : > { %v1263_v57 = vsel %vm558_vm1, %v1262_v17, %v1254_v41  ;;  %v1380_v41 = vpack.c.bf16 %v1372_v14, %v1372_v14  ;;  %v1548_v54 = vrot.slane %v1537_v43, 3 }
 0x3b4   : > { %v1216_v61 = vpop.xlane.xlu1 %1215  ;;  %v1265_v3 = vsel %vm561_vm2, %v1264_v51, %v1263_v57 }
 0x3b5   : > { %v2376_v1 = vmax.f32 %v2371_v52, %v1216_v61  ;;  %v1266_v61 = vrot.slane %v1257_v48, 5  ;;  %v1381_v48 = vpack.c.bf16 %v1373_v49, %v1373_v49 }
 0x3b7   : > { %v1218_v8 = vsub.f32 %v2371_v52, %v2376_v1  ;;  %1325 = vst.msk [vmem:[#allocation2 + $0x10] sm:$0xff] %vm471_vm9, %v2376_v1  ;;  %1223 = vperm.xlu1 %1943, %v2376_v1   ;;  %v1267_v20 = vsel %vm564_vm3, %v1266_v61, %v1265_v3  ;;  %v1539_v59 = vunpack.c.l.b16 %v1381_v48 }
 0x3b8   : > { %v1269_v35 = vsel %vm567_vm4, %v1268_v10, %v1267_v20  ;;  %v663_v20 = vmul.f32 1.442695, %v662_v21  ;;  %v941_v21 = vmul.f32 1.442695, %v940_v40  ;;  %v952_v40 = vld [vmem:[#allocation3 + $0x8] sm:$0xff] }
 0x3b9   : > { %v1271_v38 = vsel %vm570_vm5, %v1270_v29, %v1269_v35  ;;  %v1552_v55 = vrot.slane %v1539_v59, 1 }
 0x3ba   : > { %v1273_v53 = vsel %vm573_vm7, %v1272_v44, %v1271_v38  ;;  %v1508_v38 = vld [vmem:[#allocation3 + $0x18] sm:$0xff] }
 0x3bb   : > { %v1275_v58 = vsel %vm576_vm8, %v1274_v47, %v1273_v53 }
 0x3bc   : > { %v1494_v22 = vpop.xlane.xlu1 %1493 }
 0x3bd   : > { %v2392_v23 = vmax.f32 %v2388_v16, %v1494_v22  ;;  %v1535_v22 = vunpack.c.l.b16 %v1377_v0  ;;  %v1276_v0 = vpack.c.b16 %v1275_v58, %v1275_v58 }
 0x3bf   : > { %v1496_v26 = vsub.f32 %v2388_v16, %v2392_v23  ;;  %1603 = vst.msk [vmem:[#allocation2 + $0x18] sm:$0xff] %vm471_vm9, %v2392_v23  ;;  %1501 = vperm.xlu1 %1943, %v2392_v23   ;;  %v1544_v27 = vrot.slane %v1535_v22, 5  ;;  %v1281_v9 = vsel %vm723_vm10, %v1276_v0, 0 }
 0x3e3   : > { %676 = vadd.xlane.f32.xlu1 %v675_v28  ;;  %v1542_v28 = vrot.slane %v1534_v4, 6 }
 0x3e5   : > { %v1543_v17 = vsel %vm561_vm2, %v1542_v28, %v1541_v32  ;;  %v1219_v28 = vmul.f32 1.442695, %v1218_v8 }
 0x3e6   : > { %v1545_v51 = vsel %vm564_vm3, %v1544_v27, %v1543_v17 }
 0x3e7   : > { %v1547_v56 = vsel %vm567_vm4, %v1546_v46, %v1545_v51 }
 0x3e8   : > { %v1549_v63 = vsel %vm570_vm5, %v1548_v54, %v1547_v56 }
 0x42e   : > { %v946_v34 = vpop.permute.xlu1 %945 }
 0x42f   : > { %v948_v37 = vsub.f32 %v2342_v11, %v946_v34  ;;  %v1538_v11 = vunpack.c.l.b16 %v1380_v41 }
 0x431   : > { %v949_v42 = vmul.f32 1.442695, %v948_v37  ;;  %v1550_v60 = vrot.slane %v1538_v11, 2  ;;  %v681_v37 = vld [vmem:[#allocation4] sm:$0xff] }
 0x433   : > { %1946 = vpow2.f32 %v949_v42  ;;  %v1551_v2 = vsel %vm573_vm7, %v1550_v60, %v1549_v63  ;;  %v1238_v63 = vld [vmem:[#allocation4 + $0x10] sm:$0xff] }
 0x434   : > { %v1553_v10 = vsel %vm576_vm8, %v1552_v55, %v1551_v2 }
 0x435   : > { %v1554_v15 = vpack.c.b16 %v1553_v10, %v1553_v10 }
 0x436   : > { %v1224_v45 = vpop.permute.xlu1 %1223 }
 0x437   : > { %v1226_v57 = vsub.f32 %v2346_v19, %v1224_v45  ;;  %v1559_v50 = vsel %vm723_vm10, %v1554_v15, 0 }
 0x439   : > { %v1227_v61 = vmul.f32 1.442695, %v1226_v57 }
 0x43b   : > { %1948 = vpow2.f32 %v1227_v61 }
 0x43d   : > { %v1947_v3 = vpop.eup %1946 }
 0x43e   : > { %v1502_v4 = vpop.permute.xlu1 %1501  ;;  %v954_v5 = vsel %vm480_vm0, %v1947_v3, 0.0  ;;  %v967_v6 = vpack.c.bf16 %v1947_v3, %v1947_v3 }
 0x43f   : > { %v1504_v19 = vsub.f32 %v2350_v25, %v1502_v4  ;;  %955 = vadd.xlane.f32.xlu0 %v954_v5 }
 0x440   : > { %1867 = vmatmul.mubr.msk.bf16.vlgmr.msra.gmra.mrb[4].mxu0 %vm480_vm0, %v967_v6 }
 0x441   : > { %v1505_v13 = vmul.f32 1.442695, %v1504_v19  ;;  %1877 = vmatpush3.bf16.msra.mxu0 %v1281_v9  ;;  %1878 = vmatprep.mubr.msk.bf16.mxu0 %vm2009_vm6, %v2008_v24  ;;  %v1516_v9 = vld [vmem:[#allocation4 + $0x18] sm:$0xff] }
 0x442   : > { %1888 = vmatprep.subr.bf16.mxu0 %v2008_v24 }
 0x443   : > { %1950 = vpow2.f32 %v1505_v13 }
 0x444   : > { %1952 = vpow2.f32 %v663_v20 }
 0x445   : > { %v1949_v18 = vpop.eup %1948  ;;  %1954 = vpow2.f32 %v1219_v28 }
 0x446   : > { %v1232_v25 = vsel %vm480_vm0, %v1949_v18, 0.0  ;;  %v1245_v22 = vpack.c.bf16 %v1949_v18, %v1949_v18  ;;  %1956 = vpow2.f32 %v941_v21 }
 0x447   : > { %1233 = vadd.xlane.f32.xlu1 %v1232_v25 }
 0x448   : > { %1879 = vmatmul.mubr.msk.bf16.vlgmr.msra.gmra.mrb[8].mxu0 %vm480_vm0, %v1245_v22 }
 0x449   : > { %1889 = vmatpush3.bf16.msra.mxu0 %v1559_v50  ;;  %1890 = vmatprep.mubr.msk.bf16.mxu0 %vm2009_vm6, %v2008_v24  ;;  %v1497_v24 = vmul.f32 1.442695, %v1496_v26 }
 0x44b   : > { %1958 = vpow2.f32 %v1497_v24 }
 0x44d   : > { %v1951_v29 = vpop.eup %1950 }
 0x44e   : > { %v1510_v62 = vsel %vm480_vm0, %v1951_v29, 0.0  ;;  %v1523_v12 = vpack.c.bf16 %v1951_v29, %v1951_v29  ;;  %v1953_v14 = vpop.eup %1952 }
 0x44f   : > { %1511 = vadd.xlane.f32.xlu1 %v1510_v62  ;;  %v1955_v52 = vpop.eup %1954  ;;  %v674_v32 = vmul.f32 %v1953_v14, %v673_v31 }
 0x450   : > { %1891 = vmatmul.mubr.msk.bf16.vlgmr.msra.gmra.mrb[12].mxu0 %vm480_vm0, %v1523_v12  ;;  %v1957_v1 = vpop.eup %1956  ;;  %v1231_v39 = vmul.f32 %v1955_v52, %v1230_v36 }
 0x451   : > { %v953_v16 = vmul.f32 %v1957_v1, %v952_v40 }
 0x455   : > { %684 = vperm.xlu0 %1942, %v1953_v14   ;;  %v1959_v8 = vpop.eup %1958 }
 0x456   : > { %v1509_v43 = vmul.f32 %v1959_v8, %v1508_v38 }
 0x459   : > { %1241 = vperm.xlu0 %1942, %v1955_v52  }
 0x460   : > { %963 = vperm.xlu1 %1943, %v1957_v1  }
 0x464   : > { %1519 = vperm.xlu1 %1943, %v1959_v8  }
 0x470   : > { %v677_v34 = vpop.xlane.xlu1 %676 }
 0x471   : > { %v678_v35 = vadd.f32 %v677_v34, %v674_v32 }
 0x473   : > { %680 = vst.msk [vmem:[#allocation3] sm:$0xff] %vm471_vm9, %v678_v35 }
 0x47a   : > { %v1608_v30 = vld [vmem:[#allocation3] sm:$0xff] }
 0x47b   : > { %1960 = vrcp.f32 %v1608_v30 }
 0x485   : > { %v1961_v33 = vpop.eup %1960 }
 0x486   : > { %1612 = vperm.xlu1 %1943, %v1961_v33  }
 0x4cc   : > { %v956_v23 = vpop.xlane.xlu0 %955 }
 0x4cd   : > { %v957_v26 = vadd.f32 %v956_v23, %v953_v16 }
 0x4cf   : > { %958 = vst.msk [vmem:[#allocation3 + $0x8] sm:$0xff] %vm471_vm9, %v957_v26 }
 0x4d4   : > { %v1234_v27 = vpop.xlane.xlu1 %1233  ;;  %v685_v44 = vpop.permute.xlu0 %684 }
 0x4d5   : > { %v1235_v49 = vadd.f32 %v1234_v27, %v1231_v39  ;;  %v687_v41 = vmul.f32 %v685_v44, %v681_v37 }
 0x4d6   : > { %v1617_v17 = vld [vmem:[#allocation3 + $0x8] sm:$0xff] }
 0x4d7   : > { %1236 = vst.msk [vmem:[#allocation3 + $0x10] sm:$0xff] %vm471_vm9, %v1235_v49  ;;  %v767_v42 = vadd.f32 %v2340_v7, %v687_v41  ;;  %1962 = vrcp.f32 %v1617_v17  ;;  %v960_v7 = vld [vmem:[#allocation4 + $0x8] sm:$0xff] }
 0x4d8   : > { %v1242_v0 = vpop.permute.xlu0 %1241 }
 0x4d9   : > { %768 = vst.msk [vmem:[#allocation4] sm:$0xff] %vm480_vm0, %v767_v42  ;;  %v1244_v55 = vmul.f32 %v1242_v0, %v1238_v63 }
 0x4dc   : > { %v1512_v46 = vpop.xlane.xlu1 %1511 }
 0x4dd   : > { %v1513_v47 = vadd.f32 %v1512_v46, %v1509_v43 }
 0x4de   : > { %v1626_v48 = vld [vmem:[#allocation3 + $0x10] sm:$0xff] }
 0x4df   : > { %1514 = vst.msk [vmem:[#allocation3 + $0x18] sm:$0xff] %vm471_vm9, %v1513_v47  ;;  %1964 = vrcp.f32 %v1626_v48 }
 0x4e0   : > { %v964_v45 = vpop.permute.xlu1 %963  ;;  %v1607_v1 = vld [vmem:[#allocation4] sm:$0xff] }
 0x4e1   : > { %v1963_v51 = vpop.eup %1962  ;;  %v966_v56 = vmul.f32 %v964_v45, %v960_v7 }
 0x4e2   : > { %1621 = vperm.xlu0 %1942, %v1963_v51  }
 0x4e4   : > { %v1520_v19 = vpop.permute.xlu1 %1519 }
 0x4e5   : > { %v1522_v10 = vmul.f32 %v1520_v19, %v1516_v9 }
 0x4e6   : > { %v1635_v53 = vld [vmem:[#allocation3 + $0x18] sm:$0xff] }
 0x4e7   : > { %1966 = vrcp.f32 %v1635_v53 }
 0x4e9   : > { %v1965_v11 = vpop.eup %1964 }
 0x4ea   : > { %1630 = vperm.xlu1 %1943, %v1965_v11  }
 0x4f1   : > { %v1967_v54 = vpop.eup %1966 }
 0x4f2   : > { %1639 = vperm.xlu0 %1942, %v1967_v54  }
 0x505   : > { %v1613_v29 = vpop.permute.xlu1 %1612 }
 0x506   : > { %v1615_v31 = vmul.f32 %v1613_v29, %v1607_v1 }
 0x513   : > { %v1039_v57 = vpop.f32.mrb[4].mxu0 }
 0x514   : > { %v1045_v58 = vadd.f32 %v1039_v57, %v966_v56  ;;  %v1868_v59 = vpop.f32.mrb[5].mxu0 }
 0x515   : > { %v1042_v60 = vpop.f32.mrb[6].mxu0 }
 0x516   : > { %1046 = vst.msk [vmem:[#allocation4 + $0x8] sm:$0xff] %vm480_vm0, %v1045_v58  ;;  %v1869_v61 = vpop.f32.mrb[7].mxu0 }
 0x51b   : > { %v1317_v2 = vpop.f32.mrb[8].mxu0 }
 0x51c   : > { %v1323_v3 = vadd.f32 %v1317_v2, %v1244_v55  ;;  %v1880_v4 = vpop.f32.mrb[9].mxu0 }
 0x51d   : > { %v1320_v5 = vpop.f32.mrb[10].mxu0  ;;  %v1616_v50 = vld [vmem:[#allocation4 + $0x8] sm:$0xff] }
 0x51e   : > { %1324 = vst.msk [vmem:[#allocation4 + $0x10] sm:$0xff] %vm480_vm0, %v1323_v3  ;;  %v1881_v6 = vpop.f32.mrb[11].mxu0 }
 0x523   : > { %v1595_v13 = vpop.f32.mrb[12].mxu0 }
 0x524   : > { %v1601_v15 = vadd.f32 %v1595_v13, %v1522_v10  ;;  %v1892_v18 = vpop.f32.mrb[13].mxu0 }
 0x525   : > { %v1598_v20 = vpop.f32.mrb[14].mxu0  ;;  %v1625_v12 = vld [vmem:[#allocation4 + $0x10] sm:$0xff] }
 0x526   : > { %1602 = vst.msk [vmem:[#allocation4 + $0x18] sm:$0xff] %vm480_vm0, %v1601_v15  ;;  %v1893_v25 = vpop.f32.mrb[15].mxu0 }
 0x52d   : > { %v1634_v24 = vld [vmem:[#allocation4 + $0x18] sm:$0xff] }
 0x561   : > { %v1622_v22 = vpop.permute.xlu0 %1621 }
 0x562   : > { %v1624_v28 = vmul.f32 %v1622_v22, %v1616_v50 }
 0x564   : > { %1644 = vrot.lane.b32.xlu1 %v1624_v28, %s2012_s27 }
 0x569   : > { %v1631_v62 = vpop.permute.xlu1 %1630 }
 0x56a   : > { %v1633_v21 = vmul.f32 %v1631_v62, %v1625_v12 }
 0x56c   : > { %1648 = vrot.lane.b32.xlu0 %v1633_v21, %s2013_s28 }
 0x571   : > { %v1640_v14 = vpop.permute.xlu0 %1639 }
 0x572   : > { %v1642_v52 = vmul.f32 %v1640_v14, %v1634_v24 }
 0x574   : > { %1652 = vrot.lane.b32.xlu1 %v1642_v52, %s2014_s29 }
 0x5d6   : > { %v1645_v8 = vpop.permute.xlu1 %1644 }
 0x5d7   : > { %v1655_v34 = vsel %vm480_vm0, %v1615_v31, %v1645_v8 }
 0x5de   : > { %v1649_v32 = vpop.permute.xlu0 %1648 }
 0x5df   : > { %v1657_v35 = vsel %vm1656_vm11, %v1655_v34, %v1649_v32 }
 0x5e6   : > { %v1653_v30 = vpop.permute.xlu1 %1652 }
 0x5e7   : > { %v1659_v33 = vsel %vm1658_vm12, %v1657_v35, %v1653_v30 }
 0x5e8   : > { %1661 = vst.msk [vmem:[%s465_s6] sm:$0xff] %vm1660_vm13, %v1659_v33 }
 0x5e9 PF: > { %s13_s16 = sadd.s32 1, %s2006_s16   ;;  %s2496_s12 = smov %s1994_s13 }
 0x5ea   : > { %p10_p10 = scmp.ge.s32.totalorder %s13_s16, 10   ;;  %s2497_s13 = smov %s2074_s21 }
 0x5eb   : > { %s2498_s14 = smov %s2002_s15  ;;  %s2499_s15 = smov %s2501_s17 }
 0x5ec   :  { %12 = sbr.rel (!%p10_p10) target bundleno = 3 (0x3), region = 223 }

// kernel: stdit3_block_forward.15
= control target key start
LH: loop header
LB: loop body
LE: loop exit
PB: predicated region body
PF: predicated region fallthrough
CT: control target
= control target key end

     0   :  { %s686_s15 = smov 0   ;;  %s688_s16 = smov 0   ;;  %s737_s0 = inlined_call_operand.vmem [shape: f32[2,32,32], index: 0, kind: input, shape index: {}]   ;;  %s738_s1 = inlined_call_operand.vmem [shape: bf16[32,32], index: 1, kind: input, shape index: {}]   ;;  %s739_s2 = inlined_call_operand.vmem [shape: f32[1,32], index: 2, kind: input, shape index: {}]   ;;  %s740_s3 = inlined_call_operand.vmem [shape: f32[2,32,32], index: 3, kind: input, shape index: {}]   ;;  %s741_s4 = inlined_call_operand.vmem [shape: f32[2,32,32], index: 4, kind: output, shape index: {}]  }
   0x1   :  { %s690_s17 = smov 0  }
   0x2 LB: > { %s33_s18 = sadd.s32 1, %s655_s16  ;;  %p582_p0 = scmp.ge.s32.totalorder %s659_s17, 1  ;;  %s659_s17 = sphi %s690_s17, %s14_s17   ;;  %s655_s16 = sphi %s688_s16, %s743_s16   ;;  %s651_s15 = sphi %s686_s15, %s742_s15  }
   0x3   : > { %p35_p1 = scmp.ge.s32.totalorder %s33_s18, 2  ;;  %p231_p2 = scmp.lt.s32.totalorder %s659_s17, 3 }
   0x5   : > { %s745_s18 = smov (%p35_p1, %s33_s18), 0  ;;  %p232_p3 = pnand %p582_p0, %p231_p2 }
   0x6   : > { %v635_v0 = vld [vmem:[%s738_s1] sm:$0xff] (!%p232_p3)   ;;  %p288_p4 = scmp.lt.s32.totalorder (!%p232_p3), %s651_s15, 1  ;;  %v636_v1 = vld [vmem:[%s738_s1 + $0x8] sm:$0xff] (!%p232_p3)   ;;  %vm360_vm0 = vcmask (!%p232_p3), 261120  }
   0x7   : > { %235 = sbr.rel (%p232_p3) target bundleno = 241 (0xf1), region = 36  ;;  %603 = vmatprep.subr.bf16.mxu0 (!%p232_p3), %v635_v0  ;;  %v589_v8 = vld [vmem:[%s739_s2] ss:$0 sm:$0xff] (!%p232_p3) }
   0x8   : > { %604 = vmatpush3.bf16.msra.mxu0 (!%p232_p3), %v635_v0 }
   0x9   : > { %605 = vmatprep.subr.bf16.mxu0 (!%p232_p3), %v636_v1 }
   0xc   : > { %606 = vmatpush3.bf16.msra.mxu0 (!%p232_p3), %v636_v1 }
   0xe   : > { %s747_s15 = smov (!%p288_p4, %s651_s15), 1 }
   0xf   : > { %s596_s23 = sshll.u32 %s747_s15, 5 }
  0x10   : > { %s295_s26 = scalar_lea.vmem %s737_s0, %s596_s23  ;;  %s315_s29 = scalar_lea.vmem %s740_s3, %s596_s23 }
  0x11   : > { %v331_v2 = vld [vmem:[%s295_s26] sm:$0xff]  ;;  %v332_v3 = vld [vmem:[%s295_s26 + $0x8] sm:$0xff]  ;;  %v333_v4 = vld [vmem:[%s295_s26 + $0x10] sm:$0xff]  ;;  %s328_s8 = scalar_lea.vmem %s741_s4, %s596_s23 }
  0x12   : > { %v335_v5 = vpack.c.bf16 %v332_v3, %v331_v2  ;;  %v334_v6 = vld [vmem:[%s295_s26 + $0x18] sm:$0xff]  ;;  %v418_v10 = vld [vmem:[%s315_s29 + $0x10] sm:$0xff]  ;;  %v416_v13 = vld [vmem:[%s315_s29] sm:$0xff] }
  0x13   : > { %v336_v7 = vpack.c.bf16 %v334_v6, %v333_v4  ;;  %v419_v16 = vld [vmem:[%s315_s29 + $0x18] sm:$0xff]  ;;  %v417_v20 = vld [vmem:[%s315_s29 + $0x8] sm:$0xff] }
  0x14   : > { %607 = vmatprep.mubr.msk.bf16.mxu0 %vm360_vm0, %v335_v5 }
  0x15   : > { %608 = vmatmul.mubr.msk.bf16.vlgmr.msra.gmra.mrb[0].mxu0 %vm360_vm0, %v336_v7 }
  0xe8   : > { %v609_v9 = vpop.f32.mrb[0].mxu0 }
  0xe9   : > { %v410_v11 = vadd.f32 %v609_v9, %v589_v8  ;;  %v401_v12 = vpop.f32.mrb[1].mxu0 }
  0xea   : > { %v402_v14 = vadd.f32 %v589_v8, %v401_v12  ;;  %v610_v15 = vpop.f32.mrb[2].mxu0 }
  0xeb   : > { %v422_v17 = vadd.f32 %v418_v10, %v410_v11  ;;  %v413_v18 = vadd.f32 %v610_v15, %v589_v8  ;;  %v404_v19 = vpop.f32.mrb[3].mxu0 }
  0xec   : > { %v420_v21 = vadd.f32 %v416_v13, %v402_v14  ;;  %v405_v22 = vadd.f32 %v589_v8, %v404_v19 }
  0xed   : > { %426 = vst.msk [vmem:[%s328_s8 + $0x10] sm:$0xff] %vm360_vm0, %v422_v17  ;;  %v423_v23 = vadd.f32 %v419_v16, %v413_v18 }
  0xee   : > { %424 = vst.msk [vmem:[%s328_s8] sm:$0xff] %vm360_vm0, %v420_v21  ;;  %v421_v24 = vadd.f32 %v417_v20, %v405_v22 }
  0xef   : > { %427 = vst.msk [vmem:[%s328_s8 + $0x18] sm:$0xff] %vm360_vm0, %v423_v23 }
  0xf0   : > { %425 = vst.msk [vmem:[%s328_s8 + $0x8] sm:$0xff] %vm360_vm0, %v421_v24 }
  0xf1 PF: > { %s14_s17 = sadd.s32 1, %s659_s17   ;;  %s742_s15 = smov %s655_s16 }
  0xf2   : > { %p11_p5 = scmp.ge.s32.totalorder %s14_s17, 4   ;;  %s743_s16 = smov %s745_s18 }
  0xf4   :  { %13 = sbr.rel (!%p11_p5) target bundleno = 2 (0x2), region = 75 }

// kernel: stdit3_block_forward.16
= control target key start
LH: loop header
LB: loop body
LE: loop exit
PB: predicated region body
PF: predicated region fallthrough
CT: control target
= control target key end

     0   :  { %s823_s18 = smov 0   ;;  %s825_s19 = smov 0   ;;  %s892_s0 = inlined_call_operand.vmem [shape: f32[2,32,32], index: 0, kind: input, shape index: {}]   ;;  %s893_s1 = inlined_call_operand.vmem [shape: f32[2,1,32], index: 1, kind: input, shape index: {}]   ;;  %s894_s2 = inlined_call_operand.vmem [shape: f32[2,1,32], index: 2, kind: input, shape index: {}]   ;;  %s895_s3 = inlined_call_operand.vmem [shape: bf16[32,128], index: 3, kind: input, shape index: {}]   ;;  %s896_s4 = inlined_call_operand.vmem [shape: f32[1,128], index: 4, kind: input, shape index: {}]   ;;  %s897_s5 = inlined_call_operand.vmem [shape: f32[2,32,128], index: 5, kind: output, shape index: {}]  }
   0x1   :  { %s827_s20 = smov 0  }
   0x2 LB: > { %s34_s21 = sadd.s32 1, %s787_s19  ;;  %p700_p0 = scmp.ge.s32.totalorder %s791_s20, 1  ;;  %s791_s20 = sphi %s827_s20, %s15_s20   ;;  %s787_s19 = sphi %s825_s19, %s899_s19   ;;  %s783_s18 = sphi %s823_s18, %s898_s18  }
   0x3   : > { %p36_p1 = scmp.ge.s32.totalorder %s34_s21, 2  ;;  %p250_p2 = scmp.lt.s32.totalorder %s791_s20, 3 }
   0x5   : > { %s901_s21 = smov (%p36_p1, %s34_s21), 0  ;;  %p251_p3 = pnand %p700_p0, %p250_p2 }
   0x6   : > { %p303_p4 = scmp.lt.s32.totalorder (!%p251_p3), %s783_s18, 1  ;;  %vm347_vm0 = vcmask (!%p251_p3), 261120   ;;  %v751_v28 = vld [vmem:[%s895_s3] sm:$0xff] (!%p251_p3)   ;;  %v752_v29 = vld [vmem:[%s895_s3 + $0x8] sm:$0xff] (!%p251_p3)   ;;  %v404_v33 = vlaneseq (!%p251_p3) }
   0x7   : > { %254 = sbr.rel (%p251_p3) target bundleno = 592 (0x250), region = 40  ;;  %719 = vmatprep.subr.bf16.mxu0 (!%p251_p3), %v751_v28 }
   0x8   : > { %720 = vmatpush3.bf16.msra.mxu0 (!%p251_p3), %v751_v28  ;;  %v405_v40 = vshrl.u32 (!%p251_p3), %v404_v33, 7 }
   0x9   : > { %721 = vmatprep.subr.bf16.mxu0 (!%p251_p3), %v752_v29 }
   0xa   : > { %v406_v46 = vsub.s32 (!%p251_p3), 0, %v405_v40 }
   0xc   : > { %722 = vmatpush3.bf16.msra.mxu0 (!%p251_p3), %v752_v29 }
   0xe   : > { %s903_s18 = smov (!%p303_p4, %s783_s18), 1 }
   0xf   : > { %s713_s22 = sshll.u32 %s903_s18, 5  ;;  %s317_s7 = scalar_lea.vmem %s894_s2, %s903_s18 }
  0x10   : > { %s310_s25 = scalar_lea.vmem %s892_s0, %s713_s22  ;;  %v401_v42 = vld [vmem:[%s317_s7] sm:$0x1]  ;;  %s314_s10 = scalar_lea.vmem %s893_s1, %s903_s18 }
  0x11   : > { %v343_v0 = vld [vmem:[%s310_s25] sm:$0xff]  ;;  %v345_v1 = vld [vmem:[%s310_s25 + $0x10] sm:$0xff]  ;;  %v344_v4 = vld [vmem:[%s310_s25 + $0x8] sm:$0xff]  ;;  %v402_v45 = vadd.f32 1.0, %v401_v42  ;;  %s336_s15 = scalar_lea.vmem %s897_s5, %s713_s22 }
  0x12   : > { %v348_v2 = vsel %vm347_vm0, %v343_v0, 0.0  ;;  %v354_v3 = vsel %vm347_vm0, %v345_v1, 0.0  ;;  %v346_v5 = vld [vmem:[%s310_s25 + $0x18] sm:$0xff]  ;;  %v351_v6 = vsel %vm347_vm0, %v344_v4, 0.0  ;;  %v705_v54 = vld [vmem:[%s314_s10] ss:$0 sm:$0xff] }
  0x13   : > { %349 = vadd.xlane.f32.xlu0 %v348_v2  ;;  %355 = vadd.xlane.f32.xlu1 %v354_v3  ;;  %v357_v7 = vsel %vm347_vm0, %v346_v5, 0.0  ;;  %v407_v48 = vrot.slane %v402_v45, %v406_v46 }
  0x17   : > { %352 = vadd.xlane.f32.xlu0 %v351_v6  ;;  %358 = vadd.xlane.f32.xlu1 %v357_v7 }
  0xa0   : > { %v350_v8 = vpop.xlane.xlu0 %349  ;;  %v356_v9 = vpop.xlane.xlu1 %355 }
  0xa1   : > { %v361_v10 = vmul.f32 0.03125, %v350_v8  ;;  %v363_v11 = vmul.f32 0.03125, %v356_v9 }
  0xa3   : > { %v365_v12 = vsub.f32 %v343_v0, %v361_v10  ;;  %v367_v13 = vsub.f32 %v345_v1, %v363_v11 }
  0xa4   : > { %v353_v14 = vpop.xlane.xlu0 %352  ;;  %v359_v15 = vpop.xlane.xlu1 %358 }
  0xa5   : > { %v362_v16 = vmul.f32 0.03125, %v353_v14  ;;  %v364_v17 = vmul.f32 0.03125, %v359_v15  ;;  %v369_v18 = vmul.f32 %v365_v12, %v365_v12  ;;  %v371_v19 = vmul.f32 %v367_v13, %v367_v13 }
  0xa7   : > { %v366_v20 = vsub.f32 %v344_v4, %v362_v16  ;;  %v368_v21 = vsub.f32 %v346_v5, %v364_v17  ;;  %v373_v22 = vsel %vm347_vm0, %v369_v18, 0.0  ;;  %v379_v23 = vsel %vm347_vm0, %v371_v19, 0.0  ;;  %v706_v5 = vld [vmem:[%s896_s4] ss:$0 sm:$0xff] }
  0xa8   : > { %374 = vadd.xlane.f32.xlu0 %v373_v22 }
  0xa9   : > { %v370_v24 = vmul.f32 %v366_v20, %v366_v20  ;;  %v372_v25 = vmul.f32 %v368_v21, %v368_v21 }
  0xab   : > { %v376_v26 = vsel %vm347_vm0, %v370_v24, 0.0  ;;  %v382_v27 = vsel %vm347_vm0, %v372_v25, 0.0 }
  0xac   : > { %380 = vadd.xlane.f32.xlu0 %v379_v23  ;;  %377 = vadd.xlane.f32.xlu1 %v376_v26 }
  0xb0   : > { %383 = vadd.xlane.f32.xlu1 %v382_v27 }
 0x135   : > { %v375_v30 = vpop.xlane.xlu0 %374 }
 0x136   : > { %v385_v31 = vmul.f32 0.03125, %v375_v30 }
 0x138   : > { %v389_v32 = vadd.f32 1e-06, %v385_v31 }
 0x139   : > { %v378_v34 = vpop.xlane.xlu1 %377  ;;  %v381_v35 = vpop.xlane.xlu0 %380 }
 0x13a   : > { %753 = vrsqrt.f32 %v389_v32  ;;  %v386_v36 = vmul.f32 0.03125, %v378_v34  ;;  %v387_v37 = vmul.f32 0.03125, %v381_v35 }
 0x13c   : > { %v390_v38 = vadd.f32 1e-06, %v386_v36  ;;  %v391_v39 = vadd.f32 1e-06, %v387_v37 }
 0x13d   : > { %v384_v41 = vpop.xlane.xlu1 %383 }
 0x13e   : > { %755 = vrsqrt.f32 %v390_v38  ;;  %v388_v43 = vmul.f32 0.03125, %v384_v41 }
 0x13f   : > { %757 = vrsqrt.f32 %v391_v39 }
 0x140   : > { %v392_v44 = vadd.f32 1e-06, %v388_v43 }
 0x142   : > { %759 = vrsqrt.f32 %v392_v44 }
 0x144   : > { %v754_v47 = vpop.eup %753 }
 0x145   : > { %v397_v49 = vmul.f32 %v754_v47, %v365_v12 }
 0x147   : > { %v409_v52 = vmul.f32 %v407_v48, %v397_v49 }
 0x148   : > { %v756_v50 = vpop.eup %755 }
 0x149   : > { %v758_v51 = vpop.eup %757  ;;  %v398_v53 = vmul.f32 %v756_v50, %v366_v20  ;;  %v420_v58 = vadd.f32 %v705_v54, %v409_v52 }
 0x14a   : > { %v399_v55 = vmul.f32 %v758_v51, %v367_v13 }
 0x14b   : > { %v410_v56 = vmul.f32 %v407_v48, %v398_v53 }
 0x14c   : > { %v760_v57 = vpop.eup %759  ;;  %v411_v60 = vmul.f32 %v407_v48, %v399_v55 }
 0x14d   : > { %v421_v59 = vadd.f32 %v705_v54, %v410_v56  ;;  %v400_v61 = vmul.f32 %v760_v57, %v368_v21 }
 0x14e   : > { %v422_v0 = vadd.f32 %v705_v54, %v411_v60 }
 0x14f   : > { %v424_v62 = vpack.c.bf16 %v421_v59, %v420_v58  ;;  %v412_v63 = vmul.f32 %v407_v48, %v400_v61 }
 0x151   : > { %426 = vst.msk [vmem:[#allocation2] sm:$0xff] %vm347_vm0, %v424_v62  ;;  %v423_v1 = vadd.f32 %v705_v54, %v412_v63 }
 0x153   : > { %v425_v2 = vpack.c.bf16 %v423_v1, %v422_v0 }
 0x155   : > { %427 = vst.msk [vmem:[#allocation2 + $0x8] sm:$0xff] %vm347_vm0, %v425_v2 }
 0x158   : > { %v428_v3 = vld [vmem:[#allocation2] sm:$0xff] }
 0x159   : > { %723 = vmatprep.mubr.msk.bf16.mxu0 %vm347_vm0, %v428_v3 }
 0x15c   : > { %v429_v4 = vld [vmem:[#allocation2 + $0x8] sm:$0xff] }
 0x15d   : > { %724 = vmatmul.mubr.msk.bf16.vlgmr.msra.gmra.mrb[0].mxu0 %vm347_vm0, %v429_v4 }
 0x230   : > { %v725_v6 = vpop.f32.mrb[0].mxu0 }
 0x231   : > { %v503_v7 = vadd.f32 %v725_v6, %v706_v5  ;;  %v494_v8 = vpop.f32.mrb[1].mxu0 }
 0x232   : > { %v495_v9 = vadd.f32 %v706_v5, %v494_v8  ;;  %v726_v10 = vpop.f32.mrb[2].mxu0 }
 0x233   : > { %v515_v11 = vmul.f32 0.044715, %v503_v7  ;;  %v506_v12 = vadd.f32 %v726_v10, %v706_v5  ;;  %v497_v13 = vpop.f32.mrb[3].mxu0  ;;  %v511_v36 = vmul.f32 0.5, %v503_v7 }
 0x234   : > { %v513_v14 = vmul.f32 0.044715, %v495_v9  ;;  %v498_v15 = vadd.f32 %v706_v5, %v497_v13  ;;  %v509_v39 = vmul.f32 0.5, %v495_v9 }
 0x235   : > { %v519_v16 = vmul.f32 %v515_v11, %v503_v7  ;;  %v516_v17 = vmul.f32 0.044715, %v506_v12  ;;  %v512_v43 = vmul.f32 0.5, %v506_v12 }
 0x236   : > { %v517_v18 = vmul.f32 %v513_v14, %v495_v9  ;;  %v514_v19 = vmul.f32 0.044715, %v498_v15  ;;  %v510_v46 = vmul.f32 0.5, %v498_v15 }
 0x237   : > { %v523_v20 = vmul.f32 %v519_v16, %v503_v7  ;;  %v520_v21 = vmul.f32 %v516_v17, %v506_v12 }
 0x238   : > { %v521_v22 = vmul.f32 %v517_v18, %v495_v9  ;;  %v518_v23 = vmul.f32 %v514_v19, %v498_v15 }
 0x239   : > { %v527_v24 = vadd.f32 %v523_v20, %v503_v7  ;;  %v524_v25 = vmul.f32 %v520_v21, %v506_v12 }
 0x23a   : > { %v525_v26 = vadd.f32 %v521_v22, %v495_v9  ;;  %v522_v27 = vmul.f32 %v518_v23, %v498_v15 }
 0x23b   : > { %v531_v28 = vmul.f32 0.7978846, %v527_v24  ;;  %v528_v29 = vadd.f32 %v524_v25, %v506_v12 }
 0x23c   : > { %v529_v30 = vmul.f32 0.7978846, %v525_v26  ;;  %v526_v31 = vadd.f32 %v522_v27, %v498_v15 }
 0x23d   : > { %761 = vtanh.f32 %v531_v28  ;;  %v532_v32 = vmul.f32 0.7978846, %v528_v29 }
 0x23e   : > { %763 = vtanh.f32 %v529_v30  ;;  %v530_v33 = vmul.f32 0.7978846, %v526_v31 }
 0x23f   : > { %765 = vtanh.f32 %v532_v32 }
 0x240   : > { %767 = vtanh.f32 %v530_v33 }
 0x247   : > { %v762_v34 = vpop.eup %761 }
 0x248   : > { %v764_v35 = vpop.eup %763  ;;  %v539_v37 = vadd.f32 1.0, %v762_v34 }
 0x249   : > { %v766_v38 = vpop.eup %765  ;;  %v537_v40 = vadd.f32 1.0, %v764_v35 }
 0x24a   : > { %v768_v41 = vpop.eup %767  ;;  %v543_v42 = vmul.f32 %v539_v37, %v511_v36  ;;  %v540_v44 = vadd.f32 1.0, %v766_v38 }
 0x24b   : > { %v541_v45 = vmul.f32 %v537_v40, %v509_v39  ;;  %v538_v47 = vadd.f32 1.0, %v768_v41 }
 0x24c   : > { %547 = vst [vmem:[%s336_s15 + $0x10] sm:$0xff] %v543_v42  ;;  %v544_v48 = vmul.f32 %v540_v44, %v512_v43 }
 0x24d   : > { %545 = vst [vmem:[%s336_s15] sm:$0xff] %v541_v45  ;;  %v542_v49 = vmul.f32 %v538_v47, %v510_v46 }
 0x24e   : > { %548 = vst [vmem:[%s336_s15 + $0x18] sm:$0xff] %v544_v48 }
 0x24f   : > { %546 = vst [vmem:[%s336_s15 + $0x8] sm:$0xff] %v542_v49 }
 0x250 PF: > { %s15_s20 = sadd.s32 1, %s791_s20   ;;  %s898_s18 = smov %s787_s19 }
 0x251   : > { %p12_p5 = scmp.ge.s32.totalorder %s15_s20, 4   ;;  %s899_s19 = smov %s901_s21 }
 0x253   :  { %14 = sbr.rel (!%p12_p5) target bundleno = 2 (0x2), region = 86 }

// kernel: stdit3_block_forward.17
= control target key start
LH: loop header
LB: loop body
LE: loop exit
PB: predicated region body
PF: predicated region fallthrough
CT: control target
= control target key end

     0   :  { %10 = vsyncpa [#allocation3], 0  ;;  %s1079_s0 = inlined_call_operand.vmem [shape: f32[2,32,128], index: 0, kind: input, shape index: {}]   ;;  %s1080_s1 = inlined_call_operand.vmem [shape: bf16[128,32], index: 1, kind: input, shape index: {}]   ;;  %s1081_s2 = inlined_call_operand.vmem [shape: f32[1,32], index: 2, kind: input, shape index: {}]   ;;  %s1082_s3 = inlined_call_operand.vmem [shape: f32[2,1,32], index: 3, kind: input, shape index: {}]   ;;  %s1083_s4 = inlined_call_operand.vmem [shape: f32[2,32,32], index: 4, kind: input, shape index: {}]   ;;  %s1084_s5 = inlined_call_operand.hbm [shape: f32[2,32,32], index: 5, kind: output, shape index: {}]  }
   0x1   :  { %12 = vsyncpa [#allocation3 + $0x1], 0  ;;  %s915_s18 = smov 0   ;;  %s917_s19 = smov 0  }
   0x2   :  { %s919_s20 = smov 0   ;;  %s921_s21 = smov 0  }
   0x3   :  { %s923_s22 = smov 0   ;;  %s925_s23 = smov 0  }
   0x4 LB: > { %s677_s24 = sadd.s32 4294967295, %s880_s23   ;;  %s678_s25 = sadd.s32 4294967294, %s880_s23   ;;  %s880_s23 = sphi %s925_s23, %s18_s23   ;;  %s876_s22 = sphi %s923_s22, %s1091_s22   ;;  %s872_s21 = sphi %s921_s21, %s1090_s21   ;;  %s868_s20 = sphi %s919_s20, %s1089_s20   ;;  %s864_s19 = sphi %s917_s19, %s1088_s19   ;;  %s860_s18 = sphi %s915_s18, %s1087_s18  }
   0x5   : > { %s37_s26 = sadd.s32 1, %s876_s22  ;;  %s186_s27 = sadd.s32 1, %s868_s20 }
   0x6   : > { %p39_p0 = scmp.ge.s32.totalorder %s37_s26, 2  ;;  %p196_p1 = scmp.ne.s32.totalorder %s868_s20, %s864_s19 }
   0x7   : > { %p197_p2 = scmp.eq.s32.totalorder %s677_s24, 1  ;;  %p202_p3 = scmp.ne.s32.totalorder %s864_s19, %s860_s18 }
   0x8   : > { %s1093_s26 = smov (%p39_p0, %s37_s26), 0  ;;  %p203_p5 = scmp.eq.s32.totalorder %s678_s25, 1 }
   0x9   : > { %p955_p4 = por %p197_p2, %p196_p1  ;;  %s179_s29 = ssub.s32 %s876_s22, %s1093_s26 }
   0xa   : > { %p683_p6 = scmp.ge.s32.totalorder %s880_s23, 1  ;;  %p184_p7 = scmp.eq.s32.totalorder %s179_s29, 0 }
   0xb   : > { %p962_p8 = por %p203_p5, %p202_p3  ;;  %p272_p9 = scmp.lt.s32.totalorder %s880_s23, 3 }
   0xc   : > { %s968_s6 = scalar_select %p184_p7, %s868_s20, %s186_s27  }
   0xd   : > { %p273_p10 = pnand %p683_p6, %p272_p9 }
   0xe   : > { %v794_v0 = vld [vmem:[%s1080_s1] sm:$0xff] (!%p273_p10)   ;;  %p330_p11 = scmp.lt.s32.totalorder (!%p273_p10), %s872_s21, 1  ;;  %v795_v1 = vld [vmem:[%s1080_s1 + $0x8] sm:$0xff] (!%p273_p10)   ;;  %v796_v2 = vld [vmem:[%s1080_s1 + $0x10] sm:$0xff] (!%p273_p10)   ;;  %s326_s15 = sand.u32 (!%p273_p10), 1, %s864_s19   ;;  %vm512_vm0 = vcmask (!%p273_p10), 261120  }
   0xf   : > { %276 = sbr.rel (%p273_p10) target bundleno = 283 (0x11b), region = 40  ;;  %717 = vmatprep.subr.bf16.mxu0 (!%p273_p10), %v794_v0  ;;  %v797_v3 = vld [vmem:[%s1080_s1 + $0x18] sm:$0xff] (!%p273_p10)   ;;  %v798_v7 = vld [vmem:[%s1080_s1 + $0x20] sm:$0xff] (!%p273_p10)   ;;  %v799_v8 = vld [vmem:[%s1080_s1 + $0x28] sm:$0xff] (!%p273_p10)  }
  0x10   : > { %718 = vmatpush3.bf16.msra.mxu0 (!%p273_p10), %v794_v0  ;;  %v800_v9 = vld [vmem:[%s1080_s1 + $0x30] sm:$0xff] (!%p273_p10)   ;;  %v801_v10 = vld [vmem:[%s1080_s1 + $0x38] sm:$0xff] (!%p273_p10)   ;;  %v689_v14 = vld [vmem:[%s1081_s2] ss:$0 sm:$0xff] (!%p273_p10) }
  0x11   : > { %719 = vmatprep.subr.bf16.mxu0 (!%p273_p10), %v795_v1 }
  0x14   : > { %720 = vmatpush3.bf16.msra.mxu0 (!%p273_p10), %v795_v1 }
  0x15   : > { %721 = vmatprep.subr.bf16.mxu0 (!%p273_p10), %v796_v2 }
  0x16   : > { %s978_s11 = scalar_select %p330_p11, %s872_s21, 1 }
  0x18   : > { %s704_s14 = sshll.u32 %s978_s11, 5  ;;  %722 = vmatpush3.bf16.msra.mxu0 %v796_v2  ;;  %s351_s25 = scalar_lea.vmem %s1082_s3, %s978_s11 }
  0x19   : > { %s337_s17 = scalar_lea.vmem %s1079_s0, %s704_s14  ;;  %723 = vmatprep.subr.bf16.mxu0 %v797_v3  ;;  %s363_s9 = scalar_lea.vmem %s1083_s4, %s704_s14  ;;  %v698_v16 = vld [vmem:[%s351_s25] ss:$0 sm:$0xff] }
  0x1a   : > { %v367_v4 = vld [vmem:[%s337_s17] sm:$0xff]  ;;  %v368_v5 = vld [vmem:[%s337_s17 + $0x8] sm:$0xff]  ;;  %v369_v11 = vld [vmem:[%s337_s17 + $0x10] sm:$0xff]  ;;  %s706_s11 = sshll.u32 %s872_s21, 9  ;;  %s1033_s21 = scalar_lea.sflag [#allocation3], %s326_s15 }
  0x1b   : > { %v371_v6 = vpack.c.bf16 %v368_v5, %v367_v4  ;;  %v370_v12 = vld [vmem:[%s337_s17 + $0x18] sm:$0xff]  ;;  %s684_s17 = sshll.u32 %s326_s15, 5  ;;  %v495_v19 = vld [vmem:[%s363_s9 + $0x10] sm:$0xff]  ;;  %v493_v23 = vld [vmem:[%s363_s9] sm:$0xff]  ;;  %s1024_s16 = scalar_lea.hbm %s1084_s5, %s706_s11 }
  0x1c   : > { %724 = vmatpush3.bf16.msra.mxu0 %v797_v3  ;;  %v372_v13 = vpack.c.bf16 %v370_v12, %v369_v11  ;;  %v496_v27 = vld [vmem:[%s363_s9 + $0x18] sm:$0xff]  ;;  %s328_s14 = scalar_lea.vmem [#allocation2], %s684_s17  ;;  %v494_v31 = vld [vmem:[%s363_s9 + $0x8] sm:$0xff]  ;;  %s882_s25 = smov [#allocation2]  }
  0x1d   : > { %733 = vmatprep.mubr.bf16.mxu0 %v371_v6  ;;  %725 = vmatprep.subr.bf16.mxu0 %v798_v7  ;;  %s534_s10 = sshll.u32 %s328_s14, 4  ;;  %s806_s27 = sshll.u32 %s882_s25, 4  ;;  %s1026_s10 = int_to_ptr.vmem [resolvable:$true] %s534_s10  ;;  %s807_s27 = int_to_ptr.vmem [resolvable:$false] %s806_s27 }
  0x1e   : > { %s802_s24 = scalar_lea.vmem %s1026_s10, 512  ;;  %s808_s29 = scalar_lea.vmem %s807_s27, 1024 }
  0x1f   : > { %p803_p12 = scmp.ne.s32.totalorder %s1026_s10, %s802_s24  ;;  %p809_p1 = scmp.lt.s32.totalorder %s1026_s10, %s807_s27 }
  0x20   : > { %726 = vmatpush3.bf16.msra.mxu0 %v798_v7  ;;  %p810_p2 = scmp.lt.s32.totalorder %s808_s29, %s802_s24 }
  0x21   : > { %727 = vmatprep.subr.bf16.mxu0 %v799_v8  ;;  %p804_p13 = pnand %p803_p12, %p955_p4 }
  0x22   : > { %p811_p3 = por %p810_p2, %p809_p1 }
  0x23   : > { %p805_p0 = pneg %p804_p13 }
  0x24   : > { %728 = vmatpush3.bf16.msra.mxu0 %v799_v8 }
  0x25   : > { %729 = vmatprep.subr.bf16.mxu0 %v800_v9  ;;  %p812_p5 = pnand %p811_p3, %p805_p0 }
  0x28   : > { %730 = vmatpush3.bf16.msra.mxu0 %v800_v9 }
  0x29   : > { %731 = vmatprep.subr.bf16.mxu0 %v801_v10 }
  0x2c   : > { %732 = vmatpush3.bf16.msra.mxu0 %v801_v10 }
  0x2f   : > { %734 = vmatmul.mubr.bf16.vlgmr.msra.gmra.mrb[0].mxu0 %v372_v13 }
 0x102   : > { %v735_v15 = vpop.f32.mrb[0].mxu0 }
 0x103   : > { %v487_v17 = vadd.f32 %v735_v15, %v689_v14  ;;  %v478_v18 = vpop.f32.mrb[1].mxu0 }
 0x104   : > { %v479_v20 = vadd.f32 %v689_v14, %v478_v18  ;;  %v736_v21 = vpop.f32.mrb[2].mxu0 }
 0x105   : > { %v506_v22 = vmul.f32 %v698_v16, %v487_v17  ;;  %v490_v24 = vadd.f32 %v736_v21, %v689_v14  ;;  %v481_v25 = vpop.f32.mrb[3].mxu0 }
 0x106   : > { %v504_v26 = vmul.f32 %v698_v16, %v479_v20  ;;  %v482_v28 = vadd.f32 %v689_v14, %v481_v25 }
 0x107   : > { %v510_v29 = vadd.f32 %v506_v22, %v495_v19  ;;  %v507_v30 = vmul.f32 %v698_v16, %v490_v24 }
 0x108   : > { %v508_v32 = vadd.f32 %v504_v26, %v493_v23  ;;  %v505_v33 = vmul.f32 %v698_v16, %v482_v28 }
 0x109   : > { %515 = vst.msk [vmem:[%s328_s14 + $0x10] sm:$0xff] %vm512_vm0, %v510_v29  ;;  %v511_v34 = vadd.f32 %v507_v30, %v496_v27 }
 0x10a   : > { %513 = vst.msk [vmem:[%s328_s14] sm:$0xff] %vm512_vm0, %v508_v32  ;;  %v509_v35 = vadd.f32 %v505_v33, %v494_v31 }
 0x10b   : > { %516 = vst.msk [vmem:[%s328_s14 + $0x18] sm:$0xff] %vm512_vm0, %v511_v34 }
 0x10c   : > { %514 = vst.msk [vmem:[%s328_s14 + $0x8] sm:$0xff] %vm512_vm0, %v509_v35 }
 0x10d   : > { %815 = shalt.err (!%p812_p5)
}
 0x10e   : > { %s816_s15 = scalar_lea.hbm %s1024_s16, 512  ;;  %s820_s9 = scalar_lea.hbm %s1084_s5, 1024 }
 0x10f   : > { %p817_p6 = scmp.ne.s32.totalorder %s1024_s16, %s816_s15  ;;  %p821_p10 = scmp.lt.u32.totalorder %s1024_s16, %s1084_s5 }
 0x110   : > { %p822_p11 = scmp.lt.u32.totalorder %s820_s9, %s816_s15  ;;  %p824_p13 = scmp.lt.u32.totalorder %s816_s15, %s1024_s16 }
 0x111   : > { %p818_p7 = pnand %p817_p6, %p955_p4 }
 0x112   : > { %p823_p12 = por %p822_p11, %p821_p10 }
 0x113   : > { %p819_p9 = pneg %p818_p7 }
 0x114   : > { %p825_p0 = por %p824_p13, %p823_p12 }
 0x116   : > { %p826_p1 = pnand %p825_p0, %p819_p9 }
 0x118   : > { %829 = shalt.err (!%p826_p1)
}
 0x119   : > { %s883_s14 = smov 128   ;;  %s884_s12 = smov 8  }
 0x11a   : > { %737 = dma.vmem_to_hbm [thread:$0]  (%p955_p4), %s1026_s10, 512, %s1024_s16, %s1033_s21, %s883_s14, %s883_s14, %s884_s12  }
 0x11b PF: > { %p743_p2 = scmp.ge.s32.totalorder %s880_s23, 2  ;;  %s549_s13 = sand.u32 1, %s860_s18  }
 0x11c   : > { %s550_s24 = scalar_lea.sflag [#allocation3], %s549_s13 }
 0x11d   : > { %p740_p3 = pnand %p743_p2, %p962_p8 }
 0x11f   : > { %855 = dma.done.wait (!%p740_p3), %s550_s24, 512  }
 0x120   : > { %857 = vsyncadd (!%p740_p3), %s550_s24, 4294966784  ;;  %s18_s23 = sadd.s32 1, %s880_s23   ;;  %s1087_s18 = smov %s864_s19 }
 0x121   : > { %p15_p5 = scmp.ge.s32.totalorder %s18_s23, 4   ;;  %s1088_s19 = smov %s868_s20 }
 0x122   : > { %s1089_s20 = smov %s968_s6  ;;  %s1090_s21 = smov %s876_s22 }
 0x123   : > { %s1091_s22 = smov %s1093_s26  ;;  %17 = sbr.rel (!%p15_p5) target bundleno = 4 (0x4), region = 87 }
 0x12a   :  { %555 = vsyncpa [#allocation3], 1 }
 0x12b   :  { %557 = vsyncpa [#allocation3 + $0x1], 1 }

// kernel: stdit3_block_forward.14
= control target key start
LH: loop header
LB: loop body
LE: loop exit
PB: predicated region body
PF: predicated region fallthrough
CT: control target
= control target key end

     0   :  { %s3416_s12 = smov 0   ;;  %s3418_s13 = smov 0   ;;  %s4515_s0 = inlined_call_operand.vmem [shape: f32[2,32,1,4,8], index: 0, kind: input, shape index: {}]   ;;  %s4516_s1 = inlined_call_operand.vmem [shape: f32[2,8,2,4,8], index: 1, kind: input, shape index: {}, may-alias: {1,2}]   ;;  %s4517_s2 = inlined_call_operand.vmem [shape: f32[2,8,2,4,8], index: 2, kind: input, shape index: {}, may-alias: {1,2}]   ;;  %s4518_s3 = inlined_call_operand.vmem [shape: f32[2,32,32], index: 3, kind: output, shape index: {}]  }
   0x1   :  { %s3420_s14 = smov 0   ;;  %s3422_s15 = smov 0  }
   0x2   :  { %s3424_s16 = smov 0  }
   0x3 LB: > { %s32_s17 = sadd.s32 1, %s3384_s15  ;;  %p76_p1 = scmp.ne.s32.totalorder %s3376_s13, %s3372_s12  ;;  %s3388_s16 = sphi %s3424_s16, %s13_s16   ;;  %s3384_s15 = sphi %s3422_s15, %s4552_s15   ;;  %s3380_s14 = sphi %s3420_s14, %s4551_s14   ;;  %s3376_s13 = sphi %s3418_s13, %s4550_s13   ;;  %s3372_s12 = sphi %s3416_s12, %s4549_s12  }
   0x4   : > { %p34_p0 = scmp.ge.s32.totalorder %s32_s17, 2  ;;  %p77_p2 = scmp.eq.s32.totalorder %s3388_s16, 0 }
   0x5   : > { %s69_s20 = sadd.s32 1, %s3376_s13  ;;  %p3082_p5 = scmp.ge.s32.totalorder %s3388_s16, 2 }
   0x6   : > { %s4554_s17 = smov (%p34_p0, %s32_s17), 0  ;;  %p3447_p3 = por %p77_p2, %p76_p1 }
   0x7   : > { %s64_s19 = ssub.s32 %s3384_s15, %s4554_s17  ;;  %158 = sbr.rel (%p3082_p5) target bundleno = 32 (0x20), region = 16 }
   0x8   : > { %p67_p4 = scmp.eq.s32.totalorder %s64_s19, 0 }
   0xa   : > { %s3455_s21 = scalar_select %p67_p4, %s3376_s13, %s69_s20  }
   0xe   : > { %174 = sbr.rel (!%p3447_p3) target bundleno = 23 (0x17), region = 24  ;;  %s176_s22 = sand.u32 (%p3447_p3), 1, %s3376_s13  }
   0xf   : > { %s3122_s23 = sshll.u32 (%p3447_p3), %s3384_s15, 6  ;;  %s3083_s24 = sshll.u32 (%p3447_p3), %s176_s22, 5 }
  0x10   : > { %s184_s27 = scalar_lea.vmem (%p3447_p3), %s4516_s1, %s3122_s23  ;;  %s178_s28 = scalar_lea.vmem (%p3447_p3), [#allocation5], %s3083_s24 }
  0x11   : > { %v200_v0 = vld [vmem:[%s184_s27] sm:$0xf] (%p3447_p3)  ;;  %v202_v1 = vld [vmem:[%s184_s27 + $0x8] sm:$0xf] (%p3447_p3)  ;;  %v204_v2 = vld [vmem:[%s184_s27 + $0x10] sm:$0xf] (%p3447_p3) }
  0x12   : > { %201 = vst [vmem:[%s178_s28] sm:$0xf] (%p3447_p3), %v200_v0  ;;  %203 = vst [vmem:[%s178_s28 + $0x4] sm:$0xf] (%p3447_p3), %v202_v1  ;;  %v206_v3 = vld [vmem:[%s184_s27 + $0x18] sm:$0xf] (%p3447_p3) }
  0x13   : > { %v208_v4 = vld [vmem:[%s184_s27 + $0x20] sm:$0xf] (%p3447_p3)  ;;  %205 = vst [vmem:[%s178_s28 + $0x8] sm:$0xf] (%p3447_p3), %v204_v2  ;;  %207 = vst [vmem:[%s178_s28 + $0xc] sm:$0xf] (%p3447_p3), %v206_v3 }
  0x14   : > { %209 = vst [vmem:[%s178_s28 + $0x10] sm:$0xf] (%p3447_p3), %v208_v4  ;;  %v210_v5 = vld [vmem:[%s184_s27 + $0x28] sm:$0xf] (%p3447_p3)  ;;  %v212_v6 = vld [vmem:[%s184_s27 + $0x30] sm:$0xf] (%p3447_p3) }
  0x15   : > { %v214_v7 = vld [vmem:[%s184_s27 + $0x38] sm:$0xf]  ;;  %211 = vst [vmem:[%s178_s28 + $0x14] sm:$0xf] %v210_v5  ;;  %213 = vst [vmem:[%s178_s28 + $0x18] sm:$0xf] %v212_v6 }
  0x16   : > { %215 = vst [vmem:[%s178_s28 + $0x1c] sm:$0xf] %v214_v7 }
  0x17 PF: > { %254 = sbr.rel (!%p3447_p3) target bundleno = 32 (0x20), region = 65  ;;  %s256_s29 = sand.u32 (%p3447_p3), 1, %s3376_s13  }
  0x18   : > { %s3123_s30 = sshll.u32 (%p3447_p3), %s3384_s15, 6  ;;  %s3086_s4 = sshll.u32 (%p3447_p3), %s256_s29, 5 }
  0x19   : > { %s2993_s7 = scalar_lea.vmem (%p3447_p3), %s4517_s2, %s3123_s30  ;;  %s258_s8 = scalar_lea.vmem (%p3447_p3), [#allocation6], %s3086_s4 }
  0x1a   : > { %v3089_v8 = vld [vmem:[%s2993_s7 + $0x4] sm:$0xf] (%p3447_p3)  ;;  %v3090_v9 = vld [vmem:[%s2993_s7 + $0xc] sm:$0xf] (%p3447_p3)  ;;  %v3091_v10 = vld [vmem:[%s2993_s7 + $0x14] sm:$0xf] (%p3447_p3) }
  0x1b   : > { %282 = vst [vmem:[%s258_s8] sm:$0xf] (%p3447_p3), %v3089_v8  ;;  %284 = vst [vmem:[%s258_s8 + $0x4] sm:$0xf] (%p3447_p3), %v3090_v9  ;;  %v3092_v11 = vld [vmem:[%s2993_s7 + $0x1c] sm:$0xf] (%p3447_p3) }
  0x1c   : > { %v3093_v12 = vld [vmem:[%s2993_s7 + $0x24] sm:$0xf] (%p3447_p3)  ;;  %286 = vst [vmem:[%s258_s8 + $0x8] sm:$0xf] (%p3447_p3), %v3091_v10  ;;  %288 = vst [vmem:[%s258_s8 + $0xc] sm:$0xf] (%p3447_p3), %v3092_v11 }
  0x1d   : > { %290 = vst [vmem:[%s258_s8 + $0x10] sm:$0xf] (%p3447_p3), %v3093_v12  ;;  %v3094_v13 = vld [vmem:[%s2993_s7 + $0x2c] sm:$0xf] (%p3447_p3)  ;;  %v3095_v14 = vld [vmem:[%s2993_s7 + $0x34] sm:$0xf] (%p3447_p3) }
  0x1e   : > { %v3096_v15 = vld [vmem:[%s2993_s7 + $0x3c] sm:$0xf]  ;;  %292 = vst [vmem:[%s258_s8 + $0x14] sm:$0xf] %v3094_v13  ;;  %294 = vst [vmem:[%s258_s8 + $0x18] sm:$0xf] %v3095_v14 }
  0x1f   : > { %296 = vst [vmem:[%s258_s8 + $0x1c] sm:$0xf] %v3096_v15 }
  0x20 PF: > { %p3097_p6 = scmp.ge.s32.totalorder %s3388_s16, 1  ;;  %p334_p7 = scmp.lt.s32.totalorder %s3388_s16, 3 }
  0x22   : > { %p335_p8 = pnand %p3097_p6, %p334_p7 }
  0x24   : > { %338 = sbr.rel (%p335_p8) target bundleno = 1577 (0x629), region = 106 }
  0x2b   : > { %s341_s9 = sand.u32 1, %s3372_s12   ;;  %p389_p9 = scmp.lt.s32.totalorder %s3380_s14, 1  ;;  %vm658_vm0 = vcmask 1041409   ;;  %vm661_vm1 = vcmask 1042434   ;;  %vm664_vm2 = vcmask 1043459   ;;  %vm667_vm3 = vcmask 1044484  }
  0x2c   : > { %s3475_s10 = sshll.u32 %s341_s9, 5  ;;  %vm670_vm4 = vcmask 1045509   ;;  %vm448_vm5 = vcmask 64512   ;;  %vm673_vm6 = vcmask 1046534   ;;  %vm676_vm7 = vcmask 1047559   ;;  %s3393_s23 = smov 8  }
  0x2d   : > { %s3479_s11 = scalar_lea.vmem [#allocation5], %s3475_s10  ;;  %s4556_s14 = smov (!%p389_p9, %s3380_s14), 1  ;;  %vm415_vm8 = vcmask 7168   ;;  %vm972_vm9 = vcmask 1043456   ;;  %vm2936_vm10 = vcmask 195584   ;;  %vm2931_vm11 = vcmask 130048  }
  0x2e   : > { %v561_v16 = vld [vmem:[%s3479_s11] sm:$0x1]  ;;  %v562_v17 = vld [vmem:[%s3479_s11 + $0x4] sm:$0x1]  ;;  %v563_v18 = vld [vmem:[%s3479_s11 + $0x8] sm:$0x1] }
  0x2f   : > { %v564_v19 = vld [vmem:[%s3479_s11 + $0xc] sm:$0x1]  ;;  %v565_v20 = vld [vmem:[%s3479_s11 + $0x10] sm:$0x1]  ;;  %v566_v21 = vld [vmem:[%s3479_s11 + $0x14] sm:$0x1]  ;;  %v569_v22 = vpack.c.bf16 %v561_v16, %v561_v16  ;;  %v570_v23 = vpack.c.bf16 %v562_v17, %v562_v17  ;;  %v571_v24 = vpack.c.bf16 %v563_v18, %v563_v18 }
  0x30   : > { %v567_v25 = vld [vmem:[%s3479_s11 + $0x18] sm:$0x1]  ;;  %v568_v26 = vld [vmem:[%s3479_s11 + $0x1c] sm:$0x1]  ;;  %v572_v27 = vpack.c.bf16 %v564_v19, %v564_v19  ;;  %v573_v28 = vpack.c.bf16 %v565_v20, %v565_v20  ;;  %v574_v29 = vpack.c.bf16 %v566_v21, %v566_v21  ;;  %s3124_s12 = sshll.u32 %s4556_s14, 7  ;;  %s3660_s22 = scalar_lea.vmem [#allocation6], %s3475_s10 }
  0x31   : > { %v575_v30 = vpack.c.bf16 %v567_v25, %v567_v25  ;;  %v576_v31 = vpack.c.bf16 %v568_v26, %v568_v26  ;;  %v730_v32 = vunpack.c.l.b16 %v569_v22  ;;  %v731_v33 = vunpack.c.l.b16 %v570_v23  ;;  %s3498_s20 = scalar_lea.vmem %s4515_s0, %s3124_s12  ;;  %s3394_s24 = smov 16  }
  0x32   : > { %v732_v34 = vunpack.c.l.b16 %v571_v24  ;;  %v733_v35 = vunpack.c.l.b16 %v572_v27  ;;  %v734_v36 = vunpack.c.l.b16 %v573_v28  ;;  %v735_v37 = vunpack.c.l.b16 %v574_v29  ;;  %v465_v48 = vld [vmem:[%s3498_s20] sm:$0x1]  ;;  %v466_v50 = vld [vmem:[%s3498_s20 + $0x4] sm:$0x1]  ;;  %v467_v51 = vld [vmem:[%s3498_s20 + $0x8] sm:$0x1] }
  0x33   : > { %v736_v38 = vunpack.c.l.b16 %v575_v30  ;;  %v737_v39 = vunpack.c.l.b16 %v576_v31  ;;  %v738_v40 = vrot.slane %v731_v33, 7  ;;  %v468_v52 = vld [vmem:[%s3498_s20 + $0xc] sm:$0x1]  ;;  %v469_v54 = vld [vmem:[%s3498_s20 + $0x10] sm:$0x1]  ;;  %s3395_s25 = smov 24  }
  0x34   : > { %v740_v41 = vrot.slane %v732_v34, 6  ;;  %v742_v42 = vrot.slane %v733_v35, 5  ;;  %v744_v43 = vrot.slane %v734_v36, 4  ;;  %v746_v45 = vrot.slane %v735_v37, 3  ;;  %v470_v55 = vld [vmem:[%s3498_s20 + $0x14] sm:$0x1] }
  0x35   : > { %v739_v44 = vsel %vm658_vm0, %v738_v40, %v730_v32  ;;  %v748_v46 = vrot.slane %v736_v38, 2  ;;  %v750_v47 = vrot.slane %v737_v39, 1  ;;  %v471_v56 = vld [vmem:[%s3498_s20 + $0x18] sm:$0x1]  ;;  %v472_v58 = vld [vmem:[%s3498_s20 + $0x1c] sm:$0x1] }
  0x36   : > { %v741_v49 = vsel %vm661_vm1, %v740_v41, %v739_v44  ;;  %v473_v59 = vld [vmem:[%s3498_s20 + $0x20] sm:$0x1]  ;;  %v474_v60 = vld [vmem:[%s3498_s20 + $0x24] sm:$0x1]  ;;  %v475_v62 = vld [vmem:[%s3498_s20 + $0x28] sm:$0x1] }
  0x37   : > { %v743_v53 = vsel %vm664_vm2, %v742_v42, %v741_v49  ;;  %v476_v63 = vld [vmem:[%s3498_s20 + $0x2c] sm:$0x1]  ;;  %v477_v0 = vld [vmem:[%s3498_s20 + $0x30] sm:$0x1]  ;;  %v478_v2 = vld [vmem:[%s3498_s20 + $0x34] sm:$0x1] }
  0x38   : > { %v745_v57 = vsel %vm667_vm3, %v744_v43, %v743_v53  ;;  %v479_v3 = vld [vmem:[%s3498_s20 + $0x38] sm:$0x1]  ;;  %v480_v4 = vld [vmem:[%s3498_s20 + $0x3c] sm:$0x1]  ;;  %v497_v5 = vmul.f32 0.35355338, %v465_v48 }
  0x39   : > { %v747_v61 = vsel %vm670_vm4, %v746_v45, %v745_v57  ;;  %v498_v6 = vmul.f32 0.35355338, %v466_v50  ;;  %v499_v8 = vmul.f32 0.35355338, %v467_v51  ;;  %v500_v9 = vmul.f32 0.35355338, %v468_v52 }
  0x3a   : > { %v749_v1 = vsel %vm673_vm6, %v748_v46, %v747_v61  ;;  %v501_v10 = vmul.f32 0.35355338, %v469_v54  ;;  %v502_v12 = vmul.f32 0.35355338, %v470_v55  ;;  %v503_v13 = vmul.f32 0.35355338, %v471_v56 }
  0x3b   : > { %v751_v7 = vsel %vm676_vm7, %v750_v47, %v749_v1  ;;  %v504_v14 = vmul.f32 0.35355338, %v472_v58  ;;  %v505_v15 = vmul.f32 0.35355338, %v473_v59  ;;  %v506_v16 = vmul.f32 0.35355338, %v474_v60 }
  0x3c   : > { %v752_v11 = vpack.c.b16 %v751_v7, %v751_v7  ;;  %v507_v17 = vmul.f32 0.35355338, %v475_v62  ;;  %v508_v19 = vmul.f32 0.35355338, %v476_v63  ;;  %v509_v20 = vmul.f32 0.35355338, %v477_v0 }
  0x3d   : > { %v530_v21 = vpack.c.bf16 %v498_v6, %v498_v6  ;;  %v510_v22 = vmul.f32 0.35355338, %v478_v2  ;;  %v511_v23 = vmul.f32 0.35355338, %v479_v3  ;;  %v512_v24 = vmul.f32 0.35355338, %v480_v4 }
  0x3e   : > { %3198 = vmatprep.subr.msk.bf16.mxu0 %vm448_vm5, %v752_v11  ;;  %v761_v18 = vsel %vm448_vm5, %v752_v11, 0  ;;  %v531_v25 = vpack.c.bf16 %v499_v8, %v499_v8  ;;  %v529_v26 = vpack.c.bf16 %v497_v5, %v497_v5  ;;  %v532_v27 = vpack.c.bf16 %v500_v9, %v500_v9  ;;  %v481_v58 = vld [vmem:[%s3498_s20 + $0x40] sm:$0x1]  ;;  %v482_v62 = vld [vmem:[%s3498_s20 + $0x44] sm:$0x1]  ;;  %s3125_s26 = sshll.u32 %s4556_s14, 5 }
  0x3f   : > { %3151 = vmatpush3.bf16.xpose.msra.mxu0 %v761_v18  ;;  %v533_v28 = vpack.c.bf16 %v501_v10, %v501_v10  ;;  %v534_v29 = vpack.c.bf16 %v502_v12, %v502_v12  ;;  %v535_v30 = vpack.c.bf16 %v503_v13, %v503_v13  ;;  %v536_v31 = vpack.c.bf16 %v504_v14, %v504_v14  ;;  %v483_v63 = vld [vmem:[%s3498_s20 + $0x48] sm:$0x1]  ;;  %v484_v4 = vld [vmem:[%s3498_s20 + $0x4c] sm:$0x1]  ;;  %v485_v5 = vld [vmem:[%s3498_s20 + $0x50] sm:$0x1]  ;;  %s408_s29 = scalar_lea.vmem %s4518_s3, %s3125_s26 }
  0x40   : > { %v538_v32 = vpack.c.bf16 %v506_v16, %v506_v16  ;;  %v539_v33 = vpack.c.bf16 %v507_v17, %v507_v17  ;;  %v537_v34 = vpack.c.bf16 %v505_v15, %v505_v15  ;;  %v540_v35 = vpack.c.bf16 %v508_v19, %v508_v19  ;;  %v486_v10 = vld [vmem:[%s3498_s20 + $0x54] sm:$0x1]  ;;  %v487_v11 = vld [vmem:[%s3498_s20 + $0x58] sm:$0x1]  ;;  %v488_v16 = vld [vmem:[%s3498_s20 + $0x5c] sm:$0x1] }
  0x41   : > { %v541_v36 = vpack.c.bf16 %v509_v20, %v509_v20  ;;  %v542_v37 = vpack.c.bf16 %v510_v22, %v510_v22  ;;  %v543_v38 = vpack.c.bf16 %v511_v23, %v511_v23  ;;  %v544_v39 = vpack.c.bf16 %v512_v24, %v512_v24  ;;  %v489_v17 = vld [vmem:[%s3498_s20 + $0x60] sm:$0x1]  ;;  %v490_v18 = vld [vmem:[%s3498_s20 + $0x64] sm:$0x1]  ;;  %v491_v22 = vld [vmem:[%s3498_s20 + $0x68] sm:$0x1] }
  0x42   : > { %v626_v40 = vunpack.c.l.b16 %v530_v21  ;;  %v627_v41 = vunpack.c.l.b16 %v531_v25  ;;  %v625_v42 = vunpack.c.l.b16 %v529_v26  ;;  %v628_v43 = vunpack.c.l.b16 %v532_v27  ;;  %v492_v23 = vld [vmem:[%s3498_s20 + $0x6c] sm:$0x1]  ;;  %v493_v24 = vld [vmem:[%s3498_s20 + $0x70] sm:$0x1] }
  0x43   : > { %v629_v44 = vunpack.c.l.b16 %v533_v28  ;;  %v630_v45 = vunpack.c.l.b16 %v534_v29  ;;  %v631_v46 = vunpack.c.l.b16 %v535_v30  ;;  %v632_v47 = vunpack.c.l.b16 %v536_v31  ;;  %v494_v28 = vld [vmem:[%s3498_s20 + $0x74] sm:$0x1] }
  0x44   : > { %v634_v48 = vunpack.c.l.b16 %v538_v32  ;;  %v635_v49 = vunpack.c.l.b16 %v539_v33  ;;  %v633_v50 = vunpack.c.l.b16 %v537_v34  ;;  %v636_v51 = vunpack.c.l.b16 %v540_v35  ;;  %v495_v33 = vld [vmem:[%s3498_s20 + $0x78] sm:$0x1] }
  0x45   : > { %v637_v52 = vunpack.c.l.b16 %v541_v36  ;;  %v638_v53 = vunpack.c.l.b16 %v542_v37  ;;  %v639_v54 = vunpack.c.l.b16 %v543_v38  ;;  %v657_v55 = vrot.slane %v626_v40, 7  ;;  %v496_v38 = vld [vmem:[%s3498_s20 + $0x7c] sm:$0x1] }
  0x46   : > { %v660_v56 = vrot.slane %v627_v41, 6  ;;  %v663_v57 = vrot.slane %v628_v43, 5  ;;  %v640_v59 = vunpack.c.l.b16 %v544_v39  ;;  %v666_v60 = vrot.slane %v629_v44, 4 }
  0x47   : > { %v669_v61 = vrot.slane %v630_v45, 3  ;;  %v659_v0 = vsel %vm658_vm0, %v657_v55, %v625_v42  ;;  %v678_v1 = vrot.slane %v634_v48, 7  ;;  %v680_v2 = vrot.slane %v635_v49, 6 }
  0x48   : > { %v682_v3 = vrot.slane %v636_v51, 5  ;;  %v662_v6 = vsel %vm661_vm1, %v660_v56, %v659_v0  ;;  %v672_v7 = vrot.slane %v631_v46, 2  ;;  %v675_v8 = vrot.slane %v632_v47, 1 }
  0x49   : > { %v684_v9 = vrot.slane %v637_v52, 4  ;;  %v665_v12 = vsel %vm664_vm2, %v663_v57, %v662_v6  ;;  %v679_v13 = vsel %vm658_vm0, %v678_v1, %v633_v50  ;;  %v686_v14 = vrot.slane %v638_v53, 3 }
  0x4a   : > { %v688_v15 = vrot.slane %v639_v54, 2  ;;  %v668_v19 = vsel %vm667_vm3, %v666_v60, %v665_v12  ;;  %v681_v20 = vsel %vm661_vm1, %v680_v2, %v679_v13  ;;  %v690_v21 = vrot.slane %v640_v59, 1 }
  0x4b   : > { %v513_v25 = vmul.f32 0.35355338, %v481_v58  ;;  %v671_v26 = vsel %vm670_vm4, %v669_v61, %v668_v19  ;;  %v683_v27 = vsel %vm664_vm2, %v682_v3, %v681_v20  ;;  %v514_v29 = vmul.f32 0.35355338, %v482_v62 }
  0x4c   : > { %v515_v30 = vmul.f32 0.35355338, %v483_v63  ;;  %v674_v31 = vsel %vm673_vm6, %v672_v7, %v671_v26  ;;  %v685_v32 = vsel %vm667_vm3, %v684_v9, %v683_v27  ;;  %v516_v34 = vmul.f32 0.35355338, %v484_v4 }
  0x4d   : > { %v517_v35 = vmul.f32 0.35355338, %v485_v5  ;;  %v677_v36 = vsel %vm676_vm7, %v675_v8, %v674_v31  ;;  %v687_v37 = vsel %vm670_vm4, %v686_v14, %v685_v32  ;;  %v518_v39 = vmul.f32 0.35355338, %v486_v10 }
  0x4e   : > { %v519_v40 = vmul.f32 0.35355338, %v487_v11  ;;  %v689_v41 = vsel %vm673_vm6, %v688_v15, %v687_v37  ;;  %v520_v42 = vmul.f32 0.35355338, %v488_v16  ;;  %v521_v43 = vmul.f32 0.35355338, %v489_v17 }
  0x4f   : > { %v522_v44 = vmul.f32 0.35355338, %v490_v18  ;;  %v691_v45 = vsel %vm676_vm7, %v690_v21, %v689_v41  ;;  %v523_v46 = vmul.f32 0.35355338, %v491_v22  ;;  %v524_v47 = vmul.f32 0.35355338, %v492_v23 }
  0x50   : > { %v525_v48 = vmul.f32 0.35355338, %v493_v24  ;;  %v720_v49 = vpack.c.b16 %v691_v45, %v677_v36  ;;  %v526_v50 = vmul.f32 0.35355338, %v494_v28  ;;  %v527_v51 = vmul.f32 0.35355338, %v495_v33 }
  0x51   : > { %v546_v52 = vpack.c.bf16 %v514_v29, %v514_v29  ;;  %v528_v53 = vmul.f32 0.35355338, %v496_v38  ;;  %v547_v54 = vpack.c.bf16 %v515_v30, %v515_v30  ;;  %v548_v55 = vpack.c.bf16 %v516_v34, %v516_v34 }
  0x52   : > { %v549_v56 = vpack.c.bf16 %v517_v35, %v517_v35  ;;  %3152 = vmatprep.mubr.msk.bf16.mxu0 %vm448_vm5, %v720_v49  ;;  %v545_v57 = vpack.c.bf16 %v513_v25, %v513_v25  ;;  %v550_v58 = vpack.c.bf16 %v518_v39, %v518_v39  ;;  %v551_v59 = vpack.c.bf16 %v519_v40, %v519_v40 }
  0x53   : > { %v554_v60 = vpack.c.bf16 %v522_v44, %v522_v44  ;;  %v552_v61 = vpack.c.bf16 %v520_v42, %v520_v42  ;;  %v555_v62 = vpack.c.bf16 %v523_v46, %v523_v46  ;;  %v556_v63 = vpack.c.bf16 %v524_v47, %v524_v47 }
  0x54   : > { %v557_v0 = vpack.c.bf16 %v525_v48, %v525_v48  ;;  %v553_v1 = vpack.c.bf16 %v521_v43, %v521_v43  ;;  %v558_v2 = vpack.c.bf16 %v526_v50, %v526_v50  ;;  %v559_v3 = vpack.c.bf16 %v527_v51, %v527_v51 }
  0x55   : > { %v642_v4 = vunpack.c.l.b16 %v546_v52  ;;  %v560_v5 = vpack.c.bf16 %v528_v53, %v528_v53  ;;  %v643_v6 = vunpack.c.l.b16 %v547_v54  ;;  %v644_v7 = vunpack.c.l.b16 %v548_v55 }
  0x56   : > { %v645_v8 = vunpack.c.l.b16 %v549_v56  ;;  %v641_v9 = vunpack.c.l.b16 %v545_v57  ;;  %v646_v10 = vunpack.c.l.b16 %v550_v58  ;;  %v647_v11 = vunpack.c.l.b16 %v551_v59 }
  0x57   : > { %v650_v12 = vunpack.c.l.b16 %v554_v60  ;;  %v648_v13 = vunpack.c.l.b16 %v552_v61  ;;  %v651_v14 = vunpack.c.l.b16 %v555_v62  ;;  %v652_v15 = vunpack.c.l.b16 %v556_v63 }
  0x58   : > { %v653_v16 = vunpack.c.l.b16 %v557_v0  ;;  %v649_v17 = vunpack.c.l.b16 %v553_v1  ;;  %v654_v18 = vunpack.c.l.b16 %v558_v2  ;;  %v692_v19 = vrot.slane %v642_v4, 7 }
  0x59   : > { %v694_v20 = vrot.slane %v643_v6, 6  ;;  %v655_v21 = vunpack.c.l.b16 %v559_v3  ;;  %v656_v22 = vunpack.c.l.b16 %v560_v5  ;;  %v696_v23 = vrot.slane %v644_v7, 5 }
  0x5a   : > { %v698_v24 = vrot.slane %v645_v8, 4  ;;  %v693_v25 = vsel %vm658_vm0, %v692_v19, %v641_v9  ;;  %v700_v26 = vrot.slane %v646_v10, 3  ;;  %v706_v27 = vrot.slane %v650_v12, 7  ;;  %v578_v8 = vld [vmem:[%s3660_s22 + $0x4] sm:$0x1] }
  0x5b   : > { %v708_v28 = vrot.slane %v651_v14, 6  ;;  %v695_v29 = vsel %vm661_vm1, %v694_v20, %v693_v25  ;;  %v702_v30 = vrot.slane %v647_v11, 2  ;;  %v710_v31 = vrot.slane %v652_v15, 5  ;;  %v579_v11 = vld [vmem:[%s3660_s22 + $0x8] sm:$0x1] }
  0x5c   : > { %v712_v32 = vrot.slane %v653_v16, 4  ;;  %v697_v33 = vsel %vm664_vm2, %v696_v23, %v695_v29  ;;  %v704_v34 = vrot.slane %v648_v13, 1  ;;  %v707_v35 = vsel %vm658_vm0, %v706_v27, %v649_v17  ;;  %v577_v14 = vld [vmem:[%s3660_s22] sm:$0x1]  ;;  %v580_v15 = vld [vmem:[%s3660_s22 + $0xc] sm:$0x1] }
  0x5d   : > { %v714_v36 = vrot.slane %v654_v18, 3  ;;  %v699_v37 = vsel %vm667_vm3, %v698_v24, %v697_v33  ;;  %v709_v38 = vsel %vm661_vm1, %v708_v28, %v707_v35  ;;  %v716_v39 = vrot.slane %v655_v21, 2  ;;  %v581_v18 = vld [vmem:[%s3660_s22 + $0x10] sm:$0x1]  ;;  %v583_v25 = vld [vmem:[%s3660_s22 + $0x18] sm:$0x1] }
  0x5e   : > { %v701_v40 = vsel %vm670_vm4, %v700_v26, %v699_v37  ;;  %v711_v41 = vsel %vm664_vm2, %v710_v31, %v709_v38  ;;  %v718_v42 = vrot.slane %v656_v22, 1  ;;  %v3390_v50 = vmov -inf   ;;  %v582_v22 = vld [vmem:[%s3660_s22 + $0x14] sm:$0x1]  ;;  %v584_v29 = vld [vmem:[%s3660_s22 + $0x1c] sm:$0x1] }
  0x5f   : > { %v703_v43 = vsel %vm673_vm6, %v702_v30, %v701_v40  ;;  %v713_v44 = vsel %vm667_vm3, %v712_v32, %v711_v41  ;;  %418 = vst.msk [vmem:[#allocation2 + $0x10] sm:$0xff] %vm415_vm8, %v3390_v50  ;;  %416 = vst.msk [vmem:[#allocation2] sm:$0xff] %vm415_vm8, %v3390_v50  ;;  %v3391_v59 = vmov 0   ;;  %v3392_v60 = vmov 0.0  }
  0x60   : > { %v705_v45 = vsel %vm676_vm7, %v704_v34, %v703_v43  ;;  %v715_v46 = vsel %vm670_vm4, %v714_v36, %v713_v44  ;;  %417 = vst.msk [vmem:[#allocation2 + $0x8] sm:$0xff] %vm415_vm8, %v3390_v50  ;;  %419 = vst.msk [vmem:[#allocation2 + $0x18] sm:$0xff] %vm415_vm8, %v3390_v50  ;;  %3253 = vset.pattern.permute.xlu1 %v3391_v59  ;;  %3252 = vset.pattern.permute.xlu0 %v3391_v59  ;;  %v1134_v43 = vld [vmem:[%s3479_s11 + $0x5] sm:$0x1]  ;;  %vm2941_vm12 = vcmask 261120  }
  0x61   : > { %v717_v47 = vsel %vm673_vm6, %v716_v39, %v715_v46  ;;  %420 = vst.msk [vmem:[#allocation2 + $0x20] sm:$0xff] %vm415_vm8, %v3390_v50  ;;  %421 = vst.msk [vmem:[#allocation2 + $0x28] sm:$0xff] %vm415_vm8, %v3390_v50  ;;  %v586_v12 = vpack.c.bf16 %v578_v8, %v578_v8  ;;  %v587_v16 = vpack.c.bf16 %v579_v11, %v579_v11  ;;  %v1135_v46 = vld [vmem:[%s3479_s11 + $0x9] sm:$0x1] }
  0x62   : > { %v719_v48 = vsel %vm676_vm7, %v718_v42, %v717_v47  ;;  %422 = vst.msk [vmem:[#allocation2 + $0x30] sm:$0xff] %vm415_vm8, %v3390_v50  ;;  %423 = vst.msk [vmem:[#allocation2 + $0x38] sm:$0xff] %vm415_vm8, %v3390_v50  ;;  %v585_v19 = vpack.c.bf16 %v577_v14, %v577_v14  ;;  %v588_v20 = vpack.c.bf16 %v580_v15, %v580_v15 }
  0x63   : > { %v721_v49 = vpack.c.b16 %v719_v48, %v705_v45  ;;  %424 = vst.msk [vmem:[#allocation2 + $0x40] sm:$0xff] %vm415_vm8, %v3390_v50  ;;  %425 = vst.msk [vmem:[#allocation2 + $0x48] sm:$0xff] %vm415_vm8, %v3390_v50  ;;  %v589_v23 = vpack.c.bf16 %v581_v18, %v581_v18  ;;  %v944_v24 = vunpack.c.l.b16 %v586_v12  ;;  %v590_v26 = vpack.c.bf16 %v582_v22, %v582_v22  ;;  %v1139_v12 = vld [vmem:[%s3479_s11 + $0x19] sm:$0x1] }
  0x64   : > { %426 = vst.msk [vmem:[#allocation2 + $0x50] sm:$0xff] %vm415_vm8, %v3390_v50  ;;  %427 = vst.msk [vmem:[#allocation2 + $0x58] sm:$0xff] %vm415_vm8, %v3390_v50  ;;  %v943_v27 = vunpack.c.l.b16 %v585_v19  ;;  %v945_v28 = vunpack.c.l.b16 %v587_v16  ;;  %v591_v30 = vpack.c.bf16 %v583_v25, %v583_v25  ;;  %v946_v31 = vunpack.c.l.b16 %v588_v20  ;;  %v1140_v19 = vld [vmem:[%s3479_s11 + $0x1d] sm:$0x1] }
  0x65   : > { %3153 = vmatmul.mubr.msk.bf16.vlgmr.msra.gmra.mrb[0].mxu0 %vm448_vm5, %v721_v49  ;;  %428 = vst.msk [vmem:[#allocation2 + $0x60] sm:$0xff] %vm415_vm8, %v3390_v50  ;;  %429 = vst.msk [vmem:[#allocation2 + $0x68] sm:$0xff] %vm415_vm8, %v3390_v50  ;;  %v947_v32 = vunpack.c.l.b16 %v589_v23  ;;  %v592_v33 = vpack.c.bf16 %v584_v29, %v584_v29  ;;  %v948_v34 = vunpack.c.l.b16 %v590_v26  ;;  %v951_v35 = vrot.slane %v944_v24, 7 }
  0x66   : > { %430 = vst.msk [vmem:[#allocation2 + $0x70] sm:$0xff] %vm415_vm8, %v3390_v50  ;;  %431 = vst.msk [vmem:[#allocation2 + $0x78] sm:$0xff] %vm415_vm8, %v3390_v50  ;;  %v3635_v61 = vld [vmem:[#allocation2 + $0x10] sm:$0xff]  ;;  %v3637_v62 = vld [vmem:[#allocation2] sm:$0xff]  ;;  %v949_v36 = vunpack.c.l.b16 %v591_v30  ;;  %v953_v37 = vrot.slane %v945_v28, 6  ;;  %v955_v38 = vrot.slane %v946_v31, 5  ;;  %v1142_v47 = vpack.c.bf16 %v1134_v43, %v1134_v43 }
  0x67   : > { %434 = vst.msk [vmem:[#allocation3 + $0x10] sm:$0xff] %vm415_vm8, %v3392_v60  ;;  %432 = vst.msk [vmem:[#allocation3] sm:$0xff] %vm415_vm8, %v3392_v60  ;;  %v3645_v3 = vld [vmem:[#allocation2 + $0x18] sm:$0xff]  ;;  %v3652_v5 = vld [vmem:[#allocation2 + $0x8] sm:$0xff]  ;;  %v950_v39 = vunpack.c.l.b16 %v592_v33  ;;  %v952_v40 = vsel %vm658_vm0, %v951_v35, %v943_v27  ;;  %v957_v41 = vrot.slane %v947_v32, 4  ;;  %v959_v42 = vrot.slane %v948_v34, 3 }
  0x68   : > { %433 = vst.msk [vmem:[#allocation3 + $0x8] sm:$0xff] %vm415_vm8, %v3392_v60  ;;  %435 = vst.msk [vmem:[#allocation3 + $0x18] sm:$0xff] %vm415_vm8, %v3392_v60  ;;  %v954_v44 = vsel %vm661_vm1, %v953_v37, %v952_v40  ;;  %v961_v45 = vrot.slane %v949_v36, 2  ;;  %v1133_v50 = vld [vmem:[%s3479_s11 + $0x1] sm:$0x1]  ;;  %v1296_v8 = vunpack.c.l.b16 %v1142_v47  ;;  %v1147_v20 = vpack.c.bf16 %v1139_v12, %v1139_v12 }
  0x69   : > { %436 = vst.msk [vmem:[#allocation3 + $0x20] sm:$0xff] %vm415_vm8, %v3392_v60  ;;  %437 = vst.msk [vmem:[#allocation3 + $0x28] sm:$0xff] %vm415_vm8, %v3392_v60  ;;  %v956_v48 = vsel %vm664_vm2, %v955_v38, %v954_v44  ;;  %v963_v49 = vrot.slane %v950_v39, 1  ;;  %v1141_v59 = vpack.c.bf16 %v1133_v50, %v1133_v50  ;;  %v1148_v25 = vpack.c.bf16 %v1140_v19, %v1140_v19  ;;  %v1038_v40 = vld [vmem:[%s3498_s20 + $0x5] sm:$0x1] }
  0x6a   : > { %438 = vst.msk [vmem:[#allocation3 + $0x30] sm:$0xff] %vm415_vm8, %v3392_v60  ;;  %439 = vst.msk [vmem:[#allocation3 + $0x38] sm:$0xff] %vm415_vm8, %v3392_v60  ;;  %v1303_v23 = vrot.slane %v1296_v8, 7  ;;  %v1301_v28 = vunpack.c.l.b16 %v1147_v20  ;;  %v1039_v43 = vld [vmem:[%s3498_s20 + $0x9] sm:$0x1] }
  0x6b   : > { %440 = vst.msk [vmem:[#allocation3 + $0x40] sm:$0xff] %vm415_vm8, %v3392_v60  ;;  %441 = vst.msk [vmem:[#allocation3 + $0x48] sm:$0xff] %vm415_vm8, %v3392_v60  ;;  %v1295_v15 = vunpack.c.l.b16 %v1141_v59  ;;  %v1302_v33 = vunpack.c.l.b16 %v1148_v25  ;;  %v1070_v47 = vmul.f32 0.35355338, %v1038_v40  ;;  %v1071_v50 = vmul.f32 0.35355338, %v1039_v43 }
  0x6c   : > { %442 = vst.msk [vmem:[#allocation3 + $0x50] sm:$0xff] %vm415_vm8, %v3392_v60  ;;  %443 = vst.msk [vmem:[#allocation3 + $0x58] sm:$0xff] %vm415_vm8, %v3392_v60  ;;  %v1313_v37 = vrot.slane %v1301_v28, 2  ;;  %v1049_v19 = vld [vmem:[%s3498_s20 + $0x31] sm:$0x1] }
  0x6d   : > { %444 = vst.msk [vmem:[#allocation3 + $0x60] sm:$0xff] %vm415_vm8, %v3392_v60  ;;  %445 = vst.msk [vmem:[#allocation3 + $0x68] sm:$0xff] %vm415_vm8, %v3392_v60  ;;  %v1304_v29 = vsel %vm658_vm0, %v1303_v23, %v1295_v15  ;;  %v1315_v39 = vrot.slane %v1302_v33, 1  ;;  %v1102_v59 = vpack.c.bf16 %v1070_v47, %v1070_v47  ;;  %v1103_v8 = vpack.c.bf16 %v1071_v50, %v1071_v50  ;;  %v1044_v23 = vld [vmem:[%s3498_s20 + $0x1d] sm:$0x1] }
  0x6e   : > { %446 = vst.msk [vmem:[#allocation3 + $0x70] sm:$0xff] %vm415_vm8, %v3392_v60  ;;  %447 = vst.msk [vmem:[#allocation3 + $0x78] sm:$0xff] %vm415_vm8, %v3392_v60  ;;  %v1052_v28 = vld [vmem:[%s3498_s20 + $0x3d] sm:$0x1] }
  0x6f   : > { %449 = vst.msk [vmem:[#allocation4] sm:$0xff] %vm448_vm5, %v3392_v60  ;;  %450 = vst.msk [vmem:[#allocation4 + $0x8] sm:$0xff] %vm448_vm5, %v3392_v60 }
  0x70   : > { %451 = vst.msk [vmem:[#allocation4 + $0x10] sm:$0xff] %vm448_vm5, %v3392_v60  ;;  %452 = vst.msk [vmem:[#allocation4 + $0x18] sm:$0xff] %vm448_vm5, %v3392_v60 }
  0x71   : > { %453 = vst.msk [vmem:[#allocation4 + $0x20] sm:$0xff] %vm448_vm5, %v3392_v60  ;;  %454 = vst.msk [vmem:[#allocation4 + $0x28] sm:$0xff] %vm448_vm5, %v3392_v60 }
  0x72   : > { %455 = vst.msk [vmem:[#allocation4 + $0x30] sm:$0xff] %vm448_vm5, %v3392_v60  ;;  %456 = vst.msk [vmem:[#allocation4 + $0x38] sm:$0xff] %vm448_vm5, %v3392_v60 }
  0x73   : > { %457 = vst.msk [vmem:[#allocation4 + $0x40] sm:$0xff] %vm448_vm5, %v3392_v60  ;;  %458 = vst.msk [vmem:[#allocation4 + $0x48] sm:$0xff] %vm448_vm5, %v3392_v60 }
  0x74   : > { %459 = vst.msk [vmem:[#allocation4 + $0x50] sm:$0xff] %vm448_vm5, %v3392_v60  ;;  %460 = vst.msk [vmem:[#allocation4 + $0x58] sm:$0xff] %vm448_vm5, %v3392_v60 }
  0x75   : > { %461 = vst.msk [vmem:[#allocation4 + $0x60] sm:$0xff] %vm448_vm5, %v3392_v60  ;;  %462 = vst.msk [vmem:[#allocation4 + $0x68] sm:$0xff] %vm448_vm5, %v3392_v60 }
  0x76   : > { %463 = vst.msk [vmem:[#allocation4 + $0x70] sm:$0xff] %vm448_vm5, %v3392_v60  ;;  %464 = vst.msk [vmem:[#allocation4 + $0x78] sm:$0xff] %vm448_vm5, %v3392_v60 }
 0x138   : > { %v3587_v51 = vpop.f32.mrb[0].mxu0 }
 0x139   : > { %v3589_v52 = vpop.f32.mrb[1].mxu0  ;;  %v822_v53 = vsel %vm448_vm5, %v3587_v51, -inf }
 0x13a   : > { %823 = vmax.xlane.f32.xlu1 %v822_v53  ;;  %v3593_v54 = vpop.f32.mrb[2].mxu0  ;;  %v816_v55 = vsel %vm448_vm5, %v3589_v52, -inf  ;;  %v1136_v53 = vld [vmem:[%s3479_s11 + $0xd] sm:$0x1] }
 0x13b   : > { %817 = vmax.xlane.f32.xlu0 %v816_v55  ;;  %v3597_v56 = vpop.f32.mrb[3].mxu0  ;;  %v825_v57 = vsel %vm448_vm5, %v3593_v54, -inf  ;;  %v1143_v55 = vpack.c.bf16 %v1135_v46, %v1135_v46  ;;  %v1144_v60 = vpack.c.bf16 %v1136_v53, %v1136_v53  ;;  %v1046_v46 = vld [vmem:[%s3498_s20 + $0x25] sm:$0x1]  ;;  %v1047_v53 = vld [vmem:[%s3498_s20 + $0x29] sm:$0x1] }
 0x13c   : > { %v819_v58 = vsel %vm448_vm5, %v3597_v56, -inf }
 0x13d   : > { %v1298_v16 = vunpack.c.l.b16 %v1144_v60  ;;  %v1041_v60 = vld [vmem:[%s3498_s20 + $0x11] sm:$0x1] }
 0x13e   : > { %826 = vmax.xlane.f32.xlu1 %v825_v57  ;;  %v958_v57 = vsel %vm667_vm3, %v957_v41, %v956_v48  ;;  %v1073_v15 = vmul.f32 0.35355338, %v1041_v60 }
 0x13f   : > { %820 = vmax.xlane.f32.xlu0 %v819_v58  ;;  %v1137_v58 = vld [vmem:[%s3479_s11 + $0x11] sm:$0x1]  ;;  %v1307_v30 = vrot.slane %v1298_v16, 5  ;;  %v1198_v16 = vunpack.c.l.b16 %v1102_v59 }
 0x1c7   : > { %v824_v63 = vpop.xlane.xlu1 %823 }
 0x1c8   : > { %v3640_v0 = vmax.f32 %v3635_v61, %v824_v63  ;;  %v818_v1 = vpop.xlane.xlu0 %817  ;;  %v960_v63 = vsel %vm670_vm4, %v959_v42, %v958_v57  ;;  %v1078_v57 = vmul.f32 0.35355338, %v1046_v46 }
 0x1c9   : > { %v3643_v2 = vmax.f32 %v3637_v62, %v818_v1  ;;  %v1138_v1 = vld [vmem:[%s3479_s11 + $0x15] sm:$0x1]  ;;  %v962_v11 = vsel %vm673_vm6, %v961_v45, %v960_v63  ;;  %v1037_v45 = vld [vmem:[%s3498_s20 + $0x1] sm:$0x1] }
 0x1ca   : > { %1035 = vst.msk [vmem:[#allocation2 + $0x10] sm:$0xff] %vm415_vm8, %v3640_v0  ;;  %856 = vperm.xlu1 %3253, %v3640_v0   ;;  %v1146_v14 = vpack.c.bf16 %v1138_v1, %v1138_v1  ;;  %v964_v18 = vsel %vm676_vm7, %v963_v49, %v962_v11  ;;  %v1040_v49 = vld [vmem:[%s3498_s20 + $0xd] sm:$0x1]  ;;  %v1110_v12 = vpack.c.bf16 %v1078_v57, %v1078_v57  ;;  %v1054_v57 = vld [vmem:[%s3498_s20 + $0x45] sm:$0x1] }
 0x1cb   : > { %1033 = vst.msk [vmem:[#allocation2] sm:$0xff] %vm415_vm8, %v3643_v2  ;;  %v827_v7 = vpop.xlane.xlu1 %826  ;;  %846 = vperm.xlu0 %3252, %v3643_v2   ;;  %v965_v24 = vpack.c.b16 %v964_v18, %v964_v18  ;;  %v1072_v63 = vmul.f32 0.35355338, %v1040_v49  ;;  %v1048_v1 = vld [vmem:[%s3498_s20 + $0x2d] sm:$0x1] }
 0x1cc   : > { %v3664_v9 = vmax.f32 %v3645_v3, %v827_v7  ;;  %v821_v10 = vpop.xlane.xlu0 %820  ;;  %v1145_v7 = vpack.c.bf16 %v1137_v58, %v1137_v58  ;;  %v1300_v26 = vunpack.c.l.b16 %v1146_v14  ;;  %v1045_v58 = vld [vmem:[%s3498_s20 + $0x21] sm:$0x1]  ;;  %v1042_v14 = vld [vmem:[%s3498_s20 + $0x15] sm:$0x1]  ;;  %v1043_v18 = vld [vmem:[%s3498_s20 + $0x19] sm:$0x1] }
 0x1cd   : > { %v3668_v13 = vmax.f32 %v3652_v5, %v821_v10  ;;  %v1297_v10 = vunpack.c.l.b16 %v1143_v55  ;;  %3199 = vmatprep.subr.msk.bf16.mxu1 %vm972_vm9, %v965_v24  ;;  %v974_v32 = vsel %vm972_vm9, %v965_v24, 0  ;;  %v1069_v55 = vmul.f32 0.35355338, %v1037_v45  ;;  %v1050_v24 = vld [vmem:[%s3498_s20 + $0x35] sm:$0x1] }
 0x1ce   : > { %1036 = vst.msk [vmem:[#allocation2 + $0x18] sm:$0xff] %vm415_vm8, %v3664_v9  ;;  %v1299_v22 = vunpack.c.l.b16 %v1145_v7  ;;  %v1311_v35 = vrot.slane %v1300_v26, 3  ;;  %3157 = vmatpush3.bf16.msra.mxu1 %v974_v32  ;;  %v1079_v7 = vmul.f32 0.35355338, %v1047_v53  ;;  %v1080_v20 = vmul.f32 0.35355338, %v1048_v1 }
 0x1cf   : > { %1034 = vst.msk [vmem:[#allocation2 + $0x8] sm:$0xff] %vm415_vm8, %v3668_v13  ;;  %851 = vperm.xlu1 %3253, %v3668_v13   ;;  %v1305_v27 = vrot.slane %v1297_v10, 6  ;;  %v1077_v10 = vmul.f32 0.35355338, %v1045_v58  ;;  %v1101_v11 = vpack.c.bf16 %v1069_v55, %v1069_v55  ;;  %v1199_v26 = vunpack.c.l.b16 %v1103_v8 }
 0x1d0   : > { %v1309_v31 = vrot.slane %v1299_v22, 4  ;;  %v1104_v22 = vpack.c.bf16 %v1072_v63, %v1072_v63  ;;  %v1111_v25 = vpack.c.bf16 %v1079_v7, %v1079_v7  ;;  %v1206_v32 = vunpack.c.l.b16 %v1110_v12 }
 0x1d1   : > { %v1306_v34 = vsel %vm661_vm1, %v1305_v27, %v1304_v29  ;;  %v1051_v27 = vld [vmem:[%s3498_s20 + $0x39] sm:$0x1]  ;;  %v1074_v29 = vmul.f32 0.35355338, %v1042_v14  ;;  %v1075_v33 = vmul.f32 0.35355338, %v1043_v18 }
 0x1d2   : > { %v1308_v36 = vsel %vm664_vm2, %v1307_v30, %v1306_v34  ;;  %v1109_v30 = vpack.c.bf16 %v1077_v10, %v1077_v10  ;;  %v1081_v34 = vmul.f32 0.35355338, %v1049_v19  ;;  %v1200_v40 = vunpack.c.l.b16 %v1104_v22  ;;  %v1055_v10 = vld [vmem:[%s3498_s20 + $0x49] sm:$0x1] }
 0x1d3   : > { %861 = vperm.xlu1 %3253, %v3664_v9   ;;  %v1310_v38 = vsel %vm667_vm3, %v1309_v31, %v1308_v36  ;;  %v1197_v31 = vunpack.c.l.b16 %v1101_v11  ;;  %v1229_v36 = vrot.slane %v1198_v16, 7  ;;  %v1207_v43 = vunpack.c.l.b16 %v1111_v25  ;;  %v1062_v11 = vld [vmem:[%s3498_s20 + $0x65] sm:$0x1]  ;;  %v1053_v16 = vld [vmem:[%s3498_s20 + $0x41] sm:$0x1] }
 0x1d4   : > { %v1312_v41 = vsel %vm670_vm4, %v1311_v35, %v1310_v38  ;;  %v1105_v35 = vpack.c.bf16 %v1073_v15, %v1073_v15  ;;  %v1082_v38 = vmul.f32 0.35355338, %v1050_v24  ;;  %v1106_v45 = vpack.c.bf16 %v1074_v29, %v1074_v29  ;;  %v1056_v24 = vld [vmem:[%s3498_s20 + $0x4d] sm:$0x1]  ;;  %v1063_v25 = vld [vmem:[%s3498_s20 + $0x69] sm:$0x1] }
 0x1d5   : > { %v1314_v42 = vsel %vm673_vm6, %v1313_v37, %v1312_v41  ;;  %v1076_v37 = vmul.f32 0.35355338, %v1044_v23  ;;  %v1083_v41 = vmul.f32 0.35355338, %v1051_v27  ;;  %v1205_v46 = vunpack.c.l.b16 %v1109_v30 }
 0x1d6   : > { %v1316_v44 = vsel %vm676_vm7, %v1315_v39, %v1314_v42  ;;  %v1112_v39 = vpack.c.bf16 %v1080_v20, %v1080_v20  ;;  %v1084_v42 = vmul.f32 0.35355338, %v1052_v28  ;;  %v1230_v47 = vsel %vm658_vm0, %v1229_v36, %v1197_v31 }
 0x1d7   : > { %v3714_v48 = vpack.c.b16 %v1316_v44, %v1316_v44  ;;  %v1231_v44 = vrot.slane %v1199_v26, 6  ;;  %v1243_v49 = vrot.slane %v1206_v32, 7  ;;  %v1107_v50 = vpack.c.bf16 %v1075_v33, %v1075_v33  ;;  %v1061_v33 = vld [vmem:[%s3498_s20 + $0x61] sm:$0x1] }
 0x1d8   : > { %v1113_v53 = vpack.c.bf16 %v1081_v34, %v1081_v34  ;;  %v1201_v55 = vunpack.c.l.b16 %v1105_v35  ;;  %v1108_v58 = vpack.c.bf16 %v1076_v37, %v1076_v37  ;;  %v1208_v59 = vunpack.c.l.b16 %v1112_v39  ;;  %v1057_v37 = vld [vmem:[%s3498_s20 + $0x51] sm:$0x1] }
 0x1d9   : > { %3200 = vmatprep.subr.msk.bf16.mxu1 %vm448_vm5, %v3714_v48  ;;  %v1233_v60 = vrot.slane %v1200_v40, 5  ;;  %v1114_v63 = vpack.c.bf16 %v1082_v38, %v1082_v38  ;;  %v1115_v1 = vpack.c.bf16 %v1083_v41, %v1083_v41  ;;  %v1232_v7 = vsel %vm661_vm1, %v1231_v44, %v1230_v47  ;;  %v1064_v38 = vld [vmem:[%s3498_s20 + $0x6d] sm:$0x1] }
 0x1da   : > { %v1245_v8 = vrot.slane %v1207_v43, 6  ;;  %v1116_v12 = vpack.c.bf16 %v1084_v42, %v1084_v42  ;;  %v1202_v14 = vunpack.c.l.b16 %v1106_v45  ;;  %v1244_v15 = vsel %vm658_vm0, %v1243_v49, %v1205_v46 }
 0x1db   : > { %v1086_v18 = vmul.f32 0.35355338, %v1054_v57  ;;  %v3739_v19 = vsel %vm448_vm5, %v3714_v48, 0  ;;  %v1203_v20 = vunpack.c.l.b16 %v1107_v50  ;;  %v1209_v22 = vunpack.c.l.b16 %v1113_v53 }
 0x1dc   : > { %v1235_v23 = vrot.slane %v1201_v55, 4  ;;  %v1234_v26 = vsel %vm664_vm2, %v1233_v60, %v1232_v7  ;;  %v1247_v27 = vrot.slane %v1208_v59, 5  ;;  %v1087_v28 = vmul.f32 0.35355338, %v1055_v10  ;;  %v1058_v55 = vld [vmem:[%s3498_s20 + $0x55] sm:$0x1] }
 0x1dd   : > { %v1094_v29 = vmul.f32 0.35355338, %v1062_v11  ;;  %v3744_v30 = vunpack.c.l.b16 %v1108_v58  ;;  %v1210_v31 = vunpack.c.l.b16 %v1114_v63  ;;  %v1246_v32 = vsel %vm661_vm1, %v1245_v8, %v1244_v15  ;;  %v1065_v59 = vld [vmem:[%s3498_s20 + $0x71] sm:$0x1]  ;;  %v1066_v15 = vld [vmem:[%s3498_s20 + $0x75] sm:$0x1] }
 0x1de   : > { %v1085_v48 = vmul.f32 0.35355338, %v1053_v16  ;;  %v1211_v34 = vunpack.c.l.b16 %v1115_v1  ;;  %v3748_v35 = vunpack.c.l.b16 %v1116_v12  ;;  %v1237_v36 = vrot.slane %v1202_v14, 3  ;;  %v1059_v14 = vld [vmem:[%s3498_s20 + $0x59] sm:$0x1] }
 0x1df   : > { %v1118_v39 = vpack.c.bf16 %v1086_v18, %v1086_v18  ;;  %v1236_v40 = vsel %vm667_vm3, %v1235_v23, %v1234_v26  ;;  %v1249_v41 = vrot.slane %v1209_v22, 4  ;;  %v1088_v42 = vmul.f32 0.35355338, %v1056_v24  ;;  %v1067_v23 = vld [vmem:[%s3498_s20 + $0x79] sm:$0x1] }
 0x1e0   : > { %v1095_v43 = vmul.f32 0.35355338, %v1063_v25  ;;  %v1248_v44 = vsel %vm664_vm2, %v1247_v27, %v1246_v32  ;;  %v1093_v45 = vmul.f32 0.35355338, %v1061_v33  ;;  %v1119_v46 = vpack.c.bf16 %v1087_v28, %v1087_v28  ;;  %v1060_v28 = vld [vmem:[%s3498_s20 + $0x5d] sm:$0x1] }
 0x1e1   : > { %v1126_v47 = vpack.c.bf16 %v1094_v29, %v1094_v29  ;;  %v1239_v49 = vrot.slane %v1203_v20, 2  ;;  %v1241_v50 = vrot.slane %v3744_v30, 1  ;;  %v1251_v53 = vrot.slane %v1210_v31, 3  ;;  %v1068_v33 = vld [vmem:[%s3498_s20 + $0x7d] sm:$0x1] }
 0x1e2   : > { %v1117_v57 = vpack.c.bf16 %v1085_v48, %v1085_v48  ;;  %v1238_v58 = vsel %vm670_vm4, %v1237_v36, %v1236_v40  ;;  %v1089_v60 = vmul.f32 0.35355338, %v1057_v37  ;;  %v1096_v63 = vmul.f32 0.35355338, %v1064_v38  ;;  %v1703_v30 = vld [vmem:[%s3479_s11 + $0x16] sm:$0x1] }
 0x1e3   : > { %v1214_v1 = vunpack.c.l.b16 %v1118_v39  ;;  %v1250_v7 = vsel %vm667_vm3, %v1249_v41, %v1248_v44  ;;  %v1253_v8 = vrot.slane %v1211_v34, 2  ;;  %v1120_v10 = vpack.c.bf16 %v1088_v42, %v1088_v42  ;;  %v1699_v42 = vld [vmem:[%s3479_s11 + $0x6] sm:$0x1] }
 0x1e4   : > { %v1127_v11 = vpack.c.bf16 %v1095_v43, %v1095_v43  ;;  %v1255_v12 = vrot.slane %v3748_v35, 1  ;;  %v1125_v16 = vpack.c.bf16 %v1093_v45, %v1093_v45  ;;  %v1215_v18 = vunpack.c.l.b16 %v1119_v46  ;;  %v1602_v35 = vld [vmem:[%s3498_s20 + $0x2] sm:$0x1] }
 0x1e5   : > { %v1222_v20 = vunpack.c.l.b16 %v1126_v47  ;;  %v1240_v22 = vsel %vm673_vm6, %v1239_v49, %v1238_v58  ;;  %v1090_v24 = vmul.f32 0.35355338, %v1058_v55  ;;  %v1097_v25 = vmul.f32 0.35355338, %v1065_v59 }
 0x1e6   : > { %v1213_v26 = vunpack.c.l.b16 %v1117_v57  ;;  %v1252_v27 = vsel %vm670_vm4, %v1251_v53, %v1250_v7  ;;  %v1121_v29 = vpack.c.bf16 %v1089_v60, %v1089_v60  ;;  %v1128_v31 = vpack.c.bf16 %v1096_v63, %v1096_v63  ;;  %v1700_v57 = vld [vmem:[%s3479_s11 + $0xa] sm:$0x1]  ;;  %v1698_v63 = vld [vmem:[%s3479_s11 + $0x2] sm:$0x1] }
 0x1e7   : > { %v1257_v32 = vrot.slane %v1214_v1, 7  ;;  %v1091_v48 = vmul.f32 0.35355338, %v1059_v14  ;;  %v1098_v34 = vmul.f32 0.35355338, %v1066_v15  ;;  %v1216_v36 = vunpack.c.l.b16 %v1120_v10 }
 0x1e8   : > { %v1223_v37 = vunpack.c.l.b16 %v1127_v11  ;;  %v1099_v38 = vmul.f32 0.35355338, %v1067_v23  ;;  %v1221_v39 = vunpack.c.l.b16 %v1125_v16  ;;  %v1259_v40 = vrot.slane %v1215_v18, 6  ;;  %v1701_v18 = vld [vmem:[%s3479_s11 + $0xe] sm:$0x1] }
 0x1e9   : > { %v1271_v41 = vrot.slane %v1222_v20, 7  ;;  %v1092_v43 = vmul.f32 0.35355338, %v1060_v28  ;;  %v1122_v44 = vpack.c.bf16 %v1090_v24, %v1090_v24  ;;  %v1129_v45 = vpack.c.bf16 %v1097_v25, %v1097_v25 }
 0x1ea   : > { %v1258_v46 = vsel %vm658_vm0, %v1257_v32, %v1213_v26  ;;  %v1254_v47 = vsel %vm673_vm6, %v1253_v8, %v1252_v27  ;;  %v1100_v49 = vmul.f32 0.35355338, %v1068_v33  ;;  %v1217_v53 = vunpack.c.l.b16 %v1121_v29 }
 0x1eb   : > { %v1224_v55 = vunpack.c.l.b16 %v1128_v31  ;;  %v1123_v58 = vpack.c.bf16 %v1091_v48, %v1091_v48  ;;  %v1261_v59 = vrot.slane %v1216_v36, 5  ;;  %v1273_v60 = vrot.slane %v1223_v37, 6 }
 0x1ec   : > { %v1707_v1 = vpack.c.bf16 %v1699_v42, %v1699_v42  ;;  %v1130_v7 = vpack.c.bf16 %v1098_v34, %v1098_v34  ;;  %v1131_v10 = vpack.c.bf16 %v1099_v38, %v1099_v38  ;;  %v1260_v11 = vsel %vm661_vm1, %v1259_v40, %v1258_v46  ;;  %v1702_v34 = vld [vmem:[%s3479_s11 + $0x12] sm:$0x1]  ;;  %v1704_v40 = vld [vmem:[%s3479_s11 + $0x1a] sm:$0x1]  ;;  %v1705_v42 = vld [vmem:[%s3479_s11 + $0x1e] sm:$0x1] }
 0x1ed   : > { %v1272_v14 = vsel %vm658_vm0, %v1271_v41, %v1221_v39  ;;  %v1124_v15 = vpack.c.bf16 %v1092_v43, %v1092_v43  ;;  %v1218_v16 = vunpack.c.l.b16 %v1122_v44  ;;  %v1225_v8 = vunpack.c.l.b16 %v1129_v45  ;;  %v1603_v45 = vld [vmem:[%s3498_s20 + $0x6] sm:$0x1] }
 0x1ee   : > { %v1708_v20 = vpack.c.bf16 %v1700_v57, %v1700_v57  ;;  %v1132_v23 = vpack.c.bf16 %v1100_v49, %v1100_v49  ;;  %v1263_v24 = vrot.slane %v1217_v53, 4  ;;  %v1275_v25 = vrot.slane %v1224_v55, 5  ;;  %v1604_v53 = vld [vmem:[%s3498_s20 + $0xa] sm:$0x1]  ;;  %v1605_v55 = vld [vmem:[%s3498_s20 + $0xe] sm:$0x1] }
 0x1ef   : > { %v1706_v26 = vpack.c.bf16 %v1698_v63, %v1698_v63  ;;  %v3775_v27 = vunpack.c.l.b16 %v1123_v58  ;;  %v1262_v28 = vsel %vm664_vm2, %v1261_v59, %v1260_v11  ;;  %v1274_v29 = vsel %vm661_vm1, %v1273_v60, %v1272_v14  ;;  %v1606_v63 = vld [vmem:[%s3498_s20 + $0x12] sm:$0x1]  ;;  %v1612_v14 = vld [vmem:[%s3498_s20 + $0x2a] sm:$0x1] }
 0x1f0   : > { %v1861_v31 = vunpack.c.l.b16 %v1707_v1  ;;  %v3782_v32 = vsel %vm676_vm7, %v1241_v50, %v1240_v22  ;;  %v1226_v33 = vunpack.c.l.b16 %v1130_v7  ;;  %v3784_v48 = vunpack.c.l.b16 %v1131_v10  ;;  %v1611_v1 = vld [vmem:[%s3498_s20 + $0x26] sm:$0x1] }
 0x1f1   : > { %v1709_v36 = vpack.c.bf16 %v1701_v18, %v1701_v18  ;;  %v3790_v37 = vsel %vm676_vm7, %v1255_v12, %v1254_v47  ;;  %v1265_v38 = vrot.slane %v1218_v16, 3  ;;  %v1277_v39 = vrot.slane %v1225_v8, 4  ;;  %v1610_v18 = vld [vmem:[%s3498_s20 + $0x22] sm:$0x1] }
 0x1f2   : > { %v1862_v50 = vunpack.c.l.b16 %v1708_v20  ;;  %v1264_v22 = vsel %vm667_vm3, %v1263_v24, %v1262_v28  ;;  %v1276_v41 = vsel %vm664_vm2, %v1275_v25, %v1274_v29  ;;  %v1860_v43 = vunpack.c.l.b16 %v1706_v26  ;;  %v1613_v26 = vld [vmem:[%s3498_s20 + $0x2e] sm:$0x1] }
 0x1f3   : > { %v1868_v44 = vrot.slane %v1861_v31, 7  ;;  %v3799_v12 = vunpack.c.l.b16 %v1124_v15  ;;  %v3801_v46 = vunpack.c.l.b16 %v1132_v23  ;;  %v1267_v47 = vrot.slane %v3775_v27, 2 }
 0x1f4   : > { %v1710_v49 = vpack.c.bf16 %v1702_v34, %v1702_v34  ;;  %v1279_v57 = vrot.slane %v1226_v33, 3  ;;  %v1281_v58 = vrot.slane %v3784_v48, 2  ;;  %v1711_v59 = vpack.c.bf16 %v1703_v30, %v1703_v30  ;;  %v1614_v30 = vld [vmem:[%s3498_s20 + $0x32] sm:$0x1] }
 0x1f5   : > { %v1863_v60 = vunpack.c.l.b16 %v1709_v36  ;;  %v3810_v7 = vsel %vm670_vm4, %v1265_v38, %v1264_v22  ;;  %v1278_v10 = vsel %vm667_vm3, %v1277_v39, %v1276_v41  ;;  %v1870_v11 = vrot.slane %v1862_v50, 6  ;;  %v1607_v36 = vld [vmem:[%s3498_s20 + $0x16] sm:$0x1] }
 0x1f6   : > { %v1635_v15 = vmul.f32 0.35355338, %v1603_v45  ;;  %v1712_v16 = vpack.c.bf16 %v1704_v40, %v1704_v40  ;;  %v1869_v8 = vsel %vm658_vm0, %v1868_v44, %v1860_v43  ;;  %v1636_v20 = vmul.f32 0.35355338, %v1604_v53 }
 0x1f7   : > { %v1637_v23 = vmul.f32 0.35355338, %v1605_v55  ;;  %v1713_v24 = vpack.c.bf16 %v1705_v42, %v1705_v42  ;;  %v1864_v25 = vunpack.c.l.b16 %v1710_v49  ;;  %v1634_v28 = vmul.f32 0.35355338, %v1602_v35  ;;  %v1608_v49 = vld [vmem:[%s3498_s20 + $0x1a] sm:$0x1] }
 0x1f8   : > { %v1643_v29 = vmul.f32 0.35355338, %v1611_v1  ;;  %v3818_v31 = vsel %vm670_vm4, %v1279_v57, %v1278_v10  ;;  %v1865_v33 = vunpack.c.l.b16 %v1711_v59  ;;  %v1872_v34 = vrot.slane %v1863_v60, 5  ;;  %v1609_v59 = vld [vmem:[%s3498_s20 + $0x1e] sm:$0x1] }
 0x1f9   : > { %v1644_v38 = vmul.f32 0.35355338, %v1612_v14  ;;  %v1871_v39 = vsel %vm661_vm1, %v1870_v11, %v1869_v8  ;;  %v1638_v40 = vmul.f32 0.35355338, %v1606_v63  ;;  %v1642_v50 = vmul.f32 0.35355338, %v1610_v18 }
 0x1fa   : > { %v1667_v22 = vpack.c.bf16 %v1635_v15, %v1635_v15  ;;  %v3823_v41 = vunpack.c.l.b16 %v1712_v16  ;;  %v1645_v42 = vmul.f32 0.35355338, %v1613_v26  ;;  %v1668_v43 = vpack.c.bf16 %v1636_v20, %v1636_v20  ;;  %v1615_v11 = vld [vmem:[%s3498_s20 + $0x36] sm:$0x1]  ;;  %v1617_v26 = vld [vmem:[%s3498_s20 + $0x3e] sm:$0x1] }
 0x1fb   : > { %v1669_v44 = vpack.c.bf16 %v1637_v23, %v1637_v23  ;;  %v3825_v35 = vunpack.c.l.b16 %v1713_v24  ;;  %v1874_v45 = vrot.slane %v1864_v25, 4  ;;  %v1666_v53 = vpack.c.bf16 %v1634_v28, %v1634_v28  ;;  %v1616_v25 = vld [vmem:[%s3498_s20 + $0x3a] sm:$0x1] }
 0x1fc   : > { %v1675_v55 = vpack.c.bf16 %v1643_v29, %v1643_v29  ;;  %v1873_v57 = vsel %vm664_vm2, %v1872_v34, %v1871_v39  ;;  %v1639_v60 = vmul.f32 0.35355338, %v1607_v36  ;;  %v1646_v63 = vmul.f32 0.35355338, %v1614_v30 }
 0x1fd   : > { %v1676_v1 = vpack.c.bf16 %v1644_v38, %v1644_v38  ;;  %v1876_v10 = vrot.slane %v1865_v33, 3  ;;  %v1670_v14 = vpack.c.bf16 %v1638_v40, %v1638_v40  ;;  %v1674_v15 = vpack.c.bf16 %v1642_v50, %v1642_v50 }
 0x1fe   : > { %v1763_v16 = vunpack.c.l.b16 %v1667_v22  ;;  %v1640_v8 = vmul.f32 0.35355338, %v1608_v49  ;;  %v1677_v18 = vpack.c.bf16 %v1645_v42, %v1645_v42  ;;  %v1764_v20 = vunpack.c.l.b16 %v1668_v43 }
 0x1ff   : > { %v1765_v23 = vunpack.c.l.b16 %v1669_v44  ;;  %v1875_v24 = vsel %vm667_vm3, %v1874_v45, %v1873_v57  ;;  %v1641_v28 = vmul.f32 0.35355338, %v1609_v59  ;;  %v1762_v29 = vunpack.c.l.b16 %v1666_v53 }
 0x200   : > { %v1771_v34 = vunpack.c.l.b16 %v1675_v55  ;;  %v1647_v39 = vmul.f32 0.35355338, %v1615_v11  ;;  %v1671_v36 = vpack.c.bf16 %v1639_v60, %v1639_v60  ;;  %v1678_v30 = vpack.c.bf16 %v1646_v63, %v1646_v63 }
 0x201   : > { %v1772_v38 = vunpack.c.l.b16 %v1676_v1  ;;  %v1766_v33 = vunpack.c.l.b16 %v1670_v14  ;;  %v1770_v17 = vunpack.c.l.b16 %v1674_v15  ;;  %v1794_v40 = vrot.slane %v1763_v16, 7 }
 0x202   : > { %v1796_v50 = vrot.slane %v1764_v20, 6  ;;  %v1648_v22 = vmul.f32 0.35355338, %v1616_v25  ;;  %v1649_v49 = vmul.f32 0.35355338, %v1617_v26  ;;  %v1773_v42 = vunpack.c.l.b16 %v1677_v18 }
 0x203   : > { %v1798_v43 = vrot.slane %v1765_v23, 5  ;;  %v1672_v44 = vpack.c.bf16 %v1640_v8, %v1640_v8  ;;  %v1795_v45 = vsel %vm658_vm0, %v1794_v40, %v1762_v29  ;;  %v1808_v57 = vrot.slane %v1771_v34, 7  ;;  %v1619_v23 = vld [vmem:[%s3498_s20 + $0x46] sm:$0x1]  ;;  %v1618_v40 = vld [vmem:[%s3498_s20 + $0x42] sm:$0x1] }
 0x204   : > { %v1810_v59 = vrot.slane %v1772_v38, 6  ;;  %v1878_v53 = vrot.slane %v3823_v41, 2  ;;  %v1679_v55 = vpack.c.bf16 %v1647_v39, %v1647_v39  ;;  %v1767_v60 = vunpack.c.l.b16 %v1671_v36  ;;  %v1620_v36 = vld [vmem:[%s3498_s20 + $0x4a] sm:$0x1] }
 0x205   : > { %v1797_v63 = vsel %vm661_vm1, %v1796_v50, %v1795_v45  ;;  %v1877_v1 = vsel %vm670_vm4, %v1876_v10, %v1875_v24  ;;  %v1774_v11 = vunpack.c.l.b16 %v1678_v30  ;;  %v1800_v14 = vrot.slane %v1766_v33, 4  ;;  %v1627_v50 = vld [vmem:[%s3498_s20 + $0x66] sm:$0x1]  ;;  %v1623_v45 = vld [vmem:[%s3498_s20 + $0x56] sm:$0x1] }
 0x206   : > { %v1809_v15 = vsel %vm658_vm0, %v1808_v57, %v1770_v17  ;;  %v1880_v16 = vrot.slane %v3825_v35, 1  ;;  %v1673_v8 = vpack.c.bf16 %v1641_v28, %v1641_v28  ;;  %v1799_v18 = vsel %vm664_vm2, %v1798_v43, %v1797_v63  ;;  %v1621_v43 = vld [vmem:[%s3498_s20 + $0x4e] sm:$0x1]  ;;  %v1624_v57 = vld [vmem:[%s3498_s20 + $0x5a] sm:$0x1] }
 0x207   : > { %v1812_v20 = vrot.slane %v1773_v42, 5  ;;  %v1680_v25 = vpack.c.bf16 %v1648_v22, %v1648_v22  ;;  %v1681_v41 = vpack.c.bf16 %v1649_v49, %v1649_v49  ;;  %v1768_v26 = vunpack.c.l.b16 %v1672_v44 }
 0x208   : > { %v1811_v29 = vsel %vm661_vm1, %v1810_v59, %v1809_v15  ;;  %v1269_v10 = vrot.slane %v3799_v12, 1  ;;  %v1879_v24 = vsel %vm673_vm6, %v1878_v53, %v1877_v1  ;;  %v1775_v17 = vunpack.c.l.b16 %v1679_v55  ;;  %v1628_v59 = vld [vmem:[%s3498_s20 + $0x6a] sm:$0x1]  ;;  %v1625_v15 = vld [vmem:[%s3498_s20 + $0x5e] sm:$0x1] }
 0x209   : > { %v1802_v34 = vrot.slane %v1767_v60, 3  ;;  %v1283_v35 = vrot.slane %v3801_v46, 1  ;;  %v1801_v28 = vsel %vm667_vm3, %v1800_v14, %v1799_v18  ;;  %v1814_v39 = vrot.slane %v1774_v11, 4 }
 0x20a   : > { %v1651_v30 = vmul.f32 0.35355338, %v1619_v23  ;;  %v1268_v38 = vsel %vm673_vm6, %v1267_v47, %v3810_v7  ;;  %v1282_v12 = vsel %vm673_vm6, %v1281_v58, %v3818_v31  ;;  %v1769_v33 = vunpack.c.l.b16 %v1673_v8  ;;  %v1622_v7 = vld [vmem:[%s3498_s20 + $0x52] sm:$0x1]  ;;  %v1629_v23 = vld [vmem:[%s3498_s20 + $0x6e] sm:$0x1] }
 0x20b   : > { %v1813_v46 = vsel %vm664_vm2, %v1812_v20, %v1811_v29  ;;  %v1881_v22 = vsel %vm676_vm7, %v1880_v16, %v1879_v24  ;;  %v1776_v49 = vunpack.c.l.b16 %v1680_v25  ;;  %v1777_v42 = vunpack.c.l.b16 %v1681_v41  ;;  %v1626_v16 = vld [vmem:[%s3498_s20 + $0x62] sm:$0x1] }
 0x20c   : > { %v1804_v27 = vrot.slane %v1768_v26, 2  ;;  %v1285_v47 = vpack.c.b16 %v3790_v37, %v3782_v32  ;;  %v1803_v48 = vsel %vm670_vm4, %v1802_v34, %v1801_v28  ;;  %v1816_v58 = vrot.slane %v1775_v17, 3  ;;  %v1630_v26 = vld [vmem:[%s3498_s20 + $0x72] sm:$0x1]  ;;  %v1631_v17 = vld [vmem:[%s3498_s20 + $0x76] sm:$0x1] }
 0x20d   : > { %v1652_v31 = vmul.f32 0.35355338, %v1620_v36  ;;  %v1815_v44 = vsel %vm667_vm3, %v1814_v39, %v1813_v46  ;;  %v1650_v53 = vmul.f32 0.35355338, %v1618_v40  ;;  %v1659_v55 = vmul.f32 0.35355338, %v1627_v50 }
 0x20e   : > { %v1683_v60 = vpack.c.bf16 %v1651_v30, %v1651_v30  ;;  %v3870_v63 = vsel %vm676_vm7, %v1269_v10, %v1268_v38  ;;  %v3873_v1 = vsel %vm676_vm7, %v1283_v35, %v1282_v12  ;;  %v3875_v11 = vpack.c.b16 %v1881_v22, %v1881_v22  ;;  %v1632_v34 = vld [vmem:[%s3498_s20 + $0x7a] sm:$0x1]  ;;  %v1633_v40 = vld [vmem:[%s3498_s20 + $0x7e] sm:$0x1] }
 0x20f   : > { %v1806_v14 = vrot.slane %v1769_v33, 1  ;;  %v1805_v8 = vsel %vm673_vm6, %v1804_v27, %v1803_v48  ;;  %v1818_v18 = vrot.slane %v1776_v49, 2  ;;  %v1820_v20 = vrot.slane %v1777_v42, 1 }
 0x210   : > { %v1653_v25 = vmul.f32 0.35355338, %v1621_v43  ;;  %v1817_v41 = vsel %vm670_vm4, %v1816_v58, %v1815_v44  ;;  %v1654_v29 = vmul.f32 0.35355338, %v1622_v7  ;;  %v1660_v10 = vmul.f32 0.35355338, %v1628_v59 }
 0x211   : > { %v1684_v24 = vpack.c.bf16 %v1652_v31, %v1652_v31  ;;  %v1658_v35 = vmul.f32 0.35355338, %v1626_v16  ;;  %v1682_v28 = vpack.c.bf16 %v1650_v53, %v1650_v53  ;;  %v1691_v39 = vpack.c.bf16 %v1659_v55, %v1659_v55  ;;  %v2263_v16 = vld [vmem:[%s3479_s11 + $0x3] sm:$0x1] }
 0x212   : > { %v1779_v36 = vunpack.c.l.b16 %v1683_v60  ;;  %v3886_v30 = vsel %vm676_vm7, %v1806_v14, %v1805_v8  ;;  %v1655_v38 = vmul.f32 0.35355338, %v1623_v45  ;;  %v1656_v12 = vmul.f32 0.35355338, %v1624_v57  ;;  %v2264_v8 = vld [vmem:[%s3479_s11 + $0x7] sm:$0x1] }
 0x213   : > { %v3888_v33 = vmul.f32 0.35355338, %v1625_v15  ;;  %v1819_v46 = vsel %vm673_vm6, %v1818_v18, %v1817_v41  ;;  %v1661_v50 = vmul.f32 0.35355338, %v1629_v23  ;;  %v1662_v22 = vmul.f32 0.35355338, %v1630_v26 }
 0x214   : > { %v1685_v49 = vpack.c.bf16 %v1653_v25, %v1653_v25  ;;  %v1663_v42 = vmul.f32 0.35355338, %v1631_v17  ;;  %v1686_v27 = vpack.c.bf16 %v1654_v29, %v1654_v29  ;;  %v1692_v43 = vpack.c.bf16 %v1660_v10, %v1660_v10  ;;  %v2265_v18 = vld [vmem:[%s3479_s11 + $0xb] sm:$0x1]  ;;  %v2266_v26 = vld [vmem:[%s3479_s11 + $0xf] sm:$0x1] }
 0x215   : > { %v1780_v48 = vunpack.c.l.b16 %v1684_v24  ;;  %v1690_v58 = vpack.c.bf16 %v1658_v35, %v1658_v35  ;;  %v1778_v7 = vunpack.c.l.b16 %v1682_v28  ;;  %v1787_v31 = vunpack.c.l.b16 %v1691_v39  ;;  %v2267_v29 = vld [vmem:[%s3479_s11 + $0x13] sm:$0x1] }
 0x216   : > { %v1822_v44 = vrot.slane %v1779_v36, 7  ;;  %v3893_v45 = vsel %vm676_vm7, %v1820_v20, %v1819_v46  ;;  %v3895_v57 = vmul.f32 0.35355338, %v1632_v34  ;;  %v3897_v59 = vmul.f32 0.35355338, %v1633_v40 }
 0x217   : > { %v1687_v53 = vpack.c.bf16 %v1655_v38, %v1655_v38  ;;  %v1688_v55 = vpack.c.bf16 %v1656_v12, %v1656_v12  ;;  %v1689_v60 = vpack.c.bf16 %v3888_v33, %v3888_v33  ;;  %v1693_v14 = vpack.c.bf16 %v1661_v50, %v1661_v50  ;;  %v2268_v33 = vld [vmem:[%s3479_s11 + $0x17] sm:$0x1] }
 0x218   : > { %v1781_v15 = vunpack.c.l.b16 %v1685_v49  ;;  %v1694_v23 = vpack.c.bf16 %v1662_v22, %v1662_v22  ;;  %v1695_v25 = vpack.c.bf16 %v1663_v42, %v1663_v42  ;;  %v1788_v20 = vunpack.c.l.b16 %v1692_v43 }
 0x219   : > { %v1824_v41 = vrot.slane %v1780_v48, 6  ;;  %v1782_v10 = vunpack.c.l.b16 %v1686_v27  ;;  %v1786_v24 = vunpack.c.l.b16 %v1690_v58  ;;  %v1823_v17 = vsel %vm658_vm0, %v1822_v44, %v1778_v7  ;;  %v2269_v7 = vld [vmem:[%s3479_s11 + $0x1b] sm:$0x1] }
 0x21a   : > { %v1836_v34 = vrot.slane %v1787_v31, 7  ;;  %v1696_v35 = vpack.c.bf16 %v3895_v57, %v3895_v57  ;;  %v2271_v28 = vpack.c.bf16 %v2263_v16, %v2263_v16  ;;  %v2272_v39 = vpack.c.bf16 %v2264_v8, %v2264_v8  ;;  %v2270_v31 = vld [vmem:[%s3479_s11 + $0x1f] sm:$0x1] }
 0x21b   : > { %v2273_v36 = vpack.c.bf16 %v2265_v18, %v2265_v18  ;;  %v1789_v38 = vunpack.c.l.b16 %v1693_v14  ;;  %v1826_v12 = vrot.slane %v1781_v15, 5  ;;  %v2274_v46 = vpack.c.bf16 %v2266_v26, %v2266_v26 }
 0x21c   : > { %v2275_v40 = vpack.c.bf16 %v2267_v29, %v2267_v29  ;;  %v1697_v50 = vpack.c.bf16 %v3897_v59, %v3897_v59  ;;  %v1783_v22 = vunpack.c.l.b16 %v1687_v53  ;;  %v1825_v49 = vsel %vm661_vm1, %v1824_v41, %v1823_v17 }
 0x21d   : > { %v1838_v42 = vrot.slane %v1788_v20, 6  ;;  %v1790_v27 = vunpack.c.l.b16 %v1694_v23  ;;  %v1828_v43 = vrot.slane %v1782_v10, 4  ;;  %v1837_v48 = vsel %vm658_vm0, %v1836_v34, %v1786_v24 }
 0x21e   : > { %v2426_v58 = vunpack.c.l.b16 %v2272_v39  ;;  %v2276_v44 = vpack.c.bf16 %v2268_v33, %v2268_v33  ;;  %v2425_v57 = vunpack.c.l.b16 %v2271_v28  ;;  %v2427_v14 = vunpack.c.l.b16 %v2273_v36 }
 0x21f   : > { %v2428_v15 = vunpack.c.l.b16 %v2274_v46  ;;  %v1784_v16 = vunpack.c.l.b16 %v1688_v55  ;;  %v1827_v8 = vsel %vm664_vm2, %v1826_v12, %v1825_v49  ;;  %v1840_v18 = vrot.slane %v1789_v38, 5  ;;  %v2176_v49 = vld [vmem:[%s3498_s20 + $0x27] sm:$0x1] }
 0x220   : > { %v2429_v59 = vunpack.c.l.b16 %v2275_v40  ;;  %v1839_v53 = vsel %vm661_vm1, %v1838_v42, %v1837_v48  ;;  %v2433_v20 = vrot.slane %v2426_v58, 7  ;;  %v2435_v23 = vrot.slane %v2427_v14, 6  ;;  %v2167_v48 = vld [vmem:[%s3498_s20 + $0x3] sm:$0x1]  ;;  %v2169_v58 = vld [vmem:[%s3498_s20 + $0xb] sm:$0x1] }
 0x221   : > { %v2437_v41 = vrot.slane %v2428_v15, 5  ;;  %v1791_v26 = vunpack.c.l.b16 %v1695_v25  ;;  %v1830_v29 = vrot.slane %v1783_v22, 3  ;;  %v2277_v10 = vpack.c.bf16 %v2269_v7, %v2269_v7  ;;  %v2168_v25 = vld [vmem:[%s3498_s20 + $0x7] sm:$0x1] }
 0x222   : > { %v2278_v24 = vpack.c.bf16 %v2270_v31, %v2270_v31  ;;  %v1829_v17 = vsel %vm667_vm3, %v1828_v43, %v1827_v8  ;;  %v1842_v34 = vrot.slane %v1790_v27, 4  ;;  %v2430_v28 = vunpack.c.l.b16 %v2276_v44  ;;  %v2170_v31 = vld [vmem:[%s3498_s20 + $0xf] sm:$0x1]  ;;  %v2171_v44 = vld [vmem:[%s3498_s20 + $0x13] sm:$0x1] }
 0x223   : > { %v2434_v55 = vsel %vm658_vm0, %v2433_v20, %v2425_v57  ;;  %v3920_v39 = vunpack.c.l.b16 %v1689_v60  ;;  %v1841_v36 = vsel %vm664_vm2, %v1840_v18, %v1839_v53  ;;  %v2439_v12 = vrot.slane %v2429_v59, 4  ;;  %v2175_v57 = vld [vmem:[%s3498_s20 + $0x23] sm:$0x1]  ;;  %v2172_v18 = vld [vmem:[%s3498_s20 + $0x17] sm:$0x1] }
 0x224   : > { %v2436_v38 = vsel %vm661_vm1, %v2435_v23, %v2434_v55  ;;  %v1792_v33 = vunpack.c.l.b16 %v1696_v35  ;;  %v3925_v46 = vunpack.c.l.b16 %v1697_v50  ;;  %v1832_v40 = vrot.slane %v1784_v16, 2  ;;  %v2173_v59 = vld [vmem:[%s3498_s20 + $0x1b] sm:$0x1]  ;;  %v2174_v53 = vld [vmem:[%s3498_s20 + $0x1f] sm:$0x1] }
 0x225   : > { %v2438_v22 = vsel %vm664_vm2, %v2437_v41, %v2436_v38  ;;  %v1831_v42 = vsel %vm670_vm4, %v1830_v29, %v1829_v17  ;;  %v1844_v60 = vrot.slane %v1791_v26, 3  ;;  %v2431_v27 = vunpack.c.l.b16 %v2277_v10  ;;  %v2177_v20 = vld [vmem:[%s3498_s20 + $0x2b] sm:$0x1]  ;;  %v2179_v17 = vld [vmem:[%s3498_s20 + $0x33] sm:$0x1] }
 0x226   : > { %v2432_v43 = vunpack.c.l.b16 %v2278_v24  ;;  %v1843_v50 = vsel %vm667_vm3, %v1842_v34, %v1841_v36  ;;  %v2441_v7 = vrot.slane %v2430_v28, 3  ;;  %v2200_v14 = vmul.f32 0.35355338, %v2168_v25  ;;  %v2178_v24 = vld [vmem:[%s3498_s20 + $0x2f] sm:$0x1] }
 0x227   : > { %v3940_v15 = vsel %vm448_vm5, %v3875_v11, 0  ;;  %v2440_v8 = vsel %vm667_vm3, %v2439_v12, %v2438_v22  ;;  %v2208_v23 = vmul.f32 0.35355338, %v2176_v49  ;;  %v3950_v41 = vsel %vm673_vm6, %v1832_v40, %v1831_v42  ;;  %v2180_v36 = vld [vmem:[%s3498_s20 + $0x37] sm:$0x1] }
 0x228   : > { %v1846_v29 = vrot.slane %v1792_v33, 2  ;;  %v1845_v34 = vsel %vm670_vm4, %v1844_v60, %v1843_v50  ;;  %v2443_v28 = vrot.slane %v2431_v27, 2  ;;  %v2445_v55 = vrot.slane %v2432_v43, 1  ;;  %v2181_v25 = vld [vmem:[%s3498_s20 + $0x3b] sm:$0x1] }
 0x229   : > { %v2201_v38 = vmul.f32 0.35355338, %v2169_v58  ;;  %v2442_v12 = vsel %vm670_vm4, %v2441_v7, %v2440_v8  ;;  %v2199_v22 = vmul.f32 0.35355338, %v2167_v48  ;;  %v2209_v40 = vmul.f32 0.35355338, %v2177_v20 }
 0x22a   : > { %v2232_v49 = vpack.c.bf16 %v2200_v14, %v2200_v14  ;;  %v2202_v42 = vmul.f32 0.35355338, %v2170_v31  ;;  %v2203_v21 = vmul.f32 0.35355338, %v2171_v44  ;;  %v2207_v33 = vmul.f32 0.35355338, %v2175_v57 }
 0x22b   : > { %v2240_v6 = vpack.c.bf16 %v2208_v23, %v2208_v23  ;;  %v3961_v4 = vsel %vm673_vm6, %v1846_v29, %v1845_v34  ;;  %v2204_v10 = vmul.f32 0.35355338, %v2172_v18  ;;  %v3963_v60 = vmul.f32 0.35355338, %v2173_v59  ;;  %v2182_v58 = vld [vmem:[%s3498_s20 + $0x3f] sm:$0x1] }
 0x22c   : > { %v3965_v27 = vmul.f32 0.35355338, %v2174_v53  ;;  %v2444_v43 = vsel %vm673_vm6, %v2443_v28, %v2442_v12  ;;  %v2210_v50 = vmul.f32 0.35355338, %v2178_v24  ;;  %v2211_v7 = vmul.f32 0.35355338, %v2179_v17 }
 0x22d   : > { %v2233_v48 = vpack.c.bf16 %v2201_v38, %v2201_v38  ;;  %v2212_v14 = vmul.f32 0.35355338, %v2180_v36  ;;  %v2231_v31 = vpack.c.bf16 %v2199_v22, %v2199_v22  ;;  %v2241_v44 = vpack.c.bf16 %v2209_v40, %v2209_v40 }
 0x22e   : > { %v2328_v57 = vunpack.c.l.b16 %v2232_v49  ;;  %v2213_v29 = vmul.f32 0.35355338, %v2181_v25  ;;  %v2239_v18 = vpack.c.bf16 %v2207_v33, %v2207_v33  ;;  %v2336_v59 = vunpack.c.l.b16 %v2240_v6 }
 0x22f   : > { %v2446_v34 = vsel %vm676_vm7, %v2445_v55, %v2444_v43  ;;  %v3972_v28 = vmul.f32 0.35355338, %v2182_v58  ;;  %v2234_v24 = vpack.c.bf16 %v2202_v42, %v2202_v42  ;;  %v2235_v38 = vpack.c.bf16 %v2203_v21, %v2203_v21 }
 0x230   : > { %v2242_v12 = vpack.c.bf16 %v2210_v50, %v2210_v50  ;;  %v2329_v36 = vunpack.c.l.b16 %v2233_v48  ;;  %v2327_v40 = vunpack.c.l.b16 %v2231_v31  ;;  %v2337_v49 = vunpack.c.l.b16 %v2241_v44 }
 0x231   : > { %v2359_v26 = vrot.slane %v2328_v57, 7  ;;  %v2236_v25 = vpack.c.bf16 %v2204_v10, %v2204_v10  ;;  %v2335_v33 = vunpack.c.l.b16 %v2239_v18  ;;  %v2373_v6 = vrot.slane %v2336_v59, 7  ;;  %v2184_v59 = vld [vmem:[%s3498_s20 + $0x47] sm:$0x1] }
 0x232   : > { %v2243_v55 = vpack.c.bf16 %v2211_v7, %v2211_v7  ;;  %v2330_v43 = vunpack.c.l.b16 %v2234_v24  ;;  %v2237_v21 = vpack.c.bf16 %v3963_v60, %v3963_v60  ;;  %v2338_v42 = vunpack.c.l.b16 %v2242_v12  ;;  %v2186_v24 = vld [vmem:[%s3498_s20 + $0x4f] sm:$0x1] }
 0x233   : > { %v2361_v58 = vrot.slane %v2329_v36, 6  ;;  %v2238_v10 = vpack.c.bf16 %v3965_v27, %v3965_v27  ;;  %v2360_v48 = vsel %vm658_vm0, %v2359_v26, %v2327_v40  ;;  %v2375_v31 = vrot.slane %v2337_v49, 6  ;;  %v2183_v27 = vld [vmem:[%s3498_s20 + $0x43] sm:$0x1] }
 0x234   : > { %v2244_v7 = vpack.c.bf16 %v2212_v14, %v2212_v14  ;;  %v2245_v44 = vpack.c.bf16 %v2213_v29, %v2213_v29  ;;  %v2331_v57 = vunpack.c.l.b16 %v2235_v38  ;;  %v2363_v18 = vrot.slane %v2330_v43, 5  ;;  %v2191_v36 = vld [vmem:[%s3498_s20 + $0x63] sm:$0x1]  ;;  %v2195_v43 = vld [vmem:[%s3498_s20 + $0x73] sm:$0x1] }
 0x235   : > { %v2246_v26 = vpack.c.bf16 %v3972_v28, %v3972_v28  ;;  %v2362_v14 = vsel %vm661_vm1, %v2361_v58, %v2360_v48  ;;  %v2377_v29 = vrot.slane %v2338_v42, 5  ;;  %v3995_v38 = vunpack.c.l.b16 %v2238_v10  ;;  %v2193_v28 = vld [vmem:[%s3498_s20 + $0x6b] sm:$0x1] }
 0x236   : > { %v4001_v40 = vunpack.c.l.b16 %v2244_v7  ;;  %v4003_v49 = vunpack.c.l.b16 %v2245_v44  ;;  %v2218_v10 = vmul.f32 0.35355338, %v2186_v24  ;;  %v2225_v7 = vmul.f32 0.35355338, %v2193_v28  ;;  %v2196_v24 = vld [vmem:[%s3498_s20 + $0x77] sm:$0x1] }
 0x249   : > { %v857_v8 = vpop.permute.xlu1 %856 }
 0x24a   : > { %v866_v20 = vsub.f32 %v3587_v51, %v857_v8  ;;  %v847_v23 = vpop.permute.xlu0 %846  ;;  %v3975_v8 = vpack.c.b16 %v2446_v34, %v2446_v34  ;;  %v2185_v34 = vld [vmem:[%s3498_s20 + $0x4b] sm:$0x1] }
 0x24b   : > { %v864_v53 = vsub.f32 %v3589_v52, %v847_v23  ;;  %v2339_v23 = vunpack.c.l.b16 %v2243_v55  ;;  %v2187_v55 = vld [vmem:[%s3498_s20 + $0x53] sm:$0x1] }
 0x24c   : > { %v872_v17 = vmul.f32 1.442695, %v866_v20  ;;  %v2374_v20 = vsel %vm658_vm0, %v2373_v6, %v2335_v33  ;;  %v2216_v33 = vmul.f32 0.35355338, %v2184_v59  ;;  %v2364_v6 = vsel %vm664_vm2, %v2363_v18, %v2362_v14 }
 0x24d   : > { %v868_v22 = vmul.f32 1.442695, %v864_v53  ;;  %v3988_v53 = vunpack.c.l.b16 %v2236_v25  ;;  %v2376_v12 = vsel %vm661_vm1, %v2375_v31, %v2374_v20  ;;  %v2194_v25 = vld [vmem:[%s3498_s20 + $0x6f] sm:$0x1] }
 0x24e   : > { %3254 = vpow2.f32 %v872_v17  ;;  %v852_v51 = vpop.permute.xlu1 %851  ;;  %v2378_v58 = vsel %vm664_vm2, %v2377_v29, %v2376_v12  ;;  %v2226_v44 = vmul.f32 0.35355338, %v2194_v25  ;;  %v2248_v18 = vpack.c.bf16 %v2216_v33, %v2216_v33  ;;  %v2189_v29 = vld [vmem:[%s3498_s20 + $0x5b] sm:$0x1] }
 0x24f   : > { %v865_v52 = vsub.f32 %v3597_v56, %v852_v51  ;;  %3256 = vpow2.f32 %v868_v22  ;;  %v2192_v22 = vld [vmem:[%s3498_s20 + $0x67] sm:$0x1]  ;;  %v2365_v51 = vrot.slane %v2331_v57, 4  ;;  %v2227_v12 = vmul.f32 0.35355338, %v2195_v43 }
 0x250   : > { %v2224_v48 = vmul.f32 0.35355338, %v2192_v22  ;;  %v2257_v33 = vpack.c.bf16 %v2225_v7, %v2225_v7  ;;  %v2344_v35 = vunpack.c.l.b16 %v2248_v18  ;;  %v2228_v43 = vmul.f32 0.35355338, %v2196_v24 }
 0x251   : > { %v870_v50 = vmul.f32 1.442695, %v865_v52  ;;  %v2379_v52 = vrot.slane %v2339_v23, 4  ;;  %v2223_v23 = vmul.f32 0.35355338, %v2191_v36  ;;  %v4522_v37 = vrot.slane %v3988_v53, 3 }
 0x252   : > { %v862_v56 = vpop.permute.xlu1 %861  ;;  %v2256_v28 = vpack.c.bf16 %v2224_v48, %v2224_v48  ;;  %v2190_v48 = vld [vmem:[%s3498_s20 + $0x5f] sm:$0x1]  ;;  %v2387_v24 = vrot.slane %v2344_v35, 7 }
 0x253   : > { %3258 = vpow2.f32 %v870_v50  ;;  %v867_v60 = vsub.f32 %v3593_v54, %v862_v56  ;;  %v3993_v54 = vunpack.c.l.b16 %v2237_v21  ;;  %v2217_v21 = vmul.f32 0.35355338, %v2185_v34 }
 0x254   : > { %v2215_v50 = vmul.f32 0.35355338, %v2183_v27  ;;  %v4014_v56 = vunpack.c.l.b16 %v2246_v26  ;;  %v4019_v27 = vsel %vm667_vm3, %v2365_v51, %v2364_v6  ;;  %v4022_v59 = vsel %vm667_vm3, %v2379_v52, %v2378_v58  ;;  %v2188_v26 = vld [vmem:[%s3498_s20 + $0x57] sm:$0x1] }
 0x255   : > { %v874_v17 = vmul.f32 1.442695, %v867_v60  ;;  %v2249_v34 = vpack.c.bf16 %v2217_v21, %v2217_v21  ;;  %v2250_v51 = vpack.c.bf16 %v2218_v10, %v2218_v10  ;;  %v2258_v6 = vpack.c.bf16 %v2226_v44, %v2226_v44 }
 0x256   : > { %v2247_v22 = vpack.c.bf16 %v2215_v50, %v2215_v50  ;;  %v2255_v16 = vpack.c.bf16 %v2223_v23, %v2223_v23  ;;  %v2220_v21 = vmul.f32 0.35355338, %v2188_v26  ;;  %v2259_v10 = vpack.c.bf16 %v2227_v12, %v2227_v12  ;;  %v2198_v26 = vld [vmem:[%s3498_s20 + $0x7f] sm:$0x1] }
 0x257   : > { %3260 = vpow2.f32 %v874_v17  ;;  %v2219_v17 = vmul.f32 0.35355338, %v2187_v55  ;;  %v2221_v55 = vmul.f32 0.35355338, %v2189_v29  ;;  %v2345_v50 = vunpack.c.l.b16 %v2249_v34 }
 0x258   : > { %v4009_v42 = vpop.eup %3254  ;;  %v2343_v7 = vunpack.c.l.b16 %v2247_v22  ;;  %v2352_v44 = vunpack.c.l.b16 %v2256_v28  ;;  %v2346_v20 = vunpack.c.l.b16 %v2250_v51  ;;  %v2351_v29 = vunpack.c.l.b16 %v2255_v16 }
 0x259   : > { %v890_v31 = vsel %vm448_vm5, %v4009_v42, 0.0  ;;  %v3257_v57 = vpop.eup %3256  ;;  %v2251_v60 = vpack.c.bf16 %v2219_v17, %v2219_v17  ;;  %v2222_v34 = vmul.f32 0.35355338, %v2190_v48  ;;  %v2389_v17 = vrot.slane %v2345_v50, 6 }
 0x25a   : > { %891 = vadd.xlane.f32.xlu1 %v890_v31  ;;  %v884_v36 = vsel %vm448_vm5, %v3257_v57, 0.0  ;;  %v2197_v31 = vld [vmem:[%s3498_s20 + $0x7b] sm:$0x1]  ;;  %v2355_v22 = vunpack.c.l.b16 %v2259_v10  ;;  %v2388_v28 = vsel %vm658_vm0, %v2387_v24, %v2343_v7  ;;  %v2401_v51 = vrot.slane %v2352_v44, 7 }
 0x25b   : > { %v2229_v14 = vmul.f32 0.35355338, %v2197_v31  ;;  %v2347_v12 = vunpack.c.l.b16 %v2251_v60  ;;  %v2230_v35 = vmul.f32 0.35355338, %v2198_v26  ;;  %v2391_v16 = vrot.slane %v2346_v20, 5 }
 0x25c   : > { %v2390_v31 = vsel %vm661_vm1, %v2389_v17, %v2388_v28  ;;  %v2254_v48 = vpack.c.bf16 %v2222_v34, %v2222_v34  ;;  %v2371_v44 = vrot.slane %v3995_v38, 1 }
 0x25d   : > { %v3259_v25 = vpop.eup %3258  ;;  %v2261_v60 = vpack.c.bf16 %v2229_v14, %v2229_v14  ;;  %v2393_v14 = vrot.slane %v2347_v12, 4  ;;  %v2262_v10 = vpack.c.bf16 %v2230_v35, %v2230_v35 }
 0x25e   : > { %885 = vadd.xlane.f32.xlu1 %v884_v36  ;;  %v887_v52 = vsel %vm448_vm5, %v3259_v25, 0.0  ;;  %v933_v58 = vpack.c.bf16 %v3259_v25, %v3257_v57  ;;  %v2353_v57 = vunpack.c.l.b16 %v2257_v33  ;;  %v2354_v25 = vunpack.c.l.b16 %v2258_v6 }
 0x25f   : > { %888 = vadd.xlane.f32.xlu0 %v887_v52  ;;  %v2252_v52 = vpack.c.bf16 %v2220_v21, %v2220_v21  ;;  %v2253_v6 = vpack.c.bf16 %v2221_v55, %v2221_v55  ;;  %v2402_v21 = vsel %vm658_vm0, %v2401_v51, %v2351_v29  ;;  %v2407_v55 = vrot.slane %v2355_v22, 4 }
 0x260   : > { %3158 = vmatprep.mubr.msk.bf16.mxu1 %vm448_vm5, %v933_v58  ;;  %v2260_v58 = vpack.c.bf16 %v2228_v43, %v2228_v43  ;;  %v2405_v33 = vrot.slane %v2354_v25, 5  ;;  %v2350_v24 = vunpack.c.l.b16 %v2254_v48  ;;  %v2358_v34 = vunpack.c.l.b16 %v2262_v10 }
 0x261   : > { %v3261_v36 = vpop.eup %3260  ;;  %v2348_v43 = vunpack.c.l.b16 %v2252_v52  ;;  %v2349_v53 = vunpack.c.l.b16 %v2253_v6 }
 0x262   : > { %v893_v23 = vsel %vm448_vm5, %v3261_v36, 0.0  ;;  %v934_v18 = vpack.c.bf16 %v3261_v36, %v4009_v42  ;;  %v2403_v42 = vrot.slane %v2353_v57, 6  ;;  %v2356_v50 = vunpack.c.l.b16 %v2260_v58 }
 0x263   : > { %894 = vadd.xlane.f32.xlu1 %v893_v23  ;;  %v2385_v36 = vrot.slane %v4014_v56, 1  ;;  %v2357_v57 = vunpack.c.l.b16 %v2261_v60  ;;  %v2395_v25 = vrot.slane %v2348_v43, 3  ;;  %v4527_v56 = vrot.slane %v3920_v39, 1 }
 0x264   : > { %3159 = vmatmul.mubr.msk.bf16.vlgmr.msra.gmra.mrb[0].mxu1 %vm448_vm5, %v934_v18  ;;  %v2404_v32 = vsel %vm661_vm1, %v2403_v42, %v2402_v21  ;;  %v2409_v23 = vrot.slane %v2356_v50, 3  ;;  %v4525_v18 = vpack.c.b16 %v3873_v1, %v3870_v63  ;;  %v4528_v63 = vrot.slane %v3925_v46, 1 }
 0x265   : > { %3163 = vmatpush3.bf16.xpose.msra.mxu1 %v3739_v19  ;;  %3164 = vmatprep.mubr.msk.bf16.mxu1 %vm448_vm5, %v1285_v47  ;;  %v2383_v19 = vrot.slane %v4003_v49, 2  ;;  %v2368_v47 = vsel %vm670_vm4, %v4522_v37, %v4019_v27  ;;  %v2392_v49 = vsel %vm664_vm2, %v2391_v16, %v2390_v31  ;;  %v2406_v7 = vsel %vm664_vm2, %v2405_v33, %v2404_v32 }
 0x266   : > { %3202 = vmatprep.subr.msk.bf16.mxu1 %vm448_vm5, %v3875_v11  ;;  %v4523_v11 = vrot.slane %v4001_v40, 3  ;;  %v4524_v27 = vrot.slane %v3993_v54, 2  ;;  %v2394_v26 = vsel %vm667_vm3, %v2393_v14, %v2392_v49  ;;  %v2408_v38 = vsel %vm667_vm3, %v2407_v55, %v2406_v7  ;;  %v879_v14 = vld [vmem:[#allocation3 + $0x18] sm:$0xff] }
 0x267   : > { %v4526_v54 = vpack.c.b16 %v3893_v45, %v3886_v30  ;;  %v1835_v29 = vsel %vm676_vm7, %v4527_v56, %v3950_v41  ;;  %v1849_v1 = vsel %vm676_vm7, %v4528_v63, %v3961_v4  ;;  %v2397_v45 = vrot.slane %v2349_v53, 2 }
 0x268   : > { %v2382_v20 = vsel %vm670_vm4, %v4523_v11, %v4022_v59  ;;  %v2370_v40 = vsel %vm673_vm6, %v4524_v27, %v2368_v47  ;;  %v2411_v52 = vrot.slane %v2357_v57, 2  ;;  %v2396_v39 = vsel %vm670_vm4, %v2395_v25, %v2394_v26  ;;  %v877_v47 = vld [vmem:[#allocation3 + $0x8] sm:$0xff] }
 0x269   : > { %v2384_v59 = vsel %vm673_vm6, %v2383_v19, %v2382_v20  ;;  %v2410_v41 = vsel %vm670_vm4, %v2409_v23, %v2408_v38  ;;  %v1851_v58 = vpack.c.b16 %v1849_v1, %v1835_v29  ;;  %v2399_v46 = vrot.slane %v2350_v24, 1 }
 0x26a   : > { %v2386_v30 = vsel %vm676_vm7, %v2385_v36, %v2384_v59  ;;  %v2413_v12 = vrot.slane %v2358_v34, 1  ;;  %v2455_v4 = vsel %vm448_vm5, %v3975_v8, 0  ;;  %v2398_v22 = vsel %vm673_vm6, %v2397_v45, %v2396_v39 }
 0x26b   : > { %v2412_v28 = vsel %vm673_vm6, %v2411_v52, %v2410_v41  ;;  %v2400_v51 = vsel %vm676_vm7, %v2399_v46, %v2398_v22  ;;  %v4529_v42 = vsub.f32 %v3635_v61, %v3640_v0  ;;  %v4530_v33 = vsub.f32 %v3637_v62, %v3643_v2  ;;  %v878_v61 = vld [vmem:[#allocation3 + $0x10] sm:$0xff]  ;;  %v876_v62 = vld [vmem:[#allocation3] sm:$0xff] }
 0x26c   : > { %3165 = vmatmul.mubr.msk.bf16.vlgmr.msra.gmra.mrb[4].mxu1 %vm448_vm5, %v4525_v18  ;;  %v2414_v35 = vsel %vm676_vm7, %v2413_v12, %v2412_v28  ;;  %v4531_v60 = vsub.f32 %v3652_v5, %v3668_v13  ;;  %v4532_v21 = vsub.f32 %v3645_v3, %v3664_v9  ;;  %v4175_v46 = vld [vmem:[#allocation2 + $0x30] sm:$0xff]  ;;  %v4177_v12 = vld [vmem:[#allocation2 + $0x20] sm:$0xff] }
 0x26d   : > { %3175 = vmatpush3.bf16.xpose.msra.mxu1 %v3940_v15  ;;  %3176 = vmatprep.mubr.msk.bf16.mxu1 %vm448_vm5, %v4526_v54  ;;  %v2372_v15 = vsel %vm676_vm7, %v2371_v44, %v2370_v40  ;;  %v2416_v16 = vpack.c.b16 %v2414_v35, %v2400_v51  ;;  %v836_v6 = vmul.f32 1.442695, %v4530_v33 }
 0x26e   : > { %3204 = vmatprep.subr.msk.bf16.mxu1 %vm448_vm5, %v3975_v8  ;;  %v2415_v17 = vpack.c.b16 %v2386_v30, %v2372_v15  ;;  %v840_v8 = vmul.f32 1.442695, %v4529_v42  ;;  %v838_v31 = vmul.f32 1.442695, %v4531_v60  ;;  %v842_v19 = vmul.f32 1.442695, %v4532_v21 }
 0x26f   : > { %v4201_v60 = vld [vmem:[#allocation2 + $0x38] sm:$0xff]  ;;  %v907_v42 = vld [vmem:[#allocation4 + $0x10] sm:$0xff] }
 0x270   : > { %3262 = vpow2.f32 %v840_v8 }
 0x271   : > { %3264 = vpow2.f32 %v836_v6  ;;  %v4199_v6 = vld [vmem:[#allocation2 + $0x50] sm:$0xff] }
 0x272   : > { %3266 = vpow2.f32 %v838_v31 }
 0x273   : > { %3268 = vpow2.f32 %v842_v19 }
 0x274   : > { %3177 = vmatmul.mubr.msk.bf16.vlgmr.msra.gmra.mrb[8].mxu1 %vm448_vm5, %v1851_v58 }
 0x275   : > { %3187 = vmatpush3.bf16.xpose.msra.mxu1 %v2455_v4  ;;  %3188 = vmatprep.mubr.msk.bf16.mxu1 %vm448_vm5, %v2415_v17 }
 0x27a   : > { %v4111_v43 = vpop.eup %3262 }
 0x27b   : > { %v882_v0 = vmul.f32 %v4111_v43, %v878_v61  ;;  %v3265_v50 = vpop.eup %3264 }
 0x27c   : > { %3189 = vmatmul.mubr.msk.bf16.vlgmr.msra.gmra.mrb[12].mxu1 %vm448_vm5, %v2416_v16  ;;  %v3267_v2 = vpop.eup %3266  ;;  %v880_v5 = vmul.f32 %v3265_v50, %v876_v62  ;;  %v4189_v16 = vld [vmem:[#allocation2 + $0x28] sm:$0xff] }
 0x27d   : > { %v881_v11 = vmul.f32 %v3267_v2, %v877_v47  ;;  %v3269_v3 = vpop.eup %3268 }
 0x27e   : > { %v883_v48 = vmul.f32 %v3269_v3, %v879_v14 }
 0x2e7   : > { %v892_v32 = vpop.xlane.xlu1 %891 }
 0x2e8   : > { %v898_v37 = vadd.f32 %v892_v32, %v882_v0  ;;  %v4214_v0 = vld [vmem:[#allocation2 + $0x40] sm:$0xff]  ;;  %v4220_v32 = vld [vmem:[#allocation2 + $0x48] sm:$0xff] }
 0x2ea   : > { %903 = vst.msk [vmem:[#allocation3 + $0x10] sm:$0xff] %vm415_vm8, %v898_v37 }
 0x2eb   : > { %v886_v13 = vpop.xlane.xlu1 %885 }
 0x2ec   : > { %v896_v9 = vadd.f32 %v886_v13, %v880_v5  ;;  %v889_v20 = vpop.xlane.xlu0 %888  ;;  %v4233_v13 = vld [vmem:[#allocation2 + $0x70] sm:$0xff] }
 0x2ed   : > { %v897_v55 = vadd.f32 %v889_v20, %v881_v11  ;;  %4533 = vst [vmem:[#allocation7_spill] sm:$0xff] %v4233_v13 }
 0x2ee   : > { %901 = vst.msk [vmem:[#allocation3] sm:$0xff] %vm415_vm8, %v896_v9 }
 0x2ef   : > { %902 = vst.msk [vmem:[#allocation3 + $0x8] sm:$0xff] %vm415_vm8, %v897_v55 }
 0x2f0   : > { %v895_v10 = vpop.xlane.xlu1 %894 }
 0x2f1   : > { %v899_v49 = vadd.f32 %v895_v10, %v883_v48  ;;  %v4252_v10 = vld [vmem:[#allocation2 + $0x60] sm:$0xff] }
 0x2f2   : > { %4534 = vst [vmem:[#allocation8_spill] sm:$0xff] %v4252_v10 }
 0x2f3   : > { %904 = vst.msk [vmem:[#allocation3 + $0x18] sm:$0xff] %vm415_vm8, %v899_v49 }
 0x337   : > { %v4118_v7 = vpop.f32.mrb[0].mxu1 }
 0x338   : > { %v4120_v44 = vpop.f32.mrb[1].mxu1 }
 0x339   : > { %v4122_v36 = vpop.f32.mrb[2].mxu1 }
 0x33a   : > { %v4124_v53 = vpop.f32.mrb[3].mxu1 }
 0x33f   : > { %v4126_v57 = vpop.f32.mrb[4].mxu1 }
 0x340   : > { %v4128_v27 = vpop.f32.mrb[5].mxu1  ;;  %v1387_v40 = vsel %vm448_vm5, %v4126_v57, -inf }
 0x341   : > { %1388 = vmax.xlane.f32.xlu0 %v1387_v40  ;;  %v4132_v59 = vpop.f32.mrb[6].mxu1  ;;  %v1381_v25 = vsel %vm448_vm5, %v4128_v27, -inf  ;;  %v4258_v40 = vld [vmem:[#allocation2 + $0x68] sm:$0xff] }
 0x342   : > { %v4136_v23 = vpop.f32.mrb[7].mxu1  ;;  %1382 = vmax.xlane.f32.xlu1 %v1381_v25  ;;  %v1390_v56 = vsel %vm448_vm5, %v4132_v59, -inf  ;;  %v1150_v25 = vld [vmem:[%s3660_s22 + $0x5] sm:$0x1] }
 0x343   : > { %v1384_v18 = vsel %vm448_vm5, %v4136_v23, -inf }
 0x346   : > { %1385 = vmax.xlane.f32.xlu1 %v1384_v18 }
 0x347   : > { %v4140_v26 = vpop.f32.mrb[8].mxu1 }
 0x348   : > { %v1952_v38 = vsel %vm448_vm5, %v4140_v26, -inf  ;;  %v4144_v54 = vpop.f32.mrb[9].mxu1 }
 0x349   : > { %1953 = vmax.xlane.f32.xlu0 %v1952_v38  ;;  %v4148_v29 = vpop.f32.mrb[10].mxu1  ;;  %v1946_v1 = vsel %vm448_vm5, %v4144_v54, -inf }
 0x34a   : > { %1391 = vmax.xlane.f32.xlu1 %v1390_v56  ;;  %v4150_v63 = vpop.f32.mrb[11].mxu1  ;;  %v1955_v15 = vsel %vm448_vm5, %v4148_v29, -inf  ;;  %v1151_v56 = vld [vmem:[%s3660_s22 + $0x9] sm:$0x1] }
 0x34b   : > { %v1949_v24 = vsel %vm448_vm5, %v4150_v63, -inf }
 0x34d   : > { %1947 = vmax.xlane.f32.xlu0 %v1946_v1  ;;  %v1158_v1 = vpack.c.bf16 %v1150_v25, %v1150_v25  ;;  %v1155_v25 = vld [vmem:[%s3660_s22 + $0x19] sm:$0x1] }
 0x34e   : > { %1950 = vmax.xlane.f32.xlu1 %v1949_v24 }
 0x34f   : > { %v4156_v34 = vpop.f32.mrb[12].mxu1 }
 0x350   : > { %v2517_v30 = vsel %vm448_vm5, %v4156_v34, -inf  ;;  %v4162_v45 = vpop.f32.mrb[13].mxu1 }
 0x351   : > { %2518 = vmax.xlane.f32.xlu0 %v2517_v30  ;;  %v4164_v52 = vpop.f32.mrb[14].mxu1  ;;  %v2511_v41 = vsel %vm448_vm5, %v4162_v45, -inf  ;;  %v1149_v30 = vld [vmem:[%s3660_s22 + $0x1] sm:$0x1] }
 0x352   : > { %1956 = vmax.xlane.f32.xlu1 %v1955_v15  ;;  %v4166_v39 = vpop.f32.mrb[15].mxu1  ;;  %v2520_v17 = vsel %vm448_vm5, %v4164_v52, -inf }
 0x353   : > { %v2514_v58 = vsel %vm448_vm5, %v4166_v39, -inf }
 0x355   : > { %2512 = vmax.xlane.f32.xlu0 %v2511_v41  ;;  %v1152_v41 = vld [vmem:[%s3660_s22 + $0xd] sm:$0x1] }
 0x356   : > { %2515 = vmax.xlane.f32.xlu1 %v2514_v58  ;;  %v1159_v58 = vpack.c.bf16 %v1151_v56, %v1151_v56 }
 0x358   : > { %v1511_v49 = vunpack.c.l.b16 %v1159_v58 }
 0x35a   : > { %2521 = vmax.xlane.f32.xlu1 %v2520_v17 }
 0x36b   : > { %911 = vperm.xlu0 %3252, %v3265_v50   ;;  %916 = vperm.xlu1 %3253, %v3267_v2  }
 0x36f   : > { %926 = vperm.xlu0 %3252, %v3269_v3   ;;  %921 = vperm.xlu1 %3253, %v4111_v43   ;;  %v4239_v3 = vld [vmem:[#allocation2 + $0x58] sm:$0xff] }
 0x3ce   : > { %v1389_v4 = vpop.xlane.xlu0 %1388 }
 0x3cf   : > { %v4180_v22 = vmax.f32 %v4175_v46, %v1389_v4  ;;  %v1383_v28 = vpop.xlane.xlu1 %1382  ;;  %v1153_v4 = vld [vmem:[%s3660_s22 + $0x11] sm:$0x1] }
 0x3d0   : > { %v4183_v51 = vmax.f32 %v4177_v12, %v1383_v28  ;;  %v1157_v28 = vpack.c.bf16 %v1149_v30, %v1149_v30  ;;  %v1163_v30 = vpack.c.bf16 %v1155_v25, %v1155_v25 }
 0x3d1   : > { %1600 = vst.msk [vmem:[#allocation2 + $0x30] sm:$0xff] %vm415_vm8, %v4180_v22 }
 0x3d2   : > { %1598 = vst.msk [vmem:[#allocation2 + $0x20] sm:$0xff] %vm415_vm8, %v4183_v51  ;;  %1411 = vperm.xlu1 %3253, %v4183_v51   ;;  %v1515_v35 = vunpack.c.l.b16 %v1163_v30  ;;  %v908_v30 = vld [vmem:[#allocation4 + $0x18] sm:$0xff] }
 0x3d3   : > { %v1386_v8 = vpop.xlane.xlu1 %1385 }
 0x3d4   : > { %v4197_v33 = vmax.f32 %v4189_v16, %v1386_v8  ;;  %v1160_v8 = vpack.c.bf16 %v1152_v41, %v1152_v41  ;;  %v1509_v41 = vunpack.c.l.b16 %v1157_v28 }
 0x3d6   : > { %1599 = vst.msk [vmem:[#allocation2 + $0x28] sm:$0xff] %vm415_vm8, %v4197_v33  ;;  %1421 = vperm.xlu1 %3253, %v4180_v22   ;;  %v1954_v21 = vpop.xlane.xlu0 %1953 }
 0x3d7   : > { %v1392_v19 = vpop.xlane.xlu1 %1391  ;;  %v4209_v43 = vmax.f32 %v4199_v6, %v1954_v21  ;;  %v1512_v21 = vunpack.c.l.b16 %v1160_v8  ;;  %v1519_v8 = vrot.slane %v1511_v49, 6 }
 0x3d8   : > { %v4212_v61 = vmax.f32 %v4201_v60, %v1392_v19  ;;  %v4280_v19 = vld [vmem:[#allocation2 + $0x78] sm:$0xff] }
 0x3d9   : > { %2165 = vst.msk [vmem:[#allocation2 + $0x50] sm:$0xff] %vm415_vm8, %v4209_v43 }
 0x3da   : > { %1601 = vst.msk [vmem:[#allocation2 + $0x38] sm:$0xff] %vm415_vm8, %v4212_v61  ;;  %1426 = vperm.xlu0 %3252, %v4212_v61   ;;  %v1948_v2 = vpop.xlane.xlu0 %1947 }
 0x3db   : > { %v1951_v37 = vpop.xlane.xlu1 %1950  ;;  %v4228_v47 = vmax.f32 %v4214_v0, %v1948_v2  ;;  %v1154_v2 = vld [vmem:[%s3660_s22 + $0x15] sm:$0x1] }
 0x3dc   : > { %v4231_v5 = vmax.f32 %v4220_v32, %v1951_v37  ;;  %v1161_v37 = vpack.c.bf16 %v1153_v4, %v1153_v4 }
 0x3dd   : > { %2163 = vst.msk [vmem:[#allocation2 + $0x40] sm:$0xff] %vm415_vm8, %v4228_v47 }
 0x3de   : > { %2164 = vst.msk [vmem:[#allocation2 + $0x48] sm:$0xff] %vm415_vm8, %v4231_v5  ;;  %1416 = vperm.xlu0 %3252, %v4197_v33   ;;  %v2519_v20 = vpop.xlane.xlu0 %2518  ;;  %v1513_v11 = vunpack.c.l.b16 %v1161_v37  ;;  %v1521_v37 = vrot.slane %v1512_v21, 5 }
 0x3df   : > { %v1957_v14 = vpop.xlane.xlu1 %1956  ;;  %v4247_v55 = vmax.f32 %v4233_v13, %v2519_v20  ;;  %v1510_v20 = vunpack.c.l.b16 %v1158_v1  ;;  %v905_v1 = vld [vmem:[#allocation4] sm:$0xff] }
 0x3e0   : > { %v4250_v48 = vmax.f32 %v4239_v3, %v1957_v14  ;;  %v906_v14 = vld [vmem:[#allocation4 + $0x8] sm:$0xff] }
 0x3e1   : > { %2730 = vst.msk [vmem:[#allocation2 + $0x70] sm:$0xff] %vm415_vm8, %v4247_v55  ;;  %v1517_v9 = vrot.slane %v1510_v20, 7 }
 0x3e2   : > { %2166 = vst.msk [vmem:[#allocation2 + $0x58] sm:$0xff] %vm415_vm8, %v4250_v48  ;;  %1986 = vperm.xlu0 %3252, %v4209_v43   ;;  %v2513_v38 = vpop.xlane.xlu0 %2512 }
 0x3e3   : > { %v2516_v24 = vpop.xlane.xlu1 %2515  ;;  %v4268_v15 = vmax.f32 %v4252_v10, %v2513_v38  ;;  %v1162_v38 = vpack.c.bf16 %v1154_v2, %v1154_v2  ;;  %v1527_v10 = vrot.slane %v1515_v35, 2 }
 0x3e4   : > { %v4273_v17 = vmax.f32 %v4258_v40, %v2516_v24  ;;  %v1156_v24 = vld [vmem:[%s3660_s22 + $0x1d] sm:$0x1] }
 0x3e5   : > { %2728 = vst.msk [vmem:[#allocation2 + $0x60] sm:$0xff] %vm415_vm8, %v4268_v15  ;;  %v1164_v4 = vpack.c.bf16 %v1156_v24, %v1156_v24  ;;  %v1514_v50 = vunpack.c.l.b16 %v1162_v38  ;;  %v1523_v24 = vrot.slane %v1513_v11, 4 }
 0x3e6   : > { %2729 = vst.msk [vmem:[#allocation2 + $0x68] sm:$0xff] %vm415_vm8, %v4273_v17  ;;  %1976 = vperm.xlu0 %3252, %v4228_v47  }
 0x3e7   : > { %v2522_v56 = vpop.xlane.xlu1 %2521  ;;  %v1516_v28 = vunpack.c.l.b16 %v1164_v4  ;;  %v1525_v62 = vrot.slane %v1514_v50, 3 }
 0x3e8   : > { %v4291_v18 = vmax.f32 %v4280_v19, %v2522_v56  ;;  %v1518_v56 = vsel %vm658_vm0, %v1517_v9, %v1509_v41 }
 0x3e9   : > { %v1520_v20 = vsel %vm661_vm1, %v1519_v8, %v1518_v56  ;;  %v1529_v4 = vrot.slane %v1516_v28, 1  ;;  %v1719_v56 = vld [vmem:[%s3660_s22 + $0x16] sm:$0x1] }
 0x3ea   : > { %2731 = vst.msk [vmem:[#allocation2 + $0x78] sm:$0xff] %vm415_vm8, %v4291_v18  ;;  %1991 = vperm.xlu0 %3252, %v4250_v48   ;;  %v912_v58 = vpop.permute.xlu0 %911  ;;  %v1522_v13 = vsel %vm664_vm2, %v1521_v37, %v1520_v20 }
 0x3eb   : > { %v929_v2 = vmul.f32 %v912_v58, %v905_v1  ;;  %v917_v25 = vpop.permute.xlu1 %916  ;;  %v1524_v11 = vsel %vm667_vm3, %v1523_v24, %v1522_v13  ;;  %v1715_v1 = vld [vmem:[%s3660_s22 + $0x6] sm:$0x1]  ;;  %v1716_v58 = vld [vmem:[%s3660_s22 + $0xa] sm:$0x1] }
 0x3ec   : > { %v930_v38 = vmul.f32 %v917_v25, %v906_v14  ;;  %v1526_v21 = vsel %vm670_vm4, %v1525_v62, %v1524_v11  ;;  %v1723_v28 = vpack.c.bf16 %v1715_v1, %v1715_v1  ;;  %v1717_v62 = vld [vmem:[%s3660_s22 + $0xe] sm:$0x1] }
 0x3ed   : > { %v1025_v31 = vadd.f32 %v4120_v44, %v929_v2  ;;  %v1528_v14 = vsel %vm673_vm6, %v1527_v10, %v1526_v21  ;;  %v1724_v10 = vpack.c.bf16 %v1716_v58, %v1716_v58  ;;  %v1725_v2 = vpack.c.bf16 %v1717_v62, %v1717_v62 }
 0x3ee   : > { %v1026_v49 = vadd.f32 %v4124_v53, %v930_v38  ;;  %1981 = vperm.xlu0 %3252, %v4231_v5   ;;  %v927_v9 = vpop.permute.xlu0 %926  ;;  %v1530_v41 = vsel %vm676_vm7, %v1529_v4, %v1528_v14  ;;  %v2075_v25 = vunpack.c.l.b16 %v1723_v28  ;;  %v1720_v38 = vld [vmem:[%s3660_s22 + $0x1a] sm:$0x1] }
 0x3ef   : > { %1029 = vst.msk [vmem:[#allocation4] sm:$0xff] %vm448_vm5, %v1025_v31  ;;  %v932_v50 = vmul.f32 %v927_v9, %v908_v30  ;;  %v922_v44 = vpop.permute.xlu1 %921  ;;  %v1531_v31 = vpack.c.b16 %v1530_v41, %v1530_v41  ;;  %v2076_v24 = vunpack.c.l.b16 %v1724_v10  ;;  %v1727_v30 = vpack.c.bf16 %v1719_v56, %v1719_v56  ;;  %v1721_v9 = vld [vmem:[%s3660_s22 + $0x1e] sm:$0x1]  ;;  %v2281_v56 = vld [vmem:[%s3660_s22 + $0xb] sm:$0x1] }
 0x3f0   : > { %1030 = vst.msk [vmem:[#allocation4 + $0x8] sm:$0xff] %vm448_vm5, %v1026_v49  ;;  %v931_v35 = vmul.f32 %v922_v44, %v907_v42  ;;  %v1714_v42 = vld [vmem:[%s3660_s22 + $0x2] sm:$0x1]  ;;  %v2077_v4 = vunpack.c.l.b16 %v1725_v2  ;;  %v2082_v49 = vrot.slane %v2075_v25, 7  ;;  %v1728_v11 = vpack.c.bf16 %v1720_v38, %v1720_v38  ;;  %v2280_v25 = vld [vmem:[%s3660_s22 + $0x7] sm:$0x1] }
 0x3f1   : > { %v1028_v53 = vadd.f32 %v4122_v36, %v932_v50  ;;  %3201 = vmatprep.subr.msk.bf16.mxu0 %vm972_vm9, %v1531_v31  ;;  %v1539_v36 = vsel %vm972_vm9, %v1531_v31, 0  ;;  %v1722_v8 = vpack.c.bf16 %v1714_v42, %v1714_v42  ;;  %v2084_v44 = vrot.slane %v2076_v24, 6  ;;  %v2279_v24 = vld [vmem:[%s3660_s22 + $0x3] sm:$0x1]  ;;  %v2282_v38 = vld [vmem:[%s3660_s22 + $0xf] sm:$0x1] }
 0x3f2   : > { %v1027_v13 = vadd.f32 %v4118_v7, %v931_v35  ;;  %2551 = vperm.xlu0 %3252, %v4247_v55   ;;  %v1718_v7 = vld [vmem:[%s3660_s22 + $0x12] sm:$0x1]  ;;  %3169 = vmatpush3.bf16.msra.mxu0 %v1539_v36  ;;  %v1729_v21 = vpack.c.bf16 %v1721_v9, %v1721_v9  ;;  %v2079_v35 = vunpack.c.l.b16 %v1727_v30  ;;  %v2080_v41 = vunpack.c.l.b16 %v1728_v11  ;;  %v2283_v9 = vld [vmem:[%s3660_s22 + $0x13] sm:$0x1] }
 0x3f3   : > { %1032 = vst.msk [vmem:[#allocation4 + $0x18] sm:$0xff] %vm448_vm5, %v1028_v53  ;;  %v1726_v37 = vpack.c.bf16 %v1718_v7, %v1718_v7  ;;  %v2074_v20 = vunpack.c.l.b16 %v1722_v8  ;;  %v2086_v53 = vrot.slane %v2077_v4, 5  ;;  %v2289_v30 = vpack.c.bf16 %v2281_v56, %v2281_v56 }
 0x3f4   : > { %1031 = vst.msk [vmem:[#allocation4 + $0x10] sm:$0xff] %vm448_vm5, %v1027_v13  ;;  %v2081_v31 = vunpack.c.l.b16 %v1729_v21  ;;  %v2090_v28 = vrot.slane %v2079_v35, 3  ;;  %v2092_v62 = vrot.slane %v2080_v41, 2  ;;  %v2287_v4 = vpack.c.bf16 %v2279_v24, %v2279_v24  ;;  %v2284_v41 = vld [vmem:[%s3660_s22 + $0x17] sm:$0x1] }
 0x3f5   : > { %v2078_v50 = vunpack.c.l.b16 %v1726_v37  ;;  %v2083_v14 = vsel %vm658_vm0, %v2082_v49, %v2074_v20  ;;  %v2288_v37 = vpack.c.bf16 %v2280_v25, %v2280_v25  ;;  %v2290_v11 = vpack.c.bf16 %v2282_v38, %v2282_v38 }
 0x3f6   : > { %2541 = vperm.xlu0 %3252, %v4268_v15   ;;  %v2085_v1 = vsel %vm661_vm1, %v2084_v44, %v2083_v14  ;;  %v2094_v36 = vrot.slane %v2081_v31, 1  ;;  %v2641_v44 = vunpack.c.l.b16 %v2289_v30  ;;  %v2639_v35 = vunpack.c.l.b16 %v2287_v4 }
 0x3f7   : > { %v2088_v13 = vrot.slane %v2078_v50, 4  ;;  %v2087_v58 = vsel %vm664_vm2, %v2086_v53, %v2085_v1  ;;  %v2640_v49 = vunpack.c.l.b16 %v2288_v37  ;;  %v2291_v1 = vpack.c.bf16 %v2283_v9, %v2283_v9 }
 0x3f9   : > { %v2089_v42 = vsel %vm667_vm3, %v2088_v13, %v2087_v58  ;;  %v2647_v14 = vrot.slane %v2640_v49, 7  ;;  %v2642_v13 = vunpack.c.l.b16 %v2290_v11 }
 0x3fa   : > { %2546 = vperm.xlu0 %3252, %v4273_v17   ;;  %v2091_v10 = vsel %vm670_vm4, %v2090_v28, %v2089_v42  ;;  %v2649_v28 = vrot.slane %v2641_v44, 6 }
 0x3fb   : > { %v2093_v7 = vsel %vm673_vm6, %v2092_v62, %v2091_v10  ;;  %v2285_v62 = vld [vmem:[%s3660_s22 + $0x1b] sm:$0x1]  ;;  %v2292_v10 = vpack.c.bf16 %v2284_v41, %v2284_v41 }
 0x3fc   : > { %v2095_v8 = vsel %vm676_vm7, %v2094_v36, %v2093_v7  ;;  %v2648_v36 = vsel %vm658_vm0, %v2647_v14, %v2639_v35  ;;  %v2643_v7 = vunpack.c.l.b16 %v2291_v1  ;;  %v2293_v56 = vpack.c.bf16 %v2285_v62, %v2285_v62 }
 0x3fd   : > { %v4335_v2 = vpack.c.b16 %v2095_v8, %v2095_v8  ;;  %v2651_v8 = vrot.slane %v2642_v13, 5  ;;  %v2650_v37 = vsel %vm661_vm1, %v2649_v28, %v2648_v36  ;;  %v2644_v38 = vunpack.c.l.b16 %v2292_v10 }
 0x3fe   : > { %2556 = vperm.xlu0 %3252, %v4291_v18   ;;  %v2645_v11 = vunpack.c.l.b16 %v2293_v56 }
 0x3ff   : > { %3203 = vmatprep.subr.msk.bf16.mxu0 %vm972_vm9, %v4335_v2  ;;  %v2652_v49 = vsel %vm664_vm2, %v2651_v8, %v2650_v37 }
 0x400   : > { %v2657_v41 = vrot.slane %v2645_v11, 2 }
 0x451   : > { %v1412_v20 = vpop.permute.xlu1 %1411 }
 0x452   : > { %v1429_v50 = vsub.f32 %v4128_v27, %v1412_v20  ;;  %v2653_v20 = vrot.slane %v2643_v7, 4 }
 0x454   : > { %v1433_v31 = vmul.f32 1.442695, %v1429_v50  ;;  %v2655_v50 = vrot.slane %v2644_v38, 3 }
 0x455   : > { %v1422_v21 = vpop.permute.xlu1 %1421 }
 0x456   : > { %v1431_v53 = vsub.f32 %v4126_v57, %v1422_v21  ;;  %v2286_v57 = vld [vmem:[%s3660_s22 + $0x1f] sm:$0x1]  ;;  %v2654_v21 = vsel %vm667_vm3, %v2653_v20, %v2652_v49 }
 0x457   : > { %v2294_v4 = vpack.c.bf16 %v2286_v57, %v2286_v57  ;;  %v2656_v13 = vsel %vm670_vm4, %v2655_v50, %v2654_v21 }
 0x458   : > { %v1437_v58 = vmul.f32 1.442695, %v1431_v53 }
 0x459   : > { %v1427_v42 = vpop.permute.xlu0 %1426  ;;  %v2646_v35 = vunpack.c.l.b16 %v2294_v4 }
 0x45a   : > { %3270 = vpow2.f32 %v1437_v58  ;;  %v1432_v27 = vsub.f32 %v4132_v59, %v1427_v42 }
 0x45b   : > { %3272 = vpow2.f32 %v1433_v31  ;;  %v2659_v28 = vrot.slane %v2646_v35, 1 }
 0x45c   : > { %v1439_v25 = vmul.f32 1.442695, %v1432_v27 }
 0x45d   : > { %v1417_v24 = vpop.permute.xlu0 %1416 }
 0x45e   : > { %3274 = vpow2.f32 %v1439_v25  ;;  %v1430_v30 = vsub.f32 %v4136_v23, %v1417_v24 }
 0x460   : > { %v1435_v9 = vmul.f32 1.442695, %v1430_v30  ;;  %v2104_v30 = vsel %vm972_vm9, %v4335_v2, 0 }
 0x461   : > { %v1987_v59 = vpop.permute.xlu0 %1986 }
 0x462   : > { %3276 = vpow2.f32 %v1435_v9  ;;  %v1996_v44 = vsub.f32 %v4140_v26, %v1987_v59  ;;  %v2658_v26 = vsel %vm673_vm6, %v2657_v41, %v2656_v13 }
 0x463   : > { %v2660_v8 = vsel %vm676_vm7, %v2659_v28, %v2658_v26 }
 0x464   : > { %v3271_v14 = vpop.eup %3270  ;;  %v2002_v53 = vmul.f32 1.442695, %v1996_v44 }
 0x465   : > { %v1977_v1 = vpop.permute.xlu0 %1976  ;;  %v1456_v23 = vsel %vm448_vm5, %v3271_v14, 0.0  ;;  %v3273_v31 = vpop.eup %3272 }
 0x466   : > { %3278 = vpow2.f32 %v2002_v53  ;;  %v1994_v58 = vsub.f32 %v4144_v54, %v1977_v1  ;;  %1457 = vadd.xlane.f32.xlu1 %v1456_v23  ;;  %v1450_v36 = vsel %vm448_vm5, %v3273_v31, 0.0 }
 0x468   : > { %v3275_v42 = vpop.eup %3274  ;;  %v1998_v62 = vmul.f32 1.442695, %v1994_v58 }
 0x469   : > { %v1992_v10 = vpop.permute.xlu0 %1991  ;;  %v1500_v27 = vpack.c.bf16 %v3275_v42, %v3271_v14  ;;  %v1459_v54 = vsel %vm448_vm5, %v3275_v42, 0.0 }
 0x46a   : > { %3280 = vpow2.f32 %v1998_v62  ;;  %v1997_v7 = vsub.f32 %v4148_v29, %v1992_v10  ;;  %1451 = vadd.xlane.f32.xlu1 %v1450_v36  ;;  %v2661_v29 = vpack.c.b16 %v2660_v8, %v2660_v8 }
 0x46c   : > { %v3277_v25 = vpop.eup %3276  ;;  %v2004_v57 = vmul.f32 1.442695, %v1997_v7  ;;  %v2669_v28 = vsel %vm972_vm9, %v2661_v29, 0 }
 0x46d   : > { %v1982_v56 = vpop.permute.xlu0 %1981  ;;  %v1453_v37 = vsel %vm448_vm5, %v3277_v25, 0.0  ;;  %v1499_v24 = vpack.c.bf16 %v3277_v25, %v3273_v31 }
 0x46e   : > { %3282 = vpow2.f32 %v2004_v57  ;;  %v1995_v38 = vsub.f32 %v4150_v63, %v1982_v56  ;;  %1460 = vadd.xlane.f32.xlu1 %v1459_v54  ;;  %1454 = vadd.xlane.f32.xlu0 %v1453_v37  ;;  %v4535_v57 = vsub.f32 %v4177_v12, %v4183_v51  ;;  %v4536_v54 = vsub.f32 %v4201_v60, %v4212_v61 }
 0x46f   : > { %3170 = vmatprep.mubr.msk.bf16.mxu0 %vm448_vm5, %v1499_v24  ;;  %v4537_v24 = vsub.f32 %v4189_v16, %v4197_v33  ;;  %v4540_v12 = vsub.f32 %v4199_v6, %v4209_v43  ;;  %v4541_v16 = vsub.f32 %v4214_v0, %v4228_v47  ;;  %v4542_v60 = vsub.f32 %v4258_v40, %v4273_v17  ;;  %v4545_v40 = vld [vmem:[#allocation8_spill] sm:$0xff] }
 0x470   : > { %v3279_v20 = vpop.eup %3278  ;;  %v2000_v4 = vmul.f32 1.442695, %v1995_v38  ;;  %3171 = vmatmul.mubr.msk.bf16.vlgmr.msra.gmra.mrb[4].mxu0 %vm448_vm5, %v1500_v27  ;;  %v1401_v56 = vmul.f32 1.442695, %v4535_v57  ;;  %v1407_v37 = vmul.f32 1.442695, %v4536_v54  ;;  %v4544_v6 = vsub.f32 %v4280_v19, %v4291_v18 }
 0x471   : > { %v2552_v49 = vpop.permute.xlu0 %2551  ;;  %v2021_v9 = vsel %vm448_vm5, %v3279_v20, 0.0  ;;  %3181 = vmatpush3.bf16.msra.mxu0 %v2104_v30  ;;  %v1403_v38 = vmul.f32 1.442695, %v4537_v24  ;;  %v4538_v30 = vsub.f32 %v4220_v32, %v4231_v5  ;;  %v1970_v51 = vmul.f32 1.442695, %v4540_v12  ;;  %v2007_v54 = vld [vmem:[#allocation3 + $0x40] sm:$0xff] }
 0x472   : > { %3284 = vpow2.f32 %v2000_v4  ;;  %2022 = vadd.xlane.f32.xlu1 %v2021_v9  ;;  %3205 = vmatprep.subr.msk.bf16.mxu0 %vm972_vm9, %v2661_v29  ;;  %v2561_v11 = vsub.f32 %v4156_v34, %v2552_v49  ;;  %v1966_v33 = vmul.f32 1.442695, %v4541_v16  ;;  %v2533_v61 = vmul.f32 1.442695, %v4542_v60 }
 0x473   : > { %v1968_v29 = vmul.f32 1.442695, %v4538_v30  ;;  %v2537_v43 = vmul.f32 1.442695, %v4544_v6  ;;  %v4546_v17 = vsub.f32 %v4545_v40, %v4268_v15  ;;  %v2739_v15 = vld [vmem:[#allocation3] sm:$0xff] }
 0x474   : > { %v3281_v63 = vpop.eup %3280  ;;  %v2567_v21 = vmul.f32 1.442695, %v2561_v11 }
 0x475   : > { %v2542_v59 = vpop.permute.xlu0 %2541  ;;  %v2015_v2 = vsel %vm448_vm5, %v3281_v63, 0.0  ;;  %v2531_v49 = vmul.f32 1.442695, %v4546_v17 }
 0x476   : > { %v2559_v50 = vsub.f32 %v4162_v45, %v2542_v59  ;;  %2016 = vadd.xlane.f32.xlu1 %v2015_v2  ;;  %v2742_v59 = vld [vmem:[#allocation3 + $0x18] sm:$0xff] }
 0x478   : > { %v3283_v44 = vpop.eup %3282  ;;  %v2563_v35 = vmul.f32 1.442695, %v2559_v50 }
 0x479   : > { %v2547_v14 = vpop.permute.xlu0 %2546  ;;  %v2024_v53 = vsel %vm448_vm5, %v3283_v44, 0.0  ;;  %v2065_v41 = vpack.c.bf16 %v3283_v44, %v3279_v20  ;;  %v4539_v20 = vsub.f32 %v4175_v46, %v4180_v22  ;;  %v4543_v46 = vsub.f32 %v4239_v3, %v4250_v48  ;;  %v2740_v48 = vld [vmem:[#allocation3 + $0x8] sm:$0xff] }
 0x47a   : > { %3286 = vpow2.f32 %v2563_v35  ;;  %v2560_v1 = vsub.f32 %v4166_v39, %v2547_v14  ;;  %2025 = vadd.xlane.f32.xlu1 %v2024_v53 }
 0x47b   : > { %3288 = vpow2.f32 %v2567_v21  ;;  %v1405_v4 = vmul.f32 1.442695, %v4539_v20  ;;  %v1972_v22 = vmul.f32 1.442695, %v4543_v46 }
 0x47c   : > { %v3285_v23 = vpop.eup %3284  ;;  %v2565_v34 = vmul.f32 1.442695, %v2560_v1 }
 0x47d   : > { %v2557_v13 = vpop.permute.xlu0 %2556  ;;  %v2018_v31 = vsel %vm448_vm5, %v3285_v23, 0.0  ;;  %v2064_v58 = vpack.c.bf16 %v3285_v23, %v3281_v63  ;;  %v4547_v63 = vld [vmem:[#allocation7_spill] sm:$0xff]  ;;  %v1444_v23 = vld [vmem:[#allocation3 + $0x30] sm:$0xff] }
 0x47e   : > { %3290 = vpow2.f32 %v2565_v34  ;;  %v2562_v45 = vsub.f32 %v4164_v52, %v2557_v13  ;;  %2019 = vadd.xlane.f32.xlu0 %v2018_v31  ;;  %v4548_v18 = vsub.f32 %v4547_v63, %v4247_v55  ;;  %v2741_v55 = vld [vmem:[#allocation3 + $0x10] sm:$0xff]  ;;  %v1442_v31 = vld [vmem:[#allocation3 + $0x20] sm:$0xff] }
 0x47f   : > { %3182 = vmatprep.mubr.msk.bf16.mxu0 %vm448_vm5, %v2064_v58 }
 0x480   : > { %v2569_v42 = vmul.f32 1.442695, %v2562_v45  ;;  %3183 = vmatmul.mubr.msk.bf16.vlgmr.msra.gmra.mrb[8].mxu0 %vm448_vm5, %v2065_v41  ;;  %v2535_v19 = vmul.f32 1.442695, %v4548_v18 }
 0x481   : > { %3193 = vmatpush3.bf16.msra.mxu0 %v2669_v28 }
 0x482   : > { %3292 = vpow2.f32 %v2569_v42  ;;  %v1445_v42 = vld [vmem:[#allocation3 + $0x38] sm:$0xff] }
 0x483   : > { %3294 = vpow2.f32 %v1401_v56 }
 0x484   : > { %v3287_v39 = vpop.eup %3286  ;;  %3296 = vpow2.f32 %v1407_v37 }
 0x485   : > { %v2580_v62 = vsel %vm448_vm5, %v3287_v39, 0.0  ;;  %v3289_v26 = vpop.eup %3288  ;;  %3298 = vpow2.f32 %v1403_v38 }
 0x486   : > { %2581 = vadd.xlane.f32.xlu1 %v2580_v62  ;;  %v2586_v36 = vsel %vm448_vm5, %v3289_v26, 0.0  ;;  %3300 = vpow2.f32 %v1968_v29  ;;  %v2010_v29 = vld [vmem:[#allocation3 + $0x58] sm:$0xff] }
 0x487   : > { %3302 = vpow2.f32 %v1405_v4 }
 0x488   : > { %v3291_v10 = vpop.eup %3290  ;;  %3304 = vpow2.f32 %v1970_v51 }
 0x489   : > { %v2583_v52 = vsel %vm448_vm5, %v3291_v10, 0.0  ;;  %v2629_v27 = vpack.c.bf16 %v3291_v10, %v3287_v39  ;;  %3306 = vpow2.f32 %v1966_v33  ;;  %v1443_v39 = vld [vmem:[#allocation3 + $0x28] sm:$0xff] }
 0x48a   : > { %2587 = vadd.xlane.f32.xlu1 %v2586_v36  ;;  %2584 = vadd.xlane.f32.xlu0 %v2583_v52  ;;  %3308 = vpow2.f32 %v2533_v61  ;;  %v2008_v33 = vld [vmem:[#allocation3 + $0x48] sm:$0xff] }
 0x48b   : > { %3194 = vmatprep.mubr.msk.bf16.mxu0 %vm448_vm5, %v2629_v27  ;;  %3310 = vpow2.f32 %v1972_v22  ;;  %v2009_v27 = vld [vmem:[#allocation3 + $0x50] sm:$0xff] }
 0x48c   : > { %v3293_v7 = vpop.eup %3292  ;;  %3312 = vpow2.f32 %v2537_v43 }
 0x48d   : > { %v2589_v8 = vsel %vm448_vm5, %v3293_v7, 0.0  ;;  %v2630_v25 = vpack.c.bf16 %v3293_v7, %v3289_v26  ;;  %v3295_v32 = vpop.eup %3294  ;;  %3314 = vpow2.f32 %v2531_v49 }
 0x48e   : > { %2590 = vadd.xlane.f32.xlu1 %v2589_v8  ;;  %v3297_v5 = vpop.eup %3296  ;;  %3316 = vrcp.f32 %v2740_v48  ;;  %v1446_v45 = vmul.f32 %v3295_v32, %v1442_v31 }
 0x48f   : > { %3195 = vmatmul.mubr.msk.bf16.vlgmr.msra.gmra.mrb[12].mxu0 %vm448_vm5, %v2630_v25  ;;  %v3299_v0 = vpop.eup %3298  ;;  %3318 = vpow2.f32 %v2535_v19  ;;  %v1449_v26 = vmul.f32 %v3297_v5, %v1445_v42 }
 0x490   : > { %v4418_v47 = vpop.eup %3300  ;;  %3320 = vrcp.f32 %v2742_v59  ;;  %v1447_v10 = vmul.f32 %v3299_v0, %v1443_v39 }
 0x491   : > { %v3303_v3 = vpop.eup %3302  ;;  %3322 = vrcp.f32 %v2739_v15 }
 0x492   : > { %v3305_v9 = vpop.eup %3304  ;;  %3324 = vrcp.f32 %v2741_v55  ;;  %v1448_v34 = vmul.f32 %v3303_v3, %v1444_v23  ;;  %v2575_v55 = vld [vmem:[#allocation3 + $0x78] sm:$0xff] }
 0x493   : > { %v3307_v11 = vpop.eup %3306  ;;  %v2013_v57 = vmul.f32 %v3305_v9, %v2009_v27 }
 0x494   : > { %v4427_v2 = vpop.eup %3308  ;;  %v2011_v38 = vmul.f32 %v3307_v11, %v2007_v54 }
 0x495   : > { %v3311_v50 = vpop.eup %3310 }
 0x496   : > { %v4430_v44 = vpop.eup %3312  ;;  %v2014_v12 = vmul.f32 %v3311_v50, %v2010_v29 }
 0x497   : > { %v4433_v21 = vpop.eup %3314 }
 0x498   : > { %v3317_v35 = vpop.eup %3316 }
 0x499   : > { %v4436_v14 = vpop.eup %3318 }
 0x49a   : > { %v3321_v53 = vpop.eup %3320 }
 0x49b   : > { %v3323_v41 = vpop.eup %3322 }
 0x49c   : > { %v3325_v1 = vpop.eup %3324 }
 0x49f   : > { %1477 = vperm.xlu1 %3253, %v3295_v32  }
 0x4a0   : > { %1492 = vperm.xlu0 %3252, %v3297_v5   ;;  %v2012_v5 = vmul.f32 %v4418_v47, %v2008_v33 }
 0x4a3   : > { %1482 = vperm.xlu1 %3253, %v3299_v0   ;;  %v2572_v0 = vld [vmem:[#allocation3 + $0x60] sm:$0xff] }
 0x4a4   : > { %2047 = vperm.xlu0 %3252, %v4418_v47   ;;  %v2576_v49 = vmul.f32 %v4433_v21, %v2572_v0  ;;  %v2573_v47 = vld [vmem:[#allocation3 + $0x68] sm:$0xff] }
 0x4a5   : > { %v2577_v59 = vmul.f32 %v4427_v2, %v2573_v47 }
 0x4a7   : > { %1487 = vperm.xlu1 %3253, %v3303_v3  }
 0x4a8   : > { %2052 = vperm.xlu0 %3252, %v3305_v9   ;;  %v2574_v9 = vld [vmem:[#allocation3 + $0x70] sm:$0xff] }
 0x4ab   : > { %2042 = vperm.xlu1 %3253, %v3307_v11   ;;  %v2578_v11 = vmul.f32 %v4436_v14, %v2574_v9 }
 0x4ac   : > { %2612 = vperm.xlu0 %3252, %v4427_v2  }
 0x4af   : > { %2057 = vperm.xlu1 %3253, %v3311_v50  }
 0x4b0   : > { %2622 = vperm.xlu0 %3252, %v4430_v44  }
 0x4b3   : > { %2607 = vperm.xlu1 %3253, %v4433_v21  }
 0x4b4   : > { %2754 = vperm.xlu0 %3252, %v3317_v35  }
 0x4b7   : > { %2617 = vperm.xlu1 %3253, %v4436_v14  }
 0x4b8   : > { %2764 = vperm.xlu0 %3252, %v3321_v53  }
 0x4bb   : > { %2749 = vperm.xlu1 %3253, %v3323_v41   ;;  %v2579_v41 = vmul.f32 %v4430_v44, %v2575_v55  ;;  %v2602_v55 = vld [vmem:[#allocation4 + $0x68] sm:$0xff] }
 0x4bf   : > { %2759 = vperm.xlu1 %3253, %v3325_v1  }
 0x4f3   : > { %v1458_v13 = vpop.xlane.xlu1 %1457 }
 0x4f4   : > { %v1464_v58 = vadd.f32 %v1458_v13, %v1448_v34 }
 0x4f6   : > { %1468 = vst.msk [vmem:[#allocation3 + $0x30] sm:$0xff] %vm415_vm8, %v1464_v58 }
 0x4f7   : > { %v1452_v28 = vpop.xlane.xlu1 %1451 }
 0x4f8   : > { %v1462_v62 = vadd.f32 %v1452_v28, %v1446_v45 }
 0x4fa   : > { %1466 = vst.msk [vmem:[#allocation3 + $0x20] sm:$0xff] %vm415_vm8, %v1462_v62 }
 0x4fb   : > { %v1461_v36 = vpop.xlane.xlu1 %1460  ;;  %v1455_v52 = vpop.xlane.xlu0 %1454 }
 0x4fc   : > { %v1465_v7 = vadd.f32 %v1461_v36, %v1449_v26  ;;  %v1463_v8 = vadd.f32 %v1455_v52, %v1447_v10  ;;  %v1473_v26 = vld [vmem:[#allocation4 + $0x30] sm:$0xff]  ;;  %v1471_v36 = vld [vmem:[#allocation4 + $0x20] sm:$0xff]  ;;  %v1474_v52 = vld [vmem:[#allocation4 + $0x38] sm:$0xff] }
 0x4fd   : > { %v2777_v25 = vld [vmem:[#allocation3 + $0x30] sm:$0xff] }
 0x4fe   : > { %1469 = vst.msk [vmem:[#allocation3 + $0x38] sm:$0xff] %vm415_vm8, %v1465_v7  ;;  %1467 = vst.msk [vmem:[#allocation3 + $0x28] sm:$0xff] %vm415_vm8, %v1463_v8  ;;  %3326 = vrcp.f32 %v2777_v25  ;;  %v1472_v7 = vld [vmem:[#allocation4 + $0x28] sm:$0xff] }
 0x4ff   : > { %v2023_v56 = vpop.xlane.xlu1 %2022 }
 0x500   : > { %v2029_v37 = vadd.f32 %v2023_v56, %v2013_v57 }
 0x501   : > { %v2775_v24 = vld [vmem:[#allocation3 + $0x20] sm:$0xff] }
 0x502   : > { %2033 = vst.msk [vmem:[#allocation3 + $0x50] sm:$0xff] %vm415_vm8, %v2029_v37  ;;  %3328 = vrcp.f32 %v2775_v24 }
 0x503   : > { %v2017_v30 = vpop.xlane.xlu1 %2016 }
 0x504   : > { %v2027_v20 = vadd.f32 %v2017_v30, %v2011_v38 }
 0x505   : > { %v2778_v4 = vld [vmem:[#allocation3 + $0x38] sm:$0xff]  ;;  %v2776_v51 = vld [vmem:[#allocation3 + $0x28] sm:$0xff] }
 0x506   : > { %2031 = vst.msk [vmem:[#allocation3 + $0x40] sm:$0xff] %vm415_vm8, %v2027_v20  ;;  %3330 = vrcp.f32 %v2778_v4 }
 0x507   : > { %v2026_v16 = vpop.xlane.xlu1 %2025  ;;  %3332 = vrcp.f32 %v2776_v51 }
 0x508   : > { %v3327_v60 = vpop.eup %3326  ;;  %v2030_v61 = vadd.f32 %v2026_v16, %v2014_v12  ;;  %v2038_v16 = vld [vmem:[#allocation4 + $0x50] sm:$0xff] }
 0x509   : > { %2795 = vperm.xlu1 %3253, %v3327_v60   ;;  %v2813_v32 = vld [vmem:[#allocation3 + $0x50] sm:$0xff]  ;;  %v2036_v60 = vld [vmem:[#allocation4 + $0x40] sm:$0xff] }
 0x50a   : > { %2034 = vst.msk [vmem:[#allocation3 + $0x58] sm:$0xff] %vm415_vm8, %v2030_v61  ;;  %3334 = vrcp.f32 %v2813_v32  ;;  %v2039_v61 = vld [vmem:[#allocation4 + $0x58] sm:$0xff] }
 0x50b   : > { %v2020_v46 = vpop.xlane.xlu0 %2019 }
 0x50c   : > { %v3329_v22 = vpop.eup %3328  ;;  %v2028_v6 = vadd.f32 %v2020_v46, %v2012_v5  ;;  %v2037_v5 = vld [vmem:[#allocation4 + $0x48] sm:$0xff] }
 0x50d   : > { %2785 = vperm.xlu1 %3253, %v3329_v22   ;;  %v2811_v43 = vld [vmem:[#allocation3 + $0x40] sm:$0xff] }
 0x50e   : > { %2032 = vst.msk [vmem:[#allocation3 + $0x48] sm:$0xff] %vm415_vm8, %v2028_v6  ;;  %3336 = vrcp.f32 %v2811_v43 }
 0x510   : > { %v3331_v40 = vpop.eup %3330 }
 0x511   : > { %2800 = vperm.xlu0 %3252, %v3331_v40   ;;  %v2814_v17 = vld [vmem:[#allocation3 + $0x58] sm:$0xff]  ;;  %v3333_v3 = vpop.eup %3332 }
 0x512   : > { %3338 = vrcp.f32 %v2814_v17 }
 0x513   : > { %v2582_v48 = vpop.xlane.xlu1 %2581 }
 0x514   : > { %v3335_v63 = vpop.eup %3334  ;;  %v2592_v18 = vadd.f32 %v2582_v48, %v2576_v49 }
 0x515   : > { %2831 = vperm.xlu1 %3253, %v3335_v63   ;;  %2790 = vperm.xlu0 %3252, %v3333_v3   ;;  %v2812_v19 = vld [vmem:[#allocation3 + $0x48] sm:$0xff] }
 0x516   : > { %2596 = vst.msk [vmem:[#allocation3 + $0x60] sm:$0xff] %vm415_vm8, %v2592_v18  ;;  %3340 = vrcp.f32 %v2812_v19  ;;  %v2603_v19 = vld [vmem:[#allocation4 + $0x70] sm:$0xff] }
 0x517   : > { %v2588_v15 = vpop.xlane.xlu1 %2587  ;;  %v2585_v50 = vpop.xlane.xlu0 %2584 }
 0x518   : > { %v3337_v21 = vpop.eup %3336  ;;  %v2594_v35 = vadd.f32 %v2588_v15, %v2578_v11  ;;  %v2593_v53 = vadd.f32 %v2585_v50, %v2577_v59  ;;  %v2601_v59 = vld [vmem:[#allocation4 + $0x60] sm:$0xff]  ;;  %v2604_v15 = vld [vmem:[#allocation4 + $0x78] sm:$0xff] }
 0x519   : > { %2821 = vperm.xlu1 %3253, %v3337_v21  }
 0x51a   : > { %2598 = vst.msk [vmem:[#allocation3 + $0x70] sm:$0xff] %vm415_vm8, %v2594_v35  ;;  %2597 = vst.msk [vmem:[#allocation3 + $0x68] sm:$0xff] %vm415_vm8, %v2593_v53 }
 0x51b   : > { %v2591_v1 = vpop.xlane.xlu1 %2590 }
 0x51c   : > { %v3339_v23 = vpop.eup %3338  ;;  %v2595_v34 = vadd.f32 %v2591_v1, %v2579_v41 }
 0x51d   : > { %2836 = vperm.xlu0 %3252, %v3339_v23   ;;  %v2847_v14 = vld [vmem:[#allocation3 + $0x60] sm:$0xff] }
 0x51e   : > { %2599 = vst.msk [vmem:[#allocation3 + $0x78] sm:$0xff] %vm415_vm8, %v2595_v34  ;;  %3342 = vrcp.f32 %v2847_v14 }
 0x51f   : > { %v1478_v39 = vpop.permute.xlu1 %1477  ;;  %v1493_v27 = vpop.permute.xlu0 %1492 }
 0x520   : > { %v3341_v2 = vpop.eup %3340  ;;  %v1495_v25 = vmul.f32 %v1478_v39, %v1471_v36  ;;  %v1498_v56 = vmul.f32 %v1493_v27, %v1474_v52 }
 0x521   : > { %2826 = vperm.xlu0 %3252, %v3341_v2   ;;  %v2849_v13 = vld [vmem:[#allocation3 + $0x70] sm:$0xff]  ;;  %v2848_v31 = vld [vmem:[#allocation3 + $0x68] sm:$0xff] }
 0x522   : > { %3344 = vrcp.f32 %v2849_v13 }
 0x523   : > { %3346 = vrcp.f32 %v2848_v31  ;;  %v1483_v62 = vpop.permute.xlu1 %1482  ;;  %v2048_v12 = vpop.permute.xlu0 %2047 }
 0x524   : > { %v1496_v24 = vmul.f32 %v1483_v62, %v1472_v7  ;;  %v2061_v17 = vmul.f32 %v2048_v12, %v2037_v5 }
 0x525   : > { %v2850_v58 = vld [vmem:[#allocation3 + $0x78] sm:$0xff] }
 0x526   : > { %3348 = vrcp.f32 %v2850_v58 }
 0x527   : > { %v1488_v10 = vpop.permute.xlu1 %1487  ;;  %v2053_v33 = vpop.permute.xlu0 %2052 }
 0x528   : > { %v3343_v45 = vpop.eup %3342  ;;  %v1497_v8 = vmul.f32 %v1488_v10, %v1473_v26  ;;  %v2062_v46 = vmul.f32 %v2053_v33, %v2038_v16 }
 0x529   : > { %2857 = vperm.xlu1 %3253, %v3343_v45  }
 0x52b   : > { %v2043_v51 = vpop.permute.xlu1 %2042  ;;  %v2613_v18 = vpop.permute.xlu0 %2612 }
 0x52c   : > { %v3345_v28 = vpop.eup %3344  ;;  %v2060_v22 = vmul.f32 %v2043_v51, %v2036_v60  ;;  %v2626_v34 = vmul.f32 %v2613_v18, %v2602_v55 }
 0x52d   : > { %v3347_v44 = vpop.eup %3346  ;;  %2867 = vperm.xlu1 %3253, %v3345_v28  }
 0x52e   : > { %2862 = vperm.xlu0 %3252, %v3347_v44  }
 0x52f   : > { %v2058_v32 = vpop.permute.xlu1 %2057  ;;  %v2623_v50 = vpop.permute.xlu0 %2622 }
 0x530   : > { %v3349_v42 = vpop.eup %3348  ;;  %v2063_v43 = vmul.f32 %v2058_v32, %v2039_v61  ;;  %v2628_v41 = vmul.f32 %v2623_v50, %v2604_v15  ;;  %v2737_v50 = vld [vmem:[#allocation4 + $0x10] sm:$0xff] }
 0x532   : > { %2872 = vperm.xlu0 %3252, %v3349_v42  }
 0x533   : > { %v2608_v63 = vpop.permute.xlu1 %2607  ;;  %v4472_v44 = vpop.permute.xlu0 %2754 }
 0x534   : > { %v2625_v35 = vmul.f32 %v2608_v63, %v2601_v59 }
 0x537   : > { %v2618_v11 = vpop.permute.xlu1 %2617  ;;  %v4474_v26 = vpop.permute.xlu0 %2764 }
 0x538   : > { %v2627_v21 = vmul.f32 %v2618_v11, %v2603_v19  ;;  %v2735_v19 = vld [vmem:[#allocation4] sm:$0xff] }
 0x53b   : > { %v4468_v45 = vpop.permute.xlu1 %2749 }
 0x53c   : > { %v2767_v59 = vmul.f32 %v4468_v45, %v2735_v19 }
 0x53f   : > { %v4470_v28 = vpop.permute.xlu1 %2759 }
 0x543   : > { %v3172_v57 = vpop.f32.mrb[4].mxu0 }
 0x544   : > { %v1592_v54 = vadd.f32 %v3172_v57, %v1497_v8  ;;  %v1575_v37 = vpop.f32.mrb[5].mxu0 }
 0x545   : > { %v1590_v38 = vadd.f32 %v1575_v37, %v1495_v25  ;;  %v3173_v30 = vpop.f32.mrb[6].mxu0 }
 0x546   : > { %1596 = vst.msk [vmem:[#allocation4 + $0x30] sm:$0xff] %vm448_vm5, %v1592_v54  ;;  %v1593_v29 = vadd.f32 %v3173_v30, %v1498_v56  ;;  %v1578_v20 = vpop.f32.mrb[7].mxu0 }
 0x547   : > { %1594 = vst.msk [vmem:[#allocation4 + $0x20] sm:$0xff] %vm448_vm5, %v1590_v38  ;;  %v1591_v4 = vadd.f32 %v1578_v20, %v1496_v24 }
 0x548   : > { %1597 = vst.msk [vmem:[#allocation4 + $0x38] sm:$0xff] %vm448_vm5, %v1593_v29 }
 0x549   : > { %1595 = vst.msk [vmem:[#allocation4 + $0x28] sm:$0xff] %vm448_vm5, %v1591_v4 }
 0x54d   : > { %v2773_v42 = vld [vmem:[#allocation4 + $0x30] sm:$0xff] }
 0x54e   : > { %v2771_v10 = vld [vmem:[#allocation4 + $0x20] sm:$0xff] }
 0x54f   : > { %v2774_v27 = vld [vmem:[#allocation4 + $0x38] sm:$0xff] }
 0x550   : > { %v2772_v56 = vld [vmem:[#allocation4 + $0x28] sm:$0xff] }
 0x553   : > { %v3184_v6 = vpop.f32.mrb[8].mxu0 }
 0x554   : > { %v2157_v0 = vadd.f32 %v3184_v6, %v2062_v46  ;;  %v2140_v40 = vpop.f32.mrb[9].mxu0 }
 0x555   : > { %v2155_v49 = vadd.f32 %v2140_v40, %v2060_v22  ;;  %v3185_v3 = vpop.f32.mrb[10].mxu0 }
 0x556   : > { %2161 = vst.msk [vmem:[#allocation4 + $0x50] sm:$0xff] %vm448_vm5, %v2157_v0  ;;  %v2158_v48 = vadd.f32 %v3185_v3, %v2063_v43  ;;  %v2143_v9 = vpop.f32.mrb[11].mxu0 }
 0x557   : > { %2159 = vst.msk [vmem:[#allocation4 + $0x40] sm:$0xff] %vm448_vm5, %v2155_v49  ;;  %v2156_v47 = vadd.f32 %v2143_v9, %v2061_v17 }
 0x558   : > { %2162 = vst.msk [vmem:[#allocation4 + $0x58] sm:$0xff] %vm448_vm5, %v2158_v48 }
 0x559   : > { %2160 = vst.msk [vmem:[#allocation4 + $0x48] sm:$0xff] %vm448_vm5, %v2156_v47 }
 0x55d   : > { %v2809_v57 = vld [vmem:[#allocation4 + $0x50] sm:$0xff] }
 0x55e   : > { %v2807_v38 = vld [vmem:[#allocation4 + $0x40] sm:$0xff] }
 0x55f   : > { %v2810_v20 = vld [vmem:[#allocation4 + $0x58] sm:$0xff] }
 0x560   : > { %v2808_v51 = vld [vmem:[#allocation4 + $0x48] sm:$0xff] }
 0x562   : > { %v3196_v53 = vpop.f32.mrb[12].mxu0 }
 0x563   : > { %v2722_v1 = vadd.f32 %v3196_v53, %v2627_v21  ;;  %v2705_v23 = vpop.f32.mrb[13].mxu0  ;;  %v2769_v53 = vmul.f32 %v4470_v28, %v2737_v50 }
 0x564   : > { %v2720_v14 = vadd.f32 %v2705_v23, %v2625_v35  ;;  %v3197_v2 = vpop.f32.mrb[14].mxu0  ;;  %v2736_v35 = vld [vmem:[#allocation4 + $0x8] sm:$0xff] }
 0x565   : > { %2726 = vst.msk [vmem:[#allocation4 + $0x70] sm:$0xff] %vm448_vm5, %v2722_v1  ;;  %v2723_v13 = vadd.f32 %v3197_v2, %v2628_v41  ;;  %v2708_v31 = vpop.f32.mrb[15].mxu0  ;;  %v2768_v23 = vmul.f32 %v4472_v44, %v2736_v35 }
 0x566   : > { %2724 = vst.msk [vmem:[#allocation4 + $0x60] sm:$0xff] %vm448_vm5, %v2720_v14  ;;  %v2721_v58 = vadd.f32 %v2708_v31, %v2626_v34  ;;  %v2738_v31 = vld [vmem:[#allocation4 + $0x18] sm:$0xff] }
 0x567   : > { %2727 = vst.msk [vmem:[#allocation4 + $0x78] sm:$0xff] %vm448_vm5, %v2723_v13 }
 0x568   : > { %2725 = vst.msk [vmem:[#allocation4 + $0x68] sm:$0xff] %vm448_vm5, %v2721_v58 }
 0x56c   : > { %v2845_v5 = vld [vmem:[#allocation4 + $0x70] sm:$0xff] }
 0x56d   : > { %v2843_v60 = vld [vmem:[#allocation4 + $0x60] sm:$0xff] }
 0x56e   : > { %v2846_v40 = vld [vmem:[#allocation4 + $0x78] sm:$0xff] }
 0x56f   : > { %v2844_v6 = vld [vmem:[#allocation4 + $0x68] sm:$0xff] }
 0x588   : > { %v2796_v39 = vpop.permute.xlu1 %2795 }
 0x589   : > { %v2805_v62 = vmul.f32 %v2796_v39, %v2773_v42  ;;  %v2770_v42 = vmul.f32 %v4474_v26, %v2738_v31 }
 0x58b   : > { %2887 = vrot.lane.b32.xlu1 %v2805_v62, %s3393_s23 }
 0x58c   : > { %v2786_v36 = vpop.permute.xlu1 %2785 }
 0x58d   : > { %v2803_v52 = vmul.f32 %v2786_v36, %v2771_v10 }
 0x58f   : > { %2883 = vrot.lane.b32.xlu1 %v2803_v52, %s3393_s23 }
 0x590   : > { %v2801_v7 = vpop.permute.xlu0 %2800 }
 0x591   : > { %v2806_v8 = vmul.f32 %v2801_v7, %v2774_v27 }
 0x593   : > { %2889 = vrot.lane.b32.xlu0 %v2806_v8, %s3393_s23 }
 0x594   : > { %v2832_v25 = vpop.permute.xlu1 %2831  ;;  %v2791_v54 = vpop.permute.xlu0 %2790 }
 0x595   : > { %v2841_v37 = vmul.f32 %v2832_v25, %v2809_v57  ;;  %v2804_v24 = vmul.f32 %v2791_v54, %v2772_v56 }
 0x597   : > { %2903 = vrot.lane.b32.xlu1 %v2841_v37, %s3394_s24  ;;  %2885 = vrot.lane.b32.xlu0 %v2804_v24, %s3393_s23 }
 0x598   : > { %v2822_v30 = vpop.permute.xlu1 %2821 }
 0x599   : > { %v2839_v29 = vmul.f32 %v2822_v30, %v2807_v38 }
 0x59b   : > { %2899 = vrot.lane.b32.xlu1 %v2839_v29, %s3394_s24 }
 0x59c   : > { %v2837_v4 = vpop.permute.xlu0 %2836 }
 0x59d   : > { %v2842_v12 = vmul.f32 %v2837_v4, %v2810_v20 }
 0x59f   : > { %2905 = vrot.lane.b32.xlu0 %v2842_v12, %s3394_s24 }
 0x5a0   : > { %v2827_v16 = vpop.permute.xlu0 %2826 }
 0x5a1   : > { %v2840_v33 = vmul.f32 %v2827_v16, %v2808_v51 }
 0x5a3   : > { %2901 = vrot.lane.b32.xlu0 %v2840_v33, %s3394_s24 }
 0x5a8   : > { %v2858_v61 = vpop.permute.xlu1 %2857 }
 0x5a9   : > { %v2875_v32 = vmul.f32 %v2858_v61, %v2843_v60 }
 0x5ab   : > { %2915 = vrot.lane.b32.xlu1 %v2875_v32, %s3395_s25 }
 0x5ac   : > { %v2868_v46 = vpop.permute.xlu1 %2867 }
 0x5ad   : > { %v2877_v22 = vmul.f32 %v2868_v46, %v2845_v5  ;;  %v2863_v43 = vpop.permute.xlu0 %2862 }
 0x5ae   : > { %v2876_v0 = vmul.f32 %v2863_v43, %v2844_v6 }
 0x5af   : > { %2919 = vrot.lane.b32.xlu1 %v2877_v22, %s3395_s25 }
 0x5b0   : > { %2917 = vrot.lane.b32.xlu0 %v2876_v0, %s3395_s25 }
 0x5b1   : > { %v2873_v17 = vpop.permute.xlu0 %2872 }
 0x5b2   : > { %v2878_v49 = vmul.f32 %v2873_v17, %v2846_v40 }
 0x5b4   : > { %2921 = vrot.lane.b32.xlu0 %v2878_v49, %s3395_s25 }
 0x5fd   : > { %v2888_v3 = vpop.permute.xlu1 %2887 }
 0x5fe   : > { %v2929_v34 = vsel %vm448_vm5, %v2769_v53, %v2888_v3 }
 0x601   : > { %v2884_v9 = vpop.permute.xlu1 %2883 }
 0x602   : > { %v2927_v15 = vsel %vm448_vm5, %v2767_v59, %v2884_v9 }
 0x605   : > { %v2890_v48 = vpop.permute.xlu0 %2889 }
 0x606   : > { %v2930_v39 = vsel %vm448_vm5, %v2770_v42, %v2890_v48 }
 0x609   : > { %v2904_v47 = vpop.permute.xlu1 %2903  ;;  %v2886_v63 = vpop.permute.xlu0 %2885 }
 0x60a   : > { %v2934_v14 = vsel %vm2931_vm11, %v2929_v34, %v2904_v47  ;;  %v2928_v2 = vsel %vm448_vm5, %v2768_v23, %v2886_v63 }
 0x60d   : > { %v2900_v11 = vpop.permute.xlu1 %2899 }
 0x60e   : > { %v2932_v55 = vsel %vm2931_vm11, %v2927_v15, %v2900_v11 }
 0x611   : > { %v2906_v18 = vpop.permute.xlu0 %2905 }
 0x612   : > { %v2935_v62 = vsel %vm2931_vm11, %v2930_v39, %v2906_v18 }
 0x615   : > { %v2902_v41 = vpop.permute.xlu0 %2901 }
 0x616   : > { %v2933_v58 = vsel %vm2931_vm11, %v2928_v2, %v2902_v41 }
 0x61d   : > { %v2916_v21 = vpop.permute.xlu1 %2915 }
 0x61e   : > { %v2937_v1 = vsel %vm2936_vm10, %v2932_v55, %v2916_v21 }
 0x61f   : > { %2942 = vst.msk [vmem:[%s408_s29] sm:$0xff] %vm2941_vm12, %v2937_v1 }
 0x621   : > { %v2920_v13 = vpop.permute.xlu1 %2919 }
 0x622   : > { %v2939_v45 = vsel %vm2936_vm10, %v2934_v14, %v2920_v13  ;;  %v2918_v28 = vpop.permute.xlu0 %2917 }
 0x623   : > { %2944 = vst.msk [vmem:[%s408_s29 + $0x10] sm:$0xff] %vm2941_vm12, %v2939_v45  ;;  %v2938_v44 = vsel %vm2936_vm10, %v2933_v58, %v2918_v28 }
 0x624   : > { %2943 = vst.msk [vmem:[%s408_s29 + $0x8] sm:$0xff] %vm2941_vm12, %v2938_v44 }
 0x626   : > { %v2922_v10 = vpop.permute.xlu0 %2921 }
 0x627   : > { %v2940_v36 = vsel %vm2936_vm10, %v2935_v62, %v2922_v10 }
 0x628   : > { %2945 = vst.msk [vmem:[%s408_s29 + $0x18] sm:$0xff] %vm2941_vm12, %v2940_v36 }
 0x629 PF: > { %s13_s16 = sadd.s32 1, %s3388_s16   ;;  %s4549_s12 = smov %s3376_s13 }
 0x62a   : > { %p10_p10 = scmp.ge.s32.totalorder %s13_s16, 4   ;;  %s4550_s13 = smov %s3455_s21 }
 0x62b   : > { %s4551_s14 = smov %s3384_s15  ;;  %s4552_s15 = smov %s4554_s17 }
 0x62c   :  { %12 = sbr.rel (!%p10_p10) target bundleno = 3 (0x3), region = 177 }

</bundles_post_ra>
